<compile_context>
chip_gen: v7x
topology: tpu7x:2x2x1
jax: 0.10.0
libtpu: 0.0.40
codegen_flags: <defaults>
</compile_context>

<pallas_src>
import functools

import jax
import jax.numpy as jnp
from jax import lax
from jax.experimental import pallas as pl
from jax.experimental.pallas import tpu as pltpu


# ----------------------------- helpers (traced inside the kernel) --------------------------

def _sigmoid(x):
    return pl.reciprocal(1.0 + jnp.exp(-x), approx=True)


def _softmax_last(x):
    m = jnp.max(x, axis=-1, keepdims=True)
    e = jnp.exp(x - m)
    return e * pl.reciprocal(jnp.sum(e, axis=-1, keepdims=True), approx=True)


def _leaky_relu(x, slope=0.01):
    return jnp.where(x >= 0.0, x, slope * x)


# ----------------------------------- fused forward kernel ----------------------------------

def _make_fused_kernel(N, T, D, H, L, heads):
    """Single fused forward kernel; all shapes/static config captured in the closure."""
    G = 2 + heads           # packed stacks: [ main | ee | head_0 ... ]
    GH = G * H

    def kernel(x_ref, ee_ref, wrel_ref, mask_ref,
               fcin_w, fcin_b,
               wih0_main, wih0_ee, wih0_head,
               wih_hi, whh, bih, bhh,
               att_w1, att_b1, att_w2,
               gat_ws, gat_wo, gat_b,
               fc_w, fc_b,
               out_ref, seq_ref):
        f32 = jnp.float32

        # ---------------- main-path input transform: fc_in + tanh -----------------------
        x_flat = x_ref[...]                                                   # (T*N, D)
        net_flat = jnp.tanh(
            jnp.dot(x_flat, fcin_w[...], preferred_element_type=f32) + fcin_b[...])
        ee_flat = ee_ref[...]                                                 # (T*N, 1)

        # ---------------- packed multi-stack, multi-layer GRU ---------------------------
        # Hidden-state lane layout: [ main(H) | ee(H) | head_0(H) | ... ].
        # Per step only 3 block-diagonal (GH x GH) matmuls (gates r|z|n) are serialized.
        h = jnp.zeros((N, GH), f32)
        for l in range(L):
            if l == 0:
                gi = []
                for g in range(3):                        # hoisted input projections
                    gi_main = jnp.dot(net_flat, wih0_main[g], preferred_element_type=f32)
                    gi_ee = ee_flat * wih0_ee[g]          # Din=1: VPU broadcast, no matmul
                    gi_head = jnp.dot(x_flat, wih0_head[g], preferred_element_type=f32)
                    gi.append(jnp.concatenate([gi_main, gi_ee, gi_head], axis=-1)
                              + bih[0, g])
            else:
                seq_prev = seq_ref[...]                   # previous layer packed outputs
                gi = [jnp.dot(seq_prev, wih_hi[l - 1, g], preferred_element_type=f32)
                      + bih[l, g] for g in range(3)]

            h = jnp.zeros((N, GH), f32)
            for t in range(T):                            # fully unrolled recurrence
                lo = t * N
                gh_r = jnp.dot(h, whh[l, 0], preferred_element_type=f32) + bhh[l, 0]
                gh_z = jnp.dot(h, whh[l, 1], preferred_element_type=f32) + bhh[l, 1]
                gh_n = jnp.dot(h, whh[l, 2], preferred_element_type=f32) + bhh[l, 2]
                r = _sigmoid(gi[0][lo:lo + N] + gh_r)
                z = _sigmoid(gi[1][lo:lo + N] + gh_z)
                n = jnp.tanh(gi[2][lo:lo + N] + r * gh_n)
                h = (1.0 - z) * n + z * h
                seq_ref[pl.ds(lo, N), :] = h              # per-step store into VMEM scratch

        # unpack the lane-packed results
        seq_last = seq_ref[...]                           # (T*N, GH) last-layer sequence
        seq_main = seq_last[:, 0:H]                       # main GRU outputs (for ALSTM)
        x_last = h[:, 0:H]                                # main GRU final hidden
        ee_hidden = h[:, H:2 * H]                         # event GRU final hidden
        head_fin = [h[:, (2 + hi) * H:(3 + hi) * H] for hi in range(heads)]

        # ---------------- ALSTM attention pooling (softmax over time) -------------------
        s1 = jnp.tanh(jnp.dot(seq_main, att_w1[...], preferred_element_type=f32)
                      + att_b1[...])                                           # (T*N, H/2)
        score = jnp.sum(s1 * att_w2[...], axis=-1, keepdims=True)              # (T*N, 1)
        m = score[0:N]
        for t in range(1, T):
            m = jnp.maximum(m, score[t * N:(t + 1) * N])
        den = jnp.zeros((N, 1), f32)
        acc = jnp.zeros((N, H), f32)
        for t in range(T):
            e = jnp.exp(score[t * N:(t + 1) * N] - m)                          # (N, 1)
            den = den + e
            acc = acc + e * seq_main[t * N:(t + 1) * N]
        alstm = acc * pl.reciprocal(den, approx=True)                          # (N, H)

        # ---------------- graph-attention heads (build_att_tensor) ----------------------
        rows = lax.broadcasted_iota(jnp.int32, (N, N), 0)
        cols = lax.broadcasted_iota(jnp.int32, (N, N), 1)
        diag = rows == cols

        head_hiddens = []
        for hi in range(heads):
            f = head_fin[hi]
            sumsq = jnp.sum(f * f, axis=-1, keepdims=True)
            fn = f * lax.rsqrt(jnp.maximum(sumsq, 1e-12))      # == f / max(||f||, 1e-6)
            sim = lax.dot_general(fn, fn, (((1,), (1,)), ((), ())),
                                  preferred_element_type=f32)                  # (N, N)
            g = sim - diag.astype(f32)
            w_self = jnp.sum(x_last * gat_ws[hi], axis=-1, keepdims=True)      # (N, 1)
            w_other = lax.dot_general(gat_wo[hi], x_last, (((0,), (1,)), ((), ())),
                                      preferred_element_type=f32)              # (1, N)
            weight = _leaky_relu(w_self + w_other + gat_b[hi])
            vw = g * weight
            # Mask where g == 0 (reference semantics) AND explicitly on the diagonal so
            # float rounding of fn.fn cannot let self-attention leak through.
            vw = jnp.where((g == 0.0) | diag, -1e10, vw)
            vw = _softmax_last(vw)
            head_hiddens.append(jnp.dot(vw, x_last, preferred_element_type=f32))

        # ---------------- relation-matrix attention --------------------------------------
        w_self = jnp.sum(x_last * gat_ws[heads], axis=-1, keepdims=True)       # (N, 1)
        w_other = lax.dot_general(gat_wo[heads], x_last, (((0,), (1,)), ((), ())),
                                  preferred_element_type=f32)                  # (1, N)
        weight = _leaky_relu(w_self + w_other + wrel_ref[...] + gat_b[heads])
        mask = mask_ref[...]
        temp = mask * weight
        temp = jnp.where(temp == 0.0, -1e5, temp)   # matches the reference's exact-zero test
        vw = _softmax_last(temp) * mask
        rel_hidden = jnp.dot(vw, x_last, preferred_element_type=f32)

        # ---------------- final fc: VPU row-reductions against stacked weight ------------
        blocks = [x_last, alstm] + head_hiddens + [rel_hidden, ee_hidden]
        pred = jnp.zeros((N, 1), f32) + fc_b[...]
        for i, blk in enumerate(blocks):
            pred = pred + jnp.sum(blk * fc_w[i], axis=-1, keepdims=True)
        out_ref[...] = pred                                                    # (N, 1)

    return kernel


# ----------------------------------- parameters --------------------------------------------

def _uinit(key, shape, scale):
    return jax.random.uniform(key, shape, jnp.float32, minval=-scale, maxval=scale)


def _gru_layer_raw(key, din, hidden):
    k1, k2, k3, k4 = jax.random.split(key, 4)
    s = 1.0 / (hidden ** 0.5)
    return (_uinit(k1, (3, din, hidden), s),      # W_ih per gate (transposed: (Din, H))
            _uinit(k2, (3, hidden, hidden), s),   # W_hh per gate
            _uinit(k3, (3, 1, hidden), s),        # b_ih per gate
            _uinit(k4, (3, 1, hidden), s))        # b_hh per gate


def _block_diag(mats):
    r, c = mats[0].shape
    out = jnp.zeros((len(mats) * r, len(mats) * c), jnp.float32)
    for i, m in enumerate(mats):
        out = out.at[i * r:(i + 1) * r, i * c:(i + 1) * c].set(m)
    return out


def init_params(key, num_relation, d_feat, hidden_size, num_layers, head_num):
    assert head_num >= 1
    H, L = hidden_size, num_layers
    G = 2 + head_num
    GH = G * H
    ks = iter(jax.random.split(key, 256))
    p = {}

    # net: fc_in (d_feat -> H) + tanh
    s_in = 1.0 / (d_feat ** 0.5)
    p['fc_in_w'] = _uinit(next(ks), (d_feat, H), s_in)
    p['fc_in_b'] = _uinit(next(ks), (1, H), s_in)

    # raw per-stack GRU weights; stack order: main (Din=H) | ee (Din=1) | head_i (Din=D)
    def din0(si):
        return H if si == 0 else (1 if si == 1 else d_feat)
    raw = [[_gru_layer_raw(next(ks), din0(si) if l == 0 else H, H) for l in range(L)]
           for si in range(G)]

    # layer-0 input weights kept per stack group (heterogeneous input sizes)
    p['w_ih0_main'] = raw[0][0][0]                                             # (3, H, H)
    p['w_ih0_ee'] = raw[1][0][0]                                               # (3, 1, H)
    p['w_ih0_head'] = jnp.concatenate([raw[2 + hh][0][0] for hh in range(head_num)],
                                      axis=-1)                                 # (3, D, heads*H)

    # layers >= 1 input weights + all hidden weights: block-diagonal lane packing
    def packed(layer, idx):
        return jnp.stack([_block_diag([raw[si][layer][idx][g] for si in range(G)])
                          for g in range(3)])                                  # (3, GH, GH)

    def packed_bias(layer, idx):
        return jnp.stack([jnp.concatenate([raw[si][layer][idx][g] for si in range(G)],
                                          axis=-1) for g in range(3)])         # (3, 1, GH)

    if L > 1:
        p['w_ih_hi'] = jnp.stack([packed(l, 0) for l in range(1, L)])          # (L-1,3,GH,GH)
    else:
        p['w_ih_hi'] = jnp.zeros((1, 3, GH, GH), jnp.float32)                  # unused dummy
    p['w_hh'] = jnp.stack([packed(l, 1) for l in range(L)])                    # (L, 3, GH, GH)
    p['b_ih'] = jnp.stack([packed_bias(l, 2) for l in range(L)])               # (L, 3, 1, GH)
    p['b_hh'] = jnp.stack([packed_bias(l, 3) for l in range(L)])               # (L, 3, 1, GH)

    # ALSTM attention net (att_fc_out has bias=False); att_w2 stored as a row
    s_att = 1.0 / (H ** 0.5)
    p['att_w1'] = _uinit(next(ks), (H, H // 2), s_att)
    p['att_b1'] = _uinit(next(ks), (1, H // 2), s_att)
    p['att_w2'] = _uinit(next(ks), (1, H // 2), 1.0 / ((H // 2) ** 0.5))

    # graph heads + relation attention, stacked: index [0..heads-1] = heads, [heads] = relation
    ws_rows, wo_cols, bvals = [], [], []
    for _ in range(head_num):
        Wh = _uinit(next(ks), (2 * H, 1), (6.0 / (2 * H + 1)) ** 0.5)          # xavier-ish
        ws_rows.append(Wh[:H, :].T)      # (1, H)  (self term)
        wo_cols.append(Wh[H:, :])        # (H, 1)  (other term)
        bvals.append(jnp.zeros((1, 1), jnp.float32))
    Wr = _uinit(next(ks), (2 * H + num_relation, 1),
                (6.0 / (2 * H + num_relation + 1)) ** 0.5)
    ws_rows.append(Wr[:H, :].T)
    wo_cols.append(Wr[H:2 * H, :])
    bvals.append(jnp.zeros((1, 1), jnp.float32))
    p['gat_ws'] = jnp.stack(ws_rows)                                           # (heads+1, 1, H)
    p['gat_wo'] = jnp.stack(wo_cols)                                           # (heads+1, H, 1)
    p['gat_b'] = jnp.stack(bvals)                                              # (heads+1, 1, 1)
    p['rel_wr'] = Wr[2 * H:, 0]                                                # (num_relation,)

    # final fc: H*(4+head_num) -> 1, stored as stacked rows per hidden-vector block
    fin = H * (4 + head_num)
    p['fc_w'] = _uinit(next(ks), (4 + head_num, 1, H), 1.0 / (fin ** 0.5))
    p['fc_b'] = _uinit(next(ks), (1, 1), 1.0 / (fin ** 0.5))
    return p


# ----------------------------------- forward pass ------------------------------------------

def forward(params, x, relation_matrix, ee, d_feat, hidden_size, num_layers, head_num):
    N = x.shape[0]
    T = x.shape[1] // d_feat
    Te = ee.shape[1]
    H = hidden_size
    if Te != T:
        # TODO(synk): fall back to an unpacked event GRU when the event series length
        #             differs from the feature series length.
        raise ValueError("packed GRU layout requires the event length to equal T")

    # Layout plumbing only (tiny, one-shot): everything else lives in one fused kernel.
    #   x (N, d_feat*T) -> time-major flat (T*N, d_feat), row index = t*N + n
    x_flat = jnp.transpose(x.reshape(N, d_feat, T), (2, 0, 1)).reshape(T * N, d_feat)
    ee_flat = jnp.transpose(ee).reshape(T * N, 1)
    # Relation features reduced to (N, N) so R never sits in the lane dimension in-kernel.
    w_rel_pre = jnp.einsum('ijr,r->ij', relation_matrix, params['rel_wr'])
    rel_mask = (jnp.sum(relation_matrix, axis=2) != 0.0).astype(jnp.float32)

    args = [x_flat, ee_flat, w_rel_pre, rel_mask,
            params['fc_in_w'], params['fc_in_b'],
            params['w_ih0_main'], params['w_ih0_ee'], params['w_ih0_head'],
            params['w_ih_hi'], params['w_hh'], params['b_ih'], params['b_hh'],
            params['att_w1'], params['att_b1'], params['att_w2'],
            params['gat_ws'], params['gat_wo'], params['gat_b'],
            params['fc_w'], params['fc_b']]

    kernel = _make_fused_kernel(N=N, T=T, D=d_feat, H=H, L=num_layers, heads=head_num)
    pred = pl.pallas_call(
        kernel,
        out_shape=jax.ShapeDtypeStruct((N, 1), jnp.float32),
        scratch_shapes=[pltpu.VMEM((T * N, (2 + head_num) * H), jnp.float32)],
    )(*args)
    return pred[:, 0]


# -------------------------------------- main ------------------------------------------------

if __name__ == "__main__":
    N, d_feat, T, H, R = 8, 6, 8, 32, 4
    num_layers, head_num = 2, 1

    key = jax.random.PRNGKey(0)
    kp, kx, kr, ke = jax.random.split(key, 4)

    params = init_params(kp, R, d_feat, H, num_layers, head_num)
    x = jax.random.normal(kx, (N, d_feat * T), jnp.float32)
    relation_matrix = (jax.random.uniform(kr, (N, N, R)) < 0.4).astype(jnp.float32)
    ee = jax.random.normal(ke, (N, T), jnp.float32)

    fwd = jax.jit(functools.partial(forward, d_feat=d_feat, hidden_size=H,
                                    num_layers=num_layers, head_num=head_num))
    pred = jax.block_until_ready(fwd(params, x, relation_matrix, ee))

    assert pred.shape == (N,), pred.shape
    assert bool(jnp.all(jnp.isfinite(pred)))
    print("KERNEL_OK")
</pallas_src>

<mosaic_0001>
module attributes {stable_mosaic.version = 11 : i64} {
  func.func @kernel(%arg0: memref<64x6xf32, #tpu.memory_space<vmem>>, %arg1: memref<64x1xf32, #tpu.memory_space<vmem>>, %arg2: memref<8x8xf32, #tpu.memory_space<vmem>>, %arg3: memref<8x8xf32, #tpu.memory_space<vmem>>, %arg4: memref<6x32xf32, #tpu.memory_space<vmem>>, %arg5: memref<1x32xf32, #tpu.memory_space<vmem>>, %arg6: memref<3x32x32xf32, #tpu.memory_space<vmem>>, %arg7: memref<3x1x32xf32, #tpu.memory_space<vmem>>, %arg8: memref<3x6x32xf32, #tpu.memory_space<vmem>>, %arg9: memref<1x3x96x96xf32, #tpu.memory_space<vmem>>, %arg10: memref<2x3x96x96xf32, #tpu.memory_space<vmem>>, %arg11: memref<2x3x1x96xf32, #tpu.memory_space<vmem>>, %arg12: memref<2x3x1x96xf32, #tpu.memory_space<vmem>>, %arg13: memref<32x16xf32, #tpu.memory_space<vmem>>, %arg14: memref<1x16xf32, #tpu.memory_space<vmem>>, %arg15: memref<1x16xf32, #tpu.memory_space<vmem>>, %arg16: memref<2x1x32xf32, #tpu.memory_space<vmem>>, %arg17: memref<2x32x1xf32, #tpu.memory_space<vmem>>, %arg18: memref<2x1x1xf32, #tpu.memory_space<vmem>>, %arg19: memref<5x1x32xf32, #tpu.memory_space<vmem>>, %arg20: memref<1x1xf32, #tpu.memory_space<vmem>>, %arg21: memref<8x1xf32, #tpu.memory_space<vmem>>, %arg22: memref<64x96xf32, #tpu.memory_space<vmem>>) attributes {dimension_semantics = [], scalar_prefetch = 0 : i64, scratch_operands = 1 : i64, tpu.core_type = #tpu.core_type<tc>} {
    %c0 = arith.constant 0 : index
    %c0_0 = arith.constant 0 : index
    %0 = vector.load %arg0[%c0, %c0_0] : memref<64x6xf32, #tpu.memory_space<vmem>>, vector<64x6xf32>
    %c0_1 = arith.constant 0 : index
    %c0_2 = arith.constant 0 : index
    %1 = vector.load %arg4[%c0_1, %c0_2] : memref<6x32xf32, #tpu.memory_space<vmem>>, vector<6x32xf32>
    %cst = arith.constant dense<0.000000e+00> : vector<64x32xf32>
    %2 = tpu.matmul %0, %1, %cst {dimension_numbers = #tpu.dot_dimension_numbers<[1], [0], [0], [1], [0, 0, 1, 1], [], []>} : vector<64x6xf32>, vector<6x32xf32>, vector<64x32xf32> -> vector<64x32xf32>
    %c0_3 = arith.constant 0 : index
    %c0_4 = arith.constant 0 : index
    %3 = vector.load %arg5[%c0_3, %c0_4] : memref<1x32xf32, #tpu.memory_space<vmem>>, vector<1x32xf32>
    %4 = vector.broadcast %3 : vector<1x32xf32> to vector<64x32xf32>
    %5 = arith.addf %2, %4 : vector<64x32xf32>
    %6 = math.tanh %5 : vector<64x32xf32>
    %c0_5 = arith.constant 0 : index
    %c0_6 = arith.constant 0 : index
    %7 = vector.load %arg1[%c0_5, %c0_6] : memref<64x1xf32, #tpu.memory_space<vmem>>, vector<64x1xf32>
    %c0_7 = arith.constant 0 : index
    %c0_8 = arith.constant 0 : index
    %c0_9 = arith.constant 0 : index
    %8 = vector.load %arg6[%c0_7, %c0_8, %c0_9] : memref<3x32x32xf32, #tpu.memory_space<vmem>>, vector<1x32x32xf32>
    %9 = vector.shape_cast %8 : vector<1x32x32xf32> to vector<32x32xf32>
    %cst_10 = arith.constant dense<0.000000e+00> : vector<64x32xf32>
    %10 = tpu.matmul %6, %9, %cst_10 {dimension_numbers = #tpu.dot_dimension_numbers<[1], [0], [0], [1], [0, 0, 1, 1], [], []>} : vector<64x32xf32>, vector<32x32xf32>, vector<64x32xf32> -> vector<64x32xf32>
    %c0_11 = arith.constant 0 : index
    %c0_12 = arith.constant 0 : index
    %c0_13 = arith.constant 0 : index
    %11 = vector.load %arg7[%c0_11, %c0_12, %c0_13] : memref<3x1x32xf32, #tpu.memory_space<vmem>>, vector<1x1x32xf32>
    %12 = vector.shape_cast %11 : vector<1x1x32xf32> to vector<1x32xf32>
    %13 = vector.broadcast %7 : vector<64x1xf32> to vector<64x32xf32>
    %14 = vector.broadcast %12 : vector<1x32xf32> to vector<64x32xf32>
    %15 = arith.mulf %13, %14 : vector<64x32xf32>
    %c0_14 = arith.constant 0 : index
    %c0_15 = arith.constant 0 : index
    %c0_16 = arith.constant 0 : index
    %16 = vector.load %arg8[%c0_14, %c0_15, %c0_16] : memref<3x6x32xf32, #tpu.memory_space<vmem>>, vector<1x6x32xf32>
    %17 = vector.shape_cast %16 : vector<1x6x32xf32> to vector<6x32xf32>
    %cst_17 = arith.constant dense<0.000000e+00> : vector<64x32xf32>
    %18 = tpu.matmul %0, %17, %cst_17 {dimension_numbers = #tpu.dot_dimension_numbers<[1], [0], [0], [1], [0, 0, 1, 1], [], []>} : vector<64x6xf32>, vector<6x32xf32>, vector<64x32xf32> -> vector<64x32xf32>
    %19 = tpu.concatenate %10, %15, %18 in 1 : vector<64x32xf32>, vector<64x32xf32>, vector<64x32xf32> -> vector<64x96xf32>
    %c0_18 = arith.constant 0 : index
    %c0_19 = arith.constant 0 : index
    %c0_20 = arith.constant 0 : index
    %c0_21 = arith.constant 0 : index
    %20 = vector.load %arg11[%c0_18, %c0_19, %c0_20, %c0_21] : memref<2x3x1x96xf32, #tpu.memory_space<vmem>>, vector<1x1x1x96xf32>
    %21 = vector.shape_cast %20 : vector<1x1x1x96xf32> to vector<1x96xf32>
    %22 = vector.broadcast %21 : vector<1x96xf32> to vector<64x96xf32>
    %23 = arith.addf %19, %22 : vector<64x96xf32>
    %c1 = arith.constant 1 : index
    %c0_22 = arith.constant 0 : index
    %c0_23 = arith.constant 0 : index
    %24 = vector.load %arg6[%c1, %c0_22, %c0_23] : memref<3x32x32xf32, #tpu.memory_space<vmem>>, vector<1x32x32xf32>
    %25 = vector.shape_cast %24 : vector<1x32x32xf32> to vector<32x32xf32>
    %cst_24 = arith.constant dense<0.000000e+00> : vector<64x32xf32>
    %26 = tpu.matmul %6, %25, %cst_24 {dimension_numbers = #tpu.dot_dimension_numbers<[1], [0], [0], [1], [0, 0, 1, 1], [], []>} : vector<64x32xf32>, vector<32x32xf32>, vector<64x32xf32> -> vector<64x32xf32>
    %c1_25 = arith.constant 1 : index
    %c0_26 = arith.constant 0 : index
    %c0_27 = arith.constant 0 : index
    %27 = vector.load %arg7[%c1_25, %c0_26, %c0_27] : memref<3x1x32xf32, #tpu.memory_space<vmem>>, vector<1x1x32xf32>
    %28 = vector.shape_cast %27 : vector<1x1x32xf32> to vector<1x32xf32>
    %29 = vector.broadcast %7 : vector<64x1xf32> to vector<64x32xf32>
    %30 = vector.broadcast %28 : vector<1x32xf32> to vector<64x32xf32>
    %31 = arith.mulf %29, %30 : vector<64x32xf32>
    %c1_28 = arith.constant 1 : index
    %c0_29 = arith.constant 0 : index
    %c0_30 = arith.constant 0 : index
    %32 = vector.load %arg8[%c1_28, %c0_29, %c0_30] : memref<3x6x32xf32, #tpu.memory_space<vmem>>, vector<1x6x32xf32>
    %33 = vector.shape_cast %32 : vector<1x6x32xf32> to vector<6x32xf32>
    %cst_31 = arith.constant dense<0.000000e+00> : vector<64x32xf32>
    %34 = tpu.matmul %0, %33, %cst_31 {dimension_numbers = #tpu.dot_dimension_numbers<[1], [0], [0], [1], [0, 0, 1, 1], [], []>} : vector<64x6xf32>, vector<6x32xf32>, vector<64x32xf32> -> vector<64x32xf32>
    %35 = tpu.concatenate %26, %31, %34 in 1 : vector<64x32xf32>, vector<64x32xf32>, vector<64x32xf32> -> vector<64x96xf32>
    %c0_32 = arith.constant 0 : index
    %c1_33 = arith.constant 1 : index
    %c0_34 = arith.constant 0 : index
    %c0_35 = arith.constant 0 : index
    %36 = vector.load %arg11[%c0_32, %c1_33, %c0_34, %c0_35] : memref<2x3x1x96xf32, #tpu.memory_space<vmem>>, vector<1x1x1x96xf32>
    %37 = vector.shape_cast %36 : vector<1x1x1x96xf32> to vector<1x96xf32>
    %38 = vector.broadcast %37 : vector<1x96xf32> to vector<64x96xf32>
    %39 = arith.addf %35, %38 : vector<64x96xf32>
    %c2 = arith.constant 2 : index
    %c0_36 = arith.constant 0 : index
    %c0_37 = arith.constant 0 : index
    %40 = vector.load %arg6[%c2, %c0_36, %c0_37] : memref<3x32x32xf32, #tpu.memory_space<vmem>>, vector<1x32x32xf32>
    %41 = vector.shape_cast %40 : vector<1x32x32xf32> to vector<32x32xf32>
    %cst_38 = arith.constant dense<0.000000e+00> : vector<64x32xf32>
    %42 = tpu.matmul %6, %41, %cst_38 {dimension_numbers = #tpu.dot_dimension_numbers<[1], [0], [0], [1], [0, 0, 1, 1], [], []>} : vector<64x32xf32>, vector<32x32xf32>, vector<64x32xf32> -> vector<64x32xf32>
    %c2_39 = arith.constant 2 : index
    %c0_40 = arith.constant 0 : index
    %c0_41 = arith.constant 0 : index
    %43 = vector.load %arg7[%c2_39, %c0_40, %c0_41] : memref<3x1x32xf32, #tpu.memory_space<vmem>>, vector<1x1x32xf32>
    %44 = vector.shape_cast %43 : vector<1x1x32xf32> to vector<1x32xf32>
    %45 = vector.broadcast %7 : vector<64x1xf32> to vector<64x32xf32>
    %46 = vector.broadcast %44 : vector<1x32xf32> to vector<64x32xf32>
    %47 = arith.mulf %45, %46 : vector<64x32xf32>
    %c2_42 = arith.constant 2 : index
    %c0_43 = arith.constant 0 : index
    %c0_44 = arith.constant 0 : index
    %48 = vector.load %arg8[%c2_42, %c0_43, %c0_44] : memref<3x6x32xf32, #tpu.memory_space<vmem>>, vector<1x6x32xf32>
    %49 = vector.shape_cast %48 : vector<1x6x32xf32> to vector<6x32xf32>
    %cst_45 = arith.constant dense<0.000000e+00> : vector<64x32xf32>
    %50 = tpu.matmul %0, %49, %cst_45 {dimension_numbers = #tpu.dot_dimension_numbers<[1], [0], [0], [1], [0, 0, 1, 1], [], []>} : vector<64x6xf32>, vector<6x32xf32>, vector<64x32xf32> -> vector<64x32xf32>
    %51 = tpu.concatenate %42, %47, %50 in 1 : vector<64x32xf32>, vector<64x32xf32>, vector<64x32xf32> -> vector<64x96xf32>
    %c0_46 = arith.constant 0 : index
    %c2_47 = arith.constant 2 : index
    %c0_48 = arith.constant 0 : index
    %c0_49 = arith.constant 0 : index
    %52 = vector.load %arg11[%c0_46, %c2_47, %c0_48, %c0_49] : memref<2x3x1x96xf32, #tpu.memory_space<vmem>>, vector<1x1x1x96xf32>
    %53 = vector.shape_cast %52 : vector<1x1x1x96xf32> to vector<1x96xf32>
    %54 = vector.broadcast %53 : vector<1x96xf32> to vector<64x96xf32>
    %55 = arith.addf %51, %54 : vector<64x96xf32>
    %cst_50 = arith.constant 0.000000e+00 : f32
    %56 = vector.broadcast %cst_50 : f32 to vector<8x96xf32>
    %c0_51 = arith.constant 0 : index
    %c0_52 = arith.constant 0 : index
    %c0_53 = arith.constant 0 : index
    %c0_54 = arith.constant 0 : index
    %57 = vector.load %arg10[%c0_51, %c0_52, %c0_53, %c0_54] : memref<2x3x96x96xf32, #tpu.memory_space<vmem>>, vector<1x1x96x96xf32>
    %58 = vector.shape_cast %57 : vector<1x1x96x96xf32> to vector<96x96xf32>
    %cst_55 = arith.constant dense<0.000000e+00> : vector<8x96xf32>
    %59 = tpu.matmul %56, %58, %cst_55 {dimension_numbers = #tpu.dot_dimension_numbers<[1], [0], [0], [1], [0, 0, 1, 1], [], []>} : vector<8x96xf32>, vector<96x96xf32>, vector<8x96xf32> -> vector<8x96xf32>
    %c0_56 = arith.constant 0 : index
    %c0_57 = arith.constant 0 : index
    %c0_58 = arith.constant 0 : index
    %c0_59 = arith.constant 0 : index
    %60 = vector.load %arg12[%c0_56, %c0_57, %c0_58, %c0_59] : memref<2x3x1x96xf32, #tpu.memory_space<vmem>>, vector<1x1x1x96xf32>
    %61 = vector.shape_cast %60 : vector<1x1x1x96xf32> to vector<1x96xf32>
    %62 = vector.broadcast %61 : vector<1x96xf32> to vector<8x96xf32>
    %63 = arith.addf %59, %62 : vector<8x96xf32>
    %c0_60 = arith.constant 0 : index
    %c1_61 = arith.constant 1 : index
    %c0_62 = arith.constant 0 : index
    %c0_63 = arith.constant 0 : index
    %64 = vector.load %arg10[%c0_60, %c1_61, %c0_62, %c0_63] : memref<2x3x96x96xf32, #tpu.memory_space<vmem>>, vector<1x1x96x96xf32>
    %65 = vector.shape_cast %64 : vector<1x1x96x96xf32> to vector<96x96xf32>
    %cst_64 = arith.constant dense<0.000000e+00> : vector<8x96xf32>
    %66 = tpu.matmul %56, %65, %cst_64 {dimension_numbers = #tpu.dot_dimension_numbers<[1], [0], [0], [1], [0, 0, 1, 1], [], []>} : vector<8x96xf32>, vector<96x96xf32>, vector<8x96xf32> -> vector<8x96xf32>
    %c0_65 = arith.constant 0 : index
    %c1_66 = arith.constant 1 : index
    %c0_67 = arith.constant 0 : index
    %c0_68 = arith.constant 0 : index
    %67 = vector.load %arg12[%c0_65, %c1_66, %c0_67, %c0_68] : memref<2x3x1x96xf32, #tpu.memory_space<vmem>>, vector<1x1x1x96xf32>
    %68 = vector.shape_cast %67 : vector<1x1x1x96xf32> to vector<1x96xf32>
    %69 = vector.broadcast %68 : vector<1x96xf32> to vector<8x96xf32>
    %70 = arith.addf %66, %69 : vector<8x96xf32>
    %c0_69 = arith.constant 0 : index
    %c2_70 = arith.constant 2 : index
    %c0_71 = arith.constant 0 : index
    %c0_72 = arith.constant 0 : index
    %71 = vector.load %arg10[%c0_69, %c2_70, %c0_71, %c0_72] : memref<2x3x96x96xf32, #tpu.memory_space<vmem>>, vector<1x1x96x96xf32>
    %72 = vector.shape_cast %71 : vector<1x1x96x96xf32> to vector<96x96xf32>
    %cst_73 = arith.constant dense<0.000000e+00> : vector<8x96xf32>
    %73 = tpu.matmul %56, %72, %cst_73 {dimension_numbers = #tpu.dot_dimension_numbers<[1], [0], [0], [1], [0, 0, 1, 1], [], []>} : vector<8x96xf32>, vector<96x96xf32>, vector<8x96xf32> -> vector<8x96xf32>
    %c0_74 = arith.constant 0 : index
    %c2_75 = arith.constant 2 : index
    %c0_76 = arith.constant 0 : index
    %c0_77 = arith.constant 0 : index
    %74 = vector.load %arg12[%c0_74, %c2_75, %c0_76, %c0_77] : memref<2x3x1x96xf32, #tpu.memory_space<vmem>>, vector<1x1x1x96xf32>
    %75 = vector.shape_cast %74 : vector<1x1x1x96xf32> to vector<1x96xf32>
    %76 = vector.broadcast %75 : vector<1x96xf32> to vector<8x96xf32>
    %77 = arith.addf %73, %76 : vector<8x96xf32>
    %78 = vector.extract_strided_slice %23 {offsets = [0, 0], sizes = [8, 96], strides = [1, 1]} : vector<64x96xf32> to vector<8x96xf32>
    %79 = arith.addf %78, %63 : vector<8x96xf32>
    %cst_78 = arith.constant 0.000000e+00 : f32
    %80 = vector.broadcast %cst_78 : f32 to vector<8x96xf32>
    %81 = arith.subf %80, %79 : vector<8x96xf32>
    %82 = math.exp %81 : vector<8x96xf32>
    %cst_79 = arith.constant 1.000000e+00 : f32
    %83 = vector.broadcast %cst_79 : f32 to vector<8x96xf32>
    %84 = arith.addf %83, %82 : vector<8x96xf32>
    %85 = tpu.reciprocal %84 {approx = true} : vector<8x96xf32> -> vector<8x96xf32>
    %86 = vector.extract_strided_slice %39 {offsets = [0, 0], sizes = [8, 96], strides = [1, 1]} : vector<64x96xf32> to vector<8x96xf32>
    %87 = arith.addf %86, %70 : vector<8x96xf32>
    %cst_80 = arith.constant 0.000000e+00 : f32
    %88 = vector.broadcast %cst_80 : f32 to vector<8x96xf32>
    %89 = arith.subf %88, %87 : vector<8x96xf32>
    %90 = math.exp %89 : vector<8x96xf32>
    %cst_81 = arith.constant 1.000000e+00 : f32
    %91 = vector.broadcast %cst_81 : f32 to vector<8x96xf32>
    %92 = arith.addf %91, %90 : vector<8x96xf32>
    %93 = tpu.reciprocal %92 {approx = true} : vector<8x96xf32> -> vector<8x96xf32>
    %94 = vector.extract_strided_slice %55 {offsets = [0, 0], sizes = [8, 96], strides = [1, 1]} : vector<64x96xf32> to vector<8x96xf32>
    %95 = arith.mulf %85, %77 : vector<8x96xf32>
    %96 = arith.addf %94, %95 : vector<8x96xf32>
    %97 = math.tanh %96 : vector<8x96xf32>
    %cst_82 = arith.constant 1.000000e+00 : f32
    %98 = vector.broadcast %cst_82 : f32 to vector<8x96xf32>
    %99 = arith.subf %98, %93 : vector<8x96xf32>
    %100 = arith.mulf %99, %97 : vector<8x96xf32>
    %101 = arith.mulf %93, %56 : vector<8x96xf32>
    %102 = arith.addf %100, %101 : vector<8x96xf32>
    %c0_83 = arith.constant 0 : index
    %c0_84 = arith.constant 0 : index
    %103 = vector.load %arg22[%c0_83, %c0_84] : memref<64x96xf32, #tpu.memory_space<vmem>>, vector<8x96xf32>
    tpu.vector_store %arg22[%c0_83, %c0_84], %102 {strides = array<i32>} : memref<64x96xf32, #tpu.memory_space<vmem>>, vector<8x96xf32>,
    %c0_85 = arith.constant 0 : index
    %c0_86 = arith.constant 0 : index
    %c0_87 = arith.constant 0 : index
    %c0_88 = arith.constant 0 : index
    %104 = vector.load %arg10[%c0_85, %c0_86, %c0_87, %c0_88] : memref<2x3x96x96xf32, #tpu.memory_space<vmem>>, vector<1x1x96x96xf32>
    %105 = vector.shape_cast %104 : vector<1x1x96x96xf32> to vector<96x96xf32>
    %cst_89 = arith.constant dense<0.000000e+00> : vector<8x96xf32>
    %106 = tpu.matmul %102, %105, %cst_89 {dimension_numbers = #tpu.dot_dimension_numbers<[1], [0], [0], [1], [0, 0, 1, 1], [], []>} : vector<8x96xf32>, vector<96x96xf32>, vector<8x96xf32> -> vector<8x96xf32>
    %c0_90 = arith.constant 0 : index
    %c0_91 = arith.constant 0 : index
    %c0_92 = arith.constant 0 : index
    %c0_93 = arith.constant 0 : index
    %107 = vector.load %arg12[%c0_90, %c0_91, %c0_92, %c0_93] : memref<2x3x1x96xf32, #tpu.memory_space<vmem>>, vector<1x1x1x96xf32>
    %108 = vector.shape_cast %107 : vector<1x1x1x96xf32> to vector<1x96xf32>
    %109 = vector.broadcast %108 : vector<1x96xf32> to vector<8x96xf32>
    %110 = arith.addf %106, %109 : vector<8x96xf32>
    %c0_94 = arith.constant 0 : index
    %c1_95 = arith.constant 1 : index
    %c0_96 = arith.constant 0 : index
    %c0_97 = arith.constant 0 : index
    %111 = vector.load %arg10[%c0_94, %c1_95, %c0_96, %c0_97] : memref<2x3x96x96xf32, #tpu.memory_space<vmem>>, vector<1x1x96x96xf32>
    %112 = vector.shape_cast %111 : vector<1x1x96x96xf32> to vector<96x96xf32>
    %cst_98 = arith.constant dense<0.000000e+00> : vector<8x96xf32>
    %113 = tpu.matmul %102, %112, %cst_98 {dimension_numbers = #tpu.dot_dimension_numbers<[1], [0], [0], [1], [0, 0, 1, 1], [], []>} : vector<8x96xf32>, vector<96x96xf32>, vector<8x96xf32> -> vector<8x96xf32>
    %c0_99 = arith.constant 0 : index
    %c1_100 = arith.constant 1 : index
    %c0_101 = arith.constant 0 : index
    %c0_102 = arith.constant 0 : index
    %114 = vector.load %arg12[%c0_99, %c1_100, %c0_101, %c0_102] : memref<2x3x1x96xf32, #tpu.memory_space<vmem>>, vector<1x1x1x96xf32>
    %115 = vector.shape_cast %114 : vector<1x1x1x96xf32> to vector<1x96xf32>
    %116 = vector.broadcast %115 : vector<1x96xf32> to vector<8x96xf32>
    %117 = arith.addf %113, %116 : vector<8x96xf32>
    %c0_103 = arith.constant 0 : index
    %c2_104 = arith.constant 2 : index
    %c0_105 = arith.constant 0 : index
    %c0_106 = arith.constant 0 : index
    %118 = vector.load %arg10[%c0_103, %c2_104, %c0_105, %c0_106] : memref<2x3x96x96xf32, #tpu.memory_space<vmem>>, vector<1x1x96x96xf32>
    %119 = vector.shape_cast %118 : vector<1x1x96x96xf32> to vector<96x96xf32>
    %cst_107 = arith.constant dense<0.000000e+00> : vector<8x96xf32>
    %120 = tpu.matmul %102, %119, %cst_107 {dimension_numbers = #tpu.dot_dimension_numbers<[1], [0], [0], [1], [0, 0, 1, 1], [], []>} : vector<8x96xf32>, vector<96x96xf32>, vector<8x96xf32> -> vector<8x96xf32>
    %c0_108 = arith.constant 0 : index
    %c2_109 = arith.constant 2 : index
    %c0_110 = arith.constant 0 : index
    %c0_111 = arith.constant 0 : index
    %121 = vector.load %arg12[%c0_108, %c2_109, %c0_110, %c0_111] : memref<2x3x1x96xf32, #tpu.memory_space<vmem>>, vector<1x1x1x96xf32>
    %122 = vector.shape_cast %121 : vector<1x1x1x96xf32> to vector<1x96xf32>
    %123 = vector.broadcast %122 : vector<1x96xf32> to vector<8x96xf32>
    %124 = arith.addf %120, %123 : vector<8x96xf32>
    %125 = vector.extract_strided_slice %23 {offsets = [8, 0], sizes = [8, 96], strides = [1, 1]} : vector<64x96xf32> to vector<8x96xf32>
    %126 = arith.addf %125, %110 : vector<8x96xf32>
    %cst_112 = arith.constant 0.000000e+00 : f32
    %127 = vector.broadcast %cst_112 : f32 to vector<8x96xf32>
    %128 = arith.subf %127, %126 : vector<8x96xf32>
    %129 = math.exp %128 : vector<8x96xf32>
    %cst_113 = arith.constant 1.000000e+00 : f32
    %130 = vector.broadcast %cst_113 : f32 to vector<8x96xf32>
    %131 = arith.addf %130, %129 : vector<8x96xf32>
    %132 = tpu.reciprocal %131 {approx = true} : vector<8x96xf32> -> vector<8x96xf32>
    %133 = vector.extract_strided_slice %39 {offsets = [8, 0], sizes = [8, 96], strides = [1, 1]} : vector<64x96xf32> to vector<8x96xf32>
    %134 = arith.addf %133, %117 : vector<8x96xf32>
    %cst_114 = arith.constant 0.000000e+00 : f32
    %135 = vector.broadcast %cst_114 : f32 to vector<8x96xf32>
    %136 = arith.subf %135, %134 : vector<8x96xf32>
    %137 = math.exp %136 : vector<8x96xf32>
    %cst_115 = arith.constant 1.000000e+00 : f32
    %138 = vector.broadcast %cst_115 : f32 to vector<8x96xf32>
    %139 = arith.addf %138, %137 : vector<8x96xf32>
    %140 = tpu.reciprocal %139 {approx = true} : vector<8x96xf32> -> vector<8x96xf32>
    %141 = vector.extract_strided_slice %55 {offsets = [8, 0], sizes = [8, 96], strides = [1, 1]} : vector<64x96xf32> to vector<8x96xf32>
    %142 = arith.mulf %132, %124 : vector<8x96xf32>
    %143 = arith.addf %141, %142 : vector<8x96xf32>
    %144 = math.tanh %143 : vector<8x96xf32>
    %cst_116 = arith.constant 1.000000e+00 : f32
    %145 = vector.broadcast %cst_116 : f32 to vector<8x96xf32>
    %146 = arith.subf %145, %140 : vector<8x96xf32>
    %147 = arith.mulf %146, %144 : vector<8x96xf32>
    %148 = arith.mulf %140, %102 : vector<8x96xf32>
    %149 = arith.addf %147, %148 : vector<8x96xf32>
    %c8 = arith.constant 8 : index
    %c0_117 = arith.constant 0 : index
    %150 = vector.load %arg22[%c8, %c0_117] : memref<64x96xf32, #tpu.memory_space<vmem>>, vector<8x96xf32>
    tpu.vector_store %arg22[%c8, %c0_117], %149 {strides = array<i32>} : memref<64x96xf32, #tpu.memory_space<vmem>>, vector<8x96xf32>,
    %c0_118 = arith.constant 0 : index
    %c0_119 = arith.constant 0 : index
    %c0_120 = arith.constant 0 : index
    %c0_121 = arith.constant 0 : index
    %151 = vector.load %arg10[%c0_118, %c0_119, %c0_120, %c0_121] : memref<2x3x96x96xf32, #tpu.memory_space<vmem>>, vector<1x1x96x96xf32>
    %152 = vector.shape_cast %151 : vector<1x1x96x96xf32> to vector<96x96xf32>
    %cst_122 = arith.constant dense<0.000000e+00> : vector<8x96xf32>
    %153 = tpu.matmul %149, %152, %cst_122 {dimension_numbers = #tpu.dot_dimension_numbers<[1], [0], [0], [1], [0, 0, 1, 1], [], []>} : vector<8x96xf32>, vector<96x96xf32>, vector<8x96xf32> -> vector<8x96xf32>
    %c0_123 = arith.constant 0 : index
    %c0_124 = arith.constant 0 : index
    %c0_125 = arith.constant 0 : index
    %c0_126 = arith.constant 0 : index
    %154 = vector.load %arg12[%c0_123, %c0_124, %c0_125, %c0_126] : memref<2x3x1x96xf32, #tpu.memory_space<vmem>>, vector<1x1x1x96xf32>
    %155 = vector.shape_cast %154 : vector<1x1x1x96xf32> to vector<1x96xf32>
    %156 = vector.broadcast %155 : vector<1x96xf32> to vector<8x96xf32>
    %157 = arith.addf %153, %156 : vector<8x96xf32>
    %c0_127 = arith.constant 0 : index
    %c1_128 = arith.constant 1 : index
    %c0_129 = arith.constant 0 : index
    %c0_130 = arith.constant 0 : index
    %158 = vector.load %arg10[%c0_127, %c1_128, %c0_129, %c0_130] : memref<2x3x96x96xf32, #tpu.memory_space<vmem>>, vector<1x1x96x96xf32>
    %159 = vector.shape_cast %158 : vector<1x1x96x96xf32> to vector<96x96xf32>
    %cst_131 = arith.constant dense<0.000000e+00> : vector<8x96xf32>
    %160 = tpu.matmul %149, %159, %cst_131 {dimension_numbers = #tpu.dot_dimension_numbers<[1], [0], [0], [1], [0, 0, 1, 1], [], []>} : vector<8x96xf32>, vector<96x96xf32>, vector<8x96xf32> -> vector<8x96xf32>
    %c0_132 = arith.constant 0 : index
    %c1_133 = arith.constant 1 : index
    %c0_134 = arith.constant 0 : index
    %c0_135 = arith.constant 0 : index
    %161 = vector.load %arg12[%c0_132, %c1_133, %c0_134, %c0_135] : memref<2x3x1x96xf32, #tpu.memory_space<vmem>>, vector<1x1x1x96xf32>
    %162 = vector.shape_cast %161 : vector<1x1x1x96xf32> to vector<1x96xf32>
    %163 = vector.broadcast %162 : vector<1x96xf32> to vector<8x96xf32>
    %164 = arith.addf %160, %163 : vector<8x96xf32>
    %c0_136 = arith.constant 0 : index
    %c2_137 = arith.constant 2 : index
    %c0_138 = arith.constant 0 : index
    %c0_139 = arith.constant 0 : index
    %165 = vector.load %arg10[%c0_136, %c2_137, %c0_138, %c0_139] : memref<2x3x96x96xf32, #tpu.memory_space<vmem>>, vector<1x1x96x96xf32>
    %166 = vector.shape_cast %165 : vector<1x1x96x96xf32> to vector<96x96xf32>
    %cst_140 = arith.constant dense<0.000000e+00> : vector<8x96xf32>
    %167 = tpu.matmul %149, %166, %cst_140 {dimension_numbers = #tpu.dot_dimension_numbers<[1], [0], [0], [1], [0, 0, 1, 1], [], []>} : vector<8x96xf32>, vector<96x96xf32>, vector<8x96xf32> -> vector<8x96xf32>
    %c0_141 = arith.constant 0 : index
    %c2_142 = arith.constant 2 : index
    %c0_143 = arith.constant 0 : index
    %c0_144 = arith.constant 0 : index
    %168 = vector.load %arg12[%c0_141, %c2_142, %c0_143, %c0_144] : memref<2x3x1x96xf32, #tpu.memory_space<vmem>>, vector<1x1x1x96xf32>
    %169 = vector.shape_cast %168 : vector<1x1x1x96xf32> to vector<1x96xf32>
    %170 = vector.broadcast %169 : vector<1x96xf32> to vector<8x96xf32>
    %171 = arith.addf %167, %170 : vector<8x96xf32>
    %172 = vector.extract_strided_slice %23 {offsets = [16, 0], sizes = [8, 96], strides = [1, 1]} : vector<64x96xf32> to vector<8x96xf32>
    %173 = arith.addf %172, %157 : vector<8x96xf32>
    %cst_145 = arith.constant 0.000000e+00 : f32
    %174 = vector.broadcast %cst_145 : f32 to vector<8x96xf32>
    %175 = arith.subf %174, %173 : vector<8x96xf32>
    %176 = math.exp %175 : vector<8x96xf32>
    %cst_146 = arith.constant 1.000000e+00 : f32
    %177 = vector.broadcast %cst_146 : f32 to vector<8x96xf32>
    %178 = arith.addf %177, %176 : vector<8x96xf32>
    %179 = tpu.reciprocal %178 {approx = true} : vector<8x96xf32> -> vector<8x96xf32>
    %180 = vector.extract_strided_slice %39 {offsets = [16, 0], sizes = [8, 96], strides = [1, 1]} : vector<64x96xf32> to vector<8x96xf32>
    %181 = arith.addf %180, %164 : vector<8x96xf32>
    %cst_147 = arith.constant 0.000000e+00 : f32
    %182 = vector.broadcast %cst_147 : f32 to vector<8x96xf32>
    %183 = arith.subf %182, %181 : vector<8x96xf32>
    %184 = math.exp %183 : vector<8x96xf32>
    %cst_148 = arith.constant 1.000000e+00 : f32
    %185 = vector.broadcast %cst_148 : f32 to vector<8x96xf32>
    %186 = arith.addf %185, %184 : vector<8x96xf32>
    %187 = tpu.reciprocal %186 {approx = true} : vector<8x96xf32> -> vector<8x96xf32>
    %188 = vector.extract_strided_slice %55 {offsets = [16, 0], sizes = [8, 96], strides = [1, 1]} : vector<64x96xf32> to vector<8x96xf32>
    %189 = arith.mulf %179, %171 : vector<8x96xf32>
    %190 = arith.addf %188, %189 : vector<8x96xf32>
    %191 = math.tanh %190 : vector<8x96xf32>
    %cst_149 = arith.constant 1.000000e+00 : f32
    %192 = vector.broadcast %cst_149 : f32 to vector<8x96xf32>
    %193 = arith.subf %192, %187 : vector<8x96xf32>
    %194 = arith.mulf %193, %191 : vector<8x96xf32>
    %195 = arith.mulf %187, %149 : vector<8x96xf32>
    %196 = arith.addf %194, %195 : vector<8x96xf32>
    %c16 = arith.constant 16 : index
    %c0_150 = arith.constant 0 : index
    %197 = vector.load %arg22[%c16, %c0_150] : memref<64x96xf32, #tpu.memory_space<vmem>>, vector<8x96xf32>
    tpu.vector_store %arg22[%c16, %c0_150], %196 {strides = array<i32>} : memref<64x96xf32, #tpu.memory_space<vmem>>, vector<8x96xf32>,
    %c0_151 = arith.constant 0 : index
    %c0_152 = arith.constant 0 : index
    %c0_153 = arith.constant 0 : index
    %c0_154 = arith.constant 0 : index
    %198 = vector.load %arg10[%c0_151, %c0_152, %c0_153, %c0_154] : memref<2x3x96x96xf32, #tpu.memory_space<vmem>>, vector<1x1x96x96xf32>
    %199 = vector.shape_cast %198 : vector<1x1x96x96xf32> to vector<96x96xf32>
    %cst_155 = arith.constant dense<0.000000e+00> : vector<8x96xf32>
    %200 = tpu.matmul %196, %199, %cst_155 {dimension_numbers = #tpu.dot_dimension_numbers<[1], [0], [0], [1], [0, 0, 1, 1], [], []>} : vector<8x96xf32>, vector<96x96xf32>, vector<8x96xf32> -> vector<8x96xf32>
    %c0_156 = arith.constant 0 : index
    %c0_157 = arith.constant 0 : index
    %c0_158 = arith.constant 0 : index
    %c0_159 = arith.constant 0 : index
    %201 = vector.load %arg12[%c0_156, %c0_157, %c0_158, %c0_159] : memref<2x3x1x96xf32, #tpu.memory_space<vmem>>, vector<1x1x1x96xf32>
    %202 = vector.shape_cast %201 : vector<1x1x1x96xf32> to vector<1x96xf32>
    %203 = vector.broadcast %202 : vector<1x96xf32> to vector<8x96xf32>
    %204 = arith.addf %200, %203 : vector<8x96xf32>
    %c0_160 = arith.constant 0 : index
    %c1_161 = arith.constant 1 : index
    %c0_162 = arith.constant 0 : index
    %c0_163 = arith.constant 0 : index
    %205 = vector.load %arg10[%c0_160, %c1_161, %c0_162, %c0_163] : memref<2x3x96x96xf32, #tpu.memory_space<vmem>>, vector<1x1x96x96xf32>
    %206 = vector.shape_cast %205 : vector<1x1x96x96xf32> to vector<96x96xf32>
    %cst_164 = arith.constant dense<0.000000e+00> : vector<8x96xf32>
    %207 = tpu.matmul %196, %206, %cst_164 {dimension_numbers = #tpu.dot_dimension_numbers<[1], [0], [0], [1], [0, 0, 1, 1], [], []>} : vector<8x96xf32>, vector<96x96xf32>, vector<8x96xf32> -> vector<8x96xf32>
    %c0_165 = arith.constant 0 : index
    %c1_166 = arith.constant 1 : index
    %c0_167 = arith.constant 0 : index
    %c0_168 = arith.constant 0 : index
    %208 = vector.load %arg12[%c0_165, %c1_166, %c0_167, %c0_168] : memref<2x3x1x96xf32, #tpu.memory_space<vmem>>, vector<1x1x1x96xf32>
    %209 = vector.shape_cast %208 : vector<1x1x1x96xf32> to vector<1x96xf32>
    %210 = vector.broadcast %209 : vector<1x96xf32> to vector<8x96xf32>
    %211 = arith.addf %207, %210 : vector<8x96xf32>
    %c0_169 = arith.constant 0 : index
    %c2_170 = arith.constant 2 : index
    %c0_171 = arith.constant 0 : index
    %c0_172 = arith.constant 0 : index
    %212 = vector.load %arg10[%c0_169, %c2_170, %c0_171, %c0_172] : memref<2x3x96x96xf32, #tpu.memory_space<vmem>>, vector<1x1x96x96xf32>
    %213 = vector.shape_cast %212 : vector<1x1x96x96xf32> to vector<96x96xf32>
    %cst_173 = arith.constant dense<0.000000e+00> : vector<8x96xf32>
    %214 = tpu.matmul %196, %213, %cst_173 {dimension_numbers = #tpu.dot_dimension_numbers<[1], [0], [0], [1], [0, 0, 1, 1], [], []>} : vector<8x96xf32>, vector<96x96xf32>, vector<8x96xf32> -> vector<8x96xf32>
    %c0_174 = arith.constant 0 : index
    %c2_175 = arith.constant 2 : index
    %c0_176 = arith.constant 0 : index
    %c0_177 = arith.constant 0 : index
    %215 = vector.load %arg12[%c0_174, %c2_175, %c0_176, %c0_177] : memref<2x3x1x96xf32, #tpu.memory_space<vmem>>, vector<1x1x1x96xf32>
    %216 = vector.shape_cast %215 : vector<1x1x1x96xf32> to vector<1x96xf32>
    %217 = vector.broadcast %216 : vector<1x96xf32> to vector<8x96xf32>
    %218 = arith.addf %214, %217 : vector<8x96xf32>
    %219 = vector.extract_strided_slice %23 {offsets = [24, 0], sizes = [8, 96], strides = [1, 1]} : vector<64x96xf32> to vector<8x96xf32>
    %220 = arith.addf %219, %204 : vector<8x96xf32>
    %cst_178 = arith.constant 0.000000e+00 : f32
    %221 = vector.broadcast %cst_178 : f32 to vector<8x96xf32>
    %222 = arith.subf %221, %220 : vector<8x96xf32>
    %223 = math.exp %222 : vector<8x96xf32>
    %cst_179 = arith.constant 1.000000e+00 : f32
    %224 = vector.broadcast %cst_179 : f32 to vector<8x96xf32>
    %225 = arith.addf %224, %223 : vector<8x96xf32>
    %226 = tpu.reciprocal %225 {approx = true} : vector<8x96xf32> -> vector<8x96xf32>
    %227 = vector.extract_strided_slice %39 {offsets = [24, 0], sizes = [8, 96], strides = [1, 1]} : vector<64x96xf32> to vector<8x96xf32>
    %228 = arith.addf %227, %211 : vector<8x96xf32>
    %cst_180 = arith.constant 0.000000e+00 : f32
    %229 = vector.broadcast %cst_180 : f32 to vector<8x96xf32>
    %230 = arith.subf %229, %228 : vector<8x96xf32>
    %231 = math.exp %230 : vector<8x96xf32>
    %cst_181 = arith.constant 1.000000e+00 : f32
    %232 = vector.broadcast %cst_181 : f32 to vector<8x96xf32>
    %233 = arith.addf %232, %231 : vector<8x96xf32>
    %234 = tpu.reciprocal %233 {approx = true} : vector<8x96xf32> -> vector<8x96xf32>
    %235 = vector.extract_strided_slice %55 {offsets = [24, 0], sizes = [8, 96], strides = [1, 1]} : vector<64x96xf32> to vector<8x96xf32>
    %236 = arith.mulf %226, %218 : vector<8x96xf32>
    %237 = arith.addf %235, %236 : vector<8x96xf32>
    %238 = math.tanh %237 : vector<8x96xf32>
    %cst_182 = arith.constant 1.000000e+00 : f32
    %239 = vector.broadcast %cst_182 : f32 to vector<8x96xf32>
    %240 = arith.subf %239, %234 : vector<8x96xf32>
    %241 = arith.mulf %240, %238 : vector<8x96xf32>
    %242 = arith.mulf %234, %196 : vector<8x96xf32>
    %243 = arith.addf %241, %242 : vector<8x96xf32>
    %c24 = arith.constant 24 : index
    %c0_183 = arith.constant 0 : index
    %244 = vector.load %arg22[%c24, %c0_183] : memref<64x96xf32, #tpu.memory_space<vmem>>, vector<8x96xf32>
    tpu.vector_store %arg22[%c24, %c0_183], %243 {strides = array<i32>} : memref<64x96xf32, #tpu.memory_space<vmem>>, vector<8x96xf32>,
    %c0_184 = arith.constant 0 : index
    %c0_185 = arith.constant 0 : index
    %c0_186 = arith.constant 0 : index
    %c0_187 = arith.constant 0 : index
    %245 = vector.load %arg10[%c0_184, %c0_185, %c0_186, %c0_187] : memref<2x3x96x96xf32, #tpu.memory_space<vmem>>, vector<1x1x96x96xf32>
    %246 = vector.shape_cast %245 : vector<1x1x96x96xf32> to vector<96x96xf32>
    %cst_188 = arith.constant dense<0.000000e+00> : vector<8x96xf32>
    %247 = tpu.matmul %243, %246, %cst_188 {dimension_numbers = #tpu.dot_dimension_numbers<[1], [0], [0], [1], [0, 0, 1, 1], [], []>} : vector<8x96xf32>, vector<96x96xf32>, vector<8x96xf32> -> vector<8x96xf32>
    %c0_189 = arith.constant 0 : index
    %c0_190 = arith.constant 0 : index
    %c0_191 = arith.constant 0 : index
    %c0_192 = arith.constant 0 : index
    %248 = vector.load %arg12[%c0_189, %c0_190, %c0_191, %c0_192] : memref<2x3x1x96xf32, #tpu.memory_space<vmem>>, vector<1x1x1x96xf32>
    %249 = vector.shape_cast %248 : vector<1x1x1x96xf32> to vector<1x96xf32>
    %250 = vector.broadcast %249 : vector<1x96xf32> to vector<8x96xf32>
    %251 = arith.addf %247, %250 : vector<8x96xf32>
    %c0_193 = arith.constant 0 : index
    %c1_194 = arith.constant 1 : index
    %c0_195 = arith.constant 0 : index
    %c0_196 = arith.constant 0 : index
    %252 = vector.load %arg10[%c0_193, %c1_194, %c0_195, %c0_196] : memref<2x3x96x96xf32, #tpu.memory_space<vmem>>, vector<1x1x96x96xf32>
    %253 = vector.shape_cast %252 : vector<1x1x96x96xf32> to vector<96x96xf32>
    %cst_197 = arith.constant dense<0.000000e+00> : vector<8x96xf32>
    %254 = tpu.matmul %243, %253, %cst_197 {dimension_numbers = #tpu.dot_dimension_numbers<[1], [0], [0], [1], [0, 0, 1, 1], [], []>} : vector<8x96xf32>, vector<96x96xf32>, vector<8x96xf32> -> vector<8x96xf32>
    %c0_198 = arith.constant 0 : index
    %c1_199 = arith.constant 1 : index
    %c0_200 = arith.constant 0 : index
    %c0_201 = arith.constant 0 : index
    %255 = vector.load %arg12[%c0_198, %c1_199, %c0_200, %c0_201] : memref<2x3x1x96xf32, #tpu.memory_space<vmem>>, vector<1x1x1x96xf32>
    %256 = vector.shape_cast %255 : vector<1x1x1x96xf32> to vector<1x96xf32>
    %257 = vector.broadcast %256 : vector<1x96xf32> to vector<8x96xf32>
    %258 = arith.addf %254, %257 : vector<8x96xf32>
    %c0_202 = arith.constant 0 : index
    %c2_203 = arith.constant 2 : index
    %c0_204 = arith.constant 0 : index
    %c0_205 = arith.constant 0 : index
    %259 = vector.load %arg10[%c0_202, %c2_203, %c0_204, %c0_205] : memref<2x3x96x96xf32, #tpu.memory_space<vmem>>, vector<1x1x96x96xf32>
    %260 = vector.shape_cast %259 : vector<1x1x96x96xf32> to vector<96x96xf32>
    %cst_206 = arith.constant dense<0.000000e+00> : vector<8x96xf32>
    %261 = tpu.matmul %243, %260, %cst_206 {dimension_numbers = #tpu.dot_dimension_numbers<[1], [0], [0], [1], [0, 0, 1, 1], [], []>} : vector<8x96xf32>, vector<96x96xf32>, vector<8x96xf32> -> vector<8x96xf32>
    %c0_207 = arith.constant 0 : index
    %c2_208 = arith.constant 2 : index
    %c0_209 = arith.constant 0 : index
    %c0_210 = arith.constant 0 : index
    %262 = vector.load %arg12[%c0_207, %c2_208, %c0_209, %c0_210] : memref<2x3x1x96xf32, #tpu.memory_space<vmem>>, vector<1x1x1x96xf32>
    %263 = vector.shape_cast %262 : vector<1x1x1x96xf32> to vector<1x96xf32>
    %264 = vector.broadcast %263 : vector<1x96xf32> to vector<8x96xf32>
    %265 = arith.addf %261, %264 : vector<8x96xf32>
    %266 = vector.extract_strided_slice %23 {offsets = [32, 0], sizes = [8, 96], strides = [1, 1]} : vector<64x96xf32> to vector<8x96xf32>
    %267 = arith.addf %266, %251 : vector<8x96xf32>
    %cst_211 = arith.constant 0.000000e+00 : f32
    %268 = vector.broadcast %cst_211 : f32 to vector<8x96xf32>
    %269 = arith.subf %268, %267 : vector<8x96xf32>
    %270 = math.exp %269 : vector<8x96xf32>
    %cst_212 = arith.constant 1.000000e+00 : f32
    %271 = vector.broadcast %cst_212 : f32 to vector<8x96xf32>
    %272 = arith.addf %271, %270 : vector<8x96xf32>
    %273 = tpu.reciprocal %272 {approx = true} : vector<8x96xf32> -> vector<8x96xf32>
    %274 = vector.extract_strided_slice %39 {offsets = [32, 0], sizes = [8, 96], strides = [1, 1]} : vector<64x96xf32> to vector<8x96xf32>
    %275 = arith.addf %274, %258 : vector<8x96xf32>
    %cst_213 = arith.constant 0.000000e+00 : f32
    %276 = vector.broadcast %cst_213 : f32 to vector<8x96xf32>
    %277 = arith.subf %276, %275 : vector<8x96xf32>
    %278 = math.exp %277 : vector<8x96xf32>
    %cst_214 = arith.constant 1.000000e+00 : f32
    %279 = vector.broadcast %cst_214 : f32 to vector<8x96xf32>
    %280 = arith.addf %279, %278 : vector<8x96xf32>
    %281 = tpu.reciprocal %280 {approx = true} : vector<8x96xf32> -> vector<8x96xf32>
    %282 = vector.extract_strided_slice %55 {offsets = [32, 0], sizes = [8, 96], strides = [1, 1]} : vector<64x96xf32> to vector<8x96xf32>
    %283 = arith.mulf %273, %265 : vector<8x96xf32>
    %284 = arith.addf %282, %283 : vector<8x96xf32>
    %285 = math.tanh %284 : vector<8x96xf32>
    %cst_215 = arith.constant 1.000000e+00 : f32
    %286 = vector.broadcast %cst_215 : f32 to vector<8x96xf32>
    %287 = arith.subf %286, %281 : vector<8x96xf32>
    %288 = arith.mulf %287, %285 : vector<8x96xf32>
    %289 = arith.mulf %281, %243 : vector<8x96xf32>
    %290 = arith.addf %288, %289 : vector<8x96xf32>
    %c32 = arith.constant 32 : index
    %c0_216 = arith.constant 0 : index
    %291 = vector.load %arg22[%c32, %c0_216] : memref<64x96xf32, #tpu.memory_space<vmem>>, vector<8x96xf32>
    tpu.vector_store %arg22[%c32, %c0_216], %290 {strides = array<i32>} : memref<64x96xf32, #tpu.memory_space<vmem>>, vector<8x96xf32>,
    %c0_217 = arith.constant 0 : index
    %c0_218 = arith.constant 0 : index
    %c0_219 = arith.constant 0 : index
    %c0_220 = arith.constant 0 : index
    %292 = vector.load %arg10[%c0_217, %c0_218, %c0_219, %c0_220] : memref<2x3x96x96xf32, #tpu.memory_space<vmem>>, vector<1x1x96x96xf32>
    %293 = vector.shape_cast %292 : vector<1x1x96x96xf32> to vector<96x96xf32>
    %cst_221 = arith.constant dense<0.000000e+00> : vector<8x96xf32>
    %294 = tpu.matmul %290, %293, %cst_221 {dimension_numbers = #tpu.dot_dimension_numbers<[1], [0], [0], [1], [0, 0, 1, 1], [], []>} : vector<8x96xf32>, vector<96x96xf32>, vector<8x96xf32> -> vector<8x96xf32>
    %c0_222 = arith.constant 0 : index
    %c0_223 = arith.constant 0 : index
    %c0_224 = arith.constant 0 : index
    %c0_225 = arith.constant 0 : index
    %295 = vector.load %arg12[%c0_222, %c0_223, %c0_224, %c0_225] : memref<2x3x1x96xf32, #tpu.memory_space<vmem>>, vector<1x1x1x96xf32>
    %296 = vector.shape_cast %295 : vector<1x1x1x96xf32> to vector<1x96xf32>
    %297 = vector.broadcast %296 : vector<1x96xf32> to vector<8x96xf32>
    %298 = arith.addf %294, %297 : vector<8x96xf32>
    %c0_226 = arith.constant 0 : index
    %c1_227 = arith.constant 1 : index
    %c0_228 = arith.constant 0 : index
    %c0_229 = arith.constant 0 : index
    %299 = vector.load %arg10[%c0_226, %c1_227, %c0_228, %c0_229] : memref<2x3x96x96xf32, #tpu.memory_space<vmem>>, vector<1x1x96x96xf32>
    %300 = vector.shape_cast %299 : vector<1x1x96x96xf32> to vector<96x96xf32>
    %cst_230 = arith.constant dense<0.000000e+00> : vector<8x96xf32>
    %301 = tpu.matmul %290, %300, %cst_230 {dimension_numbers = #tpu.dot_dimension_numbers<[1], [0], [0], [1], [0, 0, 1, 1], [], []>} : vector<8x96xf32>, vector<96x96xf32>, vector<8x96xf32> -> vector<8x96xf32>
    %c0_231 = arith.constant 0 : index
    %c1_232 = arith.constant 1 : index
    %c0_233 = arith.constant 0 : index
    %c0_234 = arith.constant 0 : index
    %302 = vector.load %arg12[%c0_231, %c1_232, %c0_233, %c0_234] : memref<2x3x1x96xf32, #tpu.memory_space<vmem>>, vector<1x1x1x96xf32>
    %303 = vector.shape_cast %302 : vector<1x1x1x96xf32> to vector<1x96xf32>
    %304 = vector.broadcast %303 : vector<1x96xf32> to vector<8x96xf32>
    %305 = arith.addf %301, %304 : vector<8x96xf32>
    %c0_235 = arith.constant 0 : index
    %c2_236 = arith.constant 2 : index
    %c0_237 = arith.constant 0 : index
    %c0_238 = arith.constant 0 : index
    %306 = vector.load %arg10[%c0_235, %c2_236, %c0_237, %c0_238] : memref<2x3x96x96xf32, #tpu.memory_space<vmem>>, vector<1x1x96x96xf32>
    %307 = vector.shape_cast %306 : vector<1x1x96x96xf32> to vector<96x96xf32>
    %cst_239 = arith.constant dense<0.000000e+00> : vector<8x96xf32>
    %308 = tpu.matmul %290, %307, %cst_239 {dimension_numbers = #tpu.dot_dimension_numbers<[1], [0], [0], [1], [0, 0, 1, 1], [], []>} : vector<8x96xf32>, vector<96x96xf32>, vector<8x96xf32> -> vector<8x96xf32>
    %c0_240 = arith.constant 0 : index
    %c2_241 = arith.constant 2 : index
    %c0_242 = arith.constant 0 : index
    %c0_243 = arith.constant 0 : index
    %309 = vector.load %arg12[%c0_240, %c2_241, %c0_242, %c0_243] : memref<2x3x1x96xf32, #tpu.memory_space<vmem>>, vector<1x1x1x96xf32>
    %310 = vector.shape_cast %309 : vector<1x1x1x96xf32> to vector<1x96xf32>
    %311 = vector.broadcast %310 : vector<1x96xf32> to vector<8x96xf32>
    %312 = arith.addf %308, %311 : vector<8x96xf32>
    %313 = vector.extract_strided_slice %23 {offsets = [40, 0], sizes = [8, 96], strides = [1, 1]} : vector<64x96xf32> to vector<8x96xf32>
    %314 = arith.addf %313, %298 : vector<8x96xf32>
    %cst_244 = arith.constant 0.000000e+00 : f32
    %315 = vector.broadcast %cst_244 : f32 to vector<8x96xf32>
    %316 = arith.subf %315, %314 : vector<8x96xf32>
    %317 = math.exp %316 : vector<8x96xf32>
    %cst_245 = arith.constant 1.000000e+00 : f32
    %318 = vector.broadcast %cst_245 : f32 to vector<8x96xf32>
    %319 = arith.addf %318, %317 : vector<8x96xf32>
    %320 = tpu.reciprocal %319 {approx = true} : vector<8x96xf32> -> vector<8x96xf32>
    %321 = vector.extract_strided_slice %39 {offsets = [40, 0], sizes = [8, 96], strides = [1, 1]} : vector<64x96xf32> to vector<8x96xf32>
    %322 = arith.addf %321, %305 : vector<8x96xf32>
    %cst_246 = arith.constant 0.000000e+00 : f32
    %323 = vector.broadcast %cst_246 : f32 to vector<8x96xf32>
    %324 = arith.subf %323, %322 : vector<8x96xf32>
    %325 = math.exp %324 : vector<8x96xf32>
    %cst_247 = arith.constant 1.000000e+00 : f32
    %326 = vector.broadcast %cst_247 : f32 to vector<8x96xf32>
    %327 = arith.addf %326, %325 : vector<8x96xf32>
    %328 = tpu.reciprocal %327 {approx = true} : vector<8x96xf32> -> vector<8x96xf32>
    %329 = vector.extract_strided_slice %55 {offsets = [40, 0], sizes = [8, 96], strides = [1, 1]} : vector<64x96xf32> to vector<8x96xf32>
    %330 = arith.mulf %320, %312 : vector<8x96xf32>
    %331 = arith.addf %329, %330 : vector<8x96xf32>
    %332 = math.tanh %331 : vector<8x96xf32>
    %cst_248 = arith.constant 1.000000e+00 : f32
    %333 = vector.broadcast %cst_248 : f32 to vector<8x96xf32>
    %334 = arith.subf %333, %328 : vector<8x96xf32>
    %335 = arith.mulf %334, %332 : vector<8x96xf32>
    %336 = arith.mulf %328, %290 : vector<8x96xf32>
    %337 = arith.addf %335, %336 : vector<8x96xf32>
    %c40 = arith.constant 40 : index
    %c0_249 = arith.constant 0 : index
    %338 = vector.load %arg22[%c40, %c0_249] : memref<64x96xf32, #tpu.memory_space<vmem>>, vector<8x96xf32>
    tpu.vector_store %arg22[%c40, %c0_249], %337 {strides = array<i32>} : memref<64x96xf32, #tpu.memory_space<vmem>>, vector<8x96xf32>,
    %c0_250 = arith.constant 0 : index
    %c0_251 = arith.constant 0 : index
    %c0_252 = arith.constant 0 : index
    %c0_253 = arith.constant 0 : index
    %339 = vector.load %arg10[%c0_250, %c0_251, %c0_252, %c0_253] : memref<2x3x96x96xf32, #tpu.memory_space<vmem>>, vector<1x1x96x96xf32>
    %340 = vector.shape_cast %339 : vector<1x1x96x96xf32> to vector<96x96xf32>
    %cst_254 = arith.constant dense<0.000000e+00> : vector<8x96xf32>
    %341 = tpu.matmul %337, %340, %cst_254 {dimension_numbers = #tpu.dot_dimension_numbers<[1], [0], [0], [1], [0, 0, 1, 1], [], []>} : vector<8x96xf32>, vector<96x96xf32>, vector<8x96xf32> -> vector<8x96xf32>
    %c0_255 = arith.constant 0 : index
    %c0_256 = arith.constant 0 : index
    %c0_257 = arith.constant 0 : index
    %c0_258 = arith.constant 0 : index
    %342 = vector.load %arg12[%c0_255, %c0_256, %c0_257, %c0_258] : memref<2x3x1x96xf32, #tpu.memory_space<vmem>>, vector<1x1x1x96xf32>
    %343 = vector.shape_cast %342 : vector<1x1x1x96xf32> to vector<1x96xf32>
    %344 = vector.broadcast %343 : vector<1x96xf32> to vector<8x96xf32>
    %345 = arith.addf %341, %344 : vector<8x96xf32>
    %c0_259 = arith.constant 0 : index
    %c1_260 = arith.constant 1 : index
    %c0_261 = arith.constant 0 : index
    %c0_262 = arith.constant 0 : index
    %346 = vector.load %arg10[%c0_259, %c1_260, %c0_261, %c0_262] : memref<2x3x96x96xf32, #tpu.memory_space<vmem>>, vector<1x1x96x96xf32>
    %347 = vector.shape_cast %346 : vector<1x1x96x96xf32> to vector<96x96xf32>
    %cst_263 = arith.constant dense<0.000000e+00> : vector<8x96xf32>
    %348 = tpu.matmul %337, %347, %cst_263 {dimension_numbers = #tpu.dot_dimension_numbers<[1], [0], [0], [1], [0, 0, 1, 1], [], []>} : vector<8x96xf32>, vector<96x96xf32>, vector<8x96xf32> -> vector<8x96xf32>
    %c0_264 = arith.constant 0 : index
    %c1_265 = arith.constant 1 : index
    %c0_266 = arith.constant 0 : index
    %c0_267 = arith.constant 0 : index
    %349 = vector.load %arg12[%c0_264, %c1_265, %c0_266, %c0_267] : memref<2x3x1x96xf32, #tpu.memory_space<vmem>>, vector<1x1x1x96xf32>
    %350 = vector.shape_cast %349 : vector<1x1x1x96xf32> to vector<1x96xf32>
    %351 = vector.broadcast %350 : vector<1x96xf32> to vector<8x96xf32>
    %352 = arith.addf %348, %351 : vector<8x96xf32>
    %c0_268 = arith.constant 0 : index
    %c2_269 = arith.constant 2 : index
    %c0_270 = arith.constant 0 : index
    %c0_271 = arith.constant 0 : index
    %353 = vector.load %arg10[%c0_268, %c2_269, %c0_270, %c0_271] : memref<2x3x96x96xf32, #tpu.memory_space<vmem>>, vector<1x1x96x96xf32>
    %354 = vector.shape_cast %353 : vector<1x1x96x96xf32> to vector<96x96xf32>
    %cst_272 = arith.constant dense<0.000000e+00> : vector<8x96xf32>
    %355 = tpu.matmul %337, %354, %cst_272 {dimension_numbers = #tpu.dot_dimension_numbers<[1], [0], [0], [1], [0, 0, 1, 1], [], []>} : vector<8x96xf32>, vector<96x96xf32>, vector<8x96xf32> -> vector<8x96xf32>
    %c0_273 = arith.constant 0 : index
    %c2_274 = arith.constant 2 : index
    %c0_275 = arith.constant 0 : index
    %c0_276 = arith.constant 0 : index
    %356 = vector.load %arg12[%c0_273, %c2_274, %c0_275, %c0_276] : memref<2x3x1x96xf32, #tpu.memory_space<vmem>>, vector<1x1x1x96xf32>
    %357 = vector.shape_cast %356 : vector<1x1x1x96xf32> to vector<1x96xf32>
    %358 = vector.broadcast %357 : vector<1x96xf32> to vector<8x96xf32>
    %359 = arith.addf %355, %358 : vector<8x96xf32>
    %360 = vector.extract_strided_slice %23 {offsets = [48, 0], sizes = [8, 96], strides = [1, 1]} : vector<64x96xf32> to vector<8x96xf32>
    %361 = arith.addf %360, %345 : vector<8x96xf32>
    %cst_277 = arith.constant 0.000000e+00 : f32
    %362 = vector.broadcast %cst_277 : f32 to vector<8x96xf32>
    %363 = arith.subf %362, %361 : vector<8x96xf32>
    %364 = math.exp %363 : vector<8x96xf32>
    %cst_278 = arith.constant 1.000000e+00 : f32
    %365 = vector.broadcast %cst_278 : f32 to vector<8x96xf32>
    %366 = arith.addf %365, %364 : vector<8x96xf32>
    %367 = tpu.reciprocal %366 {approx = true} : vector<8x96xf32> -> vector<8x96xf32>
    %368 = vector.extract_strided_slice %39 {offsets = [48, 0], sizes = [8, 96], strides = [1, 1]} : vector<64x96xf32> to vector<8x96xf32>
    %369 = arith.addf %368, %352 : vector<8x96xf32>
    %cst_279 = arith.constant 0.000000e+00 : f32
    %370 = vector.broadcast %cst_279 : f32 to vector<8x96xf32>
    %371 = arith.subf %370, %369 : vector<8x96xf32>
    %372 = math.exp %371 : vector<8x96xf32>
    %cst_280 = arith.constant 1.000000e+00 : f32
    %373 = vector.broadcast %cst_280 : f32 to vector<8x96xf32>
    %374 = arith.addf %373, %372 : vector<8x96xf32>
    %375 = tpu.reciprocal %374 {approx = true} : vector<8x96xf32> -> vector<8x96xf32>
    %376 = vector.extract_strided_slice %55 {offsets = [48, 0], sizes = [8, 96], strides = [1, 1]} : vector<64x96xf32> to vector<8x96xf32>
    %377 = arith.mulf %367, %359 : vector<8x96xf32>
    %378 = arith.addf %376, %377 : vector<8x96xf32>
    %379 = math.tanh %378 : vector<8x96xf32>
    %cst_281 = arith.constant 1.000000e+00 : f32
    %380 = vector.broadcast %cst_281 : f32 to vector<8x96xf32>
    %381 = arith.subf %380, %375 : vector<8x96xf32>
    %382 = arith.mulf %381, %379 : vector<8x96xf32>
    %383 = arith.mulf %375, %337 : vector<8x96xf32>
    %384 = arith.addf %382, %383 : vector<8x96xf32>
    %c48 = arith.constant 48 : index
    %c0_282 = arith.constant 0 : index
    %385 = vector.load %arg22[%c48, %c0_282] : memref<64x96xf32, #tpu.memory_space<vmem>>, vector<8x96xf32>
    tpu.vector_store %arg22[%c48, %c0_282], %384 {strides = array<i32>} : memref<64x96xf32, #tpu.memory_space<vmem>>, vector<8x96xf32>,
    %c0_283 = arith.constant 0 : index
    %c0_284 = arith.constant 0 : index
    %c0_285 = arith.constant 0 : index
    %c0_286 = arith.constant 0 : index
    %386 = vector.load %arg10[%c0_283, %c0_284, %c0_285, %c0_286] : memref<2x3x96x96xf32, #tpu.memory_space<vmem>>, vector<1x1x96x96xf32>
    %387 = vector.shape_cast %386 : vector<1x1x96x96xf32> to vector<96x96xf32>
    %cst_287 = arith.constant dense<0.000000e+00> : vector<8x96xf32>
    %388 = tpu.matmul %384, %387, %cst_287 {dimension_numbers = #tpu.dot_dimension_numbers<[1], [0], [0], [1], [0, 0, 1, 1], [], []>} : vector<8x96xf32>, vector<96x96xf32>, vector<8x96xf32> -> vector<8x96xf32>
    %c0_288 = arith.constant 0 : index
    %c0_289 = arith.constant 0 : index
    %c0_290 = arith.constant 0 : index
    %c0_291 = arith.constant 0 : index
    %389 = vector.load %arg12[%c0_288, %c0_289, %c0_290, %c0_291] : memref<2x3x1x96xf32, #tpu.memory_space<vmem>>, vector<1x1x1x96xf32>
    %390 = vector.shape_cast %389 : vector<1x1x1x96xf32> to vector<1x96xf32>
    %391 = vector.broadcast %390 : vector<1x96xf32> to vector<8x96xf32>
    %392 = arith.addf %388, %391 : vector<8x96xf32>
    %c0_292 = arith.constant 0 : index
    %c1_293 = arith.constant 1 : index
    %c0_294 = arith.constant 0 : index
    %c0_295 = arith.constant 0 : index
    %393 = vector.load %arg10[%c0_292, %c1_293, %c0_294, %c0_295] : memref<2x3x96x96xf32, #tpu.memory_space<vmem>>, vector<1x1x96x96xf32>
    %394 = vector.shape_cast %393 : vector<1x1x96x96xf32> to vector<96x96xf32>
    %cst_296 = arith.constant dense<0.000000e+00> : vector<8x96xf32>
    %395 = tpu.matmul %384, %394, %cst_296 {dimension_numbers = #tpu.dot_dimension_numbers<[1], [0], [0], [1], [0, 0, 1, 1], [], []>} : vector<8x96xf32>, vector<96x96xf32>, vector<8x96xf32> -> vector<8x96xf32>
    %c0_297 = arith.constant 0 : index
    %c1_298 = arith.constant 1 : index
    %c0_299 = arith.constant 0 : index
    %c0_300 = arith.constant 0 : index
    %396 = vector.load %arg12[%c0_297, %c1_298, %c0_299, %c0_300] : memref<2x3x1x96xf32, #tpu.memory_space<vmem>>, vector<1x1x1x96xf32>
    %397 = vector.shape_cast %396 : vector<1x1x1x96xf32> to vector<1x96xf32>
    %398 = vector.broadcast %397 : vector<1x96xf32> to vector<8x96xf32>
    %399 = arith.addf %395, %398 : vector<8x96xf32>
    %c0_301 = arith.constant 0 : index
    %c2_302 = arith.constant 2 : index
    %c0_303 = arith.constant 0 : index
    %c0_304 = arith.constant 0 : index
    %400 = vector.load %arg10[%c0_301, %c2_302, %c0_303, %c0_304] : memref<2x3x96x96xf32, #tpu.memory_space<vmem>>, vector<1x1x96x96xf32>
    %401 = vector.shape_cast %400 : vector<1x1x96x96xf32> to vector<96x96xf32>
    %cst_305 = arith.constant dense<0.000000e+00> : vector<8x96xf32>
    %402 = tpu.matmul %384, %401, %cst_305 {dimension_numbers = #tpu.dot_dimension_numbers<[1], [0], [0], [1], [0, 0, 1, 1], [], []>} : vector<8x96xf32>, vector<96x96xf32>, vector<8x96xf32> -> vector<8x96xf32>
    %c0_306 = arith.constant 0 : index
    %c2_307 = arith.constant 2 : index
    %c0_308 = arith.constant 0 : index
    %c0_309 = arith.constant 0 : index
    %403 = vector.load %arg12[%c0_306, %c2_307, %c0_308, %c0_309] : memref<2x3x1x96xf32, #tpu.memory_space<vmem>>, vector<1x1x1x96xf32>
    %404 = vector.shape_cast %403 : vector<1x1x1x96xf32> to vector<1x96xf32>
    %405 = vector.broadcast %404 : vector<1x96xf32> to vector<8x96xf32>
    %406 = arith.addf %402, %405 : vector<8x96xf32>
    %407 = vector.extract_strided_slice %23 {offsets = [56, 0], sizes = [8, 96], strides = [1, 1]} : vector<64x96xf32> to vector<8x96xf32>
    %408 = arith.addf %407, %392 : vector<8x96xf32>
    %cst_310 = arith.constant 0.000000e+00 : f32
    %409 = vector.broadcast %cst_310 : f32 to vector<8x96xf32>
    %410 = arith.subf %409, %408 : vector<8x96xf32>
    %411 = math.exp %410 : vector<8x96xf32>
    %cst_311 = arith.constant 1.000000e+00 : f32
    %412 = vector.broadcast %cst_311 : f32 to vector<8x96xf32>
    %413 = arith.addf %412, %411 : vector<8x96xf32>
    %414 = tpu.reciprocal %413 {approx = true} : vector<8x96xf32> -> vector<8x96xf32>
    %415 = vector.extract_strided_slice %39 {offsets = [56, 0], sizes = [8, 96], strides = [1, 1]} : vector<64x96xf32> to vector<8x96xf32>
    %416 = arith.addf %415, %399 : vector<8x96xf32>
    %cst_312 = arith.constant 0.000000e+00 : f32
    %417 = vector.broadcast %cst_312 : f32 to vector<8x96xf32>
    %418 = arith.subf %417, %416 : vector<8x96xf32>
    %419 = math.exp %418 : vector<8x96xf32>
    %cst_313 = arith.constant 1.000000e+00 : f32
    %420 = vector.broadcast %cst_313 : f32 to vector<8x96xf32>
    %421 = arith.addf %420, %419 : vector<8x96xf32>
    %422 = tpu.reciprocal %421 {approx = true} : vector<8x96xf32> -> vector<8x96xf32>
    %423 = vector.extract_strided_slice %55 {offsets = [56, 0], sizes = [8, 96], strides = [1, 1]} : vector<64x96xf32> to vector<8x96xf32>
    %424 = arith.mulf %414, %406 : vector<8x96xf32>
    %425 = arith.addf %423, %424 : vector<8x96xf32>
    %426 = math.tanh %425 : vector<8x96xf32>
    %cst_314 = arith.constant 1.000000e+00 : f32
    %427 = vector.broadcast %cst_314 : f32 to vector<8x96xf32>
    %428 = arith.subf %427, %422 : vector<8x96xf32>
    %429 = arith.mulf %428, %426 : vector<8x96xf32>
    %430 = arith.mulf %422, %384 : vector<8x96xf32>
    %431 = arith.addf %429, %430 : vector<8x96xf32>
    %c56 = arith.constant 56 : index
    %c0_315 = arith.constant 0 : index
    %432 = vector.load %arg22[%c56, %c0_315] : memref<64x96xf32, #tpu.memory_space<vmem>>, vector<8x96xf32>
    tpu.vector_store %arg22[%c56, %c0_315], %431 {strides = array<i32>} : memref<64x96xf32, #tpu.memory_space<vmem>>, vector<8x96xf32>,
    %c0_316 = arith.constant 0 : index
    %c0_317 = arith.constant 0 : index
    %433 = vector.load %arg22[%c0_316, %c0_317] : memref<64x96xf32, #tpu.memory_space<vmem>>, vector<64x96xf32>
    %c0_318 = arith.constant 0 : index
    %c0_319 = arith.constant 0 : index
    %c0_320 = arith.constant 0 : index
    %c0_321 = arith.constant 0 : index
    %434 = vector.load %arg9[%c0_318, %c0_319, %c0_320, %c0_321] : memref<1x3x96x96xf32, #tpu.memory_space<vmem>>, vector<1x1x96x96xf32>
    %435 = vector.shape_cast %434 : vector<1x1x96x96xf32> to vector<96x96xf32>
    %cst_322 = arith.constant dense<0.000000e+00> : vector<64x96xf32>
    %436 = tpu.matmul %433, %435, %cst_322 {dimension_numbers = #tpu.dot_dimension_numbers<[1], [0], [0], [1], [0, 0, 1, 1], [], []>} : vector<64x96xf32>, vector<96x96xf32>, vector<64x96xf32> -> vector<64x96xf32>
    %c1_323 = arith.constant 1 : index
    %c0_324 = arith.constant 0 : index
    %c0_325 = arith.constant 0 : index
    %c0_326 = arith.constant 0 : index
    %437 = vector.load %arg11[%c1_323, %c0_324, %c0_325, %c0_326] : memref<2x3x1x96xf32, #tpu.memory_space<vmem>>, vector<1x1x1x96xf32>
    %438 = vector.shape_cast %437 : vector<1x1x1x96xf32> to vector<1x96xf32>
    %439 = vector.broadcast %438 : vector<1x96xf32> to vector<64x96xf32>
    %440 = arith.addf %436, %439 : vector<64x96xf32>
    %c0_327 = arith.constant 0 : index
    %c1_328 = arith.constant 1 : index
    %c0_329 = arith.constant 0 : index
    %c0_330 = arith.constant 0 : index
    %441 = vector.load %arg9[%c0_327, %c1_328, %c0_329, %c0_330] : memref<1x3x96x96xf32, #tpu.memory_space<vmem>>, vector<1x1x96x96xf32>
    %442 = vector.shape_cast %441 : vector<1x1x96x96xf32> to vector<96x96xf32>
    %cst_331 = arith.constant dense<0.000000e+00> : vector<64x96xf32>
    %443 = tpu.matmul %433, %442, %cst_331 {dimension_numbers = #tpu.dot_dimension_numbers<[1], [0], [0], [1], [0, 0, 1, 1], [], []>} : vector<64x96xf32>, vector<96x96xf32>, vector<64x96xf32> -> vector<64x96xf32>
    %c1_332 = arith.constant 1 : index
    %c1_333 = arith.constant 1 : index
    %c0_334 = arith.constant 0 : index
    %c0_335 = arith.constant 0 : index
    %444 = vector.load %arg11[%c1_332, %c1_333, %c0_334, %c0_335] : memref<2x3x1x96xf32, #tpu.memory_space<vmem>>, vector<1x1x1x96xf32>
    %445 = vector.shape_cast %444 : vector<1x1x1x96xf32> to vector<1x96xf32>
    %446 = vector.broadcast %445 : vector<1x96xf32> to vector<64x96xf32>
    %447 = arith.addf %443, %446 : vector<64x96xf32>
    %c0_336 = arith.constant 0 : index
    %c2_337 = arith.constant 2 : index
    %c0_338 = arith.constant 0 : index
    %c0_339 = arith.constant 0 : index
    %448 = vector.load %arg9[%c0_336, %c2_337, %c0_338, %c0_339] : memref<1x3x96x96xf32, #tpu.memory_space<vmem>>, vector<1x1x96x96xf32>
    %449 = vector.shape_cast %448 : vector<1x1x96x96xf32> to vector<96x96xf32>
    %cst_340 = arith.constant dense<0.000000e+00> : vector<64x96xf32>
    %450 = tpu.matmul %433, %449, %cst_340 {dimension_numbers = #tpu.dot_dimension_numbers<[1], [0], [0], [1], [0, 0, 1, 1], [], []>} : vector<64x96xf32>, vector<96x96xf32>, vector<64x96xf32> -> vector<64x96xf32>
    %c1_341 = arith.constant 1 : index
    %c2_342 = arith.constant 2 : index
    %c0_343 = arith.constant 0 : index
    %c0_344 = arith.constant 0 : index
    %451 = vector.load %arg11[%c1_341, %c2_342, %c0_343, %c0_344] : memref<2x3x1x96xf32, #tpu.memory_space<vmem>>, vector<1x1x1x96xf32>
    %452 = vector.shape_cast %451 : vector<1x1x1x96xf32> to vector<1x96xf32>
    %453 = vector.broadcast %452 : vector<1x96xf32> to vector<64x96xf32>
    %454 = arith.addf %450, %453 : vector<64x96xf32>
    %cst_345 = arith.constant 0.000000e+00 : f32
    %455 = vector.broadcast %cst_345 : f32 to vector<8x96xf32>
    %c1_346 = arith.constant 1 : index
    %c0_347 = arith.constant 0 : index
    %c0_348 = arith.constant 0 : index
    %c0_349 = arith.constant 0 : index
    %456 = vector.load %arg10[%c1_346, %c0_347, %c0_348, %c0_349] : memref<2x3x96x96xf32, #tpu.memory_space<vmem>>, vector<1x1x96x96xf32>
    %457 = vector.shape_cast %456 : vector<1x1x96x96xf32> to vector<96x96xf32>
    %cst_350 = arith.constant dense<0.000000e+00> : vector<8x96xf32>
    %458 = tpu.matmul %455, %457, %cst_350 {dimension_numbers = #tpu.dot_dimension_numbers<[1], [0], [0], [1], [0, 0, 1, 1], [], []>} : vector<8x96xf32>, vector<96x96xf32>, vector<8x96xf32> -> vector<8x96xf32>
    %c1_351 = arith.constant 1 : index
    %c0_352 = arith.constant 0 : index
    %c0_353 = arith.constant 0 : index
    %c0_354 = arith.constant 0 : index
    %459 = vector.load %arg12[%c1_351, %c0_352, %c0_353, %c0_354] : memref<2x3x1x96xf32, #tpu.memory_space<vmem>>, vector<1x1x1x96xf32>
    %460 = vector.shape_cast %459 : vector<1x1x1x96xf32> to vector<1x96xf32>
    %461 = vector.broadcast %460 : vector<1x96xf32> to vector<8x96xf32>
    %462 = arith.addf %458, %461 : vector<8x96xf32>
    %c1_355 = arith.constant 1 : index
    %c1_356 = arith.constant 1 : index
    %c0_357 = arith.constant 0 : index
    %c0_358 = arith.constant 0 : index
    %463 = vector.load %arg10[%c1_355, %c1_356, %c0_357, %c0_358] : memref<2x3x96x96xf32, #tpu.memory_space<vmem>>, vector<1x1x96x96xf32>
    %464 = vector.shape_cast %463 : vector<1x1x96x96xf32> to vector<96x96xf32>
    %cst_359 = arith.constant dense<0.000000e+00> : vector<8x96xf32>
    %465 = tpu.matmul %455, %464, %cst_359 {dimension_numbers = #tpu.dot_dimension_numbers<[1], [0], [0], [1], [0, 0, 1, 1], [], []>} : vector<8x96xf32>, vector<96x96xf32>, vector<8x96xf32> -> vector<8x96xf32>
    %c1_360 = arith.constant 1 : index
    %c1_361 = arith.constant 1 : index
    %c0_362 = arith.constant 0 : index
    %c0_363 = arith.constant 0 : index
    %466 = vector.load %arg12[%c1_360, %c1_361, %c0_362, %c0_363] : memref<2x3x1x96xf32, #tpu.memory_space<vmem>>, vector<1x1x1x96xf32>
    %467 = vector.shape_cast %466 : vector<1x1x1x96xf32> to vector<1x96xf32>
    %468 = vector.broadcast %467 : vector<1x96xf32> to vector<8x96xf32>
    %469 = arith.addf %465, %468 : vector<8x96xf32>
    %c1_364 = arith.constant 1 : index
    %c2_365 = arith.constant 2 : index
    %c0_366 = arith.constant 0 : index
    %c0_367 = arith.constant 0 : index
    %470 = vector.load %arg10[%c1_364, %c2_365, %c0_366, %c0_367] : memref<2x3x96x96xf32, #tpu.memory_space<vmem>>, vector<1x1x96x96xf32>
    %471 = vector.shape_cast %470 : vector<1x1x96x96xf32> to vector<96x96xf32>
    %cst_368 = arith.constant dense<0.000000e+00> : vector<8x96xf32>
    %472 = tpu.matmul %455, %471, %cst_368 {dimension_numbers = #tpu.dot_dimension_numbers<[1], [0], [0], [1], [0, 0, 1, 1], [], []>} : vector<8x96xf32>, vector<96x96xf32>, vector<8x96xf32> -> vector<8x96xf32>
    %c1_369 = arith.constant 1 : index
    %c2_370 = arith.constant 2 : index
    %c0_371 = arith.constant 0 : index
    %c0_372 = arith.constant 0 : index
    %473 = vector.load %arg12[%c1_369, %c2_370, %c0_371, %c0_372] : memref<2x3x1x96xf32, #tpu.memory_space<vmem>>, vector<1x1x1x96xf32>
    %474 = vector.shape_cast %473 : vector<1x1x1x96xf32> to vector<1x96xf32>
    %475 = vector.broadcast %474 : vector<1x96xf32> to vector<8x96xf32>
    %476 = arith.addf %472, %475 : vector<8x96xf32>
    %477 = vector.extract_strided_slice %440 {offsets = [0, 0], sizes = [8, 96], strides = [1, 1]} : vector<64x96xf32> to vector<8x96xf32>
    %478 = arith.addf %477, %462 : vector<8x96xf32>
    %cst_373 = arith.constant 0.000000e+00 : f32
    %479 = vector.broadcast %cst_373 : f32 to vector<8x96xf32>
    %480 = arith.subf %479, %478 : vector<8x96xf32>
    %481 = math.exp %480 : vector<8x96xf32>
    %cst_374 = arith.constant 1.000000e+00 : f32
    %482 = vector.broadcast %cst_374 : f32 to vector<8x96xf32>
    %483 = arith.addf %482, %481 : vector<8x96xf32>
    %484 = tpu.reciprocal %483 {approx = true} : vector<8x96xf32> -> vector<8x96xf32>
    %485 = vector.extract_strided_slice %447 {offsets = [0, 0], sizes = [8, 96], strides = [1, 1]} : vector<64x96xf32> to vector<8x96xf32>
    %486 = arith.addf %485, %469 : vector<8x96xf32>
    %cst_375 = arith.constant 0.000000e+00 : f32
    %487 = vector.broadcast %cst_375 : f32 to vector<8x96xf32>
    %488 = arith.subf %487, %486 : vector<8x96xf32>
    %489 = math.exp %488 : vector<8x96xf32>
    %cst_376 = arith.constant 1.000000e+00 : f32
    %490 = vector.broadcast %cst_376 : f32 to vector<8x96xf32>
    %491 = arith.addf %490, %489 : vector<8x96xf32>
    %492 = tpu.reciprocal %491 {approx = true} : vector<8x96xf32> -> vector<8x96xf32>
    %493 = vector.extract_strided_slice %454 {offsets = [0, 0], sizes = [8, 96], strides = [1, 1]} : vector<64x96xf32> to vector<8x96xf32>
    %494 = arith.mulf %484, %476 : vector<8x96xf32>
    %495 = arith.addf %493, %494 : vector<8x96xf32>
    %496 = math.tanh %495 : vector<8x96xf32>
    %cst_377 = arith.constant 1.000000e+00 : f32
    %497 = vector.broadcast %cst_377 : f32 to vector<8x96xf32>
    %498 = arith.subf %497, %492 : vector<8x96xf32>
    %499 = arith.mulf %498, %496 : vector<8x96xf32>
    %500 = arith.mulf %492, %455 : vector<8x96xf32>
    %501 = arith.addf %499, %500 : vector<8x96xf32>
    %c0_378 = arith.constant 0 : index
    %c0_379 = arith.constant 0 : index
    %502 = vector.load %arg22[%c0_378, %c0_379] : memref<64x96xf32, #tpu.memory_space<vmem>>, vector<8x96xf32>
    tpu.vector_store %arg22[%c0_378, %c0_379], %501 {strides = array<i32>} : memref<64x96xf32, #tpu.memory_space<vmem>>, vector<8x96xf32>,
    %c1_380 = arith.constant 1 : index
    %c0_381 = arith.constant 0 : index
    %c0_382 = arith.constant 0 : index
    %c0_383 = arith.constant 0 : index
    %503 = vector.load %arg10[%c1_380, %c0_381, %c0_382, %c0_383] : memref<2x3x96x96xf32, #tpu.memory_space<vmem>>, vector<1x1x96x96xf32>
    %504 = vector.shape_cast %503 : vector<1x1x96x96xf32> to vector<96x96xf32>
    %cst_384 = arith.constant dense<0.000000e+00> : vector<8x96xf32>
    %505 = tpu.matmul %501, %504, %cst_384 {dimension_numbers = #tpu.dot_dimension_numbers<[1], [0], [0], [1], [0, 0, 1, 1], [], []>} : vector<8x96xf32>, vector<96x96xf32>, vector<8x96xf32> -> vector<8x96xf32>
    %c1_385 = arith.constant 1 : index
    %c0_386 = arith.constant 0 : index
    %c0_387 = arith.constant 0 : index
    %c0_388 = arith.constant 0 : index
    %506 = vector.load %arg12[%c1_385, %c0_386, %c0_387, %c0_388] : memref<2x3x1x96xf32, #tpu.memory_space<vmem>>, vector<1x1x1x96xf32>
    %507 = vector.shape_cast %506 : vector<1x1x1x96xf32> to vector<1x96xf32>
    %508 = vector.broadcast %507 : vector<1x96xf32> to vector<8x96xf32>
    %509 = arith.addf %505, %508 : vector<8x96xf32>
    %c1_389 = arith.constant 1 : index
    %c1_390 = arith.constant 1 : index
    %c0_391 = arith.constant 0 : index
    %c0_392 = arith.constant 0 : index
    %510 = vector.load %arg10[%c1_389, %c1_390, %c0_391, %c0_392] : memref<2x3x96x96xf32, #tpu.memory_space<vmem>>, vector<1x1x96x96xf32>
    %511 = vector.shape_cast %510 : vector<1x1x96x96xf32> to vector<96x96xf32>
    %cst_393 = arith.constant dense<0.000000e+00> : vector<8x96xf32>
    %512 = tpu.matmul %501, %511, %cst_393 {dimension_numbers = #tpu.dot_dimension_numbers<[1], [0], [0], [1], [0, 0, 1, 1], [], []>} : vector<8x96xf32>, vector<96x96xf32>, vector<8x96xf32> -> vector<8x96xf32>
    %c1_394 = arith.constant 1 : index
    %c1_395 = arith.constant 1 : index
    %c0_396 = arith.constant 0 : index
    %c0_397 = arith.constant 0 : index
    %513 = vector.load %arg12[%c1_394, %c1_395, %c0_396, %c0_397] : memref<2x3x1x96xf32, #tpu.memory_space<vmem>>, vector<1x1x1x96xf32>
    %514 = vector.shape_cast %513 : vector<1x1x1x96xf32> to vector<1x96xf32>
    %515 = vector.broadcast %514 : vector<1x96xf32> to vector<8x96xf32>
    %516 = arith.addf %512, %515 : vector<8x96xf32>
    %c1_398 = arith.constant 1 : index
    %c2_399 = arith.constant 2 : index
    %c0_400 = arith.constant 0 : index
    %c0_401 = arith.constant 0 : index
    %517 = vector.load %arg10[%c1_398, %c2_399, %c0_400, %c0_401] : memref<2x3x96x96xf32, #tpu.memory_space<vmem>>, vector<1x1x96x96xf32>
    %518 = vector.shape_cast %517 : vector<1x1x96x96xf32> to vector<96x96xf32>
    %cst_402 = arith.constant dense<0.000000e+00> : vector<8x96xf32>
    %519 = tpu.matmul %501, %518, %cst_402 {dimension_numbers = #tpu.dot_dimension_numbers<[1], [0], [0], [1], [0, 0, 1, 1], [], []>} : vector<8x96xf32>, vector<96x96xf32>, vector<8x96xf32> -> vector<8x96xf32>
    %c1_403 = arith.constant 1 : index
    %c2_404 = arith.constant 2 : index
    %c0_405 = arith.constant 0 : index
    %c0_406 = arith.constant 0 : index
    %520 = vector.load %arg12[%c1_403, %c2_404, %c0_405, %c0_406] : memref<2x3x1x96xf32, #tpu.memory_space<vmem>>, vector<1x1x1x96xf32>
    %521 = vector.shape_cast %520 : vector<1x1x1x96xf32> to vector<1x96xf32>
    %522 = vector.broadcast %521 : vector<1x96xf32> to vector<8x96xf32>
    %523 = arith.addf %519, %522 : vector<8x96xf32>
    %524 = vector.extract_strided_slice %440 {offsets = [8, 0], sizes = [8, 96], strides = [1, 1]} : vector<64x96xf32> to vector<8x96xf32>
    %525 = arith.addf %524, %509 : vector<8x96xf32>
    %cst_407 = arith.constant 0.000000e+00 : f32
    %526 = vector.broadcast %cst_407 : f32 to vector<8x96xf32>
    %527 = arith.subf %526, %525 : vector<8x96xf32>
    %528 = math.exp %527 : vector<8x96xf32>
    %cst_408 = arith.constant 1.000000e+00 : f32
    %529 = vector.broadcast %cst_408 : f32 to vector<8x96xf32>
    %530 = arith.addf %529, %528 : vector<8x96xf32>
    %531 = tpu.reciprocal %530 {approx = true} : vector<8x96xf32> -> vector<8x96xf32>
    %532 = vector.extract_strided_slice %447 {offsets = [8, 0], sizes = [8, 96], strides = [1, 1]} : vector<64x96xf32> to vector<8x96xf32>
    %533 = arith.addf %532, %516 : vector<8x96xf32>
    %cst_409 = arith.constant 0.000000e+00 : f32
    %534 = vector.broadcast %cst_409 : f32 to vector<8x96xf32>
    %535 = arith.subf %534, %533 : vector<8x96xf32>
    %536 = math.exp %535 : vector<8x96xf32>
    %cst_410 = arith.constant 1.000000e+00 : f32
    %537 = vector.broadcast %cst_410 : f32 to vector<8x96xf32>
    %538 = arith.addf %537, %536 : vector<8x96xf32>
    %539 = tpu.reciprocal %538 {approx = true} : vector<8x96xf32> -> vector<8x96xf32>
    %540 = vector.extract_strided_slice %454 {offsets = [8, 0], sizes = [8, 96], strides = [1, 1]} : vector<64x96xf32> to vector<8x96xf32>
    %541 = arith.mulf %531, %523 : vector<8x96xf32>
    %542 = arith.addf %540, %541 : vector<8x96xf32>
    %543 = math.tanh %542 : vector<8x96xf32>
    %cst_411 = arith.constant 1.000000e+00 : f32
    %544 = vector.broadcast %cst_411 : f32 to vector<8x96xf32>
    %545 = arith.subf %544, %539 : vector<8x96xf32>
    %546 = arith.mulf %545, %543 : vector<8x96xf32>
    %547 = arith.mulf %539, %501 : vector<8x96xf32>
    %548 = arith.addf %546, %547 : vector<8x96xf32>
    %c8_412 = arith.constant 8 : index
    %c0_413 = arith.constant 0 : index
    %549 = vector.load %arg22[%c8_412, %c0_413] : memref<64x96xf32, #tpu.memory_space<vmem>>, vector<8x96xf32>
    tpu.vector_store %arg22[%c8_412, %c0_413], %548 {strides = array<i32>} : memref<64x96xf32, #tpu.memory_space<vmem>>, vector<8x96xf32>,
    %c1_414 = arith.constant 1 : index
    %c0_415 = arith.constant 0 : index
    %c0_416 = arith.constant 0 : index
    %c0_417 = arith.constant 0 : index
    %550 = vector.load %arg10[%c1_414, %c0_415, %c0_416, %c0_417] : memref<2x3x96x96xf32, #tpu.memory_space<vmem>>, vector<1x1x96x96xf32>
    %551 = vector.shape_cast %550 : vector<1x1x96x96xf32> to vector<96x96xf32>
    %cst_418 = arith.constant dense<0.000000e+00> : vector<8x96xf32>
    %552 = tpu.matmul %548, %551, %cst_418 {dimension_numbers = #tpu.dot_dimension_numbers<[1], [0], [0], [1], [0, 0, 1, 1], [], []>} : vector<8x96xf32>, vector<96x96xf32>, vector<8x96xf32> -> vector<8x96xf32>
    %c1_419 = arith.constant 1 : index
    %c0_420 = arith.constant 0 : index
    %c0_421 = arith.constant 0 : index
    %c0_422 = arith.constant 0 : index
    %553 = vector.load %arg12[%c1_419, %c0_420, %c0_421, %c0_422] : memref<2x3x1x96xf32, #tpu.memory_space<vmem>>, vector<1x1x1x96xf32>
    %554 = vector.shape_cast %553 : vector<1x1x1x96xf32> to vector<1x96xf32>
    %555 = vector.broadcast %554 : vector<1x96xf32> to vector<8x96xf32>
    %556 = arith.addf %552, %555 : vector<8x96xf32>
    %c1_423 = arith.constant 1 : index
    %c1_424 = arith.constant 1 : index
    %c0_425 = arith.constant 0 : index
    %c0_426 = arith.constant 0 : index
    %557 = vector.load %arg10[%c1_423, %c1_424, %c0_425, %c0_426] : memref<2x3x96x96xf32, #tpu.memory_space<vmem>>, vector<1x1x96x96xf32>
    %558 = vector.shape_cast %557 : vector<1x1x96x96xf32> to vector<96x96xf32>
    %cst_427 = arith.constant dense<0.000000e+00> : vector<8x96xf32>
    %559 = tpu.matmul %548, %558, %cst_427 {dimension_numbers = #tpu.dot_dimension_numbers<[1], [0], [0], [1], [0, 0, 1, 1], [], []>} : vector<8x96xf32>, vector<96x96xf32>, vector<8x96xf32> -> vector<8x96xf32>
    %c1_428 = arith.constant 1 : index
    %c1_429 = arith.constant 1 : index
    %c0_430 = arith.constant 0 : index
    %c0_431 = arith.constant 0 : index
    %560 = vector.load %arg12[%c1_428, %c1_429, %c0_430, %c0_431] : memref<2x3x1x96xf32, #tpu.memory_space<vmem>>, vector<1x1x1x96xf32>
    %561 = vector.shape_cast %560 : vector<1x1x1x96xf32> to vector<1x96xf32>
    %562 = vector.broadcast %561 : vector<1x96xf32> to vector<8x96xf32>
    %563 = arith.addf %559, %562 : vector<8x96xf32>
    %c1_432 = arith.constant 1 : index
    %c2_433 = arith.constant 2 : index
    %c0_434 = arith.constant 0 : index
    %c0_435 = arith.constant 0 : index
    %564 = vector.load %arg10[%c1_432, %c2_433, %c0_434, %c0_435] : memref<2x3x96x96xf32, #tpu.memory_space<vmem>>, vector<1x1x96x96xf32>
    %565 = vector.shape_cast %564 : vector<1x1x96x96xf32> to vector<96x96xf32>
    %cst_436 = arith.constant dense<0.000000e+00> : vector<8x96xf32>
    %566 = tpu.matmul %548, %565, %cst_436 {dimension_numbers = #tpu.dot_dimension_numbers<[1], [0], [0], [1], [0, 0, 1, 1], [], []>} : vector<8x96xf32>, vector<96x96xf32>, vector<8x96xf32> -> vector<8x96xf32>
    %c1_437 = arith.constant 1 : index
    %c2_438 = arith.constant 2 : index
    %c0_439 = arith.constant 0 : index
    %c0_440 = arith.constant 0 : index
    %567 = vector.load %arg12[%c1_437, %c2_438, %c0_439, %c0_440] : memref<2x3x1x96xf32, #tpu.memory_space<vmem>>, vector<1x1x1x96xf32>
    %568 = vector.shape_cast %567 : vector<1x1x1x96xf32> to vector<1x96xf32>
    %569 = vector.broadcast %568 : vector<1x96xf32> to vector<8x96xf32>
    %570 = arith.addf %566, %569 : vector<8x96xf32>
    %571 = vector.extract_strided_slice %440 {offsets = [16, 0], sizes = [8, 96], strides = [1, 1]} : vector<64x96xf32> to vector<8x96xf32>
    %572 = arith.addf %571, %556 : vector<8x96xf32>
    %cst_441 = arith.constant 0.000000e+00 : f32
    %573 = vector.broadcast %cst_441 : f32 to vector<8x96xf32>
    %574 = arith.subf %573, %572 : vector<8x96xf32>
    %575 = math.exp %574 : vector<8x96xf32>
    %cst_442 = arith.constant 1.000000e+00 : f32
    %576 = vector.broadcast %cst_442 : f32 to vector<8x96xf32>
    %577 = arith.addf %576, %575 : vector<8x96xf32>
    %578 = tpu.reciprocal %577 {approx = true} : vector<8x96xf32> -> vector<8x96xf32>
    %579 = vector.extract_strided_slice %447 {offsets = [16, 0], sizes = [8, 96], strides = [1, 1]} : vector<64x96xf32> to vector<8x96xf32>
    %580 = arith.addf %579, %563 : vector<8x96xf32>
    %cst_443 = arith.constant 0.000000e+00 : f32
    %581 = vector.broadcast %cst_443 : f32 to vector<8x96xf32>
    %582 = arith.subf %581, %580 : vector<8x96xf32>
    %583 = math.exp %582 : vector<8x96xf32>
    %cst_444 = arith.constant 1.000000e+00 : f32
    %584 = vector.broadcast %cst_444 : f32 to vector<8x96xf32>
    %585 = arith.addf %584, %583 : vector<8x96xf32>
    %586 = tpu.reciprocal %585 {approx = true} : vector<8x96xf32> -> vector<8x96xf32>
    %587 = vector.extract_strided_slice %454 {offsets = [16, 0], sizes = [8, 96], strides = [1, 1]} : vector<64x96xf32> to vector<8x96xf32>
    %588 = arith.mulf %578, %570 : vector<8x96xf32>
    %589 = arith.addf %587, %588 : vector<8x96xf32>
    %590 = math.tanh %589 : vector<8x96xf32>
    %cst_445 = arith.constant 1.000000e+00 : f32
    %591 = vector.broadcast %cst_445 : f32 to vector<8x96xf32>
    %592 = arith.subf %591, %586 : vector<8x96xf32>
    %593 = arith.mulf %592, %590 : vector<8x96xf32>
    %594 = arith.mulf %586, %548 : vector<8x96xf32>
    %595 = arith.addf %593, %594 : vector<8x96xf32>
    %c16_446 = arith.constant 16 : index
    %c0_447 = arith.constant 0 : index
    %596 = vector.load %arg22[%c16_446, %c0_447] : memref<64x96xf32, #tpu.memory_space<vmem>>, vector<8x96xf32>
    tpu.vector_store %arg22[%c16_446, %c0_447], %595 {strides = array<i32>} : memref<64x96xf32, #tpu.memory_space<vmem>>, vector<8x96xf32>,
    %c1_448 = arith.constant 1 : index
    %c0_449 = arith.constant 0 : index
    %c0_450 = arith.constant 0 : index
    %c0_451 = arith.constant 0 : index
    %597 = vector.load %arg10[%c1_448, %c0_449, %c0_450, %c0_451] : memref<2x3x96x96xf32, #tpu.memory_space<vmem>>, vector<1x1x96x96xf32>
    %598 = vector.shape_cast %597 : vector<1x1x96x96xf32> to vector<96x96xf32>
    %cst_452 = arith.constant dense<0.000000e+00> : vector<8x96xf32>
    %599 = tpu.matmul %595, %598, %cst_452 {dimension_numbers = #tpu.dot_dimension_numbers<[1], [0], [0], [1], [0, 0, 1, 1], [], []>} : vector<8x96xf32>, vector<96x96xf32>, vector<8x96xf32> -> vector<8x96xf32>
    %c1_453 = arith.constant 1 : index
    %c0_454 = arith.constant 0 : index
    %c0_455 = arith.constant 0 : index
    %c0_456 = arith.constant 0 : index
    %600 = vector.load %arg12[%c1_453, %c0_454, %c0_455, %c0_456] : memref<2x3x1x96xf32, #tpu.memory_space<vmem>>, vector<1x1x1x96xf32>
    %601 = vector.shape_cast %600 : vector<1x1x1x96xf32> to vector<1x96xf32>
    %602 = vector.broadcast %601 : vector<1x96xf32> to vector<8x96xf32>
    %603 = arith.addf %599, %602 : vector<8x96xf32>
    %c1_457 = arith.constant 1 : index
    %c1_458 = arith.constant 1 : index
    %c0_459 = arith.constant 0 : index
    %c0_460 = arith.constant 0 : index
    %604 = vector.load %arg10[%c1_457, %c1_458, %c0_459, %c0_460] : memref<2x3x96x96xf32, #tpu.memory_space<vmem>>, vector<1x1x96x96xf32>
    %605 = vector.shape_cast %604 : vector<1x1x96x96xf32> to vector<96x96xf32>
    %cst_461 = arith.constant dense<0.000000e+00> : vector<8x96xf32>
    %606 = tpu.matmul %595, %605, %cst_461 {dimension_numbers = #tpu.dot_dimension_numbers<[1], [0], [0], [1], [0, 0, 1, 1], [], []>} : vector<8x96xf32>, vector<96x96xf32>, vector<8x96xf32> -> vector<8x96xf32>
    %c1_462 = arith.constant 1 : index
    %c1_463 = arith.constant 1 : index
    %c0_464 = arith.constant 0 : index
    %c0_465 = arith.constant 0 : index
    %607 = vector.load %arg12[%c1_462, %c1_463, %c0_464, %c0_465] : memref<2x3x1x96xf32, #tpu.memory_space<vmem>>, vector<1x1x1x96xf32>
    %608 = vector.shape_cast %607 : vector<1x1x1x96xf32> to vector<1x96xf32>
    %609 = vector.broadcast %608 : vector<1x96xf32> to vector<8x96xf32>
    %610 = arith.addf %606, %609 : vector<8x96xf32>
    %c1_466 = arith.constant 1 : index
    %c2_467 = arith.constant 2 : index
    %c0_468 = arith.constant 0 : index
    %c0_469 = arith.constant 0 : index
    %611 = vector.load %arg10[%c1_466, %c2_467, %c0_468, %c0_469] : memref<2x3x96x96xf32, #tpu.memory_space<vmem>>, vector<1x1x96x96xf32>
    %612 = vector.shape_cast %611 : vector<1x1x96x96xf32> to vector<96x96xf32>
    %cst_470 = arith.constant dense<0.000000e+00> : vector<8x96xf32>
    %613 = tpu.matmul %595, %612, %cst_470 {dimension_numbers = #tpu.dot_dimension_numbers<[1], [0], [0], [1], [0, 0, 1, 1], [], []>} : vector<8x96xf32>, vector<96x96xf32>, vector<8x96xf32> -> vector<8x96xf32>
    %c1_471 = arith.constant 1 : index
    %c2_472 = arith.constant 2 : index
    %c0_473 = arith.constant 0 : index
    %c0_474 = arith.constant 0 : index
    %614 = vector.load %arg12[%c1_471, %c2_472, %c0_473, %c0_474] : memref<2x3x1x96xf32, #tpu.memory_space<vmem>>, vector<1x1x1x96xf32>
    %615 = vector.shape_cast %614 : vector<1x1x1x96xf32> to vector<1x96xf32>
    %616 = vector.broadcast %615 : vector<1x96xf32> to vector<8x96xf32>
    %617 = arith.addf %613, %616 : vector<8x96xf32>
    %618 = vector.extract_strided_slice %440 {offsets = [24, 0], sizes = [8, 96], strides = [1, 1]} : vector<64x96xf32> to vector<8x96xf32>
    %619 = arith.addf %618, %603 : vector<8x96xf32>
    %cst_475 = arith.constant 0.000000e+00 : f32
    %620 = vector.broadcast %cst_475 : f32 to vector<8x96xf32>
    %621 = arith.subf %620, %619 : vector<8x96xf32>
    %622 = math.exp %621 : vector<8x96xf32>
    %cst_476 = arith.constant 1.000000e+00 : f32
    %623 = vector.broadcast %cst_476 : f32 to vector<8x96xf32>
    %624 = arith.addf %623, %622 : vector<8x96xf32>
    %625 = tpu.reciprocal %624 {approx = true} : vector<8x96xf32> -> vector<8x96xf32>
    %626 = vector.extract_strided_slice %447 {offsets = [24, 0], sizes = [8, 96], strides = [1, 1]} : vector<64x96xf32> to vector<8x96xf32>
    %627 = arith.addf %626, %610 : vector<8x96xf32>
    %cst_477 = arith.constant 0.000000e+00 : f32
    %628 = vector.broadcast %cst_477 : f32 to vector<8x96xf32>
    %629 = arith.subf %628, %627 : vector<8x96xf32>
    %630 = math.exp %629 : vector<8x96xf32>
    %cst_478 = arith.constant 1.000000e+00 : f32
    %631 = vector.broadcast %cst_478 : f32 to vector<8x96xf32>
    %632 = arith.addf %631, %630 : vector<8x96xf32>
    %633 = tpu.reciprocal %632 {approx = true} : vector<8x96xf32> -> vector<8x96xf32>
    %634 = vector.extract_strided_slice %454 {offsets = [24, 0], sizes = [8, 96], strides = [1, 1]} : vector<64x96xf32> to vector<8x96xf32>
    %635 = arith.mulf %625, %617 : vector<8x96xf32>
    %636 = arith.addf %634, %635 : vector<8x96xf32>
    %637 = math.tanh %636 : vector<8x96xf32>
    %cst_479 = arith.constant 1.000000e+00 : f32
    %638 = vector.broadcast %cst_479 : f32 to vector<8x96xf32>
    %639 = arith.subf %638, %633 : vector<8x96xf32>
    %640 = arith.mulf %639, %637 : vector<8x96xf32>
    %641 = arith.mulf %633, %595 : vector<8x96xf32>
    %642 = arith.addf %640, %641 : vector<8x96xf32>
    %c24_480 = arith.constant 24 : index
    %c0_481 = arith.constant 0 : index
    %643 = vector.load %arg22[%c24_480, %c0_481] : memref<64x96xf32, #tpu.memory_space<vmem>>, vector<8x96xf32>
    tpu.vector_store %arg22[%c24_480, %c0_481], %642 {strides = array<i32>} : memref<64x96xf32, #tpu.memory_space<vmem>>, vector<8x96xf32>,
    %c1_482 = arith.constant 1 : index
    %c0_483 = arith.constant 0 : index
    %c0_484 = arith.constant 0 : index
    %c0_485 = arith.constant 0 : index
    %644 = vector.load %arg10[%c1_482, %c0_483, %c0_484, %c0_485] : memref<2x3x96x96xf32, #tpu.memory_space<vmem>>, vector<1x1x96x96xf32>
    %645 = vector.shape_cast %644 : vector<1x1x96x96xf32> to vector<96x96xf32>
    %cst_486 = arith.constant dense<0.000000e+00> : vector<8x96xf32>
    %646 = tpu.matmul %642, %645, %cst_486 {dimension_numbers = #tpu.dot_dimension_numbers<[1], [0], [0], [1], [0, 0, 1, 1], [], []>} : vector<8x96xf32>, vector<96x96xf32>, vector<8x96xf32> -> vector<8x96xf32>
    %c1_487 = arith.constant 1 : index
    %c0_488 = arith.constant 0 : index
    %c0_489 = arith.constant 0 : index
    %c0_490 = arith.constant 0 : index
    %647 = vector.load %arg12[%c1_487, %c0_488, %c0_489, %c0_490] : memref<2x3x1x96xf32, #tpu.memory_space<vmem>>, vector<1x1x1x96xf32>
    %648 = vector.shape_cast %647 : vector<1x1x1x96xf32> to vector<1x96xf32>
    %649 = vector.broadcast %648 : vector<1x96xf32> to vector<8x96xf32>
    %650 = arith.addf %646, %649 : vector<8x96xf32>
    %c1_491 = arith.constant 1 : index
    %c1_492 = arith.constant 1 : index
    %c0_493 = arith.constant 0 : index
    %c0_494 = arith.constant 0 : index
    %651 = vector.load %arg10[%c1_491, %c1_492, %c0_493, %c0_494] : memref<2x3x96x96xf32, #tpu.memory_space<vmem>>, vector<1x1x96x96xf32>
    %652 = vector.shape_cast %651 : vector<1x1x96x96xf32> to vector<96x96xf32>
    %cst_495 = arith.constant dense<0.000000e+00> : vector<8x96xf32>
    %653 = tpu.matmul %642, %652, %cst_495 {dimension_numbers = #tpu.dot_dimension_numbers<[1], [0], [0], [1], [0, 0, 1, 1], [], []>} : vector<8x96xf32>, vector<96x96xf32>, vector<8x96xf32> -> vector<8x96xf32>
    %c1_496 = arith.constant 1 : index
    %c1_497 = arith.constant 1 : index
    %c0_498 = arith.constant 0 : index
    %c0_499 = arith.constant 0 : index
    %654 = vector.load %arg12[%c1_496, %c1_497, %c0_498, %c0_499] : memref<2x3x1x96xf32, #tpu.memory_space<vmem>>, vector<1x1x1x96xf32>
    %655 = vector.shape_cast %654 : vector<1x1x1x96xf32> to vector<1x96xf32>
    %656 = vector.broadcast %655 : vector<1x96xf32> to vector<8x96xf32>
    %657 = arith.addf %653, %656 : vector<8x96xf32>
    %c1_500 = arith.constant 1 : index
    %c2_501 = arith.constant 2 : index
    %c0_502 = arith.constant 0 : index
    %c0_503 = arith.constant 0 : index
    %658 = vector.load %arg10[%c1_500, %c2_501, %c0_502, %c0_503] : memref<2x3x96x96xf32, #tpu.memory_space<vmem>>, vector<1x1x96x96xf32>
    %659 = vector.shape_cast %658 : vector<1x1x96x96xf32> to vector<96x96xf32>
    %cst_504 = arith.constant dense<0.000000e+00> : vector<8x96xf32>
    %660 = tpu.matmul %642, %659, %cst_504 {dimension_numbers = #tpu.dot_dimension_numbers<[1], [0], [0], [1], [0, 0, 1, 1], [], []>} : vector<8x96xf32>, vector<96x96xf32>, vector<8x96xf32> -> vector<8x96xf32>
    %c1_505 = arith.constant 1 : index
    %c2_506 = arith.constant 2 : index
    %c0_507 = arith.constant 0 : index
    %c0_508 = arith.constant 0 : index
    %661 = vector.load %arg12[%c1_505, %c2_506, %c0_507, %c0_508] : memref<2x3x1x96xf32, #tpu.memory_space<vmem>>, vector<1x1x1x96xf32>
    %662 = vector.shape_cast %661 : vector<1x1x1x96xf32> to vector<1x96xf32>
    %663 = vector.broadcast %662 : vector<1x96xf32> to vector<8x96xf32>
    %664 = arith.addf %660, %663 : vector<8x96xf32>
    %665 = vector.extract_strided_slice %440 {offsets = [32, 0], sizes = [8, 96], strides = [1, 1]} : vector<64x96xf32> to vector<8x96xf32>
    %666 = arith.addf %665, %650 : vector<8x96xf32>
    %cst_509 = arith.constant 0.000000e+00 : f32
    %667 = vector.broadcast %cst_509 : f32 to vector<8x96xf32>
    %668 = arith.subf %667, %666 : vector<8x96xf32>
    %669 = math.exp %668 : vector<8x96xf32>
    %cst_510 = arith.constant 1.000000e+00 : f32
    %670 = vector.broadcast %cst_510 : f32 to vector<8x96xf32>
    %671 = arith.addf %670, %669 : vector<8x96xf32>
    %672 = tpu.reciprocal %671 {approx = true} : vector<8x96xf32> -> vector<8x96xf32>
    %673 = vector.extract_strided_slice %447 {offsets = [32, 0], sizes = [8, 96], strides = [1, 1]} : vector<64x96xf32> to vector<8x96xf32>
    %674 = arith.addf %673, %657 : vector<8x96xf32>
    %cst_511 = arith.constant 0.000000e+00 : f32
    %675 = vector.broadcast %cst_511 : f32 to vector<8x96xf32>
    %676 = arith.subf %675, %674 : vector<8x96xf32>
    %677 = math.exp %676 : vector<8x96xf32>
    %cst_512 = arith.constant 1.000000e+00 : f32
    %678 = vector.broadcast %cst_512 : f32 to vector<8x96xf32>
    %679 = arith.addf %678, %677 : vector<8x96xf32>
    %680 = tpu.reciprocal %679 {approx = true} : vector<8x96xf32> -> vector<8x96xf32>
    %681 = vector.extract_strided_slice %454 {offsets = [32, 0], sizes = [8, 96], strides = [1, 1]} : vector<64x96xf32> to vector<8x96xf32>
    %682 = arith.mulf %672, %664 : vector<8x96xf32>
    %683 = arith.addf %681, %682 : vector<8x96xf32>
    %684 = math.tanh %683 : vector<8x96xf32>
    %cst_513 = arith.constant 1.000000e+00 : f32
    %685 = vector.broadcast %cst_513 : f32 to vector<8x96xf32>
    %686 = arith.subf %685, %680 : vector<8x96xf32>
    %687 = arith.mulf %686, %684 : vector<8x96xf32>
    %688 = arith.mulf %680, %642 : vector<8x96xf32>
    %689 = arith.addf %687, %688 : vector<8x96xf32>
    %c32_514 = arith.constant 32 : index
    %c0_515 = arith.constant 0 : index
    %690 = vector.load %arg22[%c32_514, %c0_515] : memref<64x96xf32, #tpu.memory_space<vmem>>, vector<8x96xf32>
    tpu.vector_store %arg22[%c32_514, %c0_515], %689 {strides = array<i32>} : memref<64x96xf32, #tpu.memory_space<vmem>>, vector<8x96xf32>,
    %c1_516 = arith.constant 1 : index
    %c0_517 = arith.constant 0 : index
    %c0_518 = arith.constant 0 : index
    %c0_519 = arith.constant 0 : index
    %691 = vector.load %arg10[%c1_516, %c0_517, %c0_518, %c0_519] : memref<2x3x96x96xf32, #tpu.memory_space<vmem>>, vector<1x1x96x96xf32>
    %692 = vector.shape_cast %691 : vector<1x1x96x96xf32> to vector<96x96xf32>
    %cst_520 = arith.constant dense<0.000000e+00> : vector<8x96xf32>
    %693 = tpu.matmul %689, %692, %cst_520 {dimension_numbers = #tpu.dot_dimension_numbers<[1], [0], [0], [1], [0, 0, 1, 1], [], []>} : vector<8x96xf32>, vector<96x96xf32>, vector<8x96xf32> -> vector<8x96xf32>
    %c1_521 = arith.constant 1 : index
    %c0_522 = arith.constant 0 : index
    %c0_523 = arith.constant 0 : index
    %c0_524 = arith.constant 0 : index
    %694 = vector.load %arg12[%c1_521, %c0_522, %c0_523, %c0_524] : memref<2x3x1x96xf32, #tpu.memory_space<vmem>>, vector<1x1x1x96xf32>
    %695 = vector.shape_cast %694 : vector<1x1x1x96xf32> to vector<1x96xf32>
    %696 = vector.broadcast %695 : vector<1x96xf32> to vector<8x96xf32>
    %697 = arith.addf %693, %696 : vector<8x96xf32>
    %c1_525 = arith.constant 1 : index
    %c1_526 = arith.constant 1 : index
    %c0_527 = arith.constant 0 : index
    %c0_528 = arith.constant 0 : index
    %698 = vector.load %arg10[%c1_525, %c1_526, %c0_527, %c0_528] : memref<2x3x96x96xf32, #tpu.memory_space<vmem>>, vector<1x1x96x96xf32>
    %699 = vector.shape_cast %698 : vector<1x1x96x96xf32> to vector<96x96xf32>
    %cst_529 = arith.constant dense<0.000000e+00> : vector<8x96xf32>
    %700 = tpu.matmul %689, %699, %cst_529 {dimension_numbers = #tpu.dot_dimension_numbers<[1], [0], [0], [1], [0, 0, 1, 1], [], []>} : vector<8x96xf32>, vector<96x96xf32>, vector<8x96xf32> -> vector<8x96xf32>
    %c1_530 = arith.constant 1 : index
    %c1_531 = arith.constant 1 : index
    %c0_532 = arith.constant 0 : index
    %c0_533 = arith.constant 0 : index
    %701 = vector.load %arg12[%c1_530, %c1_531, %c0_532, %c0_533] : memref<2x3x1x96xf32, #tpu.memory_space<vmem>>, vector<1x1x1x96xf32>
    %702 = vector.shape_cast %701 : vector<1x1x1x96xf32> to vector<1x96xf32>
    %703 = vector.broadcast %702 : vector<1x96xf32> to vector<8x96xf32>
    %704 = arith.addf %700, %703 : vector<8x96xf32>
    %c1_534 = arith.constant 1 : index
    %c2_535 = arith.constant 2 : index
    %c0_536 = arith.constant 0 : index
    %c0_537 = arith.constant 0 : index
    %705 = vector.load %arg10[%c1_534, %c2_535, %c0_536, %c0_537] : memref<2x3x96x96xf32, #tpu.memory_space<vmem>>, vector<1x1x96x96xf32>
    %706 = vector.shape_cast %705 : vector<1x1x96x96xf32> to vector<96x96xf32>
    %cst_538 = arith.constant dense<0.000000e+00> : vector<8x96xf32>
    %707 = tpu.matmul %689, %706, %cst_538 {dimension_numbers = #tpu.dot_dimension_numbers<[1], [0], [0], [1], [0, 0, 1, 1], [], []>} : vector<8x96xf32>, vector<96x96xf32>, vector<8x96xf32> -> vector<8x96xf32>
    %c1_539 = arith.constant 1 : index
    %c2_540 = arith.constant 2 : index
    %c0_541 = arith.constant 0 : index
    %c0_542 = arith.constant 0 : index
    %708 = vector.load %arg12[%c1_539, %c2_540, %c0_541, %c0_542] : memref<2x3x1x96xf32, #tpu.memory_space<vmem>>, vector<1x1x1x96xf32>
    %709 = vector.shape_cast %708 : vector<1x1x1x96xf32> to vector<1x96xf32>
    %710 = vector.broadcast %709 : vector<1x96xf32> to vector<8x96xf32>
    %711 = arith.addf %707, %710 : vector<8x96xf32>
    %712 = vector.extract_strided_slice %440 {offsets = [40, 0], sizes = [8, 96], strides = [1, 1]} : vector<64x96xf32> to vector<8x96xf32>
    %713 = arith.addf %712, %697 : vector<8x96xf32>
    %cst_543 = arith.constant 0.000000e+00 : f32
    %714 = vector.broadcast %cst_543 : f32 to vector<8x96xf32>
    %715 = arith.subf %714, %713 : vector<8x96xf32>
    %716 = math.exp %715 : vector<8x96xf32>
    %cst_544 = arith.constant 1.000000e+00 : f32
    %717 = vector.broadcast %cst_544 : f32 to vector<8x96xf32>
    %718 = arith.addf %717, %716 : vector<8x96xf32>
    %719 = tpu.reciprocal %718 {approx = true} : vector<8x96xf32> -> vector<8x96xf32>
    %720 = vector.extract_strided_slice %447 {offsets = [40, 0], sizes = [8, 96], strides = [1, 1]} : vector<64x96xf32> to vector<8x96xf32>
    %721 = arith.addf %720, %704 : vector<8x96xf32>
    %cst_545 = arith.constant 0.000000e+00 : f32
    %722 = vector.broadcast %cst_545 : f32 to vector<8x96xf32>
    %723 = arith.subf %722, %721 : vector<8x96xf32>
    %724 = math.exp %723 : vector<8x96xf32>
    %cst_546 = arith.constant 1.000000e+00 : f32
    %725 = vector.broadcast %cst_546 : f32 to vector<8x96xf32>
    %726 = arith.addf %725, %724 : vector<8x96xf32>
    %727 = tpu.reciprocal %726 {approx = true} : vector<8x96xf32> -> vector<8x96xf32>
    %728 = vector.extract_strided_slice %454 {offsets = [40, 0], sizes = [8, 96], strides = [1, 1]} : vector<64x96xf32> to vector<8x96xf32>
    %729 = arith.mulf %719, %711 : vector<8x96xf32>
    %730 = arith.addf %728, %729 : vector<8x96xf32>
    %731 = math.tanh %730 : vector<8x96xf32>
    %cst_547 = arith.constant 1.000000e+00 : f32
    %732 = vector.broadcast %cst_547 : f32 to vector<8x96xf32>
    %733 = arith.subf %732, %727 : vector<8x96xf32>
    %734 = arith.mulf %733, %731 : vector<8x96xf32>
    %735 = arith.mulf %727, %689 : vector<8x96xf32>
    %736 = arith.addf %734, %735 : vector<8x96xf32>
    %c40_548 = arith.constant 40 : index
    %c0_549 = arith.constant 0 : index
    %737 = vector.load %arg22[%c40_548, %c0_549] : memref<64x96xf32, #tpu.memory_space<vmem>>, vector<8x96xf32>
    tpu.vector_store %arg22[%c40_548, %c0_549], %736 {strides = array<i32>} : memref<64x96xf32, #tpu.memory_space<vmem>>, vector<8x96xf32>,
    %c1_550 = arith.constant 1 : index
    %c0_551 = arith.constant 0 : index
    %c0_552 = arith.constant 0 : index
    %c0_553 = arith.constant 0 : index
    %738 = vector.load %arg10[%c1_550, %c0_551, %c0_552, %c0_553] : memref<2x3x96x96xf32, #tpu.memory_space<vmem>>, vector<1x1x96x96xf32>
    %739 = vector.shape_cast %738 : vector<1x1x96x96xf32> to vector<96x96xf32>
    %cst_554 = arith.constant dense<0.000000e+00> : vector<8x96xf32>
    %740 = tpu.matmul %736, %739, %cst_554 {dimension_numbers = #tpu.dot_dimension_numbers<[1], [0], [0], [1], [0, 0, 1, 1], [], []>} : vector<8x96xf32>, vector<96x96xf32>, vector<8x96xf32> -> vector<8x96xf32>
    %c1_555 = arith.constant 1 : index
    %c0_556 = arith.constant 0 : index
    %c0_557 = arith.constant 0 : index
    %c0_558 = arith.constant 0 : index
    %741 = vector.load %arg12[%c1_555, %c0_556, %c0_557, %c0_558] : memref<2x3x1x96xf32, #tpu.memory_space<vmem>>, vector<1x1x1x96xf32>
    %742 = vector.shape_cast %741 : vector<1x1x1x96xf32> to vector<1x96xf32>
    %743 = vector.broadcast %742 : vector<1x96xf32> to vector<8x96xf32>
    %744 = arith.addf %740, %743 : vector<8x96xf32>
    %c1_559 = arith.constant 1 : index
    %c1_560 = arith.constant 1 : index
    %c0_561 = arith.constant 0 : index
    %c0_562 = arith.constant 0 : index
    %745 = vector.load %arg10[%c1_559, %c1_560, %c0_561, %c0_562] : memref<2x3x96x96xf32, #tpu.memory_space<vmem>>, vector<1x1x96x96xf32>
    %746 = vector.shape_cast %745 : vector<1x1x96x96xf32> to vector<96x96xf32>
    %cst_563 = arith.constant dense<0.000000e+00> : vector<8x96xf32>
    %747 = tpu.matmul %736, %746, %cst_563 {dimension_numbers = #tpu.dot_dimension_numbers<[1], [0], [0], [1], [0, 0, 1, 1], [], []>} : vector<8x96xf32>, vector<96x96xf32>, vector<8x96xf32> -> vector<8x96xf32>
    %c1_564 = arith.constant 1 : index
    %c1_565 = arith.constant 1 : index
    %c0_566 = arith.constant 0 : index
    %c0_567 = arith.constant 0 : index
    %748 = vector.load %arg12[%c1_564, %c1_565, %c0_566, %c0_567] : memref<2x3x1x96xf32, #tpu.memory_space<vmem>>, vector<1x1x1x96xf32>
    %749 = vector.shape_cast %748 : vector<1x1x1x96xf32> to vector<1x96xf32>
    %750 = vector.broadcast %749 : vector<1x96xf32> to vector<8x96xf32>
    %751 = arith.addf %747, %750 : vector<8x96xf32>
    %c1_568 = arith.constant 1 : index
    %c2_569 = arith.constant 2 : index
    %c0_570 = arith.constant 0 : index
    %c0_571 = arith.constant 0 : index
    %752 = vector.load %arg10[%c1_568, %c2_569, %c0_570, %c0_571] : memref<2x3x96x96xf32, #tpu.memory_space<vmem>>, vector<1x1x96x96xf32>
    %753 = vector.shape_cast %752 : vector<1x1x96x96xf32> to vector<96x96xf32>
    %cst_572 = arith.constant dense<0.000000e+00> : vector<8x96xf32>
    %754 = tpu.matmul %736, %753, %cst_572 {dimension_numbers = #tpu.dot_dimension_numbers<[1], [0], [0], [1], [0, 0, 1, 1], [], []>} : vector<8x96xf32>, vector<96x96xf32>, vector<8x96xf32> -> vector<8x96xf32>
    %c1_573 = arith.constant 1 : index
    %c2_574 = arith.constant 2 : index
    %c0_575 = arith.constant 0 : index
    %c0_576 = arith.constant 0 : index
    %755 = vector.load %arg12[%c1_573, %c2_574, %c0_575, %c0_576] : memref<2x3x1x96xf32, #tpu.memory_space<vmem>>, vector<1x1x1x96xf32>
    %756 = vector.shape_cast %755 : vector<1x1x1x96xf32> to vector<1x96xf32>
    %757 = vector.broadcast %756 : vector<1x96xf32> to vector<8x96xf32>
    %758 = arith.addf %754, %757 : vector<8x96xf32>
    %759 = vector.extract_strided_slice %440 {offsets = [48, 0], sizes = [8, 96], strides = [1, 1]} : vector<64x96xf32> to vector<8x96xf32>
    %760 = arith.addf %759, %744 : vector<8x96xf32>
    %cst_577 = arith.constant 0.000000e+00 : f32
    %761 = vector.broadcast %cst_577 : f32 to vector<8x96xf32>
    %762 = arith.subf %761, %760 : vector<8x96xf32>
    %763 = math.exp %762 : vector<8x96xf32>
    %cst_578 = arith.constant 1.000000e+00 : f32
    %764 = vector.broadcast %cst_578 : f32 to vector<8x96xf32>
    %765 = arith.addf %764, %763 : vector<8x96xf32>
    %766 = tpu.reciprocal %765 {approx = true} : vector<8x96xf32> -> vector<8x96xf32>
    %767 = vector.extract_strided_slice %447 {offsets = [48, 0], sizes = [8, 96], strides = [1, 1]} : vector<64x96xf32> to vector<8x96xf32>
    %768 = arith.addf %767, %751 : vector<8x96xf32>
    %cst_579 = arith.constant 0.000000e+00 : f32
    %769 = vector.broadcast %cst_579 : f32 to vector<8x96xf32>
    %770 = arith.subf %769, %768 : vector<8x96xf32>
    %771 = math.exp %770 : vector<8x96xf32>
    %cst_580 = arith.constant 1.000000e+00 : f32
    %772 = vector.broadcast %cst_580 : f32 to vector<8x96xf32>
    %773 = arith.addf %772, %771 : vector<8x96xf32>
    %774 = tpu.reciprocal %773 {approx = true} : vector<8x96xf32> -> vector<8x96xf32>
    %775 = vector.extract_strided_slice %454 {offsets = [48, 0], sizes = [8, 96], strides = [1, 1]} : vector<64x96xf32> to vector<8x96xf32>
    %776 = arith.mulf %766, %758 : vector<8x96xf32>
    %777 = arith.addf %775, %776 : vector<8x96xf32>
    %778 = math.tanh %777 : vector<8x96xf32>
    %cst_581 = arith.constant 1.000000e+00 : f32
    %779 = vector.broadcast %cst_581 : f32 to vector<8x96xf32>
    %780 = arith.subf %779, %774 : vector<8x96xf32>
    %781 = arith.mulf %780, %778 : vector<8x96xf32>
    %782 = arith.mulf %774, %736 : vector<8x96xf32>
    %783 = arith.addf %781, %782 : vector<8x96xf32>
    %c48_582 = arith.constant 48 : index
    %c0_583 = arith.constant 0 : index
    %784 = vector.load %arg22[%c48_582, %c0_583] : memref<64x96xf32, #tpu.memory_space<vmem>>, vector<8x96xf32>
    tpu.vector_store %arg22[%c48_582, %c0_583], %783 {strides = array<i32>} : memref<64x96xf32, #tpu.memory_space<vmem>>, vector<8x96xf32>,
    %c1_584 = arith.constant 1 : index
    %c0_585 = arith.constant 0 : index
    %c0_586 = arith.constant 0 : index
    %c0_587 = arith.constant 0 : index
    %785 = vector.load %arg10[%c1_584, %c0_585, %c0_586, %c0_587] : memref<2x3x96x96xf32, #tpu.memory_space<vmem>>, vector<1x1x96x96xf32>
    %786 = vector.shape_cast %785 : vector<1x1x96x96xf32> to vector<96x96xf32>
    %cst_588 = arith.constant dense<0.000000e+00> : vector<8x96xf32>
    %787 = tpu.matmul %783, %786, %cst_588 {dimension_numbers = #tpu.dot_dimension_numbers<[1], [0], [0], [1], [0, 0, 1, 1], [], []>} : vector<8x96xf32>, vector<96x96xf32>, vector<8x96xf32> -> vector<8x96xf32>
    %c1_589 = arith.constant 1 : index
    %c0_590 = arith.constant 0 : index
    %c0_591 = arith.constant 0 : index
    %c0_592 = arith.constant 0 : index
    %788 = vector.load %arg12[%c1_589, %c0_590, %c0_591, %c0_592] : memref<2x3x1x96xf32, #tpu.memory_space<vmem>>, vector<1x1x1x96xf32>
    %789 = vector.shape_cast %788 : vector<1x1x1x96xf32> to vector<1x96xf32>
    %790 = vector.broadcast %789 : vector<1x96xf32> to vector<8x96xf32>
    %791 = arith.addf %787, %790 : vector<8x96xf32>
    %c1_593 = arith.constant 1 : index
    %c1_594 = arith.constant 1 : index
    %c0_595 = arith.constant 0 : index
    %c0_596 = arith.constant 0 : index
    %792 = vector.load %arg10[%c1_593, %c1_594, %c0_595, %c0_596] : memref<2x3x96x96xf32, #tpu.memory_space<vmem>>, vector<1x1x96x96xf32>
    %793 = vector.shape_cast %792 : vector<1x1x96x96xf32> to vector<96x96xf32>
    %cst_597 = arith.constant dense<0.000000e+00> : vector<8x96xf32>
    %794 = tpu.matmul %783, %793, %cst_597 {dimension_numbers = #tpu.dot_dimension_numbers<[1], [0], [0], [1], [0, 0, 1, 1], [], []>} : vector<8x96xf32>, vector<96x96xf32>, vector<8x96xf32> -> vector<8x96xf32>
    %c1_598 = arith.constant 1 : index
    %c1_599 = arith.constant 1 : index
    %c0_600 = arith.constant 0 : index
    %c0_601 = arith.constant 0 : index
    %795 = vector.load %arg12[%c1_598, %c1_599, %c0_600, %c0_601] : memref<2x3x1x96xf32, #tpu.memory_space<vmem>>, vector<1x1x1x96xf32>
    %796 = vector.shape_cast %795 : vector<1x1x1x96xf32> to vector<1x96xf32>
    %797 = vector.broadcast %796 : vector<1x96xf32> to vector<8x96xf32>
    %798 = arith.addf %794, %797 : vector<8x96xf32>
    %c1_602 = arith.constant 1 : index
    %c2_603 = arith.constant 2 : index
    %c0_604 = arith.constant 0 : index
    %c0_605 = arith.constant 0 : index
    %799 = vector.load %arg10[%c1_602, %c2_603, %c0_604, %c0_605] : memref<2x3x96x96xf32, #tpu.memory_space<vmem>>, vector<1x1x96x96xf32>
    %800 = vector.shape_cast %799 : vector<1x1x96x96xf32> to vector<96x96xf32>
    %cst_606 = arith.constant dense<0.000000e+00> : vector<8x96xf32>
    %801 = tpu.matmul %783, %800, %cst_606 {dimension_numbers = #tpu.dot_dimension_numbers<[1], [0], [0], [1], [0, 0, 1, 1], [], []>} : vector<8x96xf32>, vector<96x96xf32>, vector<8x96xf32> -> vector<8x96xf32>
    %c1_607 = arith.constant 1 : index
    %c2_608 = arith.constant 2 : index
    %c0_609 = arith.constant 0 : index
    %c0_610 = arith.constant 0 : index
    %802 = vector.load %arg12[%c1_607, %c2_608, %c0_609, %c0_610] : memref<2x3x1x96xf32, #tpu.memory_space<vmem>>, vector<1x1x1x96xf32>
    %803 = vector.shape_cast %802 : vector<1x1x1x96xf32> to vector<1x96xf32>
    %804 = vector.broadcast %803 : vector<1x96xf32> to vector<8x96xf32>
    %805 = arith.addf %801, %804 : vector<8x96xf32>
    %806 = vector.extract_strided_slice %440 {offsets = [56, 0], sizes = [8, 96], strides = [1, 1]} : vector<64x96xf32> to vector<8x96xf32>
    %807 = arith.addf %806, %791 : vector<8x96xf32>
    %cst_611 = arith.constant 0.000000e+00 : f32
    %808 = vector.broadcast %cst_611 : f32 to vector<8x96xf32>
    %809 = arith.subf %808, %807 : vector<8x96xf32>
    %810 = math.exp %809 : vector<8x96xf32>
    %cst_612 = arith.constant 1.000000e+00 : f32
    %811 = vector.broadcast %cst_612 : f32 to vector<8x96xf32>
    %812 = arith.addf %811, %810 : vector<8x96xf32>
    %813 = tpu.reciprocal %812 {approx = true} : vector<8x96xf32> -> vector<8x96xf32>
    %814 = vector.extract_strided_slice %447 {offsets = [56, 0], sizes = [8, 96], strides = [1, 1]} : vector<64x96xf32> to vector<8x96xf32>
    %815 = arith.addf %814, %798 : vector<8x96xf32>
    %cst_613 = arith.constant 0.000000e+00 : f32
    %816 = vector.broadcast %cst_613 : f32 to vector<8x96xf32>
    %817 = arith.subf %816, %815 : vector<8x96xf32>
    %818 = math.exp %817 : vector<8x96xf32>
    %cst_614 = arith.constant 1.000000e+00 : f32
    %819 = vector.broadcast %cst_614 : f32 to vector<8x96xf32>
    %820 = arith.addf %819, %818 : vector<8x96xf32>
    %821 = tpu.reciprocal %820 {approx = true} : vector<8x96xf32> -> vector<8x96xf32>
    %822 = vector.extract_strided_slice %454 {offsets = [56, 0], sizes = [8, 96], strides = [1, 1]} : vector<64x96xf32> to vector<8x96xf32>
    %823 = arith.mulf %813, %805 : vector<8x96xf32>
    %824 = arith.addf %822, %823 : vector<8x96xf32>
    %825 = math.tanh %824 : vector<8x96xf32>
    %cst_615 = arith.constant 1.000000e+00 : f32
    %826 = vector.broadcast %cst_615 : f32 to vector<8x96xf32>
    %827 = arith.subf %826, %821 : vector<8x96xf32>
    %828 = arith.mulf %827, %825 : vector<8x96xf32>
    %829 = arith.mulf %821, %783 : vector<8x96xf32>
    %830 = arith.addf %828, %829 : vector<8x96xf32>
    %c56_616 = arith.constant 56 : index
    %c0_617 = arith.constant 0 : index
    %831 = vector.load %arg22[%c56_616, %c0_617] : memref<64x96xf32, #tpu.memory_space<vmem>>, vector<8x96xf32>
    tpu.vector_store %arg22[%c56_616, %c0_617], %830 {strides = array<i32>} : memref<64x96xf32, #tpu.memory_space<vmem>>, vector<8x96xf32>,
    %c0_618 = arith.constant 0 : index
    %c0_619 = arith.constant 0 : index
    %832 = vector.load %arg22[%c0_618, %c0_619] : memref<64x96xf32, #tpu.memory_space<vmem>>, vector<64x96xf32>
    %833 = vector.extract_strided_slice %832 {offsets = [0, 0], sizes = [64, 32], strides = [1, 1]} : vector<64x96xf32> to vector<64x32xf32>
    %834 = vector.extract_strided_slice %830 {offsets = [0, 0], sizes = [8, 32], strides = [1, 1]} : vector<8x96xf32> to vector<8x32xf32>
    %835 = vector.extract_strided_slice %830 {offsets = [0, 32], sizes = [8, 32], strides = [1, 1]} : vector<8x96xf32> to vector<8x32xf32>
    %836 = vector.extract_strided_slice %830 {offsets = [0, 64], sizes = [8, 32], strides = [1, 1]} : vector<8x96xf32> to vector<8x32xf32>
    %c0_620 = arith.constant 0 : index
    %c0_621 = arith.constant 0 : index
    %837 = vector.load %arg13[%c0_620, %c0_621] : memref<32x16xf32, #tpu.memory_space<vmem>>, vector<32x16xf32>
    %cst_622 = arith.constant dense<0.000000e+00> : vector<64x16xf32>
    %838 = tpu.matmul %833, %837, %cst_622 {dimension_numbers = #tpu.dot_dimension_numbers<[1], [0], [0], [1], [0, 0, 1, 1], [], []>} : vector<64x32xf32>, vector<32x16xf32>, vector<64x16xf32> -> vector<64x16xf32>
    %c0_623 = arith.constant 0 : index
    %c0_624 = arith.constant 0 : index
    %839 = vector.load %arg14[%c0_623, %c0_624] : memref<1x16xf32, #tpu.memory_space<vmem>>, vector<1x16xf32>
    %840 = vector.broadcast %839 : vector<1x16xf32> to vector<64x16xf32>
    %841 = arith.addf %838, %840 : vector<64x16xf32>
    %842 = math.tanh %841 : vector<64x16xf32>
    %c0_625 = arith.constant 0 : index
    %c0_626 = arith.constant 0 : index
    %843 = vector.load %arg15[%c0_625, %c0_626] : memref<1x16xf32, #tpu.memory_space<vmem>>, vector<1x16xf32>
    %844 = vector.broadcast %843 : vector<1x16xf32> to vector<64x16xf32>
    %845 = arith.mulf %842, %844 : vector<64x16xf32>
    %cst_627 = arith.constant dense<0.000000e+00> : vector<64xf32>
    %846 = vector.multi_reduction <add>, %845, %cst_627 [1] : vector<64x16xf32> to vector<64xf32>
    %847 = vector.shape_cast %846 : vector<64xf32> to vector<64x1xf32>
    %848 = vector.extract_strided_slice %847 {offsets = [0, 0], sizes = [8, 1], strides = [1, 1]} : vector<64x1xf32> to vector<8x1xf32>
    %849 = vector.extract_strided_slice %847 {offsets = [8, 0], sizes = [8, 1], strides = [1, 1]} : vector<64x1xf32> to vector<8x1xf32>
    %850 = arith.maximumf %848, %849 : vector<8x1xf32>
    %851 = vector.extract_strided_slice %847 {offsets = [16, 0], sizes = [8, 1], strides = [1, 1]} : vector<64x1xf32> to vector<8x1xf32>
    %852 = arith.maximumf %850, %851 : vector<8x1xf32>
    %853 = vector.extract_strided_slice %847 {offsets = [24, 0], sizes = [8, 1], strides = [1, 1]} : vector<64x1xf32> to vector<8x1xf32>
    %854 = arith.maximumf %852, %853 : vector<8x1xf32>
    %855 = vector.extract_strided_slice %847 {offsets = [32, 0], sizes = [8, 1], strides = [1, 1]} : vector<64x1xf32> to vector<8x1xf32>
    %856 = arith.maximumf %854, %855 : vector<8x1xf32>
    %857 = vector.extract_strided_slice %847 {offsets = [40, 0], sizes = [8, 1], strides = [1, 1]} : vector<64x1xf32> to vector<8x1xf32>
    %858 = arith.maximumf %856, %857 : vector<8x1xf32>
    %859 = vector.extract_strided_slice %847 {offsets = [48, 0], sizes = [8, 1], strides = [1, 1]} : vector<64x1xf32> to vector<8x1xf32>
    %860 = arith.maximumf %858, %859 : vector<8x1xf32>
    %861 = vector.extract_strided_slice %847 {offsets = [56, 0], sizes = [8, 1], strides = [1, 1]} : vector<64x1xf32> to vector<8x1xf32>
    %862 = arith.maximumf %860, %861 : vector<8x1xf32>
    %cst_628 = arith.constant 0.000000e+00 : f32
    %863 = vector.broadcast %cst_628 : f32 to vector<8x1xf32>
    %cst_629 = arith.constant 0.000000e+00 : f32
    %864 = vector.broadcast %cst_629 : f32 to vector<8x32xf32>
    %865 = vector.extract_strided_slice %847 {offsets = [0, 0], sizes = [8, 1], strides = [1, 1]} : vector<64x1xf32> to vector<8x1xf32>
    %866 = arith.subf %865, %862 : vector<8x1xf32>
    %867 = math.exp %866 : vector<8x1xf32>
    %868 = arith.addf %863, %867 : vector<8x1xf32>
    %869 = vector.extract_strided_slice %833 {offsets = [0, 0], sizes = [8, 32], strides = [1, 1]} : vector<64x32xf32> to vector<8x32xf32>
    %870 = vector.broadcast %867 : vector<8x1xf32> to vector<8x32xf32>
    %871 = arith.mulf %870, %869 : vector<8x32xf32>
    %872 = arith.addf %864, %871 : vector<8x32xf32>
    %873 = vector.extract_strided_slice %847 {offsets = [8, 0], sizes = [8, 1], strides = [1, 1]} : vector<64x1xf32> to vector<8x1xf32>
    %874 = arith.subf %873, %862 : vector<8x1xf32>
    %875 = math.exp %874 : vector<8x1xf32>
    %876 = arith.addf %868, %875 : vector<8x1xf32>
    %877 = vector.extract_strided_slice %833 {offsets = [8, 0], sizes = [8, 32], strides = [1, 1]} : vector<64x32xf32> to vector<8x32xf32>
    %878 = vector.broadcast %875 : vector<8x1xf32> to vector<8x32xf32>
    %879 = arith.mulf %878, %877 : vector<8x32xf32>
    %880 = arith.addf %872, %879 : vector<8x32xf32>
    %881 = vector.extract_strided_slice %847 {offsets = [16, 0], sizes = [8, 1], strides = [1, 1]} : vector<64x1xf32> to vector<8x1xf32>
    %882 = arith.subf %881, %862 : vector<8x1xf32>
    %883 = math.exp %882 : vector<8x1xf32>
    %884 = arith.addf %876, %883 : vector<8x1xf32>
    %885 = vector.extract_strided_slice %833 {offsets = [16, 0], sizes = [8, 32], strides = [1, 1]} : vector<64x32xf32> to vector<8x32xf32>
    %886 = vector.broadcast %883 : vector<8x1xf32> to vector<8x32xf32>
    %887 = arith.mulf %886, %885 : vector<8x32xf32>
    %888 = arith.addf %880, %887 : vector<8x32xf32>
    %889 = vector.extract_strided_slice %847 {offsets = [24, 0], sizes = [8, 1], strides = [1, 1]} : vector<64x1xf32> to vector<8x1xf32>
    %890 = arith.subf %889, %862 : vector<8x1xf32>
    %891 = math.exp %890 : vector<8x1xf32>
    %892 = arith.addf %884, %891 : vector<8x1xf32>
    %893 = vector.extract_strided_slice %833 {offsets = [24, 0], sizes = [8, 32], strides = [1, 1]} : vector<64x32xf32> to vector<8x32xf32>
    %894 = vector.broadcast %891 : vector<8x1xf32> to vector<8x32xf32>
    %895 = arith.mulf %894, %893 : vector<8x32xf32>
    %896 = arith.addf %888, %895 : vector<8x32xf32>
    %897 = vector.extract_strided_slice %847 {offsets = [32, 0], sizes = [8, 1], strides = [1, 1]} : vector<64x1xf32> to vector<8x1xf32>
    %898 = arith.subf %897, %862 : vector<8x1xf32>
    %899 = math.exp %898 : vector<8x1xf32>
    %900 = arith.addf %892, %899 : vector<8x1xf32>
    %901 = vector.extract_strided_slice %833 {offsets = [32, 0], sizes = [8, 32], strides = [1, 1]} : vector<64x32xf32> to vector<8x32xf32>
    %902 = vector.broadcast %899 : vector<8x1xf32> to vector<8x32xf32>
    %903 = arith.mulf %902, %901 : vector<8x32xf32>
    %904 = arith.addf %896, %903 : vector<8x32xf32>
    %905 = vector.extract_strided_slice %847 {offsets = [40, 0], sizes = [8, 1], strides = [1, 1]} : vector<64x1xf32> to vector<8x1xf32>
    %906 = arith.subf %905, %862 : vector<8x1xf32>
    %907 = math.exp %906 : vector<8x1xf32>
    %908 = arith.addf %900, %907 : vector<8x1xf32>
    %909 = vector.extract_strided_slice %833 {offsets = [40, 0], sizes = [8, 32], strides = [1, 1]} : vector<64x32xf32> to vector<8x32xf32>
    %910 = vector.broadcast %907 : vector<8x1xf32> to vector<8x32xf32>
    %911 = arith.mulf %910, %909 : vector<8x32xf32>
    %912 = arith.addf %904, %911 : vector<8x32xf32>
    %913 = vector.extract_strided_slice %847 {offsets = [48, 0], sizes = [8, 1], strides = [1, 1]} : vector<64x1xf32> to vector<8x1xf32>
    %914 = arith.subf %913, %862 : vector<8x1xf32>
    %915 = math.exp %914 : vector<8x1xf32>
    %916 = arith.addf %908, %915 : vector<8x1xf32>
    %917 = vector.extract_strided_slice %833 {offsets = [48, 0], sizes = [8, 32], strides = [1, 1]} : vector<64x32xf32> to vector<8x32xf32>
    %918 = vector.broadcast %915 : vector<8x1xf32> to vector<8x32xf32>
    %919 = arith.mulf %918, %917 : vector<8x32xf32>
    %920 = arith.addf %912, %919 : vector<8x32xf32>
    %921 = vector.extract_strided_slice %847 {offsets = [56, 0], sizes = [8, 1], strides = [1, 1]} : vector<64x1xf32> to vector<8x1xf32>
    %922 = arith.subf %921, %862 : vector<8x1xf32>
    %923 = math.exp %922 : vector<8x1xf32>
    %924 = arith.addf %916, %923 : vector<8x1xf32>
    %925 = vector.extract_strided_slice %833 {offsets = [56, 0], sizes = [8, 32], strides = [1, 1]} : vector<64x32xf32> to vector<8x32xf32>
    %926 = vector.broadcast %923 : vector<8x1xf32> to vector<8x32xf32>
    %927 = arith.mulf %926, %925 : vector<8x32xf32>
    %928 = arith.addf %920, %927 : vector<8x32xf32>
    %929 = tpu.reciprocal %924 {approx = true} : vector<8x1xf32> -> vector<8x1xf32>
    %930 = vector.broadcast %929 : vector<8x1xf32> to vector<8x32xf32>
    %931 = arith.mulf %928, %930 : vector<8x32xf32>
    %932 = tpu.iota {dimensions = array<i32: 0>} : vector<8x8xi32>
    %933 = tpu.iota {dimensions = array<i32: 1>} : vector<8x8xi32>
    %934 = arith.cmpi eq, %932, %933 : vector<8x8xi32>
    %935 = arith.mulf %836, %836 : vector<8x32xf32>
    %cst_630 = arith.constant dense<0.000000e+00> : vector<8xf32>
    %936 = vector.multi_reduction <add>, %935, %cst_630 [1] : vector<8x32xf32> to vector<8xf32>
    %937 = vector.shape_cast %936 : vector<8xf32> to vector<8x1xf32>
    %cst_631 = arith.constant 9.99999996E-13 : f32
    %938 = vector.broadcast %cst_631 : f32 to vector<8x1xf32>
    %939 = arith.maximumf %937, %938 : vector<8x1xf32>
    %940 = math.rsqrt %939 : vector<8x1xf32>
    %941 = vector.broadcast %940 : vector<8x1xf32> to vector<8x32xf32>
    %942 = arith.mulf %836, %941 : vector<8x32xf32>
    %cst_632 = arith.constant dense<0.000000e+00> : vector<8x8xf32>
    %943 = tpu.matmul %942, %942, %cst_632 {dimension_numbers = #tpu.dot_dimension_numbers<[1], [1], [0], [0], [0, 0, 1, 0], [], []>} : vector<8x32xf32>, vector<8x32xf32>, vector<8x8xf32> -> vector<8x8xf32>
    %944 = arith.extui %934 : vector<8x8xi1> to vector<8x8xi32>
    %945 = arith.sitofp %944 : vector<8x8xi32> to vector<8x8xf32>
    %946 = arith.subf %943, %945 : vector<8x8xf32>
    %c0_633 = arith.constant 0 : index
    %c0_634 = arith.constant 0 : index
    %c0_635 = arith.constant 0 : index
    %947 = vector.load %arg16[%c0_633, %c0_634, %c0_635] : memref<2x1x32xf32, #tpu.memory_space<vmem>>, vector<1x1x32xf32>
    %948 = vector.shape_cast %947 : vector<1x1x32xf32> to vector<1x32xf32>
    %949 = vector.broadcast %948 : vector<1x32xf32> to vector<8x32xf32>
    %950 = arith.mulf %834, %949 : vector<8x32xf32>
    %cst_636 = arith.constant dense<0.000000e+00> : vector<8xf32>
    %951 = vector.multi_reduction <add>, %950, %cst_636 [1] : vector<8x32xf32> to vector<8xf32>
    %952 = vector.shape_cast %951 : vector<8xf32> to vector<8x1xf32>
    %c0_637 = arith.constant 0 : index
    %c0_638 = arith.constant 0 : index
    %c0_639 = arith.constant 0 : index
    %953 = vector.load %arg17[%c0_637, %c0_638, %c0_639] : memref<2x32x1xf32, #tpu.memory_space<vmem>>, vector<1x32x1xf32>
    %954 = vector.shape_cast %953 : vector<1x32x1xf32> to vector<32x1xf32>
    %cst_640 = arith.constant dense<0.000000e+00> : vector<1x8xf32>
    %955 = tpu.matmul %954, %834, %cst_640 {dimension_numbers = #tpu.dot_dimension_numbers<[0], [1], [1], [0], [0, 1, 1, 0], [], []>} : vector<32x1xf32>, vector<8x32xf32>, vector<1x8xf32> -> vector<1x8xf32>
    %956 = vector.broadcast %952 : vector<8x1xf32> to vector<8x8xf32>
    %957 = vector.broadcast %955 : vector<1x8xf32> to vector<8x8xf32>
    %958 = arith.addf %956, %957 : vector<8x8xf32>
    %c0_641 = arith.constant 0 : index
    %c0_642 = arith.constant 0 : index
    %c0_643 = arith.constant 0 : index
    %959 = vector.load %arg18[%c0_641, %c0_642, %c0_643] : memref<2x1x1xf32, #tpu.memory_space<vmem>>, vector<1x1x1xf32>
    %960 = vector.shape_cast %959 : vector<1x1x1xf32> to vector<1x1xf32>
    %961 = vector.broadcast %960 : vector<1x1xf32> to vector<8x8xf32>
    %962 = arith.addf %958, %961 : vector<8x8xf32>
    %cst_644 = arith.constant 0.000000e+00 : f32
    %963 = vector.broadcast %cst_644 : f32 to vector<8x8xf32>
    %964 = arith.cmpf oge, %962, %963 : vector<8x8xf32>
    %cst_645 = arith.constant 0.00999999977 : f32
    %965 = vector.broadcast %cst_645 : f32 to vector<8x8xf32>
    %966 = arith.mulf %965, %962 : vector<8x8xf32>
    %967 = arith.select %964, %962, %966 : vector<8x8xi1>, vector<8x8xf32>
    %968 = arith.mulf %946, %967 : vector<8x8xf32>
    %cst_646 = arith.constant 0.000000e+00 : f32
    %969 = vector.broadcast %cst_646 : f32 to vector<8x8xf32>
    %970 = arith.cmpf oeq, %946, %969 : vector<8x8xf32>
    %971 = arith.ori %970, %934 : vector<8x8xi1>
    %cst_647 = arith.constant -1.000000e+10 : f32
    %972 = vector.broadcast %cst_647 : f32 to vector<8x8xf32>
    %973 = arith.select %971, %972, %968 : vector<8x8xi1>, vector<8x8xf32>
    %cst_648 = arith.constant dense<0xFF800000> : vector<8xf32>
    %974 = vector.multi_reduction <maximumf>, %973, %cst_648 [1] : vector<8x8xf32> to vector<8xf32>
    %975 = vector.shape_cast %974 : vector<8xf32> to vector<8x1xf32>
    %976 = vector.broadcast %975 : vector<8x1xf32> to vector<8x8xf32>
    %977 = arith.subf %973, %976 : vector<8x8xf32>
    %978 = math.exp %977 : vector<8x8xf32>
    %cst_649 = arith.constant dense<0.000000e+00> : vector<8xf32>
    %979 = vector.multi_reduction <add>, %978, %cst_649 [1] : vector<8x8xf32> to vector<8xf32>
    %980 = vector.shape_cast %979 : vector<8xf32> to vector<8x1xf32>
    %981 = tpu.reciprocal %980 {approx = true} : vector<8x1xf32> -> vector<8x1xf32>
    %982 = vector.broadcast %981 : vector<8x1xf32> to vector<8x8xf32>
    %983 = arith.mulf %978, %982 : vector<8x8xf32>
    %cst_650 = arith.constant dense<0.000000e+00> : vector<8x32xf32>
    %984 = tpu.matmul %983, %834, %cst_650 {dimension_numbers = #tpu.dot_dimension_numbers<[1], [0], [0], [1], [0, 0, 1, 1], [], []>} : vector<8x8xf32>, vector<8x32xf32>, vector<8x32xf32> -> vector<8x32xf32>
    %c1_651 = arith.constant 1 : index
    %c0_652 = arith.constant 0 : index
    %c0_653 = arith.constant 0 : index
    %985 = vector.load %arg16[%c1_651, %c0_652, %c0_653] : memref<2x1x32xf32, #tpu.memory_space<vmem>>, vector<1x1x32xf32>
    %986 = vector.shape_cast %985 : vector<1x1x32xf32> to vector<1x32xf32>
    %987 = vector.broadcast %986 : vector<1x32xf32> to vector<8x32xf32>
    %988 = arith.mulf %834, %987 : vector<8x32xf32>
    %cst_654 = arith.constant dense<0.000000e+00> : vector<8xf32>
    %989 = vector.multi_reduction <add>, %988, %cst_654 [1] : vector<8x32xf32> to vector<8xf32>
    %990 = vector.shape_cast %989 : vector<8xf32> to vector<8x1xf32>
    %c1_655 = arith.constant 1 : index
    %c0_656 = arith.constant 0 : index
    %c0_657 = arith.constant 0 : index
    %991 = vector.load %arg17[%c1_655, %c0_656, %c0_657] : memref<2x32x1xf32, #tpu.memory_space<vmem>>, vector<1x32x1xf32>
    %992 = vector.shape_cast %991 : vector<1x32x1xf32> to vector<32x1xf32>
    %cst_658 = arith.constant dense<0.000000e+00> : vector<1x8xf32>
    %993 = tpu.matmul %992, %834, %cst_658 {dimension_numbers = #tpu.dot_dimension_numbers<[0], [1], [1], [0], [0, 1, 1, 0], [], []>} : vector<32x1xf32>, vector<8x32xf32>, vector<1x8xf32> -> vector<1x8xf32>
    %994 = vector.broadcast %990 : vector<8x1xf32> to vector<8x8xf32>
    %995 = vector.broadcast %993 : vector<1x8xf32> to vector<8x8xf32>
    %996 = arith.addf %994, %995 : vector<8x8xf32>
    %c0_659 = arith.constant 0 : index
    %c0_660 = arith.constant 0 : index
    %997 = vector.load %arg2[%c0_659, %c0_660] : memref<8x8xf32, #tpu.memory_space<vmem>>, vector<8x8xf32>
    %998 = arith.addf %996, %997 : vector<8x8xf32>
    %c1_661 = arith.constant 1 : index
    %c0_662 = arith.constant 0 : index
    %c0_663 = arith.constant 0 : index
    %999 = vector.load %arg18[%c1_661, %c0_662, %c0_663] : memref<2x1x1xf32, #tpu.memory_space<vmem>>, vector<1x1x1xf32>
    %1000 = vector.shape_cast %999 : vector<1x1x1xf32> to vector<1x1xf32>
    %1001 = vector.broadcast %1000 : vector<1x1xf32> to vector<8x8xf32>
    %1002 = arith.addf %998, %1001 : vector<8x8xf32>
    %cst_664 = arith.constant 0.000000e+00 : f32
    %1003 = vector.broadcast %cst_664 : f32 to vector<8x8xf32>
    %1004 = arith.cmpf oge, %1002, %1003 : vector<8x8xf32>
    %cst_665 = arith.constant 0.00999999977 : f32
    %1005 = vector.broadcast %cst_665 : f32 to vector<8x8xf32>
    %1006 = arith.mulf %1005, %1002 : vector<8x8xf32>
    %1007 = arith.select %1004, %1002, %1006 : vector<8x8xi1>, vector<8x8xf32>
    %c0_666 = arith.constant 0 : index
    %c0_667 = arith.constant 0 : index
    %1008 = vector.load %arg3[%c0_666, %c0_667] : memref<8x8xf32, #tpu.memory_space<vmem>>, vector<8x8xf32>
    %1009 = arith.mulf %1008, %1007 : vector<8x8xf32>
    %cst_668 = arith.constant 0.000000e+00 : f32
    %1010 = vector.broadcast %cst_668 : f32 to vector<8x8xf32>
    %1011 = arith.cmpf oeq, %1009, %1010 : vector<8x8xf32>
    %cst_669 = arith.constant -1.000000e+05 : f32
    %1012 = vector.broadcast %cst_669 : f32 to vector<8x8xf32>
    %1013 = arith.select %1011, %1012, %1009 : vector<8x8xi1>, vector<8x8xf32>
    %cst_670 = arith.constant dense<0xFF800000> : vector<8xf32>
    %1014 = vector.multi_reduction <maximumf>, %1013, %cst_670 [1] : vector<8x8xf32> to vector<8xf32>
    %1015 = vector.shape_cast %1014 : vector<8xf32> to vector<8x1xf32>
    %1016 = vector.broadcast %1015 : vector<8x1xf32> to vector<8x8xf32>
    %1017 = arith.subf %1013, %1016 : vector<8x8xf32>
    %1018 = math.exp %1017 : vector<8x8xf32>
    %cst_671 = arith.constant dense<0.000000e+00> : vector<8xf32>
    %1019 = vector.multi_reduction <add>, %1018, %cst_671 [1] : vector<8x8xf32> to vector<8xf32>
    %1020 = vector.shape_cast %1019 : vector<8xf32> to vector<8x1xf32>
    %1021 = tpu.reciprocal %1020 {approx = true} : vector<8x1xf32> -> vector<8x1xf32>
    %1022 = vector.broadcast %1021 : vector<8x1xf32> to vector<8x8xf32>
    %1023 = arith.mulf %1018, %1022 : vector<8x8xf32>
    %1024 = arith.mulf %1023, %1008 : vector<8x8xf32>
    %cst_672 = arith.constant dense<0.000000e+00> : vector<8x32xf32>
    %1025 = tpu.matmul %1024, %834, %cst_672 {dimension_numbers = #tpu.dot_dimension_numbers<[1], [0], [0], [1], [0, 0, 1, 1], [], []>} : vector<8x8xf32>, vector<8x32xf32>, vector<8x32xf32> -> vector<8x32xf32>
    %cst_673 = arith.constant 0.000000e+00 : f32
    %1026 = vector.broadcast %cst_673 : f32 to vector<8x1xf32>
    %c0_674 = arith.constant 0 : index
    %c0_675 = arith.constant 0 : index
    %1027 = vector.load %arg20[%c0_674, %c0_675] : memref<1x1xf32, #tpu.memory_space<vmem>>, vector<1x1xf32>
    %1028 = vector.broadcast %1027 : vector<1x1xf32> to vector<8x1xf32>
    %1029 = arith.addf %1026, %1028 : vector<8x1xf32>
    %c0_676 = arith.constant 0 : index
    %c0_677 = arith.constant 0 : index
    %c0_678 = arith.constant 0 : index
    %1030 = vector.load %arg19[%c0_676, %c0_677, %c0_678] : memref<5x1x32xf32, #tpu.memory_space<vmem>>, vector<1x1x32xf32>
    %1031 = vector.shape_cast %1030 : vector<1x1x32xf32> to vector<1x32xf32>
    %1032 = vector.broadcast %1031 : vector<1x32xf32> to vector<8x32xf32>
    %1033 = arith.mulf %834, %1032 : vector<8x32xf32>
    %cst_679 = arith.constant dense<0.000000e+00> : vector<8xf32>
    %1034 = vector.multi_reduction <add>, %1033, %cst_679 [1] : vector<8x32xf32> to vector<8xf32>
    %1035 = vector.shape_cast %1034 : vector<8xf32> to vector<8x1xf32>
    %1036 = arith.addf %1029, %1035 : vector<8x1xf32>
    %c1_680 = arith.constant 1 : index
    %c0_681 = arith.constant 0 : index
    %c0_682 = arith.constant 0 : index
    %1037 = vector.load %arg19[%c1_680, %c0_681, %c0_682] : memref<5x1x32xf32, #tpu.memory_space<vmem>>, vector<1x1x32xf32>
    %1038 = vector.shape_cast %1037 : vector<1x1x32xf32> to vector<1x32xf32>
    %1039 = vector.broadcast %1038 : vector<1x32xf32> to vector<8x32xf32>
    %1040 = arith.mulf %931, %1039 : vector<8x32xf32>
    %cst_683 = arith.constant dense<0.000000e+00> : vector<8xf32>
    %1041 = vector.multi_reduction <add>, %1040, %cst_683 [1] : vector<8x32xf32> to vector<8xf32>
    %1042 = vector.shape_cast %1041 : vector<8xf32> to vector<8x1xf32>
    %1043 = arith.addf %1036, %1042 : vector<8x1xf32>
    %c2_684 = arith.constant 2 : index
    %c0_685 = arith.constant 0 : index
    %c0_686 = arith.constant 0 : index
    %1044 = vector.load %arg19[%c2_684, %c0_685, %c0_686] : memref<5x1x32xf32, #tpu.memory_space<vmem>>, vector<1x1x32xf32>
    %1045 = vector.shape_cast %1044 : vector<1x1x32xf32> to vector<1x32xf32>
    %1046 = vector.broadcast %1045 : vector<1x32xf32> to vector<8x32xf32>
    %1047 = arith.mulf %984, %1046 : vector<8x32xf32>
    %cst_687 = arith.constant dense<0.000000e+00> : vector<8xf32>
    %1048 = vector.multi_reduction <add>, %1047, %cst_687 [1] : vector<8x32xf32> to vector<8xf32>
    %1049 = vector.shape_cast %1048 : vector<8xf32> to vector<8x1xf32>
    %1050 = arith.addf %1043, %1049 : vector<8x1xf32>
    %c3 = arith.constant 3 : index
    %c0_688 = arith.constant 0 : index
    %c0_689 = arith.constant 0 : index
    %1051 = vector.load %arg19[%c3, %c0_688, %c0_689] : memref<5x1x32xf32, #tpu.memory_space<vmem>>, vector<1x1x32xf32>
    %1052 = vector.shape_cast %1051 : vector<1x1x32xf32> to vector<1x32xf32>
    %1053 = vector.broadcast %1052 : vector<1x32xf32> to vector<8x32xf32>
    %1054 = arith.mulf %1025, %1053 : vector<8x32xf32>
    %cst_690 = arith.constant dense<0.000000e+00> : vector<8xf32>
    %1055 = vector.multi_reduction <add>, %1054, %cst_690 [1] : vector<8x32xf32> to vector<8xf32>
    %1056 = vector.shape_cast %1055 : vector<8xf32> to vector<8x1xf32>
    %1057 = arith.addf %1050, %1056 : vector<8x1xf32>
    %c4 = arith.constant 4 : index
    %c0_691 = arith.constant 0 : index
    %c0_692 = arith.constant 0 : index
    %1058 = vector.load %arg19[%c4, %c0_691, %c0_692] : memref<5x1x32xf32, #tpu.memory_space<vmem>>, vector<1x1x32xf32>
    %1059 = vector.shape_cast %1058 : vector<1x1x32xf32> to vector<1x32xf32>
    %1060 = vector.broadcast %1059 : vector<1x32xf32> to vector<8x32xf32>
    %1061 = arith.mulf %835, %1060 : vector<8x32xf32>
    %cst_693 = arith.constant dense<0.000000e+00> : vector<8xf32>
    %1062 = vector.multi_reduction <add>, %1061, %cst_693 [1] : vector<8x32xf32> to vector<8xf32>
    %1063 = vector.shape_cast %1062 : vector<8xf32> to vector<8x1xf32>
    %1064 = arith.addf %1057, %1063 : vector<8x1xf32>
    %c0_694 = arith.constant 0 : index
    %c0_695 = arith.constant 0 : index
    %1065 = vector.load %arg21[%c0_694, %c0_695] : memref<8x1xf32, #tpu.memory_space<vmem>>, vector<8x1xf32>
    tpu.vector_store %arg21[%c0_694, %c0_695], %1064 {strides = array<i32>} : memref<8x1xf32, #tpu.memory_space<vmem>>, vector<8x1xf32>,
    return
  }
}

</mosaic_0001>

<bundles_post_ra>
// kernel: forward.1
= control target key start
LH: loop header
LB: loop body
LE: loop exit
PB: predicated region body
PF: predicated region fallthrough
CT: control target
= control target key end

     0   :  { %s13417_s0 = inlined_call_operand.vmem [shape: f32[64,6], index: 0, kind: input, shape index: {}]   ;;  %s13418_s1 = inlined_call_operand.vmem [shape: f32[64,1], index: 1, kind: input, shape index: {}]   ;;  %s13419_s2 = inlined_call_operand.vmem [shape: f32[8,8], index: 2, kind: input, shape index: {}]   ;;  %s13420_s3 = inlined_call_operand.vmem [shape: f32[8,8], index: 3, kind: input, shape index: {}]   ;;  %s13421_s4 = inlined_call_operand.vmem [shape: f32[6,32], index: 4, kind: input, shape index: {}]   ;;  %s13422_s5 = inlined_call_operand.vmem [shape: f32[1,32], index: 5, kind: input, shape index: {}]   ;;  %s13423_s6 = inlined_call_operand.vmem [shape: f32[3,32,32], index: 6, kind: input, shape index: {}]   ;;  %s13424_s7 = inlined_call_operand.vmem [shape: f32[3,1,32], index: 7, kind: input, shape index: {}]   ;;  %s13425_s8 = inlined_call_operand.vmem [shape: f32[3,6,32], index: 8, kind: input, shape index: {}]   ;;  %s13426_s9 = inlined_call_operand.vmem [shape: f32[1,3,96,96], index: 9, kind: input, shape index: {}]   ;;  %s13427_s10 = inlined_call_operand.hbm [shape: f32[2,3,96,96], index: 10, kind: input, shape index: {}]   ;;  %s13428_s11 = inlined_call_operand.vmem [shape: f32[2,3,1,96], index: 11, kind: input, shape index: {}]   ;;  %s13429_s12 = inlined_call_operand.vmem [shape: f32[2,3,1,96], index: 12, kind: input, shape index: {}]   ;;  %s13430_s13 = inlined_call_operand.vmem [shape: f32[32,16], index: 13, kind: input, shape index: {}]   ;;  %s13431_s14 = inlined_call_operand.vmem [shape: f32[1,16], index: 14, kind: input, shape index: {}]   ;;  %s13432_s15 = inlined_call_operand.vmem [shape: f32[1,16], index: 15, kind: input, shape index: {}]   ;;  %s13433_s16 = inlined_call_operand.vmem [shape: f32[2,1,32], index: 16, kind: input, shape index: {}]   ;;  %s13434_s17 = inlined_call_operand.vmem [shape: f32[2,32,1], index: 17, kind: input, shape index: {}]   ;;  %s13435_s18 = inlined_call_operand.vmem [shape: f32[2,1,1], index: 18, kind: input, shape index: {}]   ;;  %s13436_s19 = inlined_call_operand.vmem [shape: f32[5,1,32], index: 19, kind: input, shape index: {}]   ;;  %s13437_s20 = inlined_call_operand.<no memory space> [shape: f32[1,1], index: 20, kind: input, shape index: {}]   ;;  %s13438_s21 = inlined_call_operand.vmem [shape: f32[8,1], index: 21, kind: output, shape index: {}]  }
   0x1   :  { %13445 = sst [smem:[#allocation23_spill]] %s13417_s0  ;;  %v26_v0 = vstv %s13437_s20 }
   0x2   :  { %13446 = sst [smem:[#allocation24_spill]] %s13418_s1  ;;  %27 = vst [vmem:[#allocation3] sm:$0x1] %v26_v0 }
   0x3   :  { %13447 = sst [smem:[#allocation25_spill]] %s13419_s2 }
   0x4   :  { %13448 = sst [smem:[#allocation26_spill]] %s13420_s3 }
   0x5   :  { %13449 = sst [smem:[#allocation27_spill]] %s13421_s4 }
   0x6   :  { %13450 = sst [smem:[#allocation28_spill]] %s13422_s5 }
   0x7   :  { %28 = vsyncpa [#allocation5], 0  ;;  %s11140_s26 = smov [#allocation4]   ;;  %s11116_s29 = scalar_lea.hbm %s13427_s10, 9216 }
   0x8   :  { %s54_s27 = sshll.u32 %s11140_s26, 4  ;;  %p11117_p0 = scmp.ne.s32.totalorder %s13427_s10, %s11116_s29  ;;  %s55_s27 = int_to_ptr.vmem [resolvable:$true] %s54_s27 }
   0x9   :  { %p11120_p1 = scmp.lt.u32.totalorder %s11116_s29, %s13427_s10 }
   0xb   :  { %p11122_p2 = pnand %p11120_p1, %p11117_p0 }
   0xd   :  { %11125 = shalt.err (!%p11122_p2)
}
   0xe   :  { %s11126_s20 = scalar_lea.vmem %s55_s27, 9216  ;;  %p11131_p4 = scmp.lt.s32.totalorder %s55_s27, %s55_s27 }
   0xf   :  { %p11127_p3 = scmp.ne.s32.totalorder %s55_s27, %s11126_s20  ;;  %p11132_p5 = scmp.lt.s32.totalorder %s11126_s20, %s11126_s20 }
  0x11   :  { %p11133_p6 = por %p11132_p5, %p11131_p4 }
  0x13   :  { %p11134_p7 = pnand %p11133_p6, %p11127_p3 }
  0x15   :  { %11137 = shalt.err (!%p11134_p7)
}
  0x16   :  { %s11141_s22 = smov 128   ;;  %s11142_s23 = smov 8  }
  0x17   :  { %60 = dma.hbm_to_vmem [thread:$0]  %s13427_s10, 9216, %s55_s27, [#allocation5], %s11141_s22, %s11141_s22, %s11142_s23  }
  0x18   :  { %11138 = dma.done.wait [#allocation5], 9216  }
  0x19   :  { %11139 = vsyncadd [#allocation5], 4294958080  ;;  %v11143_v1 = vmov 0   ;;  %vm125_vm0 = vcmask 1045504   ;;  %vm100_vm1 = vcmask 48128   ;;  %s13451_s26 = sld [smem:[#allocation27_spill]] }
  0x1a   :  { %10886 = vset.pattern.permute.xlu0 %v11143_v1  ;;  %10887 = vset.pattern.permute.xlu1 %v11143_v1  ;;  %s13452_s29 = sld [smem:[#allocation23_spill]]  ;;  %v439_v6 = vld [vmem:[%s13425_s8] sm:$0x3f]  ;;  %s13453_s23 = sld [smem:[#allocation24_spill]]  ;;  %v7304_v8 = vld [vmem:[%s13425_s8 + $0x8] sm:$0x3f] }
  0x1b   :  { %v7330_v14 = vld [vmem:[%s13425_s8 + $0x10] sm:$0x3f]  ;;  %v250_v15 = vld [vmem:[%s13423_s6] sm:$0xff]  ;;  %v251_v16 = vld [vmem:[%s13423_s6 + $0x8] sm:$0xff]  ;;  %v13441_v23 = vmov 0.0|0.0   ;;  %vm11145_vm2 = vmmov 0  }
  0x1c   :  { %v9908_v17 = vpack.c.bf16 %v251_v16, %v250_v15  ;;  %v252_v18 = vld [vmem:[%s13423_s6 + $0x10] sm:$0xff]  ;;  %v253_v19 = vld [vmem:[%s13423_s6 + $0x18] sm:$0xff]  ;;  %v1402_v20 = vld [vmem:[#allocation4 + $0x60] sm:$0xff]  ;;  %v13443_v43 = vmov 0.0   ;;  %s11147_s30 = smov 32   ;;  %s13454_s8 = sld [smem:[#allocation28_spill]] }
  0x1d   :  { %v9912_v21 = vpack.c.bf16 %v253_v19, %v252_v18  ;;  %v1403_v22 = vld [vmem:[#allocation4 + $0x68] sm:$0xff]  ;;  %v1404_v25 = vld [vmem:[#allocation4 + $0x70] sm:$0xff]  ;;  %v1405_v26 = vld [vmem:[#allocation4 + $0x78] sm:$0xff]  ;;  %vm254_vm3 = vcmask 261120   ;;  %s11148_s4 = smov 64   ;;  %vm620_vm4 = vcmask 523264  }
  0x1e   :  { %9909 = vmatprep.subr.bf16.mxu1 %v9908_v17  ;;  %v11367_v24 = vpack.c.bf16 %v1403_v22, %v1402_v20  ;;  %v11371_v27 = vpack.c.bf16 %v1405_v26, %v1404_v25  ;;  %v7290_v28 = vld [vmem:[%s13423_s6 + $0x20] sm:$0xff]  ;;  %v7291_v29 = vld [vmem:[%s13423_s6 + $0x28] sm:$0xff]  ;;  %v1408_v34 = vld [vmem:[#allocation4 + $0x90] sm:$0xff]  ;;  %vm1327_vm5 = vcmask 785408   ;;  %vm6858_vm9 = vcmask 64512   ;;  %s13496_s3 = sld [smem:[#allocation26_spill]] }
  0x1f   :  { %v92_v2 = vld [vmem:[%s13451_s26] sm:$0x3f]  ;;  %9911 = vmatpush3.bf16.msra.mxu1 %v9908_v17  ;;  %v11379_v30 = vpack.c.bf16 %v7291_v29, %v7290_v28  ;;  %v1407_v32 = vld [vmem:[#allocation4 + $0x88] sm:$0xff]  ;;  %v1412_v40 = vld [vmem:[#allocation4 + $0xb0] sm:$0xff]  ;;  %vm6536_vm13 = vcmask 130048   ;;  %vm7254_vm14 = vcmask 7168  }
  0x20   :  { %v84_v3 = vld [vmem:[%s13452_s29] sm:$0xff]  ;;  %v85_v4 = vld [vmem:[%s13452_s29 + $0x8] sm:$0xff]  ;;  %8343 = vmatprep.subr.msk.mxu0 %vm125_vm0, %v92_v2  ;;  %v86_v5 = vld [vmem:[%s13452_s29 + $0x10] sm:$0xff]  ;;  %9913 = vmatprep.subr.bf16.mxu1 %v9912_v21 }
  0x21   :  { %8345 = vmatprep.mubr.msk.f32.mxu0 %vm100_vm1, %v84_v3  ;;  %8344 = vmatpush3.msk.msra.mxu0 %vm125_vm0, %v92_v2  ;;  %v242_v7 = vld [vmem:[%s13453_s23] sm:$0xff]  ;;  %v87_v9 = vld [vmem:[%s13452_s29 + $0x18] sm:$0xff]  ;;  %v89_v11 = vld [vmem:[%s13452_s29 + $0x28] sm:$0xff] }
  0x22   :  { %8346 = vmatmul.mubr.msk.f32.vlgmr.msra.gmra.mrb[0].mxu0 %vm100_vm1, %v85_v4  ;;  %8377 = vmatprep.subr.msk.mxu0 %vm125_vm0, %v439_v6  ;;  %v88_v10 = vld [vmem:[%s13452_s29 + $0x20] sm:$0xff]  ;;  %v90_v12 = vld [vmem:[%s13452_s29 + $0x30] sm:$0xff]  ;;  %v91_v13 = vld [vmem:[%s13452_s29 + $0x38] sm:$0xff] }
  0x23   :  { %8348 = vmatprep.mubr.msk.f32.mxu0 %vm100_vm1, %v86_v5  ;;  %8378 = vmatpush3.msk.msra.mxu0 %vm125_vm0, %v439_v6  ;;  %v1406_v31 = vld [vmem:[#allocation4 + $0x80] sm:$0xff]  ;;  %v1409_v35 = vld [vmem:[#allocation4 + $0x98] sm:$0xff]  ;;  %v1411_v38 = vld [vmem:[#allocation4 + $0xa8] sm:$0xff] }
  0x24   :  { %387 = vperm.xlu0 %10886, %v242_v7   ;;  %8411 = vmatprep.subr.msk.mxu0 %vm125_vm0, %v7304_v8  ;;  %v11383_v33 = vpack.c.bf16 %v1407_v32, %v1406_v31  ;;  %v11388_v36 = vpack.c.bf16 %v1409_v35, %v1408_v34  ;;  %v1410_v37 = vld [vmem:[#allocation4 + $0xa0] sm:$0xff]  ;;  %v1413_v41 = vld [vmem:[#allocation4 + $0xb8] sm:$0xff]  ;;  %v1309_v46 = vld [vmem:[#allocation4 + $0x8] sm:$0xff] }
  0x25   :  { %9915 = vmatpush3.bf16.msra.mxu1 %v9912_v21  ;;  %v11392_v39 = vpack.c.bf16 %v1411_v38, %v1410_v37  ;;  %v11396_v42 = vpack.c.bf16 %v1413_v41, %v1412_v40  ;;  %v11408_v44 = vld [vmem:[%s13424_s7] ss:$0 sm:$0xff]  ;;  %v1308_v45 = vld [vmem:[#allocation4] sm:$0xff]  ;;  %v1310_v50 = vld [vmem:[#allocation4 + $0x10] sm:$0xff] }
  0x26   :  { %8349 = vmatmul.mubr.msk.f32.gmra.mrb[2].mxu0 %vm100_vm1, %v87_v9  ;;  %9917 = vmatprep.subr.bf16.mxu1 %v11379_v30  ;;  %v11412_v48 = vpack.c.bf16 %v1309_v46, %v1308_v45  ;;  %v1311_v51 = vld [vmem:[#allocation4 + $0x18] sm:$0xff]  ;;  %v1312_v53 = vld [vmem:[#allocation4 + $0x20] sm:$0xff]  ;;  %v1313_v54 = vld [vmem:[#allocation4 + $0x28] sm:$0xff] }
  0x27   :  { %8351 = vmatprep.mubr.msk.f32.mxu0 %vm100_vm1, %v88_v10  ;;  %v11419_v52 = vpack.c.bf16 %v1311_v51, %v1310_v50  ;;  %v11423_v55 = vpack.c.bf16 %v1313_v54, %v1312_v53  ;;  %v1314_v56 = vld [vmem:[#allocation4 + $0x30] sm:$0xff]  ;;  %v1315_v57 = vld [vmem:[#allocation4 + $0x38] sm:$0xff]  ;;  %v1316_v59 = vld [vmem:[#allocation4 + $0x40] sm:$0xff] }
  0x28   :  { %v11427_v58 = vpack.c.bf16 %v1315_v57, %v1314_v56  ;;  %v1317_v60 = vld [vmem:[#allocation4 + $0x48] sm:$0xff]  ;;  %v1318_v62 = vld [vmem:[#allocation4 + $0x50] sm:$0xff]  ;;  %v1319_v63 = vld [vmem:[#allocation4 + $0x58] sm:$0xff] }
  0x29   :  { %v11431_v61 = vpack.c.bf16 %v1317_v60, %v1316_v59  ;;  %v11435_v0 = vpack.c.bf16 %v1319_v63, %v1318_v62  ;;  %v7261_v1 = vld [vmem:[%s13454_s8] ss:$0 sm:$0xff]  ;;  %v7293_v15 = vld [vmem:[%s13423_s6 + $0x38] sm:$0xff]  ;;  %v11457_v25 = vld [vmem:[%s13424_s7 + $0x1] ss:$0 sm:$0xff] }
  0x2a   :  { %8352 = vmatmul.mubr.msk.f32.gmra.mrb[4].mxu0 %vm100_vm1, %v89_v11  ;;  %v7316_v26 = vld [vmem:[%s13423_s6 + $0x40] sm:$0xff]  ;;  %v7317_v28 = vld [vmem:[%s13423_s6 + $0x48] sm:$0xff]  ;;  %v7318_v54 = vld [vmem:[%s13423_s6 + $0x50] sm:$0xff] }
  0x2b   :  { %8354 = vmatprep.mubr.msk.f32.mxu0 %vm100_vm1, %v90_v12  ;;  %v9924_v35 = vpack.c.bf16 %v7317_v28, %v7316_v26  ;;  %v11474_v38 = vld [vmem:[%s13424_s7 + $0x2] ss:$0 sm:$0xff]  ;;  %v7319_v56 = vld [vmem:[%s13423_s6 + $0x58] sm:$0xff] }
  0x2c   :  { %v9928_v60 = vpack.c.bf16 %v7319_v56, %v7318_v54  ;;  %v1503_v28 = vld [vmem:[#allocation4 + $0x110] sm:$0xff] }
  0x2e   :  { %8355 = vmatmul.mubr.msk.f32.gmra.mrb[6].mxu0 %vm100_vm1, %v91_v13 }
  0x2f   :  { %8379 = vmatprep.mubr.msk.f32.mxu0 %vm100_vm1, %v84_v3 }
  0x32   :  { %8380 = vmatmul.mubr.msk.f32.vlgmr.msra.gmra.mrb[8].mxu0 %vm100_vm1, %v85_v4 }
  0x33   :  { %8382 = vmatprep.mubr.msk.f32.mxu0 %vm100_vm1, %v86_v5  ;;  %8412 = vmatpush3.msk.msra.mxu0 %vm125_vm0, %v7304_v8 }
  0x34   :  { %8445 = vmatprep.subr.msk.mxu0 %vm125_vm0, %v7330_v14 }
  0x36   :  { %8383 = vmatmul.mubr.msk.f32.gmra.mrb[10].mxu0 %vm100_vm1, %v87_v9 }
  0x37   :  { %8385 = vmatprep.mubr.msk.f32.mxu0 %vm100_vm1, %v88_v10 }
  0x3a   :  { %8386 = vmatmul.mubr.msk.f32.gmra.mrb[12].mxu0 %vm100_vm1, %v89_v11 }
  0x3b   :  { %8388 = vmatprep.mubr.msk.f32.mxu0 %vm100_vm1, %v90_v12 }
  0x3e   :  { %8389 = vmatmul.mubr.msk.f32.gmra.mrb[14].mxu0 %vm100_vm1, %v91_v13 }
  0x3f   :  { %8413 = vmatprep.mubr.msk.f32.mxu0 %vm100_vm1, %v84_v3 }
  0x42   :  { %8414 = vmatmul.mubr.msk.f32.vlgmr.msra.gmra.mrb[16].mxu0 %vm100_vm1, %v85_v4 }
  0x43   :  { %8416 = vmatprep.mubr.msk.f32.mxu0 %vm100_vm1, %v86_v5  ;;  %8446 = vmatpush3.msk.msra.mxu0 %vm125_vm0, %v7330_v14  ;;  %v7292_v14 = vld [vmem:[%s13423_s6 + $0x30] sm:$0xff] }
  0x44   :  { %9950 = vmatprep.subr.bf16.mxu0 %v13441_v23  ;;  %v9920_v21 = vpack.c.bf16 %v7293_v15, %v7292_v14  ;;  %v1497_v15 = vld [vmem:[#allocation4 + $0xe0] sm:$0xff] }
  0x46   :  { %8417 = vmatmul.mubr.msk.f32.gmra.mrb[18].mxu0 %vm100_vm1, %v87_v9 }
  0x47   :  { %8419 = vmatprep.mubr.msk.f32.mxu0 %vm100_vm1, %v88_v10 }
  0x4a   :  { %8420 = vmatmul.mubr.msk.f32.gmra.mrb[20].mxu0 %vm100_vm1, %v89_v11 }
  0x4b   :  { %8422 = vmatprep.mubr.msk.f32.mxu0 %vm100_vm1, %v90_v12 }
  0x4e   :  { %8423 = vmatmul.mubr.msk.f32.gmra.mrb[22].mxu0 %vm100_vm1, %v91_v13 }
  0x4f   :  { %8447 = vmatprep.mubr.msk.f32.mxu0 %vm100_vm1, %v84_v3 }
  0x52   :  { %8448 = vmatmul.mubr.msk.f32.vlgmr.msra.gmra.mrb[24].mxu0 %vm100_vm1, %v85_v4 }
  0x53   :  { %8450 = vmatprep.mubr.msk.f32.mxu0 %vm100_vm1, %v86_v5  ;;  %9952 = vmatpush3.bf16.msra.mxu0 %v11367_v24 }
  0x54   :  { %9953 = vmatprep.subr.bf16.mxu0 %v13441_v23 }
  0x56   :  { %8451 = vmatmul.mubr.msk.f32.gmra.mrb[26].mxu0 %vm100_vm1, %v87_v9 }
  0x57   :  { %8453 = vmatprep.mubr.msk.f32.mxu0 %vm100_vm1, %v88_v10  ;;  %9955 = vmatpush3.bf16.msra.mxu0 %v11371_v27 }
  0x58   :  { %9956 = vmatprep.subr.bf16.mxu0 %v13441_v23 }
  0x5a   :  { %8454 = vmatmul.mubr.msk.f32.gmra.mrb[28].mxu0 %vm100_vm1, %v89_v11 }
  0x5b   :  { %8456 = vmatprep.mubr.msk.f32.mxu0 %vm100_vm1, %v90_v12  ;;  %9958 = vmatpush3.bf16.msra.mxu0 %v11383_v33 }
  0x5c   :  { %9959 = vmatprep.subr.bf16.mxu0 %v13441_v23 }
  0x5e   :  { %8457 = vmatmul.mubr.msk.f32.gmra.mrb[30].mxu0 %vm100_vm1, %v91_v13 }
  0x5f   :  { %9961 = vmatpush3.bf16.msra.mxu0 %v11388_v36  ;;  %8510 = vmatprep.mubr.msk.f32.mxu0 %vm11145_vm2, %v13443_v43 }
  0x60   :  { %9962 = vmatprep.subr.bf16.mxu0 %v13441_v23 }
  0x63   :  { %9964 = vmatpush3.bf16.msra.mxu0 %v11392_v39 }
  0x64   :  { %9965 = vmatprep.subr.bf16.mxu0 %v13441_v23 }
  0x67   :  { %9967 = vmatpush3.bf16.msra.mxu0 %v11396_v42 }
  0x68   :  { %9986 = vmatprep.subr.bf16.mxu0 %v13441_v23 }
  0x6a   :  { %8511 = vmatmul.mubr.f32.vlgmr.msra.gmra.mrb[32].mxu0 %v13443_v43 }
  0x6b   :  { %8564 = vmatprep.mubr.msk.f32.mxu0 %vm11145_vm2, %v13443_v43  ;;  %9988 = vmatpush3.bf16.msra.mxu0 %v11412_v48 }
  0x6c   :  { %9989 = vmatprep.subr.bf16.mxu0 %v13441_v23 }
  0x6f   :  { %9991 = vmatpush3.bf16.msra.mxu0 %v11419_v52 }
  0x70   :  { %9992 = vmatprep.subr.bf16.mxu0 %v13441_v23 }
  0x73   :  { %9994 = vmatpush3.bf16.msra.mxu0 %v11423_v55 }
  0x74   :  { %9995 = vmatprep.subr.bf16.mxu0 %v13441_v23 }
  0x77   :  { %9997 = vmatpush3.bf16.msra.mxu0 %v11427_v58 }
  0x78   :  { %9998 = vmatprep.subr.bf16.mxu0 %v13441_v23 }
  0x7b   :  { %10000 = vmatpush3.bf16.msra.mxu0 %v11431_v61 }
  0x7c   :  { %10001 = vmatprep.subr.bf16.mxu0 %v13441_v23 }
  0x7f   :  { %10003 = vmatpush3.bf16.msra.mxu0 %v11435_v0 }
  0x80   :  { %10022 = vmatprep.subr.bf16.mxu0 %v13441_v23 }
  0xa3   :  { %v11410_v47 = vpop.permute.xlu0 %387 }
  0xa4   :  { %v431_v49 = vmul.f32 %v11408_v44, %v11410_v47  ;;  %v762_v34 = vmul.f32 %v11457_v25, %v11410_v47  ;;  %v1094_v45 = vmul.f32 %v11474_v38, %v11410_v47  ;;  %v243_v47 = vld [vmem:[%s13453_s23 + $0x8] sm:$0xff] }
  0xa6   :  { %556 = vrot.lane.b32.xlu0 %v431_v49, %s11147_s30 }
  0xf5   :  { %v8347_v2 = vpop.f32.mrb[0].mxu0 }
  0xf6   :  { %v201_v3 = vadd.f32 %v8347_v2, %v7261_v1  ;;  %v195_v4 = vpop.f32.mrb[1].mxu0 }
  0xf7   :  { %v196_v5 = vadd.f32 %v7261_v1, %v195_v4 }
  0xf9   :  { %10888 = vtanh.f32 %v196_v5  ;;  %v8350_v6 = vpop.f32.mrb[2].mxu0 }
  0xfa   :  { %10890 = vtanh.f32 %v201_v3  ;;  %v211_v7 = vadd.f32 %v8350_v6, %v7261_v1  ;;  %v205_v8 = vpop.f32.mrb[3].mxu0 }
  0xfb   :  { %v206_v9 = vadd.f32 %v7261_v1, %v205_v8 }
  0xfd   :  { %10892 = vtanh.f32 %v206_v9  ;;  %v8353_v10 = vpop.f32.mrb[4].mxu0  ;;  %v1493_v9 = vld [vmem:[#allocation4 + $0xc0] sm:$0xff] }
  0xfe   :  { %10894 = vtanh.f32 %v211_v7  ;;  %v221_v11 = vadd.f32 %v8353_v10, %v7261_v1  ;;  %v215_v12 = vpop.f32.mrb[5].mxu0  ;;  %v1494_v10 = vld [vmem:[#allocation4 + $0xc8] sm:$0xff] }
  0xff   :  { %v216_v13 = vadd.f32 %v7261_v1, %v215_v12  ;;  %v1495_v12 = vld [vmem:[#allocation4 + $0xd0] sm:$0xff] }
 0x101   :  { %10896 = vtanh.f32 %v216_v13  ;;  %v8356_v16 = vpop.f32.mrb[6].mxu0  ;;  %v1496_v13 = vld [vmem:[#allocation4 + $0xd8] sm:$0xff] }
 0x102   :  { %10898 = vtanh.f32 %v221_v11  ;;  %v231_v17 = vadd.f32 %v8356_v16, %v7261_v1  ;;  %v225_v18 = vpop.f32.mrb[7].mxu0  ;;  %v11558_v11 = vpack.c.bf16 %v1494_v10, %v1493_v9  ;;  %v11563_v14 = vpack.c.bf16 %v1496_v13, %v1495_v12  ;;  %v1498_v16 = vld [vmem:[#allocation4 + $0xe8] sm:$0xff] }
 0x103   :  { %v11448_v19 = vpop.eup %10888  ;;  %v226_v20 = vadd.f32 %v7261_v1, %v225_v18  ;;  %v1499_v18 = vld [vmem:[#allocation4 + $0xf0] sm:$0xff] }
 0x104   :  { %v11450_v22 = vpop.eup %10890  ;;  %8365 = vmatprep.mubr.msk.f32.mxu1 %vm254_vm3, %v11448_v19 }
 0x105   :  { %10900 = vtanh.f32 %v226_v20  ;;  %8366 = vmatmul.mubr.msk.f32.vlgmr.msra.gmra.mrb[0].mxu1 %vm254_vm3, %v11450_v22  ;;  %v8381_v29 = vpop.f32.mrb[8].mxu0 }
 0x106   :  { %10902 = vtanh.f32 %v231_v17  ;;  %9919 = vmatpush3.bf16.msra.mxu1 %v11379_v30  ;;  %v509_v31 = vpop.f32.mrb[9].mxu0  ;;  %v11569_v17 = vpack.c.bf16 %v1498_v16, %v1497_v15 }
 0x107   :  { %v10893_v32 = vpop.eup %10892  ;;  %588 = vrot.lane.b32.xlu1 %v509_v31, %s11148_s4  ;;  %9921 = vmatprep.subr.bf16.mxu1 %v9920_v21 }
 0x108   :  { %v10895_v37 = vpop.eup %10894  ;;  %8368 = vmatprep.mubr.msk.f32.mxu1 %vm254_vm3, %v10893_v32 }
 0x109   :  { %8369 = vmatmul.mubr.msk.f32.gmra.mrb[2].mxu1 %vm254_vm3, %v10895_v37  ;;  %v11478_v30 = vpop.f32.mrb[10].mxu0 }
 0x10a   :  { %9923 = vmatpush3.bf16.msra.mxu1 %v9920_v21  ;;  %v11480_v40 = vpop.f32.mrb[11].mxu0  ;;  %v1501_v21 = vld [vmem:[#allocation4 + $0x100] sm:$0xff] }
 0x10b   :  { %v10897_v41 = vpop.eup %10896  ;;  %888 = vrot.lane.b32.xlu1 %v762_v34, %s11147_s30  ;;  %9925 = vmatprep.subr.bf16.mxu1 %v9924_v35 }
 0x10c   :  { %v10899_v46 = vpop.eup %10898  ;;  %8371 = vmatprep.mubr.msk.f32.mxu1 %vm254_vm3, %v10897_v41 }
 0x10d   :  { %8372 = vmatmul.mubr.msk.f32.gmra.mrb[4].mxu1 %vm254_vm3, %v10899_v46  ;;  %v11487_v49 = vpop.f32.mrb[12].mxu0 }
 0x10e   :  { %v11489_v50 = vpop.f32.mrb[13].mxu0 }
 0x10f   :  { %v10901_v51 = vpop.eup %10900  ;;  %1220 = vrot.lane.b32.xlu1 %v1094_v45, %s11147_s30 }
 0x110   :  { %v10903_v53 = vpop.eup %10902  ;;  %8374 = vmatprep.mubr.msk.f32.mxu1 %vm254_vm3, %v10901_v51 }
 0x111   :  { %8375 = vmatmul.mubr.msk.f32.gmra.mrb[6].mxu1 %vm254_vm3, %v10903_v53  ;;  %v11503_v57 = vpop.f32.mrb[14].mxu0 }
 0x112   :  { %13455 = vst [vmem:[#allocation7_spill] sm:$0xff] %v11503_v57  ;;  %8399 = vmatprep.mubr.msk.f32.mxu1 %vm254_vm3, %v11448_v19  ;;  %v11507_v59 = vpop.f32.mrb[15].mxu0 }
 0x113   :  { %13456 = vst [vmem:[#allocation8_spill] sm:$0xff] %v11507_v59  ;;  %392 = vperm.xlu1 %10887, %v243_v47  }
 0x115   :  { %8400 = vmatmul.mubr.msk.f32.vlgmr.msra.gmra.mrb[8].mxu1 %vm254_vm3, %v11450_v22  ;;  %v8415_v62 = vpop.f32.mrb[16].mxu0 }
 0x116   :  { %9927 = vmatpush3.bf16.msra.mxu1 %v9924_v35  ;;  %8402 = vmatprep.mubr.msk.f32.mxu1 %vm254_vm3, %v10893_v32  ;;  %v841_v63 = vpop.f32.mrb[17].mxu0 }
 0x117   :  { %9929 = vmatprep.subr.bf16.mxu1 %v9928_v60  ;;  %920 = vrot.lane.b32.xlu0 %v841_v63, %s11148_s4 }
 0x118   :  { %590 = vrot.lane.b32.xlu1 %v8381_v29, %s11148_s4  ;;  %v1504_v29 = vld [vmem:[#allocation4 + $0x118] sm:$0xff]  ;;  %v557_v16 = vpop.permute.xlu0 %556 }
 0x119   :  { %8403 = vmatmul.mubr.msk.f32.gmra.mrb[10].mxu1 %vm254_vm3, %v10895_v37  ;;  %v11515_v1 = vpop.f32.mrb[18].mxu0  ;;  %v11581_v31 = vpack.c.bf16 %v1504_v29, %v1503_v28  ;;  %v11647_v28 = vld [vmem:[%s13428_s11 + $0x1] ss:$0 sm:$0xff] }
 0x11a   :  { %8405 = vmatprep.mubr.msk.f32.mxu1 %vm254_vm3, %v10897_v41  ;;  %9931 = vmatpush3.bf16.msra.mxu1 %v9928_v60  ;;  %v11518_v2 = vpop.f32.mrb[19].mxu0 }
 0x11b   :  { %9932 = vmatprep.subr.bf16.mxu1 %v13441_v23 }
 0x11c   :  { %922 = vrot.lane.b32.xlu1 %v8415_v62, %s11148_s4 }
 0x11d   :  { %8406 = vmatmul.mubr.msk.f32.gmra.mrb[12].mxu1 %vm254_vm3, %v10899_v46  ;;  %v11523_v3 = vpop.f32.mrb[20].mxu0 }
 0x11e   :  { %8408 = vmatprep.mubr.msk.f32.mxu1 %vm254_vm3, %v10901_v51  ;;  %v11526_v4 = vpop.f32.mrb[21].mxu0 }
 0x121   :  { %8409 = vmatmul.mubr.msk.f32.gmra.mrb[14].mxu1 %vm254_vm3, %v10903_v53  ;;  %v11529_v5 = vpop.f32.mrb[22].mxu0 }
 0x122   :  { %13457 = vst [vmem:[#allocation9_spill] sm:$0xff] %v11529_v5  ;;  %8433 = vmatprep.mubr.msk.f32.mxu1 %vm254_vm3, %v11448_v19  ;;  %v11533_v6 = vpop.f32.mrb[23].mxu0  ;;  %v1500_v19 = vld [vmem:[#allocation4 + $0xf8] sm:$0xff] }
 0x123   :  { %13458 = vst [vmem:[#allocation10_spill] sm:$0xff] %v11533_v6  ;;  %v11573_v20 = vpack.c.bf16 %v1500_v19, %v1499_v18 }
 0x125   :  { %8434 = vmatmul.mubr.msk.f32.vlgmr.msra.gmra.mrb[16].mxu1 %vm254_vm3, %v11450_v22  ;;  %v8449_v7 = vpop.f32.mrb[24].mxu0  ;;  %v1502_v22 = vld [vmem:[#allocation4 + $0x108] sm:$0xff] }
 0x126   :  { %9934 = vmatpush3.bf16.msra.mxu1 %v11412_v48  ;;  %8436 = vmatprep.mubr.msk.f32.mxu1 %vm254_vm3, %v10893_v32  ;;  %v1173_v8 = vpop.f32.mrb[25].mxu0  ;;  %v11577_v26 = vpack.c.bf16 %v1502_v22, %v1501_v21 }
 0x127   :  { %9935 = vmatprep.subr.bf16.mxu1 %v13441_v23  ;;  %1252 = vrot.lane.b32.xlu0 %v1173_v8, %s11148_s4 }
 0x128   :  { %1254 = vrot.lane.b32.xlu1 %v8449_v7, %s11148_s4  ;;  %v244_v7 = vld [vmem:[%s13453_s23 + $0x10] sm:$0xff] }
 0x129   :  { %8437 = vmatmul.mubr.msk.f32.gmra.mrb[18].mxu1 %vm254_vm3, %v10895_v37  ;;  %v11597_v32 = vpop.f32.mrb[26].mxu0 }
 0x12a   :  { %9937 = vmatpush3.bf16.msra.mxu1 %v11419_v52  ;;  %8439 = vmatprep.mubr.msk.f32.mxu1 %vm254_vm3, %v10897_v41  ;;  %v1183_v34 = vpop.f32.mrb[27].mxu0 }
 0x12b   :  { %9938 = vmatprep.subr.bf16.mxu1 %v13441_v23 }
 0x12d   :  { %8440 = vmatmul.mubr.msk.f32.gmra.mrb[20].mxu1 %vm254_vm3, %v10899_v46  ;;  %v11600_v35 = vpop.f32.mrb[28].mxu0 }
 0x12e   :  { %9940 = vmatpush3.bf16.msra.mxu1 %v11423_v55  ;;  %8442 = vmatprep.mubr.msk.f32.mxu1 %vm254_vm3, %v10901_v51  ;;  %v11603_v37 = vpop.f32.mrb[29].mxu0 }
 0x12f   :  { %9941 = vmatprep.subr.bf16.mxu1 %v13441_v23 }
 0x131   :  { %8443 = vmatmul.mubr.msk.f32.gmra.mrb[22].mxu1 %vm254_vm3, %v10903_v53  ;;  %v11605_v41 = vpop.f32.mrb[30].mxu0 }
 0x132   :  { %9943 = vmatpush3.bf16.msra.mxu1 %v11427_v58  ;;  %8483 = vmatprep.mubr.msk.f32.mxu1 %vm11145_vm2, %v13443_v43  ;;  %13459 = vst [vmem:[#allocation11_spill] sm:$0xff] %v11605_v41  ;;  %v11608_v45 = vpop.f32.mrb[31].mxu0 }
 0x133   :  { %9944 = vmatprep.subr.bf16.mxu1 %v13441_v23  ;;  %13460 = vst [vmem:[#allocation12_spill] sm:$0xff] %v11608_v45 }
 0x136   :  { %9946 = vmatpush3.bf16.msra.mxu1 %v11431_v61 }
 0x137   :  { %9947 = vmatprep.subr.bf16.mxu1 %v13441_v23 }
 0x13a   :  { %9949 = vmatpush3.bf16.msra.mxu1 %v11435_v0 }
 0x13b   :  { %9968 = vmatprep.subr.bf16.mxu1 %v13441_v23 }
 0x13d   :  { %8484 = vmatmul.mubr.f32.vlgmr.msra.gmra.mrb[24].mxu1 %v13443_v43  ;;  %v1488_v46 = vpop.f32.mrb[32].mxu0 }
 0x13e   :  { %9970 = vmatpush3.bf16.msra.mxu1 %v11558_v11  ;;  %8537 = vmatprep.mubr.msk.f32.mxu1 %vm11145_vm2, %v13443_v43  ;;  %v8512_v51 = vpop.f32.mrb[33].mxu0 }
 0x13f   :  { %9971 = vmatprep.subr.bf16.mxu1 %v13441_v23 }
 0x142   :  { %9973 = vmatpush3.bf16.msra.mxu1 %v11563_v14 }
 0x143   :  { %9974 = vmatprep.subr.bf16.mxu1 %v13441_v23 }
 0x146   :  { %9976 = vmatpush3.bf16.msra.mxu1 %v11569_v17 }
 0x147   :  { %9977 = vmatprep.subr.bf16.mxu1 %v13441_v23 }
 0x14a   :  { %9979 = vmatpush3.bf16.msra.mxu1 %v11573_v20 }
 0x14b   :  { %9980 = vmatprep.subr.bf16.mxu1 %v13441_v23 }
 0x14e   :  { %9982 = vmatpush3.bf16.msra.mxu1 %v11577_v26 }
 0x14f   :  { %9983 = vmatprep.subr.bf16.mxu1 %v13441_v23 }
 0x152   :  { %9985 = vmatpush3.bf16.msra.mxu1 %v11581_v31 }
 0x153   :  { %10004 = vmatprep.subr.bf16.mxu1 %v13441_v23 }
 0x155   :  { %8538 = vmatmul.mubr.f32.vlgmr.msra.gmra.mrb[26].mxu1 %v13443_v43 }
 0x156   :  { %10006 = vmatpush3.bf16.msra.mxu1 %v11367_v24  ;;  %8591 = vmatprep.mubr.msk.f32.mxu1 %vm11145_vm2, %v13443_v43 }
 0x157   :  { %10007 = vmatprep.subr.bf16.mxu1 %v13441_v23 }
 0x15a   :  { %10009 = vmatpush3.bf16.msra.mxu1 %v11371_v27 }
 0x15b   :  { %10010 = vmatprep.subr.bf16.mxu1 %v13441_v23 }
 0x15e   :  { %10012 = vmatpush3.bf16.msra.mxu1 %v11383_v33 }
 0x15f   :  { %10013 = vmatprep.subr.bf16.mxu1 %v13441_v23 }
 0x162   :  { %10015 = vmatpush3.bf16.msra.mxu1 %v11388_v36 }
 0x163   :  { %10016 = vmatprep.subr.bf16.mxu1 %v13441_v23 }
 0x166   :  { %10018 = vmatpush3.bf16.msra.mxu1 %v11392_v39 }
 0x167   :  { %10019 = vmatprep.subr.bf16.mxu1 %v13441_v23 }
 0x16a   :  { %10021 = vmatpush3.bf16.msra.mxu1 %v11396_v42 }
 0x16b   :  { %10040 = vmatprep.subr.bf16.mxu1 %v13441_v23 }
 0x179   :  { %v589_v53 = vpop.permute.xlu1 %588 }
 0x17d   :  { %v889_v47 = vpop.permute.xlu1 %888 }
 0x181   :  { %v11611_v54 = vpop.permute.xlu1 %1220 }
 0x189   :  { %v921_v21 = vpop.permute.xlu0 %920 }
 0x192   :  { %v393_v56 = vpop.permute.xlu1 %392 }
 0x193   :  { %v432_v60 = vmul.f32 %v11408_v44, %v393_v56  ;;  %v763_v62 = vmul.f32 %v11457_v25, %v393_v56  ;;  %v1095_v63 = vmul.f32 %v11474_v38, %v393_v56 }
 0x195   :  { %558 = vrot.lane.b32.xlu0 %v432_v60, %s11147_s30 }
 0x199   :  { %890 = vrot.lane.b32.xlu0 %v763_v62, %s11147_s30 }
 0x19d   :  { %1222 = vrot.lane.b32.xlu0 %v1095_v63, %s11147_s30 }
 0x1a1   :  { %397 = vperm.xlu0 %10886, %v244_v7  }
 0x1a5   :  { %592 = vrot.lane.b32.xlu0 %v11480_v40, %s11148_s4  ;;  %v11642_v40 = vld [vmem:[%s13429_s12 + $0x1] ss:$0 sm:$0xff] }
 0x1a9   :  { %924 = vrot.lane.b32.xlu0 %v11518_v2, %s11148_s4 }
 0x1ad   :  { %1256 = vrot.lane.b32.xlu0 %v1183_v34, %s11148_s4  ;;  %v1489_v34 = vadd.f32 %v11642_v40, %v1488_v46 }
 0x1d8   :  { %v8367_v8 = vpop.f32.mrb[0].mxu1 }
 0x1d9   :  { %v345_v9 = vpop.f32.mrb[1].mxu1 }
 0x1dc   :  { %v11627_v10 = vpop.f32.mrb[2].mxu1 }
 0x1dd   :  { %v11629_v12 = vpop.f32.mrb[3].mxu1 }
 0x1e0   :  { %v11631_v13 = vpop.f32.mrb[4].mxu1 }
 0x1e1   :  { %13461 = vst [vmem:[#allocation13_spill] sm:$0xff] %v11631_v13  ;;  %v11633_v15 = vpop.f32.mrb[5].mxu1 }
 0x1e4   :  { %v11635_v18 = vpop.f32.mrb[6].mxu1 }
 0x1e5   :  { %13462 = vst [vmem:[#allocation14_spill] sm:$0xff] %v11635_v18  ;;  %v11637_v19 = vpop.f32.mrb[7].mxu1 }
 0x1e6   :  { %13463 = vst [vmem:[#allocation15_spill] sm:$0xff] %v11637_v19  ;;  %v1253_v19 = vpop.permute.xlu0 %1252 }
 0x1e8   :  { %v8401_v2 = vpop.f32.mrb[8].mxu1 }
 0x1e9   :  { %v715_v22 = vpop.f32.mrb[9].mxu1 }
 0x1ea   :  { %v944_v29 = vsel %vm254_vm3, %v715_v22, %v889_v47 }
 0x1eb   :  { %v952_v51 = vsel %vm620_vm4, %v944_v29, %v921_v21 }
 0x1ec   :  { %v968_v56 = vadd.f32 %v11647_v28, %v952_v51  ;;  %v11653_v60 = vpop.f32.mrb[10].mxu1 }
 0x1ed   :  { %v11655_v62 = vpop.f32.mrb[11].mxu1 }
 0x1ee   :  { %v1589_v63 = vadd.f32 %v1489_v34, %v968_v56 }
 0x1f0   :  { %v11657_v7 = vpop.f32.mrb[12].mxu1  ;;  %v1590_v13 = vsub.f32 0.0, %v1589_v63 }
 0x1f1   :  { %13464 = vst [vmem:[#allocation16_spill] sm:$0xff] %v11657_v7  ;;  %v11659_v23 = vpop.f32.mrb[13].mxu1 }
 0x1f2   :  { %v1591_v45 = vmul.f32 1.442695, %v1590_v13 }
 0x1f4   :  { %v11661_v43 = vpop.f32.mrb[14].mxu1 }
 0x1f5   :  { %13465 = vst [vmem:[#allocation17_spill] sm:$0xff] %v11661_v43  ;;  %v11663_v18 = vpop.f32.mrb[15].mxu1 }
 0x1f6   :  { %13466 = vst [vmem:[#allocation18_spill] sm:$0xff] %v11663_v18  ;;  %v612_v18 = vsel %vm254_vm3, %v345_v9, %v557_v16 }
 0x1f7   :  { %v621_v7 = vsel %vm620_vm4, %v612_v18, %v589_v53 }
 0x1f8   :  { %v8435_v47 = vpop.f32.mrb[16].mxu1 }
 0x1f9   :  { %v1047_v22 = vpop.f32.mrb[17].mxu1 }
 0x1fa   :  { %v1276_v13 = vsel %vm254_vm3, %v1047_v22, %v11611_v54 }
 0x1fc   :  { %v11665_v46 = vpop.f32.mrb[18].mxu1 }
 0x1fd   :  { %v11667_v21 = vpop.f32.mrb[19].mxu1 }
 0x200   :  { %v11669_v29 = vpop.f32.mrb[20].mxu1 }
 0x201   :  { %13467 = vst [vmem:[#allocation19_spill] sm:$0xff] %v11669_v29  ;;  %v11671_v51 = vpop.f32.mrb[21].mxu1  ;;  %v11688_v29 = vld [vmem:[%s13428_s11] ss:$0 sm:$0xff] }
 0x202   :  { %13468 = vst [vmem:[#allocation20_spill] sm:$0xff] %v11671_v51 }
 0x204   :  { %v11673_v34 = vpop.f32.mrb[22].mxu1 }
 0x205   :  { %13469 = vst [vmem:[#allocation21_spill] sm:$0xff] %v11673_v34  ;;  %v11675_v56 = vpop.f32.mrb[23].mxu1  ;;  %v11693_v34 = vld [vmem:[%s13429_s12] ss:$0 sm:$0xff] }
 0x206   :  { %13470 = vst [vmem:[#allocation22_spill] sm:$0xff] %v11675_v56 }
 0x207   :  { %v559_v41 = vpop.permute.xlu0 %558 }
 0x208   :  { %v11678_v43 = vsel %vm254_vm3, %v8367_v8, %v559_v41 }
 0x20b   :  { %v891_v5 = vpop.permute.xlu0 %890 }
 0x20c   :  { %v11682_v57 = vsel %vm254_vm3, %v8401_v2, %v891_v5  ;;  %v636_v5 = vadd.f32 %v11688_v29, %v621_v7 }
 0x20f   :  { %v1223_v41 = vpop.permute.xlu0 %1222 }
 0x210   :  { %v11696_v8 = vsel %vm254_vm3, %v8435_v47, %v1223_v41  ;;  %v1397_v9 = vpop.f32.mrb[24].mxu1 }
 0x211   :  { %v1398_v16 = vadd.f32 %v11693_v34, %v1397_v9  ;;  %v8485_v53 = vpop.f32.mrb[25].mxu1 }
 0x213   :  { %v1583_v18 = vadd.f32 %v1398_v16, %v636_v5  ;;  %v1284_v16 = vsel %vm620_vm4, %v1276_v13, %v1253_v19 }
 0x215   :  { %v1584_v2 = vsub.f32 0.0, %v1583_v18 }
 0x217   :  { %v1585_v56 = vmul.f32 1.442695, %v1584_v2 }
 0x219   :  { %10904 = vpow2.f32 %v1585_v56 }
 0x21a   :  { %10906 = vpow2.f32 %v1591_v45  ;;  %v11708_v45 = vld [vmem:[%s13429_s12 + $0x2] ss:$0 sm:$0xff] }
 0x220   :  { %v398_v6 = vpop.permute.xlu0 %397 }
 0x221   :  { %v433_v59 = vmul.f32 %v11408_v44, %v398_v6  ;;  %v764_v41 = vmul.f32 %v11457_v25, %v398_v6  ;;  %v1096_v9 = vmul.f32 %v11474_v38, %v398_v6  ;;  %v11720_v6 = vld [vmem:[%s13428_s11 + $0x2] ss:$0 sm:$0xff] }
 0x222   :  { %v1300_v54 = vadd.f32 %v11720_v6, %v1284_v16 }
 0x223   :  { %v10905_v51 = vpop.eup %10904  ;;  %560 = vrot.lane.b32.xlu1 %v433_v59, %s11147_s30  ;;  %v245_v59 = vld [vmem:[%s13453_s23 + $0x18] sm:$0xff] }
 0x224   :  { %v1587_v47 = vadd.f32 1.0, %v10905_v51  ;;  %v10907_v63 = vpop.eup %10906 }
 0x225   :  { %v1593_v51 = vadd.f32 1.0, %v10907_v63 }
 0x226   :  { %10908 = vrcp.f32 %v1587_v47 }
 0x227   :  { %892 = vrot.lane.b32.xlu1 %v764_v41, %s11147_s30  ;;  %10910 = vrcp.f32 %v1593_v51 }
 0x228   :  { %v1579_v7 = vpop.f32.mrb[26].mxu1 }
 0x229   :  { %v8539_v5 = vpop.f32.mrb[27].mxu1  ;;  %v1580_v56 = vadd.f32 %v11708_v45, %v1579_v7 }
 0x22a   :  { %v11813_v5 = vpop.permute.xlu0 %592 }
 0x22b   :  { %1224 = vrot.lane.b32.xlu1 %v1096_v9, %s11147_s30 }
 0x22f   :  { %402 = vperm.xlu1 %10887, %v245_v59  }
 0x230   :  { %v10909_v53 = vpop.eup %10908 }
 0x231   :  { %v1595_v22 = vmul.f32 %v10909_v53, %v1580_v56  ;;  %v10911_v2 = vpop.eup %10910 }
 0x232   :  { %v1598_v47 = vsub.f32 1.0, %v10911_v2  ;;  %v1600_v7 = vmul.f32 0.0, %v10911_v2 }
 0x233   :  { %v1596_v18 = vadd.f32 %v1595_v22, %v1300_v54  ;;  %594 = vrot.lane.b32.xlu1 %v11478_v30, %s11148_s4  ;;  %v13471_v30 = vmov 0.0  }
 0x235   :  { %10912 = vtanh.f32 %v1596_v18 }
 0x237   :  { %926 = vrot.lane.b32.xlu1 %v11515_v1, %s11148_s4  ;;  %v13472_v1 = vmov 0.0|0.0  }
 0x23b   :  { %1258 = vrot.lane.b32.xlu1 %v11597_v32, %s11148_s4 }
 0x23f   :  { %v10913_v19 = vpop.eup %10912 }
 0x240   :  { %v1599_v41 = vmul.f32 %v10913_v19, %v1598_v47 }
 0x242   :  { %v11730_v9 = vadd.f32 %v1600_v7, %v1599_v41 }
 0x244   :  { %1602 = vst.msk [vmem:[#allocation2] sm:$0xff] %vm1327_vm5, %v11730_v9  ;;  %8565 = vmatmul.mubr.msk.f32.vlgmr.msra.gmra.mrb[34].mxu0 %vm1327_vm5, %v11730_v9  ;;  %8592 = vmatmul.mubr.msk.f32.vlgmr.msra.gmra.mrb[28].mxu1 %vm1327_vm5, %v11730_v9 }
 0x245   :  { %10024 = vmatpush3.bf16.msra.mxu0 %v11558_v11  ;;  %8618 = vmatprep.mubr.msk.f32.mxu0 %vm11145_vm2, %v13471_v30 }
 0x246   :  { %10025 = vmatprep.subr.bf16.mxu0 %v13472_v1  ;;  %10042 = vmatpush3.bf16.msra.mxu1 %v11412_v48 }
 0x247   :  { %10043 = vmatprep.subr.bf16.mxu1 %v13472_v1  ;;  %8645 = vmatprep.mubr.msk.f32.mxu1 %vm11145_vm2, %v13471_v30 }
 0x249   :  { %10027 = vmatpush3.bf16.msra.mxu0 %v11563_v14 }
 0x24a   :  { %10028 = vmatprep.subr.bf16.mxu0 %v13472_v1  ;;  %10045 = vmatpush3.bf16.msra.mxu1 %v11419_v52 }
 0x24b   :  { %10046 = vmatprep.subr.bf16.mxu1 %v13472_v1 }
 0x24d   :  { %10030 = vmatpush3.bf16.msra.mxu0 %v11569_v17 }
 0x24e   :  { %10031 = vmatprep.subr.bf16.mxu0 %v13472_v1  ;;  %10048 = vmatpush3.bf16.msra.mxu1 %v11423_v55 }
 0x24f   :  { %10049 = vmatprep.subr.bf16.mxu1 %v13472_v1 }
 0x251   :  { %10033 = vmatpush3.bf16.msra.mxu0 %v11573_v20 }
 0x252   :  { %10034 = vmatprep.subr.bf16.mxu0 %v13472_v1  ;;  %10051 = vmatpush3.bf16.msra.mxu1 %v11427_v58 }
 0x253   :  { %10052 = vmatprep.subr.bf16.mxu1 %v13472_v1 }
 0x255   :  { %10036 = vmatpush3.bf16.msra.mxu0 %v11577_v26 }
 0x256   :  { %10037 = vmatprep.subr.bf16.mxu0 %v13472_v1  ;;  %10054 = vmatpush3.bf16.msra.mxu1 %v11431_v61 }
 0x257   :  { %10055 = vmatprep.subr.bf16.mxu1 %v13472_v1 }
 0x259   :  { %10039 = vmatpush3.bf16.msra.mxu0 %v11581_v31 }
 0x25a   :  { %10058 = vmatprep.subr.bf16.mxu0 %v13472_v1  ;;  %10057 = vmatpush3.bf16.msra.mxu1 %v11435_v0 }
 0x25b   :  { %10076 = vmatprep.subr.bf16.mxu1 %v13472_v1 }
 0x25c   :  { %8619 = vmatmul.mubr.msk.f32.vlgmr.msra.gmra.mrb[36].mxu0 %vm1327_vm5, %v11730_v9 }
 0x25d   :  { %10060 = vmatpush3.bf16.msra.mxu0 %v11367_v24  ;;  %8672 = vmatprep.mubr.msk.f32.mxu0 %vm11145_vm2, %v13471_v30  ;;  %v591_v24 = vpop.permute.xlu1 %590 }
 0x25e   :  { %10061 = vmatprep.subr.bf16.mxu0 %v13472_v1 }
 0x261   :  { %10063 = vmatpush3.bf16.msra.mxu0 %v11371_v27  ;;  %v923_v27 = vpop.permute.xlu1 %922 }
 0x262   :  { %10064 = vmatprep.subr.bf16.mxu0 %v13472_v1 }
 0x265   :  { %10066 = vmatpush3.bf16.msra.mxu0 %v11383_v33  ;;  %v1255_v48 = vpop.permute.xlu1 %1254 }
 0x266   :  { %10067 = vmatprep.subr.bf16.mxu0 %v13472_v1 }
 0x269   :  { %10069 = vmatpush3.bf16.msra.mxu0 %v11388_v36 }
 0x26a   :  { %10070 = vmatprep.subr.bf16.mxu0 %v13472_v1 }
 0x26d   :  { %10072 = vmatpush3.bf16.msra.mxu0 %v11392_v39 }
 0x26e   :  { %10073 = vmatprep.subr.bf16.mxu0 %v13472_v1 }
 0x271   :  { %10075 = vmatpush3.bf16.msra.mxu0 %v11396_v42 }
 0x272   :  { %10094 = vmatprep.subr.bf16.mxu0 %v13472_v1 }
 0x295   :  { %v561_v52 = vpop.permute.xlu1 %560 }
 0x296   :  { %v11784_v33 = vsel %vm254_vm3, %v11629_v12, %v561_v52  ;;  %v246_v12 = vld [vmem:[%s13453_s23 + $0x20] sm:$0xff] }
 0x299   :  { %v893_v55 = vpop.permute.xlu1 %892 }
 0x29a   :  { %v11788_v36 = vsel %vm254_vm3, %v11655_v62, %v893_v55  ;;  %v622_v62 = vsel %vm620_vm4, %v11678_v43, %v591_v24  ;;  %v11819_v43 = vpop.permute.xlu0 %924 }
 0x29b   :  { %v637_v59 = vadd.f32 %v11688_v29, %v622_v62 }
 0x29d   :  { %v1225_v39 = vpop.permute.xlu1 %1224 }
 0x29e   :  { %v11792_v58 = vsel %vm254_vm3, %v11667_v21, %v1225_v39  ;;  %v953_v21 = vsel %vm620_vm4, %v11682_v57, %v923_v27  ;;  %v11821_v22 = vpop.permute.xlu0 %1256 }
 0x2ae   :  { %v403_v42 = vpop.permute.xlu1 %402 }
 0x2af   :  { %v434_v61 = vmul.f32 %v11408_v44, %v403_v42  ;;  %v765_v0 = vmul.f32 %v11457_v25, %v403_v42  ;;  %v1097_v32 = vmul.f32 %v11474_v38, %v403_v42 }
 0x2b1   :  { %562 = vrot.lane.b32.xlu0 %v434_v61, %s11147_s30 }
 0x2b5   :  { %894 = vrot.lane.b32.xlu0 %v765_v0, %s11147_s30 }
 0x2b9   :  { %1226 = vrot.lane.b32.xlu0 %v1097_v32, %s11147_s30 }
 0x2bd   :  { %407 = vperm.xlu0 %10886, %v246_v12  }
 0x2c1   :  { %596 = vrot.lane.b32.xlu0 %v11489_v50, %s11148_s4  ;;  %v969_v50 = vadd.f32 %v11647_v28, %v953_v21 }
 0x2c5   :  { %928 = vrot.lane.b32.xlu0 %v11526_v4, %s11148_s4 }
 0x2c9   :  { %1260 = vrot.lane.b32.xlu0 %v11603_v37, %s11148_s4 }
 0x317   :  { %v1691_v63 = vpop.f32.mrb[34].mxu0  ;;  %v1780_v13 = vpop.f32.mrb[28].mxu1 }
 0x318   :  { %v1692_v51 = vadd.f32 %v11693_v34, %v1691_v63  ;;  %v1781_v4 = vadd.f32 %v11642_v40, %v1780_v13  ;;  %v8566_v56 = vpop.f32.mrb[35].mxu0  ;;  %v8593_v37 = vpop.f32.mrb[29].mxu1 }
 0x31a   :  { %v1873_v16 = vadd.f32 %v1692_v51, %v637_v59  ;;  %v1879_v53 = vadd.f32 %v1781_v4, %v969_v50 }
 0x31c   :  { %v1874_v54 = vsub.f32 0.0, %v1873_v16  ;;  %v1880_v18 = vsub.f32 0.0, %v1879_v53  ;;  %v2275_v16 = vld [vmem:[#allocation4 + $0x60] sm:$0xff]  ;;  %v2276_v53 = vld [vmem:[#allocation4 + $0x68] sm:$0xff] }
 0x31e   :  { %v1875_v57 = vmul.f32 1.442695, %v1874_v54  ;;  %v1881_v2 = vmul.f32 1.442695, %v1880_v18  ;;  %v13473_v54 = vld [vmem:[#allocation20_spill] sm:$0xff]  ;;  %v11903_v18 = vpack.c.bf16 %v2276_v53, %v2275_v16 }
 0x320   :  { %10914 = vpow2.f32 %v1875_v57 }
 0x321   :  { %10916 = vpow2.f32 %v1881_v2 }
 0x323   :  { %v563_v47 = vpop.permute.xlu0 %562 }
 0x324   :  { %v11825_v19 = vsel %vm254_vm3, %v11627_v10, %v563_v47  ;;  %v1285_v10 = vsel %vm620_vm4, %v11696_v8, %v1255_v48  ;;  %v2277_v47 = vld [vmem:[#allocation4 + $0x70] sm:$0xff] }
 0x327   :  { %v895_v41 = vpop.permute.xlu0 %894 }
 0x328   :  { %v11829_v7 = vsel %vm254_vm3, %v11653_v60, %v895_v41  ;;  %v1301_v60 = vadd.f32 %v11720_v6, %v1285_v10  ;;  %v2278_v41 = vld [vmem:[#allocation4 + $0x78] sm:$0xff]  ;;  %v2189_v10 = vld [vmem:[#allocation4 + $0x30] sm:$0xff] }
 0x32a   :  { %v10915_v24 = vpop.eup %10914 }
 0x32b   :  { %v1877_v27 = vadd.f32 1.0, %v10915_v24  ;;  %v1227_v52 = vpop.permute.xlu0 %1226  ;;  %v10917_v61 = vpop.eup %10916  ;;  %v11911_v24 = vpack.c.bf16 %v2278_v41, %v2277_v47  ;;  %v954_v47 = vsel %vm620_vm4, %v11788_v36, %v11819_v43 }
 0x32c   :  { %v11833_v55 = vsel %vm254_vm3, %v11665_v46, %v1227_v52  ;;  %v1883_v0 = vadd.f32 1.0, %v10917_v61  ;;  %v2188_v52 = vld [vmem:[#allocation4 + $0x28] sm:$0xff] }
 0x32d   :  { %10918 = vrcp.f32 %v1877_v27  ;;  %v2187_v27 = vld [vmem:[#allocation4 + $0x20] sm:$0xff]  ;;  %v2280_v61 = vld [vmem:[#allocation4 + $0x88] sm:$0xff] }
 0x32e   :  { %10920 = vrcp.f32 %v1883_v0 }
 0x32f   :  { %v1869_v39 = vpop.f32.mrb[36].mxu0 }
 0x330   :  { %v8620_v42 = vpop.f32.mrb[37].mxu0  ;;  %v1870_v32 = vadd.f32 %v11708_v45, %v1869_v39  ;;  %v11916_v39 = vpack.c.bf16 %v2188_v52, %v2187_v27 }
 0x331   :  { %v2279_v42 = vld [vmem:[#allocation4 + $0x80] sm:$0xff] }
 0x332   :  { %v11919_v0 = vpack.c.bf16 %v2280_v61, %v2279_v42  ;;  %v970_v61 = vadd.f32 %v11647_v28, %v954_v47 }
 0x337   :  { %v10919_v12 = vpop.eup %10918 }
 0x338   :  { %v1885_v62 = vmul.f32 %v10919_v12, %v1870_v32  ;;  %v10921_v59 = vpop.eup %10920  ;;  %v2190_v32 = vld [vmem:[#allocation4 + $0x38] sm:$0xff] }
 0x339   :  { %v1888_v48 = vsub.f32 1.0, %v10921_v59  ;;  %v1890_v4 = vmul.f32 %v10921_v59, %v11730_v9  ;;  %v11924_v12 = vpack.c.bf16 %v2190_v32, %v2189_v10  ;;  %v2283_v59 = vld [vmem:[#allocation4 + $0xa0] sm:$0xff] }
 0x33a   :  { %v1886_v21 = vadd.f32 %v1885_v62, %v1301_v60  ;;  %v2281_v60 = vld [vmem:[#allocation4 + $0x90] sm:$0xff]  ;;  %v2282_v62 = vld [vmem:[#allocation4 + $0x98] sm:$0xff] }
 0x33c   :  { %10922 = vtanh.f32 %v1886_v21  ;;  %v408_v63 = vpop.permute.xlu0 %407  ;;  %v11927_v21 = vpack.c.bf16 %v2282_v62, %v2281_v60 }
 0x33d   :  { %v435_v46 = vmul.f32 %v11408_v44, %v408_v63  ;;  %v766_v13 = vmul.f32 %v11457_v25, %v408_v63  ;;  %v1098_v8 = vmul.f32 %v11474_v38, %v408_v63  ;;  %v247_v44 = vld [vmem:[%s13453_s23 + $0x28] sm:$0xff] }
 0x33e   :  { %v2191_v63 = vld [vmem:[#allocation4 + $0x40] sm:$0xff] }
 0x33f   :  { %564 = vrot.lane.b32.xlu1 %v435_v46, %s11147_s30  ;;  %v2192_v46 = vld [vmem:[#allocation4 + $0x48] sm:$0xff] }
 0x340   :  { %v11979_v36 = vpop.permute.xlu0 %596 }
 0x343   :  { %896 = vrot.lane.b32.xlu1 %v766_v13, %s11147_s30  ;;  %v11932_v13 = vpack.c.bf16 %v2192_v46, %v2191_v63 }
 0x346   :  { %v10923_v50 = vpop.eup %10922 }
 0x347   :  { %1228 = vrot.lane.b32.xlu1 %v1098_v8, %s11147_s30  ;;  %v1889_v51 = vmul.f32 %v10923_v50, %v1888_v48  ;;  %v2284_v8 = vld [vmem:[#allocation4 + $0xa8] sm:$0xff] }
 0x348   :  { %v11935_v48 = vpack.c.bf16 %v2284_v8, %v2283_v59 }
 0x349   :  { %v11846_v56 = vadd.f32 %v1890_v4, %v1889_v51  ;;  %v2193_v51 = vld [vmem:[#allocation4 + $0x50] sm:$0xff]  ;;  %v2194_v4 = vld [vmem:[#allocation4 + $0x58] sm:$0xff] }
 0x34b   :  { %1892 = vst.msk [vmem:[#allocation2 + $0x8] sm:$0xff] %vm1327_vm5, %v11846_v56  ;;  %8646 = vmatmul.mubr.msk.f32.vlgmr.msra.gmra.mrb[30].mxu1 %vm1327_vm5, %v11846_v56  ;;  %8673 = vmatmul.mubr.msk.f32.vlgmr.msra.gmra.mrb[38].mxu0 %vm1327_vm5, %v11846_v56 }
 0x34c   :  { %10078 = vmatpush3.bf16.msra.mxu1 %v11558_v11  ;;  %412 = vperm.xlu1 %10887, %v247_v44   ;;  %v2285_v44 = vld [vmem:[#allocation4 + $0xb0] sm:$0xff] }
 0x34d   :  { %10079 = vmatprep.subr.bf16.mxu1 %v13472_v1  ;;  %8699 = vmatprep.mubr.msk.f32.mxu1 %vm11145_vm2, %v13471_v30 }
 0x34e   :  { %8726 = vmatprep.mubr.msk.f32.mxu0 %vm11145_vm2, %v13471_v30 }
 0x350   :  { %10081 = vmatpush3.bf16.msra.mxu1 %v11563_v14  ;;  %598 = vrot.lane.b32.xlu1 %v11487_v49, %s11148_s4  ;;  %v11883_v49 = vpop.permute.xlu1 %594 }
 0x351   :  { %10082 = vmatprep.subr.bf16.mxu1 %v13472_v1 }
 0x354   :  { %10084 = vmatpush3.bf16.msra.mxu1 %v11569_v17  ;;  %930 = vrot.lane.b32.xlu1 %v11523_v3, %s11148_s4  ;;  %v11885_v3 = vpop.permute.xlu1 %926 }
 0x355   :  { %10085 = vmatprep.subr.bf16.mxu1 %v13472_v1 }
 0x358   :  { %10087 = vmatpush3.bf16.msra.mxu1 %v11573_v20  ;;  %1262 = vrot.lane.b32.xlu1 %v11600_v35, %s11148_s4  ;;  %v11887_v11 = vpop.permute.xlu1 %1258  ;;  %v2184_v35 = vld [vmem:[#allocation4 + $0x8] sm:$0xff] }
 0x359   :  { %10088 = vmatprep.subr.bf16.mxu1 %v13472_v1 }
 0x35c   :  { %10090 = vmatpush3.bf16.msra.mxu1 %v11577_v26 }
 0x35d   :  { %10091 = vmatprep.subr.bf16.mxu1 %v13472_v1 }
 0x360   :  { %10093 = vmatpush3.bf16.msra.mxu1 %v11581_v31  ;;  %v2183_v31 = vld [vmem:[#allocation4] sm:$0xff] }
 0x361   :  { %10112 = vmatprep.subr.bf16.mxu1 %v13472_v1  ;;  %v11897_v37 = vpack.c.bf16 %v2184_v35, %v2183_v31  ;;  %v2286_v31 = vld [vmem:[#allocation4 + $0xb8] sm:$0xff]  ;;  %v11946_v35 = vpack.c.bf16 %v2194_v4, %v2193_v51 }
 0x363   :  { %8700 = vmatmul.mubr.msk.f32.vlgmr.msra.gmra.mrb[32].mxu1 %vm1327_vm5, %v11846_v56  ;;  %10096 = vmatpush3.bf16.msra.mxu0 %v11897_v37 }
 0x364   :  { %8753 = vmatprep.mubr.msk.f32.mxu1 %vm11145_vm2, %v13471_v30  ;;  %10114 = vmatpush3.bf16.msra.mxu1 %v11903_v18 }
 0x365   :  { %10097 = vmatprep.subr.bf16.mxu0 %v13472_v1  ;;  %10115 = vmatprep.subr.bf16.mxu1 %v13472_v1 }
 0x368   :  { %10117 = vmatpush3.bf16.msra.mxu1 %v11911_v24 }
 0x369   :  { %10118 = vmatprep.subr.bf16.mxu1 %v13472_v1 }
 0x36c   :  { %10120 = vmatpush3.bf16.msra.mxu1 %v11919_v0 }
 0x36d   :  { %10121 = vmatprep.subr.bf16.mxu1 %v13472_v1 }
 0x370   :  { %10123 = vmatpush3.bf16.msra.mxu1 %v11927_v21 }
 0x371   :  { %10124 = vmatprep.subr.bf16.mxu1 %v13472_v1 }
 0x374   :  { %10126 = vmatpush3.bf16.msra.mxu1 %v11935_v48 }
 0x375   :  { %10127 = vmatprep.subr.bf16.mxu1 %v13472_v1 }
 0x3b1   :  { %v565_v14 = vpop.permute.xlu1 %564 }
 0x3b2   :  { %v11891_v17 = vsel %vm254_vm3, %v11633_v15, %v565_v14  ;;  %v2186_v15 = vld [vmem:[#allocation4 + $0x18] sm:$0xff] }
 0x3b3   :  { %v11941_v14 = vld [vmem:[%s13424_s7] ss:$0 sm:$0xff] }
 0x3b5   :  { %v897_v20 = vpop.permute.xlu1 %896 }
 0x3b6   :  { %v11895_v26 = vsel %vm254_vm3, %v11659_v23, %v897_v20  ;;  %v2185_v23 = vld [vmem:[#allocation4 + $0x10] sm:$0xff] }
 0x3b7   :  { %v11908_v2 = vpack.c.bf16 %v2186_v15, %v2185_v23  ;;  %v13474_v23 = vld [vmem:[#allocation8_spill] sm:$0xff] }
 0x3b8   :  { %v13476_v15 = vld [vmem:[#allocation12_spill] sm:$0xff] }
 0x3b9   :  { %v1229_v9 = vpop.permute.xlu1 %1228  ;;  %10099 = vmatpush3.bf16.msra.mxu0 %v11908_v2 }
 0x3ba   :  { %v11901_v57 = vsel %vm254_vm3, %v13473_v54, %v1229_v9  ;;  %10100 = vmatprep.subr.bf16.mxu0 %v13472_v1  ;;  %v11949_v9 = vpack.c.bf16 %v2286_v31, %v2285_v44  ;;  %v248_v54 = vld [vmem:[%s13453_s23 + $0x30] sm:$0xff]  ;;  %v1286_v44 = vsel %vm620_vm4, %v11792_v58, %v11821_v22 }
 0x3bc   :  { %10129 = vmatpush3.bf16.msra.mxu1 %v11949_v9 }
 0x3bd   :  { %10102 = vmatpush3.bf16.msra.mxu0 %v11916_v39  ;;  %10148 = vmatprep.subr.bf16.mxu1 %v13472_v1 }
 0x3be   :  { %10103 = vmatprep.subr.bf16.mxu0 %v13472_v1 }
 0x3c1   :  { %10105 = vmatpush3.bf16.msra.mxu0 %v11924_v12 }
 0x3c2   :  { %10106 = vmatprep.subr.bf16.mxu0 %v13472_v1 }
 0x3c5   :  { %10108 = vmatpush3.bf16.msra.mxu0 %v11932_v13 }
 0x3c6   :  { %10109 = vmatprep.subr.bf16.mxu0 %v13472_v1 }
 0x3c9   :  { %10111 = vmatpush3.bf16.msra.mxu0 %v11946_v35 }
 0x3ca   :  { %10130 = vmatprep.subr.bf16.mxu0 %v13472_v1 }
 0x3cb   :  { %v413_v50 = vpop.permute.xlu1 %412 }
 0x3cc   :  { %v436_v20 = vmul.f32 %v11941_v14, %v413_v50  ;;  %v767_v16 = vmul.f32 %v11457_v25, %v413_v50  ;;  %v1099_v53 = vmul.f32 %v11474_v38, %v413_v50  ;;  %v13475_v25 = vld [vmem:[#allocation10_spill] sm:$0xff]  ;;  %v623_v38 = vsel %vm620_vm4, %v11784_v33, %v11813_v5 }
 0x3cd   :  { %v638_v52 = vadd.f32 %v11688_v29, %v623_v38 }
 0x3ce   :  { %566 = vrot.lane.b32.xlu0 %v436_v20, %s11147_s30 }
 0x3d2   :  { %898 = vrot.lane.b32.xlu0 %v767_v16, %s11147_s30 }
 0x3d6   :  { %1230 = vrot.lane.b32.xlu0 %v1099_v53, %s11147_s30  ;;  %v1302_v53 = vadd.f32 %v11720_v6, %v1286_v44 }
 0x3da   :  { %417 = vperm.xlu0 %10886, %v248_v54  }
 0x3de   :  { %600 = vrot.lane.b32.xlu0 %v13474_v23, %s11148_s4 }
 0x3e2   :  { %932 = vrot.lane.b32.xlu0 %v13475_v25, %s11148_s4 }
 0x3e6   :  { %1264 = vrot.lane.b32.xlu0 %v13476_v15, %s11148_s4  ;;  %v13477_v15 = vld [vmem:[#allocation13_spill] sm:$0xff] }
 0x41e   :  { %v1981_v41 = vpop.f32.mrb[30].mxu1  ;;  %v2070_v27 = vpop.f32.mrb[38].mxu0 }
 0x41f   :  { %v1982_v42 = vadd.f32 %v11693_v34, %v1981_v41  ;;  %v2071_v10 = vadd.f32 %v11642_v40, %v2070_v27  ;;  %v8647_v32 = vpop.f32.mrb[31].mxu1  ;;  %v8674_v60 = vpop.f32.mrb[39].mxu0  ;;  %v13478_v41 = vld [vmem:[#allocation16_spill] sm:$0xff] }
 0x420   :  { %v11981_v34 = vpop.permute.xlu0 %928  ;;  %v2365_v32 = vld [vmem:[#allocation4 + $0xc8] sm:$0xff] }
 0x421   :  { %v2163_v62 = vadd.f32 %v1982_v42, %v638_v52  ;;  %v2169_v63 = vadd.f32 %v2071_v10, %v970_v61  ;;  %v13479_v52 = vld [vmem:[#allocation19_spill] sm:$0xff] }
 0x422   :  { %v2364_v10 = vld [vmem:[#allocation4 + $0xc0] sm:$0xff] }
 0x423   :  { %v2164_v46 = vsub.f32 0.0, %v2163_v62  ;;  %v2170_v5 = vsub.f32 0.0, %v2169_v63 }
 0x424   :  { %v11986_v20 = vpop.permute.xlu0 %1260 }
 0x425   :  { %v2165_v33 = vmul.f32 1.442695, %v2164_v46  ;;  %v2171_v59 = vmul.f32 1.442695, %v2170_v5  ;;  %v12003_v46 = vpack.c.bf16 %v2365_v32, %v2364_v10  ;;  %v2366_v5 = vld [vmem:[#allocation4 + $0xd0] sm:$0xff]  ;;  %v13482_v32 = vld [vmem:[#allocation11_spill] sm:$0xff] }
 0x426   :  { %v13481_v10 = vld [vmem:[#allocation9_spill] sm:$0xff] }
 0x427   :  { %10924 = vpow2.f32 %v2165_v33 }
 0x428   :  { %10926 = vpow2.f32 %v2171_v59  ;;  %v2367_v59 = vld [vmem:[#allocation4 + $0xd8] sm:$0xff] }
 0x431   :  { %v10925_v43 = vpop.eup %10924 }
 0x432   :  { %v2167_v8 = vadd.f32 1.0, %v10925_v43  ;;  %v10927_v40 = vpop.eup %10926  ;;  %v12014_v43 = vpack.c.bf16 %v2367_v59, %v2366_v5  ;;  %v13483_v59 = vld [vmem:[#allocation15_spill] sm:$0xff] }
 0x433   :  { %v2173_v4 = vadd.f32 1.0, %v10927_v40  ;;  %v2371_v40 = vld [vmem:[#allocation4 + $0xf8] sm:$0xff] }
 0x434   :  { %10928 = vrcp.f32 %v2167_v8  ;;  %v2369_v8 = vld [vmem:[#allocation4 + $0xe8] sm:$0xff] }
 0x435   :  { %10930 = vrcp.f32 %v2173_v4 }
 0x436   :  { %v2159_v50 = vpop.f32.mrb[32].mxu1 }
 0x437   :  { %v8701_v51 = vpop.f32.mrb[33].mxu1  ;;  %v2160_v31 = vadd.f32 %v11708_v45, %v2159_v50 }
 0x438   :  { %v2370_v51 = vld [vmem:[#allocation4 + $0xf0] sm:$0xff] }
 0x43e   :  { %v10929_v16 = vpop.eup %10928 }
 0x43f   :  { %v2175_v54 = vmul.f32 %v10929_v16, %v2160_v31  ;;  %v10931_v27 = vpop.eup %10930  ;;  %v12031_v31 = vpack.c.bf16 %v2371_v40, %v2370_v51  ;;  %v2372_v16 = vld [vmem:[#allocation4 + $0x100] sm:$0xff]  ;;  %v13484_v51 = vld [vmem:[#allocation18_spill] sm:$0xff] }
 0x440   :  { %v567_v23 = vpop.permute.xlu0 %566  ;;  %v2178_v61 = vsub.f32 1.0, %v10931_v27  ;;  %v2180_v63 = vmul.f32 %v10931_v27, %v11846_v56  ;;  %v2368_v56 = vld [vmem:[#allocation4 + $0xe0] sm:$0xff] }
 0x441   :  { %v2176_v25 = vadd.f32 %v2175_v54, %v1302_v53  ;;  %v11992_v38 = vsel %vm254_vm3, %v13477_v15, %v567_v23  ;;  %v12024_v50 = vpack.c.bf16 %v2369_v8, %v2368_v56  ;;  %v2373_v53 = vld [vmem:[#allocation4 + $0x108] sm:$0xff]  ;;  %v11109_v54 = vld [vmem:[%s13424_s7 + $0x1] ss:$0 sm:$0xff]  ;;  %v2374_v15 = vld [vmem:[#allocation4 + $0x110] sm:$0xff] }
 0x443   :  { %10932 = vtanh.f32 %v2176_v25  ;;  %v12041_v25 = vpack.c.bf16 %v2373_v53, %v2372_v16 }
 0x444   :  { %v899_v47 = vpop.permute.xlu0 %898 }
 0x445   :  { %v11996_v58 = vsel %vm254_vm3, %v13478_v41, %v899_v47  ;;  %v2375_v47 = vld [vmem:[#allocation4 + $0x118] sm:$0xff]  ;;  %v11110_v41 = vld [vmem:[%s13424_s7 + $0x2] ss:$0 sm:$0xff] }
 0x446   :  { %v12051_v27 = vpack.c.bf16 %v2375_v47, %v2374_v15 }
 0x448   :  { %v1231_v22 = vpop.permute.xlu0 %1230 }
 0x449   :  { %v12000_v42 = vsel %vm254_vm3, %v13479_v52, %v1231_v22  ;;  %v249_v52 = vld [vmem:[%s13453_s23 + $0x38] sm:$0xff] }
 0x44d   :  { %v10933_v60 = vpop.eup %10932 }
 0x44e   :  { %v2179_v62 = vmul.f32 %v10933_v60, %v2178_v61  ;;  %v13480_v61 = vld [vmem:[#allocation7_spill] sm:$0xff]  ;;  %v12086_v60 = vpop.permute.xlu1 %598 }
 0x450   :  { %v12005_v33 = vadd.f32 %v2180_v63, %v2179_v62 }
 0x452   :  { %2182 = vst.msk [vmem:[#allocation2 + $0x10] sm:$0xff] %vm1327_vm5, %v12005_v33  ;;  %8727 = vmatmul.mubr.msk.f32.vlgmr.msra.gmra.mrb[40].mxu0 %vm1327_vm5, %v12005_v33  ;;  %8754 = vmatmul.mubr.msk.f32.vlgmr.msra.gmra.mrb[34].mxu1 %vm1327_vm5, %v12005_v33  ;;  %v12088_v62 = vpop.permute.xlu1 %930 }
 0x453   :  { %10132 = vmatpush3.bf16.msra.mxu0 %v12003_v46  ;;  %8780 = vmatprep.mubr.msk.f32.mxu0 %vm11145_vm2, %v13471_v30 }
 0x454   :  { %10133 = vmatprep.subr.bf16.mxu0 %v13472_v1  ;;  %10150 = vmatpush3.bf16.msra.mxu1 %v11897_v37 }
 0x455   :  { %10151 = vmatprep.subr.bf16.mxu1 %v13472_v1  ;;  %8807 = vmatprep.mubr.msk.f32.mxu1 %vm11145_vm2, %v13471_v30 }
 0x456   :  { %v12090_v63 = vpop.permute.xlu1 %1262 }
 0x457   :  { %10135 = vmatpush3.bf16.msra.mxu0 %v12014_v43 }
 0x458   :  { %10136 = vmatprep.subr.bf16.mxu0 %v13472_v1  ;;  %10153 = vmatpush3.bf16.msra.mxu1 %v11908_v2 }
 0x459   :  { %v418_v4 = vpop.permute.xlu0 %417  ;;  %10154 = vmatprep.subr.bf16.mxu1 %v13472_v1 }
 0x45a   :  { %v437_v44 = vmul.f32 %v11941_v14, %v418_v4  ;;  %v768_v23 = vmul.f32 %v11109_v54, %v418_v4  ;;  %v1100_v22 = vmul.f32 %v11110_v41, %v418_v4 }
 0x45b   :  { %10138 = vmatpush3.bf16.msra.mxu0 %v12024_v50 }
 0x45c   :  { %568 = vrot.lane.b32.xlu1 %v437_v44, %s11147_s30  ;;  %10139 = vmatprep.subr.bf16.mxu0 %v13472_v1  ;;  %v13485_v44 = vld [vmem:[#allocation22_spill] sm:$0xff] }
 0x45d   :  { %10156 = vmatpush3.bf16.msra.mxu1 %v11916_v39 }
 0x45e   :  { %10157 = vmatprep.subr.bf16.mxu1 %v13472_v1 }
 0x45f   :  { %10141 = vmatpush3.bf16.msra.mxu0 %v12031_v31 }
 0x460   :  { %900 = vrot.lane.b32.xlu1 %v768_v23, %s11147_s30  ;;  %10142 = vmatprep.subr.bf16.mxu0 %v13472_v1 }
 0x461   :  { %10159 = vmatpush3.bf16.msra.mxu1 %v11924_v12 }
 0x462   :  { %10160 = vmatprep.subr.bf16.mxu1 %v13472_v1 }
 0x463   :  { %10144 = vmatpush3.bf16.msra.mxu0 %v12041_v25 }
 0x464   :  { %1232 = vrot.lane.b32.xlu1 %v1100_v22, %s11147_s30  ;;  %10145 = vmatprep.subr.bf16.mxu0 %v13472_v1  ;;  %v624_v22 = vsel %vm620_vm4, %v11825_v19, %v11883_v49 }
 0x465   :  { %10162 = vmatpush3.bf16.msra.mxu1 %v11932_v13 }
 0x466   :  { %10163 = vmatprep.subr.bf16.mxu1 %v13472_v1 }
 0x467   :  { %10147 = vmatpush3.bf16.msra.mxu0 %v12051_v27 }
 0x468   :  { %422 = vperm.xlu1 %10887, %v249_v52   ;;  %10166 = vmatprep.subr.bf16.mxu0 %v13472_v1  ;;  %v955_v52 = vsel %vm620_vm4, %v11829_v7, %v11885_v3 }
 0x469   :  { %10165 = vmatpush3.bf16.msra.mxu1 %v11946_v35  ;;  %v971_v49 = vadd.f32 %v11647_v28, %v955_v52  ;;  %v1287_v28 = vsel %vm620_vm4, %v11833_v55, %v11887_v11  ;;  %v956_v55 = vsel %vm620_vm4, %v11895_v26, %v11981_v34 }
 0x46a   :  { %8781 = vmatmul.mubr.msk.f32.vlgmr.msra.gmra.mrb[42].mxu0 %vm1327_vm5, %v12005_v33  ;;  %10184 = vmatprep.subr.bf16.mxu1 %v13472_v1 }
 0x46b   :  { %10168 = vmatpush3.bf16.msra.mxu0 %v11903_v18  ;;  %8834 = vmatprep.mubr.msk.f32.mxu0 %vm11145_vm2, %v13471_v30 }
 0x46c   :  { %602 = vrot.lane.b32.xlu1 %v13480_v61, %s11148_s4  ;;  %10169 = vmatprep.subr.bf16.mxu0 %v13472_v1 }
 0x46f   :  { %10171 = vmatpush3.bf16.msra.mxu0 %v11911_v24 }
 0x470   :  { %934 = vrot.lane.b32.xlu1 %v13481_v10, %s11148_s4  ;;  %10172 = vmatprep.subr.bf16.mxu0 %v13472_v1  ;;  %v639_v10 = vadd.f32 %v11688_v29, %v624_v22 }
 0x473   :  { %10174 = vmatpush3.bf16.msra.mxu0 %v11919_v0 }
 0x474   :  { %1266 = vrot.lane.b32.xlu1 %v13482_v32, %s11148_s4  ;;  %10175 = vmatprep.subr.bf16.mxu0 %v13472_v1 }
 0x477   :  { %10177 = vmatpush3.bf16.msra.mxu0 %v11927_v21 }
 0x478   :  { %10178 = vmatprep.subr.bf16.mxu0 %v13472_v1 }
 0x47b   :  { %10180 = vmatpush3.bf16.msra.mxu0 %v11935_v48 }
 0x47c   :  { %10181 = vmatprep.subr.bf16.mxu0 %v13472_v1 }
 0x47f   :  { %10183 = vmatpush3.bf16.msra.mxu0 %v11949_v9 }
 0x480   :  { %10202 = vmatprep.subr.bf16.mxu0 %v13472_v1 }
 0x4ce   :  { %v569_v5 = vpop.permute.xlu1 %568 }
 0x4cf   :  { %v12094_v56 = vsel %vm254_vm3, %v13483_v59, %v569_v5 }
 0x4d2   :  { %v901_v8 = vpop.permute.xlu1 %900 }
 0x4d3   :  { %v12098_v40 = vsel %vm254_vm3, %v13484_v51, %v901_v8 }
 0x4d6   :  { %v1233_v4 = vpop.permute.xlu1 %1232 }
 0x4d7   :  { %v12102_v16 = vsel %vm254_vm3, %v13485_v44, %v1233_v4 }
 0x4e7   :  { %v423_v53 = vpop.permute.xlu1 %422 }
 0x4e8   :  { %v438_v23 = vmul.f32 %v11941_v14, %v423_v53  ;;  %v769_v15 = vmul.f32 %v11109_v54, %v423_v53  ;;  %v1101_v47 = vmul.f32 %v11110_v41, %v423_v53  ;;  %v12117_v14 = vld [vmem:[%s13429_s12] ss:$0 sm:$0xff]  ;;  %v12122_v54 = vld [vmem:[%s13429_s12 + $0x1] ss:$0 sm:$0xff] }
 0x4ea   :  { %570 = vrot.lane.b32.xlu0 %v438_v23, %s11147_s30 }
 0x4ee   :  { %902 = vrot.lane.b32.xlu0 %v769_v15, %s11147_s30 }
 0x4f2   :  { %1234 = vrot.lane.b32.xlu0 %v1101_v47, %s11147_s30 }
 0x525   :  { %v2271_v41 = vpop.f32.mrb[40].mxu0  ;;  %v2360_v61 = vpop.f32.mrb[34].mxu1 }
 0x526   :  { %v2272_v19 = vadd.f32 %v12117_v14, %v2271_v41  ;;  %v2361_v7 = vadd.f32 %v12122_v54, %v2360_v61  ;;  %v8728_v3 = vpop.f32.mrb[41].mxu0  ;;  %v8755_v32 = vpop.f32.mrb[35].mxu1 }
 0x528   :  { %v2453_v5 = vadd.f32 %v2272_v19, %v639_v10  ;;  %v2459_v59 = vadd.f32 %v2361_v7, %v971_v49  ;;  %v1303_v10 = vadd.f32 %v11720_v6, %v1287_v28 }
 0x52a   :  { %v2454_v8 = vsub.f32 0.0, %v2453_v5  ;;  %v2460_v4 = vsub.f32 0.0, %v2459_v59 }
 0x52c   :  { %v2455_v51 = vmul.f32 1.442695, %v2454_v8  ;;  %v2461_v44 = vmul.f32 1.442695, %v2460_v4 }
 0x52e   :  { %10934 = vpow2.f32 %v2455_v51 }
 0x52f   :  { %10936 = vpow2.f32 %v2461_v44  ;;  %v12197_v44 = vld [vmem:[%s13428_s11 + $0x1] ss:$0 sm:$0xff] }
 0x538   :  { %v10935_v53 = vpop.eup %10934 }
 0x539   :  { %v2457_v23 = vadd.f32 1.0, %v10935_v53  ;;  %v10937_v22 = vpop.eup %10936  ;;  %v972_v53 = vadd.f32 %v12197_v44, %v956_v55 }
 0x53a   :  { %v2463_v41 = vadd.f32 1.0, %v10937_v22 }
 0x53b   :  { %10938 = vrcp.f32 %v2457_v23 }
 0x53c   :  { %10940 = vrcp.f32 %v2463_v41 }
 0x53d   :  { %v2449_v15 = vpop.f32.mrb[42].mxu0 }
 0x53e   :  { %v8782_v47 = vpop.f32.mrb[43].mxu0  ;;  %v2450_v52 = vadd.f32 %v11708_v45, %v2449_v15  ;;  %v625_v45 = vsel %vm620_vm4, %v11891_v17, %v11979_v36 }
 0x53f   :  { %v640_v51 = vadd.f32 %v11688_v29, %v625_v45 }
 0x545   :  { %v10939_v61 = vpop.eup %10938 }
 0x546   :  { %v2465_v19 = vmul.f32 %v10939_v61, %v2450_v52  ;;  %v10941_v7 = vpop.eup %10940 }
 0x547   :  { %v2468_v3 = vsub.f32 1.0, %v10941_v7  ;;  %v2470_v59 = vmul.f32 %v10941_v7, %v12005_v33  ;;  %v1288_v7 = vsel %vm620_vm4, %v11901_v57, %v11986_v20 }
 0x548   :  { %v2466_v49 = vadd.f32 %v2465_v19, %v1303_v10  ;;  %v12204_v19 = vld [vmem:[%s13429_s12 + $0x2] ss:$0 sm:$0xff] }
 0x54a   :  { %10942 = vtanh.f32 %v2466_v49 }
 0x554   :  { %v10943_v32 = vpop.eup %10942 }
 0x555   :  { %v2469_v5 = vmul.f32 %v10943_v32, %v2468_v3 }
 0x557   :  { %v12134_v8 = vadd.f32 %v2470_v59, %v2469_v5  ;;  %v1304_v5 = vadd.f32 %v11720_v6, %v1288_v7  ;;  %v626_v6 = vsel %vm620_vm4, %v11992_v38, %v12086_v60 }
 0x559   :  { %2472 = vst.msk [vmem:[#allocation2 + $0x18] sm:$0xff] %vm1327_vm5, %v12134_v8  ;;  %8808 = vmatmul.mubr.msk.f32.vlgmr.msra.gmra.mrb[36].mxu1 %vm1327_vm5, %v12134_v8  ;;  %8835 = vmatmul.mubr.msk.f32.vlgmr.msra.gmra.mrb[44].mxu0 %vm1327_vm5, %v12134_v8 }
 0x55a   :  { %10186 = vmatpush3.bf16.msra.mxu1 %v12003_v46  ;;  %8861 = vmatprep.mubr.msk.f32.mxu1 %vm11145_vm2, %v13471_v30 }
 0x55b   :  { %10187 = vmatprep.subr.bf16.mxu1 %v13472_v1  ;;  %10204 = vmatpush3.bf16.msra.mxu0 %v11897_v37 }
 0x55c   :  { %10205 = vmatprep.subr.bf16.mxu0 %v13472_v1  ;;  %8888 = vmatprep.mubr.msk.f32.mxu0 %vm11145_vm2, %v13471_v30 }
 0x55e   :  { %10189 = vmatpush3.bf16.msra.mxu1 %v12014_v43 }
 0x55f   :  { %10190 = vmatprep.subr.bf16.mxu1 %v13472_v1  ;;  %10207 = vmatpush3.bf16.msra.mxu0 %v11908_v2 }
 0x560   :  { %10208 = vmatprep.subr.bf16.mxu0 %v13472_v1 }
 0x562   :  { %10192 = vmatpush3.bf16.msra.mxu1 %v12024_v50 }
 0x563   :  { %10193 = vmatprep.subr.bf16.mxu1 %v13472_v1  ;;  %10210 = vmatpush3.bf16.msra.mxu0 %v11916_v39 }
 0x564   :  { %10211 = vmatprep.subr.bf16.mxu0 %v13472_v1 }
 0x566   :  { %10195 = vmatpush3.bf16.msra.mxu1 %v12031_v31 }
 0x567   :  { %10196 = vmatprep.subr.bf16.mxu1 %v13472_v1  ;;  %10213 = vmatpush3.bf16.msra.mxu0 %v11924_v12 }
 0x568   :  { %10214 = vmatprep.subr.bf16.mxu0 %v13472_v1 }
 0x56a   :  { %10198 = vmatpush3.bf16.msra.mxu1 %v12041_v25 }
 0x56b   :  { %10199 = vmatprep.subr.bf16.mxu1 %v13472_v1  ;;  %10216 = vmatpush3.bf16.msra.mxu0 %v11932_v13 }
 0x56c   :  { %10217 = vmatprep.subr.bf16.mxu0 %v13472_v1 }
 0x56e   :  { %10201 = vmatpush3.bf16.msra.mxu1 %v12051_v27 }
 0x56f   :  { %10220 = vmatprep.subr.bf16.mxu1 %v13472_v1  ;;  %10219 = vmatpush3.bf16.msra.mxu0 %v11946_v35 }
 0x570   :  { %10238 = vmatprep.subr.bf16.mxu0 %v13472_v1 }
 0x571   :  { %8862 = vmatmul.mubr.msk.f32.vlgmr.msra.gmra.mrb[38].mxu1 %vm1327_vm5, %v12134_v8 }
 0x572   :  { %10222 = vmatpush3.bf16.msra.mxu1 %v11903_v18  ;;  %8915 = vmatprep.mubr.msk.f32.mxu1 %vm11145_vm2, %v13471_v30 }
 0x573   :  { %10223 = vmatprep.subr.bf16.mxu1 %v13472_v1 }
 0x576   :  { %10225 = vmatpush3.bf16.msra.mxu1 %v11911_v24 }
 0x577   :  { %10226 = vmatprep.subr.bf16.mxu1 %v13472_v1 }
 0x57a   :  { %10228 = vmatpush3.bf16.msra.mxu1 %v11919_v0 }
 0x57b   :  { %10229 = vmatprep.subr.bf16.mxu1 %v13472_v1 }
 0x57e   :  { %10231 = vmatpush3.bf16.msra.mxu1 %v11927_v21 }
 0x57f   :  { %10232 = vmatprep.subr.bf16.mxu1 %v13472_v1 }
 0x582   :  { %10234 = vmatpush3.bf16.msra.mxu1 %v11935_v48 }
 0x583   :  { %10235 = vmatprep.subr.bf16.mxu1 %v13472_v1 }
 0x586   :  { %10237 = vmatpush3.bf16.msra.mxu1 %v11949_v9 }
 0x587   :  { %10256 = vmatprep.subr.bf16.mxu1 %v13472_v1 }
 0x62c   :  { %v2561_v11 = vpop.f32.mrb[36].mxu1  ;;  %v2650_v33 = vpop.f32.mrb[44].mxu0 }
 0x62d   :  { %v2562_v4 = vadd.f32 %v12117_v14, %v2561_v11  ;;  %v2651_v23 = vadd.f32 %v12122_v54, %v2650_v33  ;;  %v8809_v17 = vpop.f32.mrb[37].mxu1  ;;  %v8836_v36 = vpop.f32.mrb[45].mxu0 }
 0x62f   :  { %v2743_v15 = vadd.f32 %v2562_v4, %v640_v51  ;;  %v2749_v47 = vadd.f32 %v2651_v23, %v972_v53 }
 0x631   :  { %v2744_v26 = vsub.f32 0.0, %v2743_v15  ;;  %v2750_v22 = vsub.f32 0.0, %v2749_v47  ;;  %v1289_v15 = vsel %vm620_vm4, %v12000_v42, %v12090_v63 }
 0x633   :  { %v2745_v34 = vmul.f32 1.442695, %v2744_v26  ;;  %v2751_v29 = vmul.f32 1.442695, %v2750_v22 }
 0x635   :  { %10944 = vpow2.f32 %v2745_v34  ;;  %v12286_v34 = vld [vmem:[%s13428_s11 + $0x2] ss:$0 sm:$0xff] }
 0x636   :  { %10946 = vpow2.f32 %v2751_v29  ;;  %v1305_v22 = vadd.f32 %v12286_v34, %v1289_v15 }
 0x63f   :  { %v10945_v41 = vpop.eup %10944 }
 0x640   :  { %v2747_v28 = vadd.f32 1.0, %v10945_v41  ;;  %v10947_v10 = vpop.eup %10946 }
 0x641   :  { %v2753_v49 = vadd.f32 1.0, %v10947_v10 }
 0x642   :  { %10948 = vrcp.f32 %v2747_v28 }
 0x643   :  { %10950 = vrcp.f32 %v2753_v49  ;;  %v3436_v49 = vld [vmem:[#allocation4 + $0x68] sm:$0xff] }
 0x644   :  { %v2739_v52 = vpop.f32.mrb[38].mxu1 }
 0x645   :  { %v8863_v61 = vpop.f32.mrb[39].mxu1  ;;  %v2740_v3 = vadd.f32 %v12204_v19, %v2739_v52 }
 0x64c   :  { %v10949_v32 = vpop.eup %10948 }
 0x64d   :  { %v2755_v59 = vmul.f32 %v10949_v32, %v2740_v3  ;;  %v10951_v55 = vpop.eup %10950  ;;  %v3437_v3 = vld [vmem:[#allocation4 + $0x70] sm:$0xff] }
 0x64e   :  { %v2758_v11 = vsub.f32 1.0, %v10951_v55  ;;  %v2760_v4 = vmul.f32 %v10951_v55, %v12134_v8  ;;  %v3348_v55 = vld [vmem:[#allocation4 + $0x28] sm:$0xff] }
 0x64f   :  { %v2756_v45 = vadd.f32 %v2755_v59, %v1304_v5  ;;  %v3438_v5 = vld [vmem:[#allocation4 + $0x78] sm:$0xff] }
 0x650   :  { %v10332_v59 = vpack.c.bf16 %v3438_v5, %v3437_v3 }
 0x651   :  { %10952 = vtanh.f32 %v2756_v45  ;;  %v3347_v45 = vld [vmem:[#allocation4 + $0x20] sm:$0xff] }
 0x65b   :  { %v10953_v33 = vpop.eup %10952 }
 0x65c   :  { %v2759_v51 = vmul.f32 %v10953_v33, %v2758_v11  ;;  %v3439_v11 = vld [vmem:[#allocation4 + $0x80] sm:$0xff]  ;;  %v10317_v33 = vpack.c.bf16 %v3348_v55, %v3347_v45 }
 0x65e   :  { %v12212_v53 = vadd.f32 %v2760_v4, %v2759_v51  ;;  %v3440_v51 = vld [vmem:[#allocation4 + $0x88] sm:$0xff] }
 0x65f   :  { %v10335_v4 = vpack.c.bf16 %v3440_v51, %v3439_v11  ;;  %v3524_v51 = vld [vmem:[#allocation4 + $0xc0] sm:$0xff] }
 0x660   :  { %2762 = vst.msk [vmem:[#allocation2 + $0x20] sm:$0xff] %vm1327_vm5, %v12212_v53  ;;  %8889 = vmatmul.mubr.msk.f32.vlgmr.msra.gmra.mrb[46].mxu0 %vm1327_vm5, %v12212_v53  ;;  %8916 = vmatmul.mubr.msk.f32.vlgmr.msra.gmra.mrb[40].mxu1 %vm1327_vm5, %v12212_v53 }
 0x661   :  { %10240 = vmatpush3.bf16.msra.mxu0 %v12003_v46  ;;  %8942 = vmatprep.mubr.msk.f32.mxu0 %vm11145_vm2, %v13471_v30 }
 0x662   :  { %10241 = vmatprep.subr.bf16.mxu0 %v13472_v1  ;;  %10258 = vmatpush3.bf16.msra.mxu1 %v11897_v37  ;;  %v957_v37 = vsel %vm620_vm4, %v11996_v58, %v12088_v62 }
 0x663   :  { %10259 = vmatprep.subr.bf16.mxu1 %v13472_v1  ;;  %8969 = vmatprep.mubr.msk.f32.mxu1 %vm11145_vm2, %v13471_v30 }
 0x665   :  { %10243 = vmatpush3.bf16.msra.mxu0 %v12014_v43 }
 0x666   :  { %10244 = vmatprep.subr.bf16.mxu0 %v13472_v1  ;;  %10261 = vmatpush3.bf16.msra.mxu1 %v11908_v2  ;;  %v12273_v2 = vld [vmem:[%s13428_s11] ss:$0 sm:$0xff] }
 0x667   :  { %10262 = vmatprep.subr.bf16.mxu1 %v13472_v1 }
 0x669   :  { %10246 = vmatpush3.bf16.msra.mxu0 %v12024_v50 }
 0x66a   :  { %10247 = vmatprep.subr.bf16.mxu0 %v13472_v1  ;;  %10264 = vmatpush3.bf16.msra.mxu1 %v11916_v39 }
 0x66b   :  { %10265 = vmatprep.subr.bf16.mxu1 %v13472_v1 }
 0x66d   :  { %10249 = vmatpush3.bf16.msra.mxu0 %v12031_v31 }
 0x66e   :  { %10250 = vmatprep.subr.bf16.mxu0 %v13472_v1  ;;  %10267 = vmatpush3.bf16.msra.mxu1 %v11924_v12 }
 0x66f   :  { %10268 = vmatprep.subr.bf16.mxu1 %v13472_v1 }
 0x671   :  { %10252 = vmatpush3.bf16.msra.mxu0 %v12041_v25 }
 0x672   :  { %10253 = vmatprep.subr.bf16.mxu0 %v13472_v1  ;;  %10270 = vmatpush3.bf16.msra.mxu1 %v11932_v13 }
 0x673   :  { %10271 = vmatprep.subr.bf16.mxu1 %v13472_v1 }
 0x675   :  { %10255 = vmatpush3.bf16.msra.mxu0 %v12051_v27 }
 0x676   :  { %10274 = vmatprep.subr.bf16.mxu0 %v13472_v1  ;;  %10273 = vmatpush3.bf16.msra.mxu1 %v11946_v35 }
 0x677   :  { %10292 = vmatprep.subr.bf16.mxu1 %v13472_v1 }
 0x678   :  { %8943 = vmatmul.mubr.msk.f32.vlgmr.msra.gmra.mrb[48].mxu0 %vm1327_vm5, %v12212_v53 }
 0x679   :  { %10276 = vmatpush3.bf16.msra.mxu0 %v11903_v18  ;;  %8996 = vmatprep.mubr.msk.f32.mxu0 %vm11145_vm2, %v13471_v30 }
 0x67a   :  { %10277 = vmatprep.subr.bf16.mxu0 %v13472_v1 }
 0x67d   :  { %10279 = vmatpush3.bf16.msra.mxu0 %v11911_v24  ;;  %v641_v24 = vadd.f32 %v12273_v2, %v626_v6  ;;  %v3350_v6 = vld [vmem:[#allocation4 + $0x38] sm:$0xff] }
 0x67e   :  { %10280 = vmatprep.subr.bf16.mxu0 %v13472_v1 }
 0x681   :  { %10282 = vmatpush3.bf16.msra.mxu0 %v11919_v0  ;;  %v973_v0 = vadd.f32 %v12197_v44, %v957_v37  ;;  %v3441_v37 = vld [vmem:[#allocation4 + $0x90] sm:$0xff] }
 0x682   :  { %10283 = vmatprep.subr.bf16.mxu0 %v13472_v1 }
 0x685   :  { %10285 = vmatpush3.bf16.msra.mxu0 %v11927_v21 }
 0x686   :  { %10286 = vmatprep.subr.bf16.mxu0 %v13472_v1 }
 0x689   :  { %10288 = vmatpush3.bf16.msra.mxu0 %v11935_v48 }
 0x68a   :  { %10289 = vmatprep.subr.bf16.mxu0 %v13472_v1 }
 0x68d   :  { %10291 = vmatpush3.bf16.msra.mxu0 %v11949_v9 }
 0x68e   :  { %10310 = vmatprep.subr.bf16.mxu0 %v13472_v1 }
 0x733   :  { %v2851_v57 = vpop.f32.mrb[46].mxu0  ;;  %v2940_v18 = vpop.f32.mrb[40].mxu1 }
 0x734   :  { %v2852_v39 = vadd.f32 %v12117_v14, %v2851_v57  ;;  %v2941_v12 = vadd.f32 %v12122_v54, %v2940_v18  ;;  %v8890_v21 = vpop.f32.mrb[47].mxu0  ;;  %v8917_v13 = vpop.f32.mrb[41].mxu1  ;;  %v3442_v18 = vld [vmem:[#allocation4 + $0x98] sm:$0xff] }
 0x735   :  { %v3444_v21 = vld [vmem:[#allocation4 + $0xa8] sm:$0xff] }
 0x736   :  { %v3033_v48 = vadd.f32 %v2852_v39, %v641_v24  ;;  %v3039_v35 = vadd.f32 %v2941_v12, %v973_v0  ;;  %v3351_v24 = vld [vmem:[#allocation4 + $0x40] sm:$0xff]  ;;  %v3352_v39 = vld [vmem:[#allocation4 + $0x48] sm:$0xff]  ;;  %v10338_v0 = vpack.c.bf16 %v3442_v18, %v3441_v37 }
 0x737   :  { %v3443_v12 = vld [vmem:[#allocation4 + $0xa0] sm:$0xff]  ;;  %v10323_v13 = vpack.c.bf16 %v3352_v39, %v3351_v24  ;;  %v3526_v39 = vld [vmem:[#allocation4 + $0xd0] sm:$0xff] }
 0x738   :  { %v3034_v9 = vsub.f32 0.0, %v3033_v48  ;;  %v3040_v38 = vsub.f32 0.0, %v3039_v35  ;;  %v10341_v48 = vpack.c.bf16 %v3444_v21, %v3443_v12  ;;  %v3353_v35 = vld [vmem:[#allocation4 + $0x50] sm:$0xff]  ;;  %v3645_v21 = vld [vmem:[%s13426_s9 + $0x20] sm:$0xff] }
 0x73a   :  { %v3035_v20 = vmul.f32 1.442695, %v3034_v9  ;;  %v3041_v58 = vmul.f32 1.442695, %v3040_v38  ;;  %v3354_v9 = vld [vmem:[#allocation4 + $0x58] sm:$0xff] }
 0x73b   :  { %v3446_v38 = vld [vmem:[#allocation4 + $0xb8] sm:$0xff] }
 0x73c   :  { %10954 = vpow2.f32 %v3035_v20  ;;  %v3445_v20 = vld [vmem:[#allocation4 + $0xb0] sm:$0xff] }
 0x73d   :  { %10956 = vpow2.f32 %v3041_v58  ;;  %v3641_v58 = vld [vmem:[%s13426_s9] sm:$0xff] }
 0x746   :  { %v10955_v60 = vpop.eup %10954 }
 0x747   :  { %v3037_v62 = vadd.f32 1.0, %v10955_v60  ;;  %v10957_v17 = vpop.eup %10956  ;;  %v3642_v60 = vld [vmem:[%s13426_s9 + $0x8] sm:$0xff] }
 0x748   :  { %v3043_v36 = vadd.f32 1.0, %v10957_v17  ;;  %v601_v17 = vpop.permute.xlu0 %600 }
 0x749   :  { %10958 = vrcp.f32 %v3037_v62  ;;  %v10326_v62 = vpack.c.bf16 %v3354_v9, %v3353_v35  ;;  %v627_v15 = vsel %vm620_vm4, %v12094_v56, %v601_v17  ;;  %v3528_v9 = vld [vmem:[#allocation4 + $0xe0] sm:$0xff] }
 0x74a   :  { %10960 = vrcp.f32 %v3043_v36  ;;  %v3649_v17 = vld [vmem:[%s13426_s9 + $0x40] sm:$0xff] }
 0x74b   :  { %v3029_v8 = vpop.f32.mrb[48].mxu0 }
 0x74c   :  { %v8944_v23 = vpop.f32.mrb[49].mxu0  ;;  %v3030_v47 = vadd.f32 %v12204_v19, %v3029_v8  ;;  %v10344_v8 = vpack.c.bf16 %v3446_v38, %v3445_v20  ;;  %v933_v36 = vpop.permute.xlu0 %932  ;;  %v3529_v20 = vld [vmem:[#allocation4 + $0xe8] sm:$0xff] }
 0x74d   :  { %v10364_v23 = vpack.c.bf16 %v3642_v60, %v3641_v58  ;;  %v3647_v38 = vld [vmem:[%s13426_s9 + $0x30] sm:$0xff]  ;;  %v3648_v58 = vld [vmem:[%s13426_s9 + $0x38] sm:$0xff]  ;;  %v10353_v60 = vpack.c.bf16 %v3529_v20, %v3528_v9  ;;  %v7439_v20 = vld [vmem:[%s13426_s9 + $0xe0] sm:$0xff] }
 0x753   :  { %v10959_v26 = vpop.eup %10958 }
 0x754   :  { %v3045_v29 = vmul.f32 %v10959_v26, %v3030_v47  ;;  %v10961_v28 = vpop.eup %10960  ;;  %v958_v47 = vsel %vm620_vm4, %v12098_v40, %v933_v36  ;;  %v3650_v36 = vld [vmem:[%s13426_s9 + $0x48] sm:$0xff] }
 0x755   :  { %v3048_v52 = vsub.f32 1.0, %v10961_v28  ;;  %v3050_v42 = vmul.f32 %v10961_v28, %v12212_v53  ;;  %v3349_v53 = vld [vmem:[#allocation4 + $0x30] sm:$0xff]  ;;  %v974_v28 = vadd.f32 %v12197_v44, %v958_v47  ;;  %v10380_v47 = vpack.c.bf16 %v3650_v36, %v3649_v17 }
 0x756   :  { %v3046_v41 = vadd.f32 %v3045_v29, %v1305_v22  ;;  %v10320_v57 = vpack.c.bf16 %v3350_v6, %v3349_v53  ;;  %v642_v29 = vadd.f32 %v12273_v2, %v627_v15  ;;  %v7442_v17 = vld [vmem:[%s13426_s9 + $0xf8] sm:$0xff] }
 0x758   :  { %10962 = vtanh.f32 %v3046_v41 }
 0x762   :  { %v10963_v61 = vpop.eup %10962 }
 0x763   :  { %v3049_v10 = vmul.f32 %v10963_v61, %v3048_v52 }
 0x765   :  { %v12290_v63 = vadd.f32 %v3050_v42, %v3049_v10 }
 0x767   :  { %3052 = vst.msk [vmem:[#allocation2 + $0x28] sm:$0xff] %vm1327_vm5, %v12290_v63  ;;  %8970 = vmatmul.mubr.msk.f32.vlgmr.msra.gmra.mrb[42].mxu1 %vm1327_vm5, %v12290_v63  ;;  %8997 = vmatmul.mubr.msk.f32.vlgmr.msra.gmra.mrb[50].mxu0 %vm1327_vm5, %v12290_v63 }
 0x768   :  { %10294 = vmatpush3.bf16.msra.mxu1 %v12003_v46  ;;  %9023 = vmatprep.mubr.msk.f32.mxu1 %vm11145_vm2, %v13471_v30  ;;  %v3343_v46 = vld [vmem:[#allocation4] sm:$0xff] }
 0x769   :  { %10295 = vmatprep.subr.bf16.mxu1 %v13472_v1  ;;  %9050 = vmatprep.mubr.msk.f32.mxu0 %vm11145_vm2, %v13471_v30 }
 0x76c   :  { %10297 = vmatpush3.bf16.msra.mxu1 %v12014_v43  ;;  %v3344_v43 = vld [vmem:[#allocation4 + $0x8] sm:$0xff] }
 0x76d   :  { %10298 = vmatprep.subr.bf16.mxu1 %v13472_v1 }
 0x770   :  { %10300 = vmatpush3.bf16.msra.mxu1 %v12024_v50  ;;  %v3435_v50 = vld [vmem:[#allocation4 + $0x60] sm:$0xff] }
 0x771   :  { %10301 = vmatprep.subr.bf16.mxu1 %v13472_v1  ;;  %v10329_v7 = vpack.c.bf16 %v3436_v49, %v3435_v50 }
 0x774   :  { %10303 = vmatpush3.bf16.msra.mxu1 %v12031_v31  ;;  %v10311_v31 = vpack.c.bf16 %v3344_v43, %v3343_v46 }
 0x775   :  { %10304 = vmatprep.subr.bf16.mxu1 %v13472_v1 }
 0x776   :  { %10312 = vmatpush3.bf16.msra.mxu0 %v10311_v31 }
 0x777   :  { %10313 = vmatprep.subr.bf16.mxu0 %v13472_v1 }
 0x778   :  { %10306 = vmatpush3.bf16.msra.mxu1 %v12041_v25  ;;  %v3345_v25 = vld [vmem:[#allocation4 + $0x10] sm:$0xff] }
 0x779   :  { %10307 = vmatprep.subr.bf16.mxu1 %v13472_v1 }
 0x77c   :  { %10309 = vmatpush3.bf16.msra.mxu1 %v12051_v27  ;;  %v3346_v27 = vld [vmem:[#allocation4 + $0x18] sm:$0xff] }
 0x77d   :  { %10328 = vmatprep.subr.bf16.mxu1 %v13472_v1  ;;  %v10314_v32 = vpack.c.bf16 %v3346_v27, %v3345_v25  ;;  %v1265_v27 = vpop.permute.xlu0 %1264 }
 0x77f   :  { %9024 = vmatmul.mubr.msk.f32.vlgmr.msra.gmra.mrb[44].mxu1 %vm1327_vm5, %v12290_v63  ;;  %10315 = vmatpush3.bf16.msra.mxu0 %v10314_v32 }
 0x780   :  { %9077 = vmatprep.mubr.msk.f32.mxu1 %vm11145_vm2, %v13471_v30  ;;  %10330 = vmatpush3.bf16.msra.mxu1 %v10329_v7 }
 0x781   :  { %10331 = vmatprep.subr.bf16.mxu1 %v13472_v1  ;;  %10316 = vmatprep.subr.bf16.mxu0 %v13472_v1 }
 0x783   :  { %10318 = vmatpush3.bf16.msra.mxu0 %v10317_v33 }
 0x784   :  { %10333 = vmatpush3.bf16.msra.mxu1 %v10332_v59  ;;  %10319 = vmatprep.subr.bf16.mxu0 %v13472_v1 }
 0x785   :  { %10334 = vmatprep.subr.bf16.mxu1 %v13472_v1 }
 0x787   :  { %10321 = vmatpush3.bf16.msra.mxu0 %v10320_v57  ;;  %v3644_v57 = vld [vmem:[%s13426_s9 + $0x18] sm:$0xff] }
 0x788   :  { %10336 = vmatpush3.bf16.msra.mxu1 %v10335_v4  ;;  %10322 = vmatprep.subr.bf16.mxu0 %v13472_v1  ;;  %v3525_v4 = vld [vmem:[#allocation4 + $0xc8] sm:$0xff] }
 0x789   :  { %10337 = vmatprep.subr.bf16.mxu1 %v13472_v1  ;;  %v10347_v18 = vpack.c.bf16 %v3525_v4, %v3524_v51  ;;  %v7423_v4 = vld [vmem:[%s13426_s9 + $0xb0] sm:$0xff] }
 0x78b   :  { %10324 = vmatpush3.bf16.msra.mxu0 %v10323_v13  ;;  %v12368_v13 = vld [vmem:[#allocation2] sm:$0xff] }
 0x78c   :  { %10339 = vmatpush3.bf16.msra.mxu1 %v10338_v0  ;;  %10325 = vmatprep.subr.bf16.mxu0 %v13472_v1  ;;  %v3527_v0 = vld [vmem:[#allocation4 + $0xd8] sm:$0xff] }
 0x78d   :  { %10340 = vmatprep.subr.bf16.mxu1 %v13472_v1 }
 0x78f   :  { %10327 = vmatpush3.bf16.msra.mxu0 %v10326_v62  ;;  %v10376_v62 = vpack.c.bf16 %v3648_v58, %v3647_v38  ;;  %v7440_v38 = vld [vmem:[%s13426_s9 + $0xe8] sm:$0xff] }
 0x790   :  { %10342 = vmatpush3.bf16.msra.mxu1 %v10341_v48  ;;  %10346 = vmatprep.subr.bf16.mxu0 %v13472_v1  ;;  %v10350_v48 = vpack.c.bf16 %v3527_v0, %v3526_v39  ;;  %v4044_v39 = vld [vmem:[#allocation4 + $0x128] sm:$0xff]  ;;  %v10420_v58 = vpack.c.bf16 %v7440_v38, %v7439_v20 }
 0x791   :  { %10343 = vmatprep.subr.bf16.mxu1 %v13472_v1 }
 0x794   :  { %10345 = vmatpush3.bf16.msra.mxu1 %v10344_v8  ;;  %v3530_v8 = vld [vmem:[#allocation4 + $0xf0] sm:$0xff] }
 0x795   :  { %10365 = vmatprep.subr.bf16.mxu1 %v10364_v23 }
 0x83a   :  { %v3141_v26 = vpop.f32.mrb[42].mxu1  ;;  %v3230_v22 = vpop.f32.mrb[50].mxu0 }
 0x83b   :  { %v3142_v41 = vadd.f32 %v12117_v14, %v3141_v26  ;;  %v3231_v52 = vadd.f32 %v12122_v54, %v3230_v22  ;;  %v8971_v61 = vpop.f32.mrb[43].mxu1  ;;  %v8998_v10 = vpop.f32.mrb[51].mxu0  ;;  %v1290_v54 = vsel %vm620_vm4, %v12102_v16, %v1265_v27  ;;  %v3643_v16 = vld [vmem:[%s13426_s9 + $0x10] sm:$0xff]  ;;  %v3532_v26 = vld [vmem:[#allocation4 + $0x100] sm:$0xff] }
 0x83c   :  { %v1306_v59 = vadd.f32 %v12286_v34, %v1290_v54  ;;  %v10368_v12 = vpack.c.bf16 %v3644_v57, %v3643_v16  ;;  %v3533_v22 = vld [vmem:[#allocation4 + $0x108] sm:$0xff]  ;;  %v3534_v61 = vld [vmem:[#allocation4 + $0x110] sm:$0xff]  ;;  %v3535_v10 = vld [vmem:[#allocation4 + $0x118] sm:$0xff] }
 0x83d   :  { %v3323_v42 = vadd.f32 %v3142_v41, %v642_v29  ;;  %v3329_v46 = vadd.f32 %v3231_v52, %v974_v28  ;;  %v3651_v29 = vld [vmem:[%s13426_s9 + $0x50] sm:$0xff]  ;;  %v3652_v41 = vld [vmem:[%s13426_s9 + $0x58] sm:$0xff]  ;;  %v10359_v28 = vpack.c.bf16 %v3533_v22, %v3532_v26  ;;  %v7436_v16 = vld [vmem:[%s13426_s9 + $0xc8] sm:$0xff] }
 0x83e   :  { %v10384_v52 = vpack.c.bf16 %v3652_v41, %v3651_v29  ;;  %v7419_v54 = vld [vmem:[%s13426_s9 + $0x90] sm:$0xff]  ;;  %v7443_v22 = vld [vmem:[%s13426_s9 + $0x100] sm:$0xff]  ;;  %v7444_v29 = vld [vmem:[%s13426_s9 + $0x108] sm:$0xff] }
 0x83f   :  { %v3324_v43 = vsub.f32 0.0, %v3323_v42  ;;  %v3330_v56 = vsub.f32 0.0, %v3329_v46  ;;  %v7413_v42 = vld [vmem:[%s13426_s9 + $0x60] sm:$0xff]  ;;  %v7414_v46 = vld [vmem:[%s13426_s9 + $0x68] sm:$0xff]  ;;  %v10428_v41 = vpack.c.bf16 %v7444_v29, %v7443_v22 }
 0x841   :  { %v3325_v50 = vmul.f32 1.442695, %v3324_v43  ;;  %v3331_v31 = vmul.f32 1.442695, %v3330_v56  ;;  %v10362_v43 = vpack.c.bf16 %v3535_v10, %v3534_v61  ;;  %v7415_v56 = vld [vmem:[%s13426_s9 + $0x70] sm:$0xff] }
 0x842   :  { %v7445_v10 = vld [vmem:[%s13426_s9 + $0x110] sm:$0xff] }
 0x843   :  { %10964 = vpow2.f32 %v3325_v50  ;;  %v10388_v50 = vpack.c.bf16 %v7414_v46, %v7413_v42  ;;  %v7446_v42 = vld [vmem:[%s13426_s9 + $0x118] sm:$0xff] }
 0x844   :  { %10966 = vpow2.f32 %v3331_v31  ;;  %v7416_v31 = vld [vmem:[%s13426_s9 + $0x78] sm:$0xff]  ;;  %v10432_v46 = vpack.c.bf16 %v7446_v42, %v7445_v10 }
 0x84d   :  { %v10965_v40 = vpop.eup %10964 }
 0x84e   :  { %v3327_v49 = vadd.f32 1.0, %v10965_v40  ;;  %v10967_v14 = vpop.eup %10966  ;;  %v10392_v40 = vpack.c.bf16 %v7416_v31, %v7415_v56  ;;  %v571_v31 = vpop.permute.xlu0 %570 }
 0x84f   :  { %v3333_v3 = vadd.f32 1.0, %v10967_v14  ;;  %v12421_v14 = vld [vmem:[#allocation2 + $0x10] sm:$0xff] }
 0x850   :  { %10968 = vrcp.f32 %v3327_v49  ;;  %v12409_v49 = vld [vmem:[#allocation2 + $0x8] sm:$0xff] }
 0x851   :  { %10970 = vrcp.f32 %v3333_v3  ;;  %v12427_v3 = vld [vmem:[#allocation2 + $0x18] sm:$0xff] }
 0x852   :  { %v3319_v7 = vpop.f32.mrb[44].mxu1 }
 0x853   :  { %v9025_v25 = vpop.f32.mrb[45].mxu1  ;;  %v3320_v32 = vadd.f32 %v12204_v19, %v3319_v7  ;;  %v7417_v7 = vld [vmem:[%s13426_s9 + $0x80] sm:$0xff] }
 0x854   :  { %v7418_v25 = vld [vmem:[%s13426_s9 + $0x88] sm:$0xff] }
 0x855   :  { %v10396_v27 = vpack.c.bf16 %v7418_v25, %v7417_v7  ;;  %v903_v7 = vpop.permute.xlu0 %902  ;;  %v13486_v25 = vld [vmem:[#allocation14_spill] sm:$0xff] }
 0x85a   :  { %v10969_v5 = vpop.eup %10968 }
 0x85b   :  { %v3335_v45 = vmul.f32 %v10969_v5, %v3320_v32  ;;  %v10971_v11 = vpop.eup %10970  ;;  %v7420_v32 = vld [vmem:[%s13426_s9 + $0x98] sm:$0xff]  ;;  %v12437_v5 = vld [vmem:[#allocation2 + $0x20] sm:$0xff] }
 0x85c   :  { %v3338_v33 = vsub.f32 1.0, %v10971_v11  ;;  %v3340_v37 = vmul.f32 %v10971_v11, %v12290_v63  ;;  %v3646_v63 = vld [vmem:[%s13426_s9 + $0x28] sm:$0xff] }
 0x85d   :  { %v3336_v55 = vadd.f32 %v3335_v45, %v1306_v59  ;;  %v10372_v35 = vpack.c.bf16 %v3646_v63, %v3645_v21  ;;  %v10400_v59 = vpack.c.bf16 %v7420_v32, %v7419_v54  ;;  %v12441_v45 = vld [vmem:[#allocation2 + $0x28] sm:$0xff]  ;;  %v7438_v21 = vld [vmem:[%s13426_s9 + $0xd8] sm:$0xff] }
 0x85e   :  { %v7422_v11 = vld [vmem:[%s13426_s9 + $0xa8] sm:$0xff]  ;;  %v13487_v54 = vld [vmem:[#allocation17_spill] sm:$0xff] }
 0x85f   :  { %10972 = vtanh.f32 %v3336_v55  ;;  %v7421_v55 = vld [vmem:[%s13426_s9 + $0xa0] sm:$0xff]  ;;  %v951_v32 = vsel %vm254_vm3, %v13487_v54, %v903_v7 }
 0x860   :  { %v10404_v51 = vpack.c.bf16 %v7422_v11, %v7421_v55 }
 0x869   :  { %v10973_v53 = vpop.eup %10972 }
 0x86a   :  { %v3339_v6 = vmul.f32 %v10973_v53, %v3338_v33  ;;  %v7424_v53 = vld [vmem:[%s13426_s9 + $0xb8] sm:$0xff] }
 0x86c   :  { %v12354_v24 = vadd.f32 %v3340_v37, %v3339_v6  ;;  %v10408_v6 = vpack.c.bf16 %v7424_v53, %v7423_v4  ;;  %v7435_v37 = vld [vmem:[%s13426_s9 + $0xc0] sm:$0xff] }
 0x86d   :  { %v10412_v57 = vpack.c.bf16 %v7436_v16, %v7435_v37  ;;  %v7398_v4 = vld [vmem:[%s13429_s12 + $0x1] ss:$0 sm:$0xff] }
 0x86e   :  { %3342 = vst.msk [vmem:[#allocation2 + $0x30] sm:$0xff] %vm1327_vm5, %v12354_v24  ;;  %9051 = vmatmul.mubr.msk.f32.vlgmr.msra.gmra.mrb[52].mxu0 %vm1327_vm5, %v12354_v24  ;;  %9078 = vmatmul.mubr.msk.f32.vlgmr.msra.gmra.mrb[46].mxu1 %vm1327_vm5, %v12354_v24 }
 0x86f   :  { %10348 = vmatpush3.bf16.msra.mxu0 %v10347_v18  ;;  %10367 = vmatpush3.bf16.msra.mxu1 %v10364_v23  ;;  %v3531_v23 = vld [vmem:[#allocation4 + $0xf8] sm:$0xff]  ;;  %v4043_v18 = vld [vmem:[#allocation4 + $0x120] sm:$0xff] }
 0x870   :  { %9131 = vmatprep.mubr.msk.f32.mxu1 %vm1327_vm5, %v12368_v13  ;;  %10349 = vmatprep.subr.bf16.mxu0 %v13472_v1  ;;  %v10356_v15 = vpack.c.bf16 %v3531_v23, %v3530_v8  ;;  %v12480_v0 = vpack.c.bf16 %v4044_v39, %v4043_v18  ;;  %v7441_v23 = vld [vmem:[%s13426_s9 + $0xf0] sm:$0xff] }
 0x871   :  { %10369 = vmatprep.subr.bf16.mxu1 %v10368_v12  ;;  %9104 = vmatprep.mubr.msk.f32.mxu0 %vm11145_vm2, %v13471_v30  ;;  %v10424_v36 = vpack.c.bf16 %v7442_v17, %v7441_v23 }
 0x873   :  { %10351 = vmatpush3.bf16.msra.mxu0 %v10350_v48  ;;  %10371 = vmatpush3.bf16.msra.mxu1 %v10368_v12  ;;  %v7437_v12 = vld [vmem:[%s13426_s9 + $0xd0] sm:$0xff] }
 0x874   :  { %10352 = vmatprep.subr.bf16.mxu0 %v13472_v1  ;;  %10373 = vmatprep.subr.bf16.mxu1 %v10372_v35  ;;  %v10416_v63 = vpack.c.bf16 %v7438_v21, %v7437_v12  ;;  %v4045_v48 = vld [vmem:[#allocation4 + $0x130] sm:$0xff] }
 0x875   :  { %v12451_v33 = vld [vmem:[#allocation2 + $0x30] sm:$0xff] }
 0x877   :  { %10354 = vmatpush3.bf16.msra.mxu0 %v10353_v60  ;;  %10375 = vmatpush3.bf16.msra.mxu1 %v10372_v35  ;;  %v4046_v35 = vld [vmem:[#allocation4 + $0x138] sm:$0xff]  ;;  %v4047_v60 = vld [vmem:[#allocation4 + $0x140] sm:$0xff] }
 0x878   :  { %10355 = vmatprep.subr.bf16.mxu0 %v13472_v1  ;;  %10377 = vmatprep.subr.bf16.mxu1 %v10376_v62  ;;  %v12490_v9 = vpack.c.bf16 %v4046_v35, %v4045_v48 }
 0x87b   :  { %10357 = vmatpush3.bf16.msra.mxu0 %v10356_v15  ;;  %10379 = vmatpush3.bf16.msra.mxu1 %v10376_v62  ;;  %v4048_v62 = vld [vmem:[#allocation4 + $0x148] sm:$0xff]  ;;  %v4049_v15 = vld [vmem:[#allocation4 + $0x150] sm:$0xff] }
 0x87c   :  { %10358 = vmatprep.subr.bf16.mxu0 %v13472_v1  ;;  %10381 = vmatprep.subr.bf16.mxu1 %v10380_v47  ;;  %v12500_v8 = vpack.c.bf16 %v4048_v62, %v4047_v60  ;;  %v1235_v62 = vpop.permute.xlu0 %1234 }
 0x87f   :  { %10360 = vmatpush3.bf16.msra.mxu0 %v10359_v28  ;;  %10383 = vmatpush3.bf16.msra.mxu1 %v10380_v47  ;;  %v4050_v47 = vld [vmem:[#allocation4 + $0x158] sm:$0xff]  ;;  %v4051_v28 = vld [vmem:[#allocation4 + $0x160] sm:$0xff] }
 0x880   :  { %10361 = vmatprep.subr.bf16.mxu0 %v13472_v1  ;;  %10385 = vmatprep.subr.bf16.mxu1 %v10384_v52  ;;  %v12510_v26 = vpack.c.bf16 %v4050_v47, %v4049_v15  ;;  %v13488_v15 = vld [vmem:[#allocation21_spill] sm:$0xff] }
 0x881   :  { %v1283_v47 = vsel %vm254_vm3, %v13488_v15, %v1235_v62 }
 0x883   :  { %10363 = vmatpush3.bf16.msra.mxu0 %v10362_v43  ;;  %10387 = vmatpush3.bf16.msra.mxu1 %v10384_v52  ;;  %v4052_v52 = vld [vmem:[#allocation4 + $0x168] sm:$0xff]  ;;  %v4053_v43 = vld [vmem:[#allocation4 + $0x170] sm:$0xff] }
 0x884   :  { %10389 = vmatprep.subr.bf16.mxu0 %v10388_v50  ;;  %10413 = vmatprep.subr.bf16.mxu1 %v10412_v57  ;;  %v12520_v61 = vpack.c.bf16 %v4052_v52, %v4051_v28 }
 0x886   :  { %9105 = vmatmul.mubr.msk.f32.vlgmr.msra.gmra.mrb[54].mxu0 %vm1327_vm5, %v12354_v24  ;;  %9132 = vmatmul.mubr.msk.f32.vlgmr.msra.gmra.mrb[48].mxu1 %vm1327_vm5, %v12409_v49 }
 0x887   :  { %9134 = vmatprep.mubr.msk.f32.mxu1 %vm1327_vm5, %v12421_v14  ;;  %10391 = vmatpush3.bf16.msra.mxu0 %v10388_v50  ;;  %v4054_v50 = vld [vmem:[#allocation4 + $0x178] sm:$0xff] }
 0x888   :  { %9167 = vmatprep.mubr.msk.f32.mxu0 %vm1327_vm5, %v12368_v13  ;;  %10393 = vmatprep.subr.bf16.mxu0 %v10392_v40  ;;  %v12530_v56 = vpack.c.bf16 %v4054_v50, %v4053_v43 }
 0x889   :  { %10415 = vmatpush3.bf16.msra.mxu1 %v10412_v57 }
 0x88a   :  { %9135 = vmatmul.mubr.msk.f32.gmra.mrb[50].mxu1 %vm1327_vm5, %v12427_v3  ;;  %10417 = vmatprep.subr.bf16.mxu1 %v10416_v63 }
 0x88b   :  { %9137 = vmatprep.mubr.msk.f32.mxu1 %vm1327_vm5, %v12437_v5  ;;  %10395 = vmatpush3.bf16.msra.mxu0 %v10392_v40  ;;  %v603_v40 = vpop.permute.xlu1 %602 }
 0x88c   :  { %10397 = vmatprep.subr.bf16.mxu0 %v10396_v27 }
 0x88d   :  { %10419 = vmatpush3.bf16.msra.mxu1 %v10416_v63 }
 0x88e   :  { %9138 = vmatmul.mubr.msk.f32.gmra.mrb[52].mxu1 %vm1327_vm5, %v12441_v45  ;;  %10421 = vmatprep.subr.bf16.mxu1 %v10420_v58 }
 0x88f   :  { %9140 = vmatprep.mubr.msk.f32.mxu1 %vm1327_vm5, %v12451_v33  ;;  %10399 = vmatpush3.bf16.msra.mxu0 %v10396_v27  ;;  %v619_v27 = vsel %vm254_vm3, %v13486_v25, %v571_v31 }
 0x890   :  { %10401 = vmatprep.subr.bf16.mxu0 %v10400_v59  ;;  %v628_v55 = vsel %vm620_vm4, %v619_v27, %v603_v40 }
 0x891   :  { %10423 = vmatpush3.bf16.msra.mxu1 %v10420_v58  ;;  %v643_v37 = vadd.f32 %v12273_v2, %v628_v55 }
 0x892   :  { %10425 = vmatprep.subr.bf16.mxu1 %v10424_v36 }
 0x893   :  { %10403 = vmatpush3.bf16.msra.mxu0 %v10400_v59  ;;  %v935_v59 = vpop.permute.xlu1 %934 }
 0x894   :  { %10405 = vmatprep.subr.bf16.mxu0 %v10404_v51  ;;  %v959_v11 = vsel %vm620_vm4, %v951_v32, %v935_v59 }
 0x895   :  { %10427 = vmatpush3.bf16.msra.mxu1 %v10424_v36  ;;  %v975_v57 = vadd.f32 %v12197_v44, %v959_v11 }
 0x896   :  { %10429 = vmatprep.subr.bf16.mxu1 %v10428_v41 }
 0x897   :  { %10407 = vmatpush3.bf16.msra.mxu0 %v10404_v51  ;;  %v7395_v51 = vld [vmem:[%s13429_s12] ss:$0 sm:$0xff]  ;;  %v1267_v29 = vpop.permute.xlu1 %1266 }
 0x898   :  { %10409 = vmatprep.subr.bf16.mxu0 %v10408_v6  ;;  %v1291_v52 = vsel %vm620_vm4, %v1283_v47, %v1267_v29  ;;  %v4233_v47 = vld [vmem:[#allocation4 + $0x220] sm:$0xff]  ;;  %v4234_v29 = vld [vmem:[#allocation4 + $0x228] sm:$0xff] }
 0x899   :  { %10431 = vmatpush3.bf16.msra.mxu1 %v10428_v41  ;;  %v1307_v43 = vadd.f32 %v12286_v34, %v1291_v52  ;;  %v12637_v52 = vpack.c.bf16 %v4234_v29, %v4233_v47 }
 0x89a   :  { %10433 = vmatprep.subr.bf16.mxu1 %v10432_v46 }
 0x89b   :  { %10411 = vmatpush3.bf16.msra.mxu0 %v10408_v6 }
 0x89c   :  { %10436 = vmatprep.subr.bf16.mxu0 %v13472_v1 }
 0x89d   :  { %10435 = vmatpush3.bf16.msra.mxu1 %v10432_v46 }
 0x89e   :  { %9168 = vmatmul.mubr.msk.f32.vlgmr.msra.gmra.mrb[56].mxu0 %vm1327_vm5, %v12409_v49  ;;  %10454 = vmatprep.subr.bf16.mxu1 %v13472_v1 }
 0x89f   :  { %9170 = vmatprep.mubr.msk.f32.mxu0 %vm1327_vm5, %v12421_v14  ;;  %10438 = vmatpush3.bf16.msra.mxu0 %v12480_v0 }
 0x8a0   :  { %10439 = vmatprep.subr.bf16.mxu0 %v13472_v1 }
 0x8a2   :  { %9171 = vmatmul.mubr.msk.f32.gmra.mrb[58].mxu0 %vm1327_vm5, %v12427_v3 }
 0x8a3   :  { %9173 = vmatprep.mubr.msk.f32.mxu0 %vm1327_vm5, %v12437_v5  ;;  %10441 = vmatpush3.bf16.msra.mxu0 %v12490_v9 }
 0x8a4   :  { %10442 = vmatprep.subr.bf16.mxu0 %v13472_v1 }
 0x8a6   :  { %9174 = vmatmul.mubr.msk.f32.gmra.mrb[60].mxu0 %vm1327_vm5, %v12441_v45 }
 0x8a7   :  { %9176 = vmatprep.mubr.msk.f32.mxu0 %vm1327_vm5, %v12451_v33  ;;  %10444 = vmatpush3.bf16.msra.mxu0 %v12500_v8 }
 0x8a8   :  { %10445 = vmatprep.subr.bf16.mxu0 %v13472_v1 }
 0x8ab   :  { %10447 = vmatpush3.bf16.msra.mxu0 %v12510_v26 }
 0x8ac   :  { %10448 = vmatprep.subr.bf16.mxu0 %v13472_v1 }
 0x8af   :  { %10450 = vmatpush3.bf16.msra.mxu0 %v12520_v61 }
 0x8b0   :  { %10451 = vmatprep.subr.bf16.mxu0 %v13472_v1 }
 0x8b3   :  { %10453 = vmatpush3.bf16.msra.mxu0 %v12530_v56 }
 0x8b4   :  { %10472 = vmatprep.subr.bf16.mxu0 %v13472_v1 }
 0x941   :  { %v3431_v53 = vpop.f32.mrb[52].mxu0  ;;  %v3520_v6 = vpop.f32.mrb[46].mxu1 }
 0x942   :  { %v3432_v16 = vadd.f32 %v7395_v51, %v3431_v53  ;;  %v3521_v18 = vadd.f32 %v7398_v4, %v3520_v6  ;;  %v9052_v39 = vpop.f32.mrb[53].mxu0  ;;  %v9079_v12 = vpop.f32.mrb[47].mxu1  ;;  %v4134_v53 = vld [vmem:[#allocation4 + $0x180] sm:$0xff]  ;;  %v4135_v6 = vld [vmem:[#allocation4 + $0x188] sm:$0xff] }
 0x943   :  { %v4137_v39 = vld [vmem:[#allocation4 + $0x198] sm:$0xff] }
 0x944   :  { %v3613_v21 = vadd.f32 %v3432_v16, %v643_v37  ;;  %v3619_v63 = vadd.f32 %v3521_v18, %v975_v57  ;;  %v4226_v16 = vld [vmem:[#allocation4 + $0x1e8] sm:$0xff]  ;;  %v12586_v57 = vpack.c.bf16 %v4135_v6, %v4134_v53  ;;  %v4136_v18 = vld [vmem:[#allocation4 + $0x190] sm:$0xff] }
 0x946   :  { %v3614_v48 = vsub.f32 0.0, %v3613_v21  ;;  %v3620_v20 = vsub.f32 0.0, %v3619_v63  ;;  %v4227_v21 = vld [vmem:[#allocation4 + $0x1f0] sm:$0xff]  ;;  %v4228_v63 = vld [vmem:[#allocation4 + $0x1f8] sm:$0xff] }
 0x948   :  { %v3615_v35 = vmul.f32 1.442695, %v3614_v48  ;;  %v3621_v38 = vmul.f32 1.442695, %v3620_v20  ;;  %v4138_v48 = vld [vmem:[#allocation4 + $0x1a0] sm:$0xff]  ;;  %v12600_v20 = vpack.c.bf16 %v4228_v63, %v4227_v21 }
 0x94a   :  { %10974 = vpow2.f32 %v3615_v35  ;;  %v4139_v35 = vld [vmem:[#allocation4 + $0x1a8] sm:$0xff] }
 0x94b   :  { %10976 = vpow2.f32 %v3621_v38  ;;  %v4230_v38 = vld [vmem:[#allocation4 + $0x208] sm:$0xff] }
 0x954   :  { %v10975_v58 = vpop.eup %10974 }
 0x955   :  { %v3617_v60 = vadd.f32 1.0, %v10975_v58  ;;  %v10977_v36 = vpop.eup %10976  ;;  %v4140_v58 = vld [vmem:[#allocation4 + $0x1b0] sm:$0xff] }
 0x956   :  { %v3623_v41 = vadd.f32 1.0, %v10977_v36  ;;  %v4143_v36 = vld [vmem:[#allocation4 + $0x1c8] sm:$0xff] }
 0x957   :  { %10978 = vrcp.f32 %v3617_v60  ;;  %v4141_v60 = vld [vmem:[#allocation4 + $0x1b8] sm:$0xff] }
 0x958   :  { %10980 = vrcp.f32 %v3623_v41  ;;  %v4145_v41 = vld [vmem:[#allocation4 + $0x1d8] sm:$0xff] }
 0x959   :  { %v3609_v23 = vpop.f32.mrb[54].mxu0  ;;  %v12549_v2 = vpop.f32.mrb[48].mxu1 }
 0x95a   :  { %v9106_v17 = vpop.f32.mrb[55].mxu0  ;;  %v12551_v44 = vpop.f32.mrb[49].mxu1  ;;  %v3610_v10 = vadd.f32 %v12204_v19, %v3609_v23  ;;  %v4231_v23 = vld [vmem:[#allocation4 + $0x210] sm:$0xff] }
 0x95b   :  { %v4232_v17 = vld [vmem:[#allocation4 + $0x218] sm:$0xff] }
 0x95c   :  { %v12626_v15 = vpack.c.bf16 %v4232_v17, %v4231_v23 }
 0x95d   :  { %v12555_v22 = vpop.f32.mrb[50].mxu1 }
 0x95e   :  { %v12557_v28 = vpop.f32.mrb[51].mxu1 }
 0x961   :  { %v10979_v42 = vpop.eup %10978  ;;  %v12561_v46 = vpop.f32.mrb[52].mxu1 }
 0x962   :  { %v3625_v50 = vmul.f32 %v10979_v42, %v3610_v10  ;;  %v12564_v31 = vpop.f32.mrb[53].mxu1  ;;  %v10981_v7 = vpop.eup %10980  ;;  %v4235_v10 = vld [vmem:[#allocation4 + $0x230] sm:$0xff]  ;;  %v4236_v42 = vld [vmem:[#allocation4 + $0x238] sm:$0xff] }
 0x963   :  { %v3628_v25 = vsub.f32 1.0, %v10981_v7  ;;  %v3630_v54 = vmul.f32 %v10981_v7, %v12354_v24  ;;  %v4225_v24 = vld [vmem:[#allocation4 + $0x1e0] sm:$0xff] }
 0x964   :  { %v3626_v40 = vadd.f32 %v3625_v50, %v1307_v43  ;;  %v12588_v12 = vpack.c.bf16 %v4226_v16, %v4225_v24  ;;  %v12645_v50 = vpack.c.bf16 %v4236_v42, %v4235_v10  ;;  %v12723_v10 = vld [vmem:[%s13428_s11 + $0x4] ss:$0 sm:$0xff] }
 0x965   :  { %v12728_v42 = vld [vmem:[%s13429_s12 + $0x4] ss:$0 sm:$0xff] }
 0x966   :  { %10982 = vtanh.f32 %v3626_v40 }
 0x970   :  { %v10983_v27 = vpop.eup %10982 }
 0x971   :  { %v3629_v32 = vmul.f32 %v10983_v27, %v3628_v25  ;;  %v12567_v59 = vpop.f32.mrb[56].mxu0 }
 0x972   :  { %v12569_v19 = vpop.f32.mrb[57].mxu0 }
 0x973   :  { %v3631_v55 = vadd.f32 %v3630_v54, %v3629_v32  ;;  %v12693_v54 = vld [vmem:[%s13428_s11 + $0x3] ss:$0 sm:$0xff]  ;;  %v7448_v32 = vld [vmem:[%s13428_s11 + $0x5] ss:$0 sm:$0xff] }
 0x975   :  { %3632 = vst.msk [vmem:[#allocation2 + $0x38] sm:$0xff] %vm1327_vm5, %v3631_v55  ;;  %v12572_v34 = vpop.f32.mrb[58].mxu0  ;;  %v12701_v55 = vld [vmem:[%s13429_s12 + $0x3] ss:$0 sm:$0xff] }
 0x976   :  { %v12574_v11 = vpop.f32.mrb[59].mxu0 }
 0x979   :  { %v12576_v51 = vpop.f32.mrb[60].mxu0 }
 0x97a   :  { %v12578_v4 = vpop.f32.mrb[61].mxu0 }
 0x97c   :  { %v3640_v37 = vld [vmem:[#allocation2 + $0x38] sm:$0xff] }
 0x97d   :  { %9141 = vmatmul.mubr.msk.f32.gmra.mrb[54].mxu1 %vm1327_vm5, %v3640_v37  ;;  %9177 = vmatmul.mubr.msk.f32.gmra.mrb[62].mxu0 %vm1327_vm5, %v3640_v37 }
 0x97e   :  { %9203 = vmatprep.mubr.msk.f32.mxu1 %vm1327_vm5, %v12368_v13  ;;  %9239 = vmatprep.mubr.msk.f32.mxu0 %vm11145_vm2, %v13471_v30  ;;  %v12596_v13 = vpack.c.bf16 %v4137_v39, %v4136_v18 }
 0x981   :  { %9204 = vmatmul.mubr.msk.f32.vlgmr.msra.gmra.mrb[56].mxu1 %vm1327_vm5, %v12409_v49  ;;  %9240 = vmatmul.mubr.f32.vlgmr.msra.gmra.mrb[64].mxu0 %v13471_v30  ;;  %v4229_v49 = vld [vmem:[#allocation4 + $0x200] sm:$0xff] }
 0x982   :  { %10456 = vmatpush3.bf16.msra.mxu1 %v12586_v57  ;;  %9206 = vmatprep.mubr.msk.f32.mxu1 %vm1327_vm5, %v12421_v14  ;;  %v12610_v14 = vpack.c.bf16 %v4139_v35, %v4138_v48  ;;  %v12614_v62 = vpack.c.bf16 %v4230_v38, %v4229_v49 }
 0x983   :  { %10457 = vmatprep.subr.bf16.mxu1 %v13472_v1  ;;  %10474 = vmatpush3.bf16.msra.mxu0 %v12588_v12 }
 0x984   :  { %10475 = vmatprep.subr.bf16.mxu0 %v13472_v1  ;;  %9293 = vmatprep.mubr.msk.f32.mxu0 %vm11145_vm2, %v13471_v30 }
 0x985   :  { %9207 = vmatmul.mubr.msk.f32.gmra.mrb[58].mxu1 %vm1327_vm5, %v12427_v3  ;;  %v12622_v3 = vpack.c.bf16 %v4141_v60, %v4140_v58 }
 0x986   :  { %10459 = vmatpush3.bf16.msra.mxu1 %v12596_v13  ;;  %9209 = vmatprep.mubr.msk.f32.mxu1 %vm1327_vm5, %v12437_v5  ;;  %v4142_v5 = vld [vmem:[#allocation4 + $0x1c0] sm:$0xff] }
 0x987   :  { %10460 = vmatprep.subr.bf16.mxu1 %v13472_v1  ;;  %10477 = vmatpush3.bf16.msra.mxu0 %v12600_v20 }
 0x988   :  { %10478 = vmatprep.subr.bf16.mxu0 %v13472_v1 }
 0x989   :  { %9210 = vmatmul.mubr.msk.f32.gmra.mrb[60].mxu1 %vm1327_vm5, %v12441_v45  ;;  %v12631_v45 = vpack.c.bf16 %v4143_v36, %v4142_v5 }
 0x98a   :  { %10462 = vmatpush3.bf16.msra.mxu1 %v12610_v14  ;;  %9212 = vmatprep.mubr.msk.f32.mxu1 %vm1327_vm5, %v12451_v33  ;;  %v4144_v33 = vld [vmem:[#allocation4 + $0x1d0] sm:$0xff] }
 0x98b   :  { %10463 = vmatprep.subr.bf16.mxu1 %v13472_v1  ;;  %10480 = vmatpush3.bf16.msra.mxu0 %v12614_v62  ;;  %v12641_v43 = vpack.c.bf16 %v4145_v41, %v4144_v33 }
 0x98c   :  { %10481 = vmatprep.subr.bf16.mxu0 %v13472_v1 }
 0x98d   :  { %9213 = vmatmul.mubr.msk.f32.gmra.mrb[62].mxu1 %vm1327_vm5, %v3640_v37  ;;  %v3752_v37 = vadd.f32 %v12693_v54, %v12551_v44 }
 0x98e   :  { %10465 = vmatpush3.bf16.msra.mxu1 %v12622_v3  ;;  %9266 = vmatprep.mubr.msk.f32.mxu1 %vm11145_vm2, %v13471_v30 }
 0x98f   :  { %10466 = vmatprep.subr.bf16.mxu1 %v13472_v1  ;;  %10483 = vmatpush3.bf16.msra.mxu0 %v12626_v15 }
 0x990   :  { %10484 = vmatprep.subr.bf16.mxu0 %v13472_v1 }
 0x992   :  { %10468 = vmatpush3.bf16.msra.mxu1 %v12631_v45 }
 0x993   :  { %10469 = vmatprep.subr.bf16.mxu1 %v13472_v1  ;;  %10486 = vmatpush3.bf16.msra.mxu0 %v12637_v52 }
 0x994   :  { %10487 = vmatprep.subr.bf16.mxu0 %v13472_v1 }
 0x996   :  { %10471 = vmatpush3.bf16.msra.mxu1 %v12641_v43 }
 0x997   :  { %10489 = vmatpush3.bf16.msra.mxu0 %v12645_v50  ;;  %10490 = vmatprep.subr.bf16.mxu1 %v13472_v1 }
 0x998   :  { %10508 = vmatprep.subr.bf16.mxu0 %v13472_v1 }
 0x999   :  { %9267 = vmatmul.mubr.f32.vlgmr.msra.gmra.mrb[64].mxu1 %v13471_v30 }
 0x99a   :  { %9294 = vmatmul.mubr.f32.vlgmr.msra.gmra.mrb[66].mxu0 %v13471_v30  ;;  %10492 = vmatpush3.bf16.msra.mxu1 %v12480_v0 }
 0x99b   :  { %10510 = vmatpush3.bf16.msra.mxu0 %v12586_v57  ;;  %10493 = vmatprep.subr.bf16.mxu1 %v13472_v1 }
 0x99c   :  { %10511 = vmatprep.subr.bf16.mxu0 %v13472_v1  ;;  %9320 = vmatprep.mubr.msk.f32.mxu1 %vm11145_vm2, %v13471_v30 }
 0x99d   :  { %9347 = vmatprep.mubr.msk.f32.mxu0 %vm11145_vm2, %v13471_v30 }
 0x99e   :  { %10495 = vmatpush3.bf16.msra.mxu1 %v12490_v9 }
 0x99f   :  { %10513 = vmatpush3.bf16.msra.mxu0 %v12596_v13  ;;  %10496 = vmatprep.subr.bf16.mxu1 %v13472_v1 }
 0x9a0   :  { %10514 = vmatprep.subr.bf16.mxu0 %v13472_v1 }
 0x9a2   :  { %10498 = vmatpush3.bf16.msra.mxu1 %v12500_v8 }
 0x9a3   :  { %10516 = vmatpush3.bf16.msra.mxu0 %v12610_v14  ;;  %10499 = vmatprep.subr.bf16.mxu1 %v13472_v1 }
 0x9a4   :  { %10517 = vmatprep.subr.bf16.mxu0 %v13472_v1 }
 0x9a6   :  { %10501 = vmatpush3.bf16.msra.mxu1 %v12510_v26 }
 0x9a7   :  { %10519 = vmatpush3.bf16.msra.mxu0 %v12622_v3  ;;  %10502 = vmatprep.subr.bf16.mxu1 %v13472_v1 }
 0x9a8   :  { %10520 = vmatprep.subr.bf16.mxu0 %v13472_v1 }
 0x9aa   :  { %10504 = vmatpush3.bf16.msra.mxu1 %v12520_v61 }
 0x9ab   :  { %10522 = vmatpush3.bf16.msra.mxu0 %v12631_v45  ;;  %10505 = vmatprep.subr.bf16.mxu1 %v13472_v1 }
 0x9ac   :  { %10523 = vmatprep.subr.bf16.mxu0 %v13472_v1 }
 0x9ae   :  { %10507 = vmatpush3.bf16.msra.mxu1 %v12530_v56 }
 0x9af   :  { %10525 = vmatpush3.bf16.msra.mxu0 %v12641_v43  ;;  %10526 = vmatprep.subr.bf16.mxu1 %v13472_v1 }
 0x9b0   :  { %10544 = vmatprep.subr.bf16.mxu0 %v13472_v1 }
 0xa50   :  { %v12682_v40 = vpop.f32.mrb[54].mxu1  ;;  %v12684_v7 = vpop.f32.mrb[62].mxu0 }
 0xa51   :  { %13489 = vst [vmem:[#allocation20_spill] sm:$0xff] %v12682_v40  ;;  %13490 = vst [vmem:[#allocation8_spill] sm:$0xff] %v12684_v7  ;;  %v12686_v25 = vpop.f32.mrb[55].mxu1  ;;  %v12688_v27 = vpop.f32.mrb[63].mxu0 }
 0xa54   :  { %v9205_v53 = vpop.f32.mrb[56].mxu1  ;;  %v4129_v6 = vpop.f32.mrb[64].mxu0 }
 0xa55   :  { %v12705_v24 = vadd.f32 %v9205_v53, %v7448_v32  ;;  %v4130_v16 = vadd.f32 %v12701_v55, %v4129_v6  ;;  %v4003_v18 = vpop.f32.mrb[57].mxu1  ;;  %v9241_v39 = vpop.f32.mrb[65].mxu0  ;;  %v3878_v6 = vadd.f32 %v12723_v10, %v12569_v19 }
 0xa57   :  { %v4315_v21 = vadd.f32 %v4130_v16, %v3752_v37 }
 0xa58   :  { %v9208_v63 = vpop.f32.mrb[58].mxu1 }
 0xa59   :  { %v4316_v48 = vsub.f32 0.0, %v4315_v21  ;;  %v12708_v35 = vadd.f32 %v9208_v63, %v7448_v32  ;;  %v4013_v49 = vpop.f32.mrb[59].mxu1  ;;  %v12736_v21 = vld [vmem:[%s13429_s12 + $0x5] ss:$0 sm:$0xff] }
 0xa5a   :  { %v12710_v38 = vadd.f32 %v7448_v32, %v4013_v49 }
 0xa5b   :  { %v4317_v58 = vmul.f32 1.442695, %v4316_v48 }
 0xa5c   :  { %v9211_v60 = vpop.f32.mrb[60].mxu1 }
 0xa5d   :  { %10984 = vpow2.f32 %v4317_v58  ;;  %v12712_v23 = vadd.f32 %v9211_v60, %v7448_v32  ;;  %v4023_v44 = vpop.f32.mrb[61].mxu1 }
 0xa5e   :  { %v12714_v17 = vadd.f32 %v7448_v32, %v4023_v44 }
 0xa60   :  { %v9214_v5 = vpop.f32.mrb[62].mxu1 }
 0xa61   :  { %v12716_v36 = vadd.f32 %v9214_v5, %v7448_v32  ;;  %v4033_v47 = vpop.f32.mrb[63].mxu1  ;;  %v4004_v5 = vadd.f32 %v7448_v32, %v4003_v18  ;;  %v3883_v18 = vadd.f32 %v12567_v59, %v12723_v10 }
 0xa62   :  { %v12718_v29 = vadd.f32 %v7448_v32, %v4033_v47  ;;  %v3757_v32 = vadd.f32 %v12549_v2, %v12693_v54 }
 0xa63   :  { %13491 = vst [vmem:[#allocation10_spill] sm:$0xff] %v12716_v36 }
 0xa67   :  { %v10985_v33 = vpop.eup %10984 }
 0xa68   :  { %v4319_v41 = vadd.f32 1.0, %v10985_v33 }
 0xa6a   :  { %10986 = vrcp.f32 %v4319_v41 }
 0xa6c   :  { %v4220_v53 = vpop.f32.mrb[64].mxu1 }
 0xa6d   :  { %v4221_v37 = vadd.f32 %v12728_v42, %v4220_v53  ;;  %v9268_v16 = vpop.f32.mrb[65].mxu1  ;;  %v4311_v39 = vpop.f32.mrb[66].mxu0 }
 0xa6e   :  { %v9295_v63 = vpop.f32.mrb[67].mxu0  ;;  %v4312_v58 = vadd.f32 %v12736_v21, %v4311_v39 }
 0xa6f   :  { %v4321_v48 = vadd.f32 %v4221_v37, %v3878_v6 }
 0xa71   :  { %v4322_v49 = vsub.f32 0.0, %v4321_v48 }
 0xa73   :  { %v4323_v60 = vmul.f32 1.442695, %v4322_v49 }
 0xa74   :  { %v10987_v44 = vpop.eup %10986 }
 0xa75   :  { %10988 = vpow2.f32 %v4323_v60  ;;  %v4327_v47 = vmul.f32 %v10987_v44, %v4312_v58 }
 0xa77   :  { %v4328_v19 = vadd.f32 %v4327_v47, %v4004_v5 }
 0xa7f   :  { %v10989_v33 = vpop.eup %10988 }
 0xa80   :  { %v4325_v41 = vadd.f32 1.0, %v10989_v33 }
 0xa82   :  { %10990 = vrcp.f32 %v4325_v41 }
 0xa83   :  { %10992 = vtanh.f32 %v4328_v19 }
 0xa8c   :  { %v10991_v53 = vpop.eup %10990 }
 0xa8d   :  { %v4330_v16 = vsub.f32 1.0, %v10991_v53  ;;  %v10993_v36 = vpop.eup %10992  ;;  %v4332_v40 = vmul.f32 0.0, %v10991_v53 }
 0xa8f   :  { %v4331_v7 = vmul.f32 %v10993_v36, %v4330_v16 }
 0xa91   :  { %v12739_v63 = vadd.f32 %v4332_v40, %v4331_v7 }
 0xa93   :  { %4334 = vst.msk [vmem:[#allocation2] sm:$0xff] %vm1327_vm5, %v12739_v63  ;;  %9321 = vmatmul.mubr.msk.f32.vlgmr.msra.gmra.mrb[66].mxu1 %vm1327_vm5, %v12739_v63  ;;  %9348 = vmatmul.mubr.msk.f32.vlgmr.msra.gmra.mrb[68].mxu0 %vm1327_vm5, %v12739_v63 }
 0xa94   :  { %10528 = vmatpush3.bf16.msra.mxu1 %v12588_v12  ;;  %9374 = vmatprep.mubr.msk.f32.mxu1 %vm11145_vm2, %v13471_v30 }
 0xa95   :  { %10529 = vmatprep.subr.bf16.mxu1 %v13472_v1  ;;  %10546 = vmatpush3.bf16.msra.mxu0 %v12480_v0 }
 0xa96   :  { %10547 = vmatprep.subr.bf16.mxu0 %v13472_v1  ;;  %9401 = vmatprep.mubr.msk.f32.mxu0 %vm11145_vm2, %v13471_v30 }
 0xa98   :  { %10531 = vmatpush3.bf16.msra.mxu1 %v12600_v20 }
 0xa99   :  { %10532 = vmatprep.subr.bf16.mxu1 %v13472_v1  ;;  %10549 = vmatpush3.bf16.msra.mxu0 %v12490_v9 }
 0xa9a   :  { %10550 = vmatprep.subr.bf16.mxu0 %v13472_v1 }
 0xa9c   :  { %10534 = vmatpush3.bf16.msra.mxu1 %v12614_v62 }
 0xa9d   :  { %10535 = vmatprep.subr.bf16.mxu1 %v13472_v1  ;;  %10552 = vmatpush3.bf16.msra.mxu0 %v12500_v8 }
 0xa9e   :  { %10553 = vmatprep.subr.bf16.mxu0 %v13472_v1 }
 0xaa0   :  { %10537 = vmatpush3.bf16.msra.mxu1 %v12626_v15 }
 0xaa1   :  { %10538 = vmatprep.subr.bf16.mxu1 %v13472_v1  ;;  %10555 = vmatpush3.bf16.msra.mxu0 %v12510_v26 }
 0xaa2   :  { %10556 = vmatprep.subr.bf16.mxu0 %v13472_v1 }
 0xaa4   :  { %10540 = vmatpush3.bf16.msra.mxu1 %v12637_v52 }
 0xaa5   :  { %10541 = vmatprep.subr.bf16.mxu1 %v13472_v1  ;;  %10558 = vmatpush3.bf16.msra.mxu0 %v12520_v61 }
 0xaa6   :  { %10559 = vmatprep.subr.bf16.mxu0 %v13472_v1 }
 0xaa8   :  { %10543 = vmatpush3.bf16.msra.mxu1 %v12645_v50 }
 0xaa9   :  { %10562 = vmatprep.subr.bf16.mxu1 %v13472_v1  ;;  %10561 = vmatpush3.bf16.msra.mxu0 %v12530_v56 }
 0xaaa   :  { %10580 = vmatprep.subr.bf16.mxu0 %v13472_v1 }
 0xaab   :  { %9375 = vmatmul.mubr.msk.f32.vlgmr.msra.gmra.mrb[68].mxu1 %vm1327_vm5, %v12739_v63 }
 0xaac   :  { %10564 = vmatpush3.bf16.msra.mxu1 %v12586_v57  ;;  %9428 = vmatprep.mubr.msk.f32.mxu1 %vm11145_vm2, %v13471_v30 }
 0xaad   :  { %10565 = vmatprep.subr.bf16.mxu1 %v13472_v1 }
 0xab0   :  { %10567 = vmatpush3.bf16.msra.mxu1 %v12596_v13 }
 0xab1   :  { %10568 = vmatprep.subr.bf16.mxu1 %v13472_v1 }
 0xab4   :  { %10570 = vmatpush3.bf16.msra.mxu1 %v12610_v14 }
 0xab5   :  { %10571 = vmatprep.subr.bf16.mxu1 %v13472_v1 }
 0xab8   :  { %10573 = vmatpush3.bf16.msra.mxu1 %v12622_v3 }
 0xab9   :  { %10574 = vmatprep.subr.bf16.mxu1 %v13472_v1 }
 0xabc   :  { %10576 = vmatpush3.bf16.msra.mxu1 %v12631_v45 }
 0xabd   :  { %10577 = vmatprep.subr.bf16.mxu1 %v13472_v1 }
 0xac0   :  { %10579 = vmatpush3.bf16.msra.mxu1 %v12641_v43 }
 0xac1   :  { %10598 = vmatprep.subr.bf16.mxu1 %v13472_v1 }
 0xb66   :  { %v4423_v40 = vpop.f32.mrb[66].mxu1  ;;  %v4512_v7 = vpop.f32.mrb[68].mxu0 }
 0xb67   :  { %v4424_v36 = vadd.f32 %v12701_v55, %v4423_v40  ;;  %v4513_v6 = vadd.f32 %v12728_v42, %v4512_v7  ;;  %v9322_v37 = vpop.f32.mrb[67].mxu1  ;;  %v9349_v39 = vpop.f32.mrb[69].mxu0 }
 0xb69   :  { %v4605_v48 = vadd.f32 %v4424_v36, %v3757_v32  ;;  %v4611_v49 = vadd.f32 %v4513_v6, %v3883_v18 }
 0xb6b   :  { %v4606_v58 = vsub.f32 0.0, %v4605_v48  ;;  %v4612_v44 = vsub.f32 0.0, %v4611_v49 }
 0xb6d   :  { %v4607_v60 = vmul.f32 1.442695, %v4606_v58  ;;  %v4613_v5 = vmul.f32 1.442695, %v4612_v44 }
 0xb6f   :  { %10994 = vpow2.f32 %v4607_v60 }
 0xb70   :  { %10996 = vpow2.f32 %v4613_v5 }
 0xb79   :  { %v10995_v47 = vpop.eup %10994 }
 0xb7a   :  { %v4609_v19 = vadd.f32 1.0, %v10995_v47  ;;  %v10997_v59 = vpop.eup %10996 }
 0xb7b   :  { %v4615_v41 = vadd.f32 1.0, %v10997_v59 }
 0xb7c   :  { %10998 = vrcp.f32 %v4609_v19 }
 0xb7d   :  { %11000 = vrcp.f32 %v4615_v41 }
 0xb7e   :  { %v4601_v2 = vpop.f32.mrb[68].mxu1 }
 0xb7f   :  { %v9376_v33 = vpop.f32.mrb[69].mxu1  ;;  %v4602_v53 = vadd.f32 %v12736_v21, %v4601_v2 }
 0xb86   :  { %v10999_v16 = vpop.eup %10998 }
 0xb87   :  { %v4617_v40 = vmul.f32 %v10999_v16, %v4602_v53  ;;  %v11001_v32 = vpop.eup %11000 }
 0xb88   :  { %v4620_v18 = vsub.f32 1.0, %v11001_v32  ;;  %v4622_v37 = vmul.f32 %v11001_v32, %v12739_v63 }
 0xb89   :  { %v4618_v7 = vadd.f32 %v4617_v40, %v12705_v24 }
 0xb8b   :  { %11002 = vtanh.f32 %v4618_v7 }
 0xb95   :  { %v11003_v36 = vpop.eup %11002 }
 0xb96   :  { %v4621_v6 = vmul.f32 %v11003_v36, %v4620_v18 }
 0xb98   :  { %v12800_v39 = vadd.f32 %v4622_v37, %v4621_v6  ;;  %v5300_v6 = vld [vmem:[#allocation4 + $0x198] sm:$0xff]  ;;  %v5209_v37 = vld [vmem:[#allocation4 + $0x140] sm:$0xff] }
 0xb9a   :  { %4624 = vst.msk [vmem:[#allocation2 + $0x8] sm:$0xff] %vm1327_vm5, %v12800_v39  ;;  %9402 = vmatmul.mubr.msk.f32.vlgmr.msra.gmra.mrb[70].mxu0 %vm1327_vm5, %v12800_v39  ;;  %9429 = vmatmul.mubr.msk.f32.vlgmr.msra.gmra.mrb[70].mxu1 %vm1327_vm5, %v12800_v39 }
 0xb9b   :  { %10582 = vmatpush3.bf16.msra.mxu0 %v12588_v12  ;;  %9455 = vmatprep.mubr.msk.f32.mxu0 %vm11145_vm2, %v13471_v30 }
 0xb9c   :  { %10583 = vmatprep.subr.bf16.mxu0 %v13472_v1  ;;  %10600 = vmatpush3.bf16.msra.mxu1 %v12480_v0 }
 0xb9d   :  { %10601 = vmatprep.subr.bf16.mxu1 %v13472_v1  ;;  %9482 = vmatprep.mubr.msk.f32.mxu1 %vm11145_vm2, %v13471_v30 }
 0xb9f   :  { %10585 = vmatpush3.bf16.msra.mxu0 %v12600_v20 }
 0xba0   :  { %10586 = vmatprep.subr.bf16.mxu0 %v13472_v1  ;;  %10603 = vmatpush3.bf16.msra.mxu1 %v12490_v9 }
 0xba1   :  { %10604 = vmatprep.subr.bf16.mxu1 %v13472_v1 }
 0xba3   :  { %10588 = vmatpush3.bf16.msra.mxu0 %v12614_v62 }
 0xba4   :  { %10589 = vmatprep.subr.bf16.mxu0 %v13472_v1  ;;  %10606 = vmatpush3.bf16.msra.mxu1 %v12500_v8  ;;  %v3762_v8 = vadd.f32 %v12693_v54, %v12557_v28 }
 0xba5   :  { %10607 = vmatprep.subr.bf16.mxu1 %v13472_v1 }
 0xba7   :  { %10591 = vmatpush3.bf16.msra.mxu0 %v12626_v15 }
 0xba8   :  { %10592 = vmatprep.subr.bf16.mxu0 %v13472_v1  ;;  %10609 = vmatpush3.bf16.msra.mxu1 %v12510_v26  ;;  %v3888_v26 = vadd.f32 %v12723_v10, %v12574_v11 }
 0xba9   :  { %10610 = vmatprep.subr.bf16.mxu1 %v13472_v1 }
 0xbab   :  { %10594 = vmatpush3.bf16.msra.mxu0 %v12637_v52 }
 0xbac   :  { %10595 = vmatprep.subr.bf16.mxu0 %v13472_v1  ;;  %10612 = vmatpush3.bf16.msra.mxu1 %v12520_v61 }
 0xbad   :  { %10613 = vmatprep.subr.bf16.mxu1 %v13472_v1 }
 0xbaf   :  { %10597 = vmatpush3.bf16.msra.mxu0 %v12645_v50 }
 0xbb0   :  { %10616 = vmatprep.subr.bf16.mxu0 %v13472_v1  ;;  %10615 = vmatpush3.bf16.msra.mxu1 %v12530_v56 }
 0xbb1   :  { %10634 = vmatprep.subr.bf16.mxu1 %v13472_v1 }
 0xbb2   :  { %9456 = vmatmul.mubr.msk.f32.vlgmr.msra.gmra.mrb[72].mxu0 %vm1327_vm5, %v12800_v39 }
 0xbb3   :  { %10618 = vmatpush3.bf16.msra.mxu0 %v12586_v57  ;;  %9509 = vmatprep.mubr.msk.f32.mxu0 %vm11145_vm2, %v13471_v30 }
 0xbb4   :  { %10619 = vmatprep.subr.bf16.mxu0 %v13472_v1 }
 0xbb7   :  { %10621 = vmatpush3.bf16.msra.mxu0 %v12596_v13 }
 0xbb8   :  { %10622 = vmatprep.subr.bf16.mxu0 %v13472_v1 }
 0xbbb   :  { %10624 = vmatpush3.bf16.msra.mxu0 %v12610_v14 }
 0xbbc   :  { %10625 = vmatprep.subr.bf16.mxu0 %v13472_v1 }
 0xbbf   :  { %10627 = vmatpush3.bf16.msra.mxu0 %v12622_v3 }
 0xbc0   :  { %10628 = vmatprep.subr.bf16.mxu0 %v13472_v1 }
 0xbc3   :  { %10630 = vmatpush3.bf16.msra.mxu0 %v12631_v45 }
 0xbc4   :  { %10631 = vmatprep.subr.bf16.mxu0 %v13472_v1 }
 0xbc7   :  { %10633 = vmatpush3.bf16.msra.mxu0 %v12641_v43 }
 0xbc8   :  { %10652 = vmatprep.subr.bf16.mxu0 %v13472_v1 }
 0xc6d   :  { %v4713_v0 = vpop.f32.mrb[70].mxu0  ;;  %v4802_v9 = vpop.f32.mrb[70].mxu1 }
 0xc6e   :  { %v4714_v61 = vadd.f32 %v12701_v55, %v4713_v0  ;;  %v4803_v56 = vadd.f32 %v12728_v42, %v4802_v9  ;;  %v9403_v13 = vpop.f32.mrb[71].mxu0  ;;  %v9430_v24 = vpop.f32.mrb[71].mxu1  ;;  %v5211_v9 = vld [vmem:[#allocation4 + $0x150] sm:$0xff] }
 0xc6f   :  { %v5215_v24 = vld [vmem:[#allocation4 + $0x170] sm:$0xff] }
 0xc70   :  { %v4895_v63 = vadd.f32 %v4714_v61, %v3762_v8  ;;  %v4901_v48 = vadd.f32 %v4803_v56, %v3888_v26  ;;  %v5212_v8 = vld [vmem:[#allocation4 + $0x158] sm:$0xff]  ;;  %v5213_v61 = vld [vmem:[#allocation4 + $0x160] sm:$0xff]  ;;  %v5214_v56 = vld [vmem:[#allocation4 + $0x168] sm:$0xff] }
 0xc71   :  { %v12908_v26 = vpack.c.bf16 %v5212_v8, %v5211_v9  ;;  %v12912_v13 = vpack.c.bf16 %v5214_v56, %v5213_v61  ;;  %v5389_v9 = vld [vmem:[#allocation4 + $0x1f8] sm:$0xff]  ;;  %v5391_v8 = vld [vmem:[#allocation4 + $0x208] sm:$0xff]  ;;  %v5392_v56 = vld [vmem:[#allocation4 + $0x210] sm:$0xff] }
 0xc72   :  { %v4896_v49 = vsub.f32 0.0, %v4895_v63  ;;  %v4902_v60 = vsub.f32 0.0, %v4901_v48  ;;  %v5216_v63 = vld [vmem:[#allocation4 + $0x178] sm:$0xff] }
 0xc74   :  { %v4897_v58 = vmul.f32 1.442695, %v4896_v49  ;;  %v4903_v44 = vmul.f32 1.442695, %v4902_v60  ;;  %v3767_v49 = vadd.f32 %v12555_v22, %v12693_v54 }
 0xc76   :  { %11004 = vpow2.f32 %v4897_v58 }
 0xc77   :  { %11006 = vpow2.f32 %v4903_v44 }
 0xc80   :  { %v11005_v5 = vpop.eup %11004 }
 0xc81   :  { %v4899_v47 = vadd.f32 1.0, %v11005_v5  ;;  %v11007_v11 = vpop.eup %11006 }
 0xc82   :  { %v4905_v2 = vadd.f32 1.0, %v11007_v11 }
 0xc83   :  { %11008 = vrcp.f32 %v4899_v47 }
 0xc84   :  { %11010 = vrcp.f32 %v4905_v2 }
 0xc85   :  { %v4891_v28 = vpop.f32.mrb[72].mxu0 }
 0xc86   :  { %v9457_v19 = vpop.f32.mrb[73].mxu0  ;;  %v4892_v33 = vadd.f32 %v12736_v21, %v4891_v28 }
 0xc8d   :  { %v11009_v59 = vpop.eup %11008 }
 0xc8e   :  { %v4907_v41 = vmul.f32 %v11009_v59, %v4892_v33  ;;  %v11011_v16 = vpop.eup %11010 }
 0xc8f   :  { %v4910_v40 = vsub.f32 1.0, %v11011_v16  ;;  %v4912_v18 = vmul.f32 %v11011_v16, %v12800_v39  ;;  %v5210_v39 = vld [vmem:[#allocation4 + $0x148] sm:$0xff] }
 0xc90   :  { %v4908_v53 = vadd.f32 %v4907_v41, %v12710_v38  ;;  %v5299_v38 = vld [vmem:[#allocation4 + $0x190] sm:$0xff]  ;;  %v12902_v0 = vpack.c.bf16 %v5210_v39, %v5209_v37 }
 0xc91   :  { %v5388_v39 = vld [vmem:[#allocation4 + $0x1f0] sm:$0xff] }
 0xc92   :  { %11012 = vtanh.f32 %v4908_v53 }
 0xc9c   :  { %v11013_v7 = vpop.eup %11012 }
 0xc9d   :  { %v4911_v32 = vmul.f32 %v11013_v7, %v4910_v40 }
 0xc9f   :  { %v12861_v36 = vadd.f32 %v4912_v18, %v4911_v32 }
 0xca1   :  { %4914 = vst.msk [vmem:[#allocation2 + $0x10] sm:$0xff] %vm1327_vm5, %v12861_v36  ;;  %9483 = vmatmul.mubr.msk.f32.vlgmr.msra.gmra.mrb[72].mxu1 %vm1327_vm5, %v12861_v36  ;;  %9510 = vmatmul.mubr.msk.f32.vlgmr.msra.gmra.mrb[74].mxu0 %vm1327_vm5, %v12861_v36 }
 0xca2   :  { %10636 = vmatpush3.bf16.msra.mxu1 %v12588_v12  ;;  %9536 = vmatprep.mubr.msk.f32.mxu1 %vm11145_vm2, %v13471_v30  ;;  %v5205_v12 = vld [vmem:[#allocation4 + $0x120] sm:$0xff] }
 0xca3   :  { %10637 = vmatprep.subr.bf16.mxu1 %v13472_v1  ;;  %9563 = vmatprep.mubr.msk.f32.mxu0 %vm11145_vm2, %v13471_v30 }
 0xca6   :  { %10639 = vmatpush3.bf16.msra.mxu1 %v12600_v20  ;;  %v5206_v20 = vld [vmem:[#allocation4 + $0x128] sm:$0xff] }
 0xca7   :  { %10640 = vmatprep.subr.bf16.mxu1 %v13472_v1 }
 0xcaa   :  { %10642 = vmatpush3.bf16.msra.mxu1 %v12614_v62  ;;  %v12891_v62 = vpack.c.bf16 %v5206_v20, %v5205_v12  ;;  %v5386_v12 = vld [vmem:[#allocation4 + $0x1e0] sm:$0xff]  ;;  %v5387_v20 = vld [vmem:[#allocation4 + $0x1e8] sm:$0xff] }
 0xcab   :  { %10643 = vmatprep.subr.bf16.mxu1 %v13472_v1 }
 0xcac   :  { %10654 = vmatpush3.bf16.msra.mxu0 %v12891_v62 }
 0xcad   :  { %10655 = vmatprep.subr.bf16.mxu0 %v13472_v1 }
 0xcae   :  { %10645 = vmatpush3.bf16.msra.mxu1 %v12626_v15  ;;  %v5207_v15 = vld [vmem:[#allocation4 + $0x130] sm:$0xff] }
 0xcaf   :  { %10646 = vmatprep.subr.bf16.mxu1 %v13472_v1 }
 0xcb2   :  { %10648 = vmatpush3.bf16.msra.mxu1 %v12637_v52  ;;  %v5208_v52 = vld [vmem:[#allocation4 + $0x138] sm:$0xff] }
 0xcb3   :  { %10649 = vmatprep.subr.bf16.mxu1 %v13472_v1 }
 0xcb6   :  { %10651 = vmatpush3.bf16.msra.mxu1 %v12645_v50  ;;  %v12895_v50 = vpack.c.bf16 %v5208_v52, %v5207_v15 }
 0xcb7   :  { %10670 = vmatprep.subr.bf16.mxu1 %v13472_v1 }
 0xcb8   :  { %10657 = vmatpush3.bf16.msra.mxu0 %v12895_v50 }
 0xcb9   :  { %9537 = vmatmul.mubr.msk.f32.vlgmr.msra.gmra.mrb[74].mxu1 %vm1327_vm5, %v12861_v36  ;;  %10658 = vmatprep.subr.bf16.mxu0 %v13472_v1 }
 0xcba   :  { %10672 = vmatpush3.bf16.msra.mxu1 %v12586_v57  ;;  %9590 = vmatprep.mubr.msk.f32.mxu1 %vm11145_vm2, %v13471_v30  ;;  %v12897_v57 = vpack.c.bf16 %v5300_v6, %v5299_v38  ;;  %v12936_v6 = vpack.c.bf16 %v5387_v20, %v5386_v12 }
 0xcbb   :  { %10673 = vmatprep.subr.bf16.mxu1 %v13472_v1 }
 0xcbc   :  { %10660 = vmatpush3.bf16.msra.mxu0 %v12902_v0 }
 0xcbd   :  { %10661 = vmatprep.subr.bf16.mxu0 %v13472_v1 }
 0xcbe   :  { %10675 = vmatpush3.bf16.msra.mxu1 %v12897_v57 }
 0xcbf   :  { %10676 = vmatprep.subr.bf16.mxu1 %v13472_v1 }
 0xcc0   :  { %10663 = vmatpush3.bf16.msra.mxu0 %v12908_v26 }
 0xcc1   :  { %10664 = vmatprep.subr.bf16.mxu0 %v13472_v1 }
 0xcc2   :  { %10678 = vmatpush3.bf16.msra.mxu1 %v12610_v14  ;;  %v12918_v14 = vpack.c.bf16 %v5216_v63, %v5215_v24  ;;  %v5393_v24 = vld [vmem:[#allocation4 + $0x218] sm:$0xff] }
 0xcc3   :  { %10679 = vmatprep.subr.bf16.mxu1 %v13472_v1  ;;  %v12963_v63 = vpack.c.bf16 %v5393_v24, %v5392_v56 }
 0xcc4   :  { %10666 = vmatpush3.bf16.msra.mxu0 %v12912_v13 }
 0xcc5   :  { %10667 = vmatprep.subr.bf16.mxu0 %v13472_v1 }
 0xcc6   :  { %10681 = vmatpush3.bf16.msra.mxu1 %v12622_v3 }
 0xcc7   :  { %10682 = vmatprep.subr.bf16.mxu1 %v13472_v1 }
 0xcc8   :  { %10669 = vmatpush3.bf16.msra.mxu0 %v12918_v14 }
 0xcc9   :  { %10688 = vmatprep.subr.bf16.mxu0 %v13472_v1 }
 0xcca   :  { %10684 = vmatpush3.bf16.msra.mxu1 %v12631_v45  ;;  %v3893_v45 = vadd.f32 %v12572_v34, %v12723_v10 }
 0xccb   :  { %10685 = vmatprep.subr.bf16.mxu1 %v13472_v1 }
 0xcce   :  { %10687 = vmatpush3.bf16.msra.mxu1 %v12641_v43 }
 0xccf   :  { %10706 = vmatprep.subr.bf16.mxu1 %v13472_v1 }
 0xd74   :  { %v5003_v3 = vpop.f32.mrb[72].mxu1  ;;  %v5092_v48 = vpop.f32.mrb[74].mxu0 }
 0xd75   :  { %v5004_v58 = vadd.f32 %v12701_v55, %v5003_v3  ;;  %v5093_v60 = vadd.f32 %v12728_v42, %v5092_v48  ;;  %v9484_v44 = vpop.f32.mrb[73].mxu1  ;;  %v9511_v5 = vpop.f32.mrb[75].mxu0  ;;  %v5394_v3 = vld [vmem:[#allocation4 + $0x220] sm:$0xff]  ;;  %v5395_v48 = vld [vmem:[#allocation4 + $0x228] sm:$0xff] }
 0xd76   :  { %v5587_v44 = vld [vmem:[#allocation4 + $0x180] sm:$0xff]  ;;  %v5588_v5 = vld [vmem:[#allocation4 + $0x188] sm:$0xff] }
 0xd77   :  { %v5185_v47 = vadd.f32 %v5004_v58, %v3767_v49  ;;  %v5191_v43 = vadd.f32 %v5093_v60, %v3893_v45  ;;  %v12969_v49 = vpack.c.bf16 %v5395_v48, %v5394_v3  ;;  %v5396_v45 = vld [vmem:[#allocation4 + $0x230] sm:$0xff]  ;;  %v5397_v58 = vld [vmem:[#allocation4 + $0x238] sm:$0xff] }
 0xd78   :  { %v12975_v60 = vpack.c.bf16 %v5397_v58, %v5396_v45 }
 0xd79   :  { %v5186_v28 = vsub.f32 0.0, %v5185_v47  ;;  %v5192_v11 = vsub.f32 0.0, %v5191_v43  ;;  %v12988_v47 = vpack.c.bf16 %v5588_v5, %v5587_v44  ;;  %v5591_v43 = vld [vmem:[#allocation4 + $0x1a0] sm:$0xff] }
 0xd7b   :  { %v5187_v19 = vmul.f32 1.442695, %v5186_v28  ;;  %v5193_v2 = vmul.f32 1.442695, %v5192_v11  ;;  %v5592_v28 = vld [vmem:[#allocation4 + $0x1a8] sm:$0xff]  ;;  %v5593_v11 = vld [vmem:[#allocation4 + $0x1b0] sm:$0xff] }
 0xd7d   :  { %11014 = vpow2.f32 %v5187_v19  ;;  %v12994_v19 = vpack.c.bf16 %v5592_v28, %v5591_v43 }
 0xd7e   :  { %11016 = vpow2.f32 %v5193_v2  ;;  %v5594_v2 = vld [vmem:[#allocation4 + $0x1b8] sm:$0xff] }
 0xd87   :  { %v11015_v33 = vpop.eup %11014 }
 0xd88   :  { %v5189_v59 = vadd.f32 1.0, %v11015_v33  ;;  %v11017_v34 = vpop.eup %11016  ;;  %v12997_v33 = vpack.c.bf16 %v5594_v2, %v5593_v11 }
 0xd89   :  { %v5195_v53 = vadd.f32 1.0, %v11017_v34  ;;  %v5597_v34 = vld [vmem:[#allocation4 + $0x1d0] sm:$0xff] }
 0xd8a   :  { %11018 = vrcp.f32 %v5189_v59  ;;  %v5595_v59 = vld [vmem:[#allocation4 + $0x1c0] sm:$0xff] }
 0xd8b   :  { %11020 = vrcp.f32 %v5195_v53  ;;  %v5598_v53 = vld [vmem:[#allocation4 + $0x1d8] sm:$0xff] }
 0xd8c   :  { %v5181_v22 = vpop.f32.mrb[74].mxu1 }
 0xd8d   :  { %v9538_v41 = vpop.f32.mrb[75].mxu1  ;;  %v5182_v55 = vadd.f32 %v12736_v21, %v5181_v22  ;;  %v5596_v22 = vld [vmem:[#allocation4 + $0x1c8] sm:$0xff] }
 0xd8e   :  { %v13001_v41 = vpack.c.bf16 %v5596_v22, %v5595_v59 }
 0xd94   :  { %v11019_v16 = vpop.eup %11018 }
 0xd95   :  { %v5197_v40 = vmul.f32 %v11019_v16, %v5182_v55  ;;  %v11021_v32 = vpop.eup %11020  ;;  %v13005_v55 = vpack.c.bf16 %v5598_v53, %v5597_v34  ;;  %v13013_v16 = vld [vmem:[%s13429_s12 + $0x3] ss:$0 sm:$0xff]  ;;  %v3777_v34 = vadd.f32 %v12561_v46, %v12693_v54  ;;  %v3903_v53 = vadd.f32 %v12576_v51, %v12723_v10 }
 0xd96   :  { %v5200_v18 = vsub.f32 1.0, %v11021_v32  ;;  %v5202_v38 = vmul.f32 %v11021_v32, %v12861_v36  ;;  %v5390_v36 = vld [vmem:[#allocation4 + $0x200] sm:$0xff]  ;;  %v3772_v32 = vadd.f32 %v12693_v54, %v12564_v31 }
 0xd97   :  { %v5198_v7 = vadd.f32 %v5197_v40, %v12708_v35  ;;  %v12947_v35 = vpack.c.bf16 %v5389_v9, %v5388_v39  ;;  %v12957_v61 = vpack.c.bf16 %v5391_v8, %v5390_v36 }
 0xd99   :  { %11022 = vtanh.f32 %v5198_v7 }
 0xda3   :  { %v11023_v15 = vpop.eup %11022 }
 0xda4   :  { %v5201_v52 = vmul.f32 %v11023_v15, %v5200_v18  ;;  %v3898_v18 = vadd.f32 %v12723_v10, %v12578_v4  ;;  %v13090_v10 = vld [vmem:[%s13429_s12 + $0x5] ss:$0 sm:$0xff] }
 0xda6   :  { %v12938_v37 = vadd.f32 %v5202_v38, %v5201_v52 }
 0xda8   :  { %5204 = vst.msk [vmem:[#allocation2 + $0x18] sm:$0xff] %vm1327_vm5, %v12938_v37  ;;  %9564 = vmatmul.mubr.msk.f32.vlgmr.msra.gmra.mrb[76].mxu0 %vm1327_vm5, %v12938_v37  ;;  %9591 = vmatmul.mubr.msk.f32.vlgmr.msra.gmra.mrb[76].mxu1 %vm1327_vm5, %v12938_v37 }
 0xda9   :  { %10690 = vmatpush3.bf16.msra.mxu0 %v12936_v6  ;;  %9617 = vmatprep.mubr.msk.f32.mxu0 %vm11145_vm2, %v13471_v30 }
 0xdaa   :  { %10691 = vmatprep.subr.bf16.mxu0 %v13472_v1  ;;  %10708 = vmatpush3.bf16.msra.mxu1 %v12891_v62 }
 0xdab   :  { %10709 = vmatprep.subr.bf16.mxu1 %v13472_v1  ;;  %9644 = vmatprep.mubr.msk.f32.mxu1 %vm11145_vm2, %v13471_v30 }
 0xdad   :  { %10693 = vmatpush3.bf16.msra.mxu0 %v12947_v35 }
 0xdae   :  { %10694 = vmatprep.subr.bf16.mxu0 %v13472_v1  ;;  %10711 = vmatpush3.bf16.msra.mxu1 %v12895_v50 }
 0xdaf   :  { %10712 = vmatprep.subr.bf16.mxu1 %v13472_v1 }
 0xdb1   :  { %10696 = vmatpush3.bf16.msra.mxu0 %v12957_v61 }
 0xdb2   :  { %10697 = vmatprep.subr.bf16.mxu0 %v13472_v1  ;;  %10714 = vmatpush3.bf16.msra.mxu1 %v12902_v0 }
 0xdb3   :  { %10715 = vmatprep.subr.bf16.mxu1 %v13472_v1 }
 0xdb5   :  { %10699 = vmatpush3.bf16.msra.mxu0 %v12963_v63 }
 0xdb6   :  { %10700 = vmatprep.subr.bf16.mxu0 %v13472_v1  ;;  %10717 = vmatpush3.bf16.msra.mxu1 %v12908_v26 }
 0xdb7   :  { %10718 = vmatprep.subr.bf16.mxu1 %v13472_v1 }
 0xdb9   :  { %10702 = vmatpush3.bf16.msra.mxu0 %v12969_v49 }
 0xdba   :  { %10703 = vmatprep.subr.bf16.mxu0 %v13472_v1  ;;  %10720 = vmatpush3.bf16.msra.mxu1 %v12912_v13 }
 0xdbb   :  { %10721 = vmatprep.subr.bf16.mxu1 %v13472_v1 }
 0xdbd   :  { %10705 = vmatpush3.bf16.msra.mxu0 %v12975_v60 }
 0xdbe   :  { %10724 = vmatprep.subr.bf16.mxu0 %v13472_v1  ;;  %10723 = vmatpush3.bf16.msra.mxu1 %v12918_v14 }
 0xdbf   :  { %10742 = vmatprep.subr.bf16.mxu1 %v13472_v1 }
 0xdc0   :  { %9618 = vmatmul.mubr.msk.f32.vlgmr.msra.gmra.mrb[78].mxu0 %vm1327_vm5, %v12938_v37 }
 0xdc1   :  { %9671 = vmatprep.mubr.msk.f32.mxu0 %vm11145_vm2, %v13471_v30  ;;  %10726 = vmatpush3.bf16.msra.mxu0 %v12988_v47 }
 0xdc2   :  { %10727 = vmatprep.subr.bf16.mxu0 %v13472_v1 }
 0xdc5   :  { %10729 = vmatpush3.bf16.msra.mxu0 %v12897_v57 }
 0xdc6   :  { %10730 = vmatprep.subr.bf16.mxu0 %v13472_v1 }
 0xdc9   :  { %10732 = vmatpush3.bf16.msra.mxu0 %v12994_v19 }
 0xdca   :  { %10733 = vmatprep.subr.bf16.mxu0 %v13472_v1 }
 0xdcd   :  { %10735 = vmatpush3.bf16.msra.mxu0 %v12997_v33 }
 0xdce   :  { %10736 = vmatprep.subr.bf16.mxu0 %v13472_v1 }
 0xdd1   :  { %10738 = vmatpush3.bf16.msra.mxu0 %v13001_v41 }
 0xdd2   :  { %10739 = vmatprep.subr.bf16.mxu0 %v13472_v1 }
 0xdd5   :  { %10741 = vmatpush3.bf16.msra.mxu0 %v13005_v55 }
 0xdd6   :  { %10760 = vmatprep.subr.bf16.mxu0 %v13472_v1 }
 0xe7b   :  { %v5293_v40 = vpop.f32.mrb[76].mxu0  ;;  %v5382_v7 = vpop.f32.mrb[76].mxu1 }
 0xe7c   :  { %v5294_v12 = vadd.f32 %v13013_v16, %v5293_v40  ;;  %v5383_v20 = vadd.f32 %v12728_v42, %v5382_v7  ;;  %v9565_v15 = vpop.f32.mrb[77].mxu0  ;;  %v9592_v52 = vpop.f32.mrb[77].mxu1 }
 0xe7e   :  { %v5475_v38 = vadd.f32 %v5294_v12, %v3772_v32  ;;  %v5481_v39 = vadd.f32 %v5383_v20, %v3898_v18 }
 0xe80   :  { %v5476_v9 = vsub.f32 0.0, %v5475_v38  ;;  %v5482_v8 = vsub.f32 0.0, %v5481_v39 }
 0xe82   :  { %v5477_v36 = vmul.f32 1.442695, %v5476_v9  ;;  %v5483_v56 = vmul.f32 1.442695, %v5482_v8 }
 0xe84   :  { %11024 = vpow2.f32 %v5477_v36 }
 0xe85   :  { %11026 = vpow2.f32 %v5483_v56 }
 0xe8e   :  { %v11025_v24 = vpop.eup %11024 }
 0xe8f   :  { %v5479_v3 = vadd.f32 1.0, %v11025_v24  ;;  %v11027_v4 = vpop.eup %11026 }
 0xe90   :  { %v5485_v45 = vadd.f32 1.0, %v11027_v4 }
 0xe91   :  { %11028 = vrcp.f32 %v5479_v3 }
 0xe92   :  { %11030 = vrcp.f32 %v5485_v45 }
 0xe93   :  { %v5471_v31 = vpop.f32.mrb[78].mxu0 }
 0xe94   :  { %v9619_v48 = vpop.f32.mrb[79].mxu0  ;;  %v5472_v58 = vadd.f32 %v12736_v21, %v5471_v31 }
 0xe9b   :  { %v11029_v42 = vpop.eup %11028 }
 0xe9c   :  { %v5487_v44 = vmul.f32 %v11029_v42, %v5472_v58  ;;  %v11031_v43 = vpop.eup %11030 }
 0xe9d   :  { %v5490_v28 = vsub.f32 1.0, %v11031_v43  ;;  %v5492_v59 = vmul.f32 %v11031_v43, %v12938_v37 }
 0xe9e   :  { %v5488_v5 = vadd.f32 %v5487_v44, %v12714_v17  ;;  %v13079_v17 = vld [vmem:[%s13429_s12 + $0x4] ss:$0 sm:$0xff] }
 0xea0   :  { %11032 = vtanh.f32 %v5488_v5 }
 0xeaa   :  { %v11033_v11 = vpop.eup %11032 }
 0xeab   :  { %v5491_v2 = vmul.f32 %v11033_v11, %v5490_v28 }
 0xead   :  { %v13024_v22 = vadd.f32 %v5492_v59, %v5491_v2 }
 0xeaf   :  { %5494 = vst.msk [vmem:[#allocation2 + $0x20] sm:$0xff] %vm1327_vm5, %v13024_v22  ;;  %9645 = vmatmul.mubr.msk.f32.vlgmr.msra.gmra.mrb[78].mxu1 %vm1327_vm5, %v13024_v22  ;;  %9672 = vmatmul.mubr.msk.f32.vlgmr.msra.gmra.mrb[80].mxu0 %vm1327_vm5, %v13024_v22 }
 0xeb0   :  { %10744 = vmatpush3.bf16.msra.mxu1 %v12936_v6  ;;  %9698 = vmatprep.mubr.msk.f32.mxu1 %vm11145_vm2, %v13471_v30 }
 0xeb1   :  { %10745 = vmatprep.subr.bf16.mxu1 %v13472_v1  ;;  %10762 = vmatpush3.bf16.msra.mxu0 %v12891_v62 }
 0xeb2   :  { %10763 = vmatprep.subr.bf16.mxu0 %v13472_v1  ;;  %9725 = vmatprep.mubr.msk.f32.mxu0 %vm11145_vm2, %v13471_v30 }
 0xeb4   :  { %10747 = vmatpush3.bf16.msra.mxu1 %v12947_v35 }
 0xeb5   :  { %10748 = vmatprep.subr.bf16.mxu1 %v13472_v1  ;;  %10765 = vmatpush3.bf16.msra.mxu0 %v12895_v50 }
 0xeb6   :  { %10766 = vmatprep.subr.bf16.mxu0 %v13472_v1 }
 0xeb8   :  { %10750 = vmatpush3.bf16.msra.mxu1 %v12957_v61 }
 0xeb9   :  { %10751 = vmatprep.subr.bf16.mxu1 %v13472_v1  ;;  %10768 = vmatpush3.bf16.msra.mxu0 %v12902_v0 }
 0xeba   :  { %10769 = vmatprep.subr.bf16.mxu0 %v13472_v1 }
 0xebc   :  { %10753 = vmatpush3.bf16.msra.mxu1 %v12963_v63 }
 0xebd   :  { %10754 = vmatprep.subr.bf16.mxu1 %v13472_v1  ;;  %10771 = vmatpush3.bf16.msra.mxu0 %v12908_v26 }
 0xebe   :  { %10772 = vmatprep.subr.bf16.mxu0 %v13472_v1 }
 0xec0   :  { %10756 = vmatpush3.bf16.msra.mxu1 %v12969_v49 }
 0xec1   :  { %10757 = vmatprep.subr.bf16.mxu1 %v13472_v1  ;;  %10774 = vmatpush3.bf16.msra.mxu0 %v12912_v13 }
 0xec2   :  { %10775 = vmatprep.subr.bf16.mxu0 %v13472_v1 }
 0xec4   :  { %10759 = vmatpush3.bf16.msra.mxu1 %v12975_v60 }
 0xec5   :  { %10778 = vmatprep.subr.bf16.mxu1 %v13472_v1  ;;  %10777 = vmatpush3.bf16.msra.mxu0 %v12918_v14 }
 0xec6   :  { %10796 = vmatprep.subr.bf16.mxu0 %v13472_v1 }
 0xec7   :  { %9699 = vmatmul.mubr.msk.f32.vlgmr.msra.gmra.mrb[80].mxu1 %vm1327_vm5, %v13024_v22 }
 0xec8   :  { %10780 = vmatpush3.bf16.msra.mxu1 %v12988_v47  ;;  %9752 = vmatprep.mubr.msk.f32.mxu1 %vm11145_vm2, %v13471_v30 }
 0xec9   :  { %10781 = vmatprep.subr.bf16.mxu1 %v13472_v1 }
 0xecc   :  { %10783 = vmatpush3.bf16.msra.mxu1 %v12897_v57 }
 0xecd   :  { %10784 = vmatprep.subr.bf16.mxu1 %v13472_v1 }
 0xed0   :  { %10786 = vmatpush3.bf16.msra.mxu1 %v12994_v19 }
 0xed1   :  { %10787 = vmatprep.subr.bf16.mxu1 %v13472_v1 }
 0xed4   :  { %10789 = vmatpush3.bf16.msra.mxu1 %v12997_v33 }
 0xed5   :  { %10790 = vmatprep.subr.bf16.mxu1 %v13472_v1 }
 0xed8   :  { %10792 = vmatpush3.bf16.msra.mxu1 %v13001_v41 }
 0xed9   :  { %10793 = vmatprep.subr.bf16.mxu1 %v13472_v1 }
 0xedc   :  { %10795 = vmatpush3.bf16.msra.mxu1 %v13005_v55 }
 0xedd   :  { %10814 = vmatprep.subr.bf16.mxu1 %v13472_v1 }
 0xf82   :  { %v5583_v21 = vpop.f32.mrb[78].mxu1  ;;  %v5672_v37 = vpop.f32.mrb[80].mxu0 }
 0xf83   :  { %v5584_v40 = vadd.f32 %v13013_v16, %v5583_v21  ;;  %v5673_v7 = vadd.f32 %v13079_v17, %v5672_v37  ;;  %v9646_v32 = vpop.f32.mrb[79].mxu1  ;;  %v9673_v18 = vpop.f32.mrb[81].mxu0 }
 0xf85   :  { %v5765_v12 = vadd.f32 %v5584_v40, %v3777_v34  ;;  %v5771_v20 = vadd.f32 %v5673_v7, %v3903_v53 }
 0xf87   :  { %v5766_v15 = vsub.f32 0.0, %v5765_v12  ;;  %v5772_v38 = vsub.f32 0.0, %v5771_v20 }
 0xf89   :  { %v5767_v52 = vmul.f32 1.442695, %v5766_v15  ;;  %v5773_v39 = vmul.f32 1.442695, %v5772_v38  ;;  %v6375_v38 = vld [vmem:[%s13430_s13 + $0x10] sm:$0xff] }
 0xf8b   :  { %11034 = vpow2.f32 %v5767_v52 }
 0xf8c   :  { %11036 = vpow2.f32 %v5773_v39  ;;  %v6376_v39 = vld [vmem:[%s13430_s13 + $0x18] sm:$0xff] }
 0xf95   :  { %v11035_v9 = vpop.eup %11034 }
 0xf96   :  { %v5769_v36 = vadd.f32 1.0, %v11035_v9  ;;  %v11037_v51 = vpop.eup %11036 }
 0xf97   :  { %v5775_v8 = vadd.f32 1.0, %v11037_v51 }
 0xf98   :  { %11038 = vrcp.f32 %v5769_v36  ;;  %v10872_v36 = vpack.c.bf16 %v6376_v39, %v6375_v38 }
 0xf99   :  { %11040 = vrcp.f32 %v5775_v8 }
 0xf9a   :  { %v5761_v46 = vpop.f32.mrb[80].mxu1 }
 0xf9b   :  { %v9700_v54 = vpop.f32.mrb[81].mxu1  ;;  %v5762_v56 = vadd.f32 %v13090_v10, %v5761_v46  ;;  %v13200_v46 = vld [vmem:[#allocation2 + $0x10] sm:$0xff] }
 0xf9c   :  { %v13210_v54 = vld [vmem:[#allocation2 + $0x20] sm:$0xff] }
 0xfa2   :  { %v11039_v24 = vpop.eup %11038 }
 0xfa3   :  { %v5777_v3 = vmul.f32 %v11039_v24, %v5762_v56  ;;  %v11041_v48 = vpop.eup %11040  ;;  %v13492_v56 = vld [vmem:[#allocation20_spill] sm:$0xff] }
 0xfa4   :  { %v5780_v4 = vsub.f32 1.0, %v11041_v48  ;;  %v5782_v42 = vmul.f32 %v11041_v48, %v13024_v22  ;;  %v13493_v24 = vld [vmem:[#allocation8_spill] sm:$0xff] }
 0xfa5   :  { %v5778_v31 = vadd.f32 %v5777_v3, %v12712_v23  ;;  %v6373_v23 = vld [vmem:[%s13430_s13] sm:$0xff] }
 0xfa7   :  { %11042 = vtanh.f32 %v5778_v31 }
 0xfb1   :  { %v11043_v45 = vpop.eup %11042 }
 0xfb2   :  { %v5781_v58 = vmul.f32 %v11043_v45, %v5780_v4 }
 0xfb4   :  { %v13095_v44 = vadd.f32 %v5782_v42, %v5781_v58 }
 0xfb6   :  { %5784 = vst.msk [vmem:[#allocation2 + $0x28] sm:$0xff] %vm1327_vm5, %v13095_v44  ;;  %9726 = vmatmul.mubr.msk.f32.vlgmr.msra.gmra.mrb[82].mxu0 %vm1327_vm5, %v13095_v44  ;;  %9753 = vmatmul.mubr.msk.f32.vlgmr.msra.gmra.mrb[82].mxu1 %vm1327_vm5, %v13095_v44 }
 0xfb7   :  { %10798 = vmatpush3.bf16.msra.mxu0 %v12936_v6  ;;  %9779 = vmatprep.mubr.msk.f32.mxu0 %vm11145_vm2, %v13471_v30 }
 0xfb8   :  { %10799 = vmatprep.subr.bf16.mxu0 %v13472_v1  ;;  %10816 = vmatpush3.bf16.msra.mxu1 %v12891_v62  ;;  %v6374_v62 = vld [vmem:[%s13430_s13 + $0x8] sm:$0xff] }
 0xfb9   :  { %10817 = vmatprep.subr.bf16.mxu1 %v13472_v1  ;;  %9806 = vmatprep.mubr.msk.f32.mxu1 %vm11145_vm2, %v13471_v30 }
 0xfbb   :  { %10801 = vmatpush3.bf16.msra.mxu0 %v12947_v35 }
 0xfbc   :  { %10802 = vmatprep.subr.bf16.mxu0 %v13472_v1  ;;  %10819 = vmatpush3.bf16.msra.mxu1 %v12895_v50  ;;  %v10868_v50 = vpack.c.bf16 %v6374_v62, %v6373_v23 }
 0xfbd   :  { %10820 = vmatprep.subr.bf16.mxu1 %v13472_v1 }
 0xfbf   :  { %10804 = vmatpush3.bf16.msra.mxu0 %v12957_v61 }
 0xfc0   :  { %10805 = vmatprep.subr.bf16.mxu0 %v13472_v1  ;;  %10822 = vmatpush3.bf16.msra.mxu1 %v12902_v0 }
 0xfc1   :  { %10823 = vmatprep.subr.bf16.mxu1 %v13472_v1 }
 0xfc3   :  { %10807 = vmatpush3.bf16.msra.mxu0 %v12963_v63 }
 0xfc4   :  { %10808 = vmatprep.subr.bf16.mxu0 %v13472_v1  ;;  %10825 = vmatpush3.bf16.msra.mxu1 %v12908_v26  ;;  %v13155_v26 = vld [vmem:[%s13428_s11 + $0x3] ss:$0 sm:$0xff] }
 0xfc5   :  { %10826 = vmatprep.subr.bf16.mxu1 %v13472_v1 }
 0xfc7   :  { %10810 = vmatpush3.bf16.msra.mxu0 %v12969_v49 }
 0xfc8   :  { %10811 = vmatprep.subr.bf16.mxu0 %v13472_v1  ;;  %10828 = vmatpush3.bf16.msra.mxu1 %v12912_v13  ;;  %v3782_v13 = vadd.f32 %v13155_v26, %v12686_v25 }
 0xfc9   :  { %10829 = vmatprep.subr.bf16.mxu1 %v13472_v1 }
 0xfcb   :  { %10813 = vmatpush3.bf16.msra.mxu0 %v12975_v60 }
 0xfcc   :  { %10832 = vmatprep.subr.bf16.mxu0 %v13472_v1  ;;  %10831 = vmatpush3.bf16.msra.mxu1 %v12918_v14  ;;  %v13162_v14 = vld [vmem:[%s13428_s11 + $0x4] ss:$0 sm:$0xff] }
 0xfcd   :  { %10850 = vmatprep.subr.bf16.mxu1 %v13472_v1  ;;  %v3913_v3 = vadd.f32 %v13162_v14, %v13493_v24  ;;  %v7539_v24 = vld [vmem:[%s13433_s16] ss:$0 sm:$0xff] }
 0xfce   :  { %9780 = vmatmul.mubr.msk.f32.vlgmr.msra.gmra.mrb[84].mxu0 %vm1327_vm5, %v13095_v44 }
 0xfcf   :  { %10834 = vmatpush3.bf16.msra.mxu0 %v12988_v47  ;;  %9833 = vmatprep.mubr.msk.f32.mxu0 %vm11145_vm2, %v13471_v30  ;;  %v3908_v47 = vadd.f32 %v13162_v14, %v12688_v27 }
 0xfd0   :  { %10835 = vmatprep.subr.bf16.mxu0 %v13472_v1 }
 0xfd3   :  { %10837 = vmatpush3.bf16.msra.mxu0 %v12897_v57 }
 0xfd4   :  { %10838 = vmatprep.subr.bf16.mxu0 %v13472_v1 }
 0xfd7   :  { %10840 = vmatpush3.bf16.msra.mxu0 %v12994_v19 }
 0xfd8   :  { %10841 = vmatprep.subr.bf16.mxu0 %v13472_v1 }
 0xfdb   :  { %10843 = vmatpush3.bf16.msra.mxu0 %v12997_v33 }
 0xfdc   :  { %10844 = vmatprep.subr.bf16.mxu0 %v13472_v1 }
 0xfdf   :  { %10846 = vmatpush3.bf16.msra.mxu0 %v13001_v41 }
 0xfe0   :  { %10847 = vmatprep.subr.bf16.mxu0 %v13472_v1 }
 0xfe3   :  { %10849 = vmatpush3.bf16.msra.mxu0 %v13005_v55 }
 0xfe4   :  { %10869 = vmatprep.subr.bf16.mxu0 %v10868_v50 }
0x1089   :  { %v5873_v57 = vpop.f32.mrb[82].mxu0  ;;  %v5962_v0 = vpop.f32.mrb[82].mxu1 }
0x108a   :  { %v5874_v19 = vadd.f32 %v13013_v16, %v5873_v57  ;;  %v5963_v33 = vadd.f32 %v13079_v17, %v5962_v0  ;;  %v9727_v41 = vpop.f32.mrb[83].mxu0  ;;  %v9754_v55 = vpop.f32.mrb[83].mxu1 }
0x108c   :  { %v6055_v5 = vadd.f32 %v5874_v19, %v3782_v13  ;;  %v6061_v43 = vadd.f32 %v5963_v33, %v3908_v47 }
0x108e   :  { %v6056_v28 = vsub.f32 0.0, %v6055_v5  ;;  %v6062_v2 = vsub.f32 0.0, %v6061_v43  ;;  %v13494_v43 = vld [vmem:[#allocation10_spill] sm:$0xff] }
0x1090   :  { %v6057_v11 = vmul.f32 1.442695, %v6056_v28  ;;  %v6063_v25 = vmul.f32 1.442695, %v6062_v2 }
0x1092   :  { %11044 = vpow2.f32 %v6057_v11 }
0x1093   :  { %11046 = vpow2.f32 %v6063_v25 }
0x109c   :  { %v11045_v59 = vpop.eup %11044 }
0x109d   :  { %v6059_v22 = vadd.f32 1.0, %v11045_v59  ;;  %v11047_v27 = vpop.eup %11046 }
0x109e   :  { %v6065_v34 = vadd.f32 1.0, %v11047_v27 }
0x109f   :  { %11048 = vrcp.f32 %v6059_v22 }
0x10a0   :  { %11050 = vrcp.f32 %v6065_v34 }
0x10a1   :  { %v6051_v21 = vpop.f32.mrb[84].mxu0 }
0x10a2   :  { %v9781_v37 = vpop.f32.mrb[85].mxu0  ;;  %v6052_v53 = vadd.f32 %v13090_v10, %v6051_v21 }
0x10a9   :  { %v11049_v40 = vpop.eup %11048 }
0x10aa   :  { %v6067_v7 = vmul.f32 %v11049_v40, %v6052_v53  ;;  %v11051_v18 = vpop.eup %11050  ;;  %v7546_v53 = vld [vmem:[%s13434_s17 + $0x20] sm:$0xff]  ;;  %v7547_v40 = vld [vmem:[%s13434_s17 + $0x28] sm:$0xff] }
0x10ab   :  { %v6070_v12 = vsub.f32 1.0, %v11051_v18  ;;  %v6072_v52 = vmul.f32 %v11051_v18, %v13095_v44  ;;  %v7553_v18 = vld [vmem:[%s13435_s18 + $0x1] ss:$0 sm:$0xff] }
0x10ac   :  { %v6068_v32 = vadd.f32 %v6067_v7, %v12718_v29  ;;  %v13186_v29 = vld [vmem:[#allocation2] sm:$0xff]  ;;  %v7548_v7 = vld [vmem:[%s13434_s17 + $0x30] sm:$0xff] }
0x10ae   :  { %11052 = vtanh.f32 %v6068_v32  ;;  %v7549_v32 = vld [vmem:[%s13434_s17 + $0x38] sm:$0xff] }
0x10b8   :  { %v11053_v20 = vpop.eup %11052 }
0x10b9   :  { %v6071_v15 = vmul.f32 %v11053_v20, %v6070_v12 }
0x10bb   :  { %v13177_v9 = vadd.f32 %v6072_v52, %v6071_v15 }
0x10bd   :  { %6074 = vst.msk [vmem:[#allocation2 + $0x30] sm:$0xff] %vm1327_vm5, %v13177_v9  ;;  %9807 = vmatmul.mubr.msk.f32.vlgmr.msra.gmra.mrb[84].mxu1 %vm1327_vm5, %v13177_v9  ;;  %9834 = vmatmul.mubr.msk.f32.vlgmr.msra.gmra.mrb[86].mxu0 %vm1327_vm5, %v13177_v9 }
0x10be   :  { %10852 = vmatpush3.bf16.msra.mxu1 %v12936_v6  ;;  %10871 = vmatpush3.bf16.msra.mxu0 %v10868_v50  ;;  %v13196_v6 = vld [vmem:[#allocation2 + $0x8] sm:$0xff] }
0x10bf   :  { %9871 = vmatprep.mubr.msk.f32.mxu0 %vm254_vm3, %v13186_v29  ;;  %10853 = vmatprep.subr.bf16.mxu1 %v13472_v1 }
0x10c0   :  { %10873 = vmatprep.subr.bf16.mxu0 %v10872_v36  ;;  %9860 = vmatprep.mubr.msk.f32.mxu1 %vm11145_vm2, %v13471_v30 }
0x10c2   :  { %10855 = vmatpush3.bf16.msra.mxu1 %v12947_v35  ;;  %10875 = vmatpush3.bf16.msra.mxu0 %v10872_v36  ;;  %v13206_v35 = vld [vmem:[#allocation2 + $0x18] sm:$0xff]  ;;  %v6724_v36 = vld [vmem:[%s13434_s17 + $0x8] sm:$0xff] }
0x10c3   :  { %10856 = vmatprep.subr.bf16.mxu1 %v13472_v1  ;;  %9893 = vmatprep.subr.mxu0 %v13471_v30 }
0x10c4   :  { %v13220_v51 = vld [vmem:[#allocation2 + $0x30] sm:$0xff] }
0x10c5   :  { %9872 = vmatmul.mubr.msk.f32.vlgmr.msra.gmra.mrb[88].mxu0 %vm254_vm3, %v13196_v6 }
0x10c6   :  { %10858 = vmatpush3.bf16.msra.mxu1 %v12957_v61  ;;  %9874 = vmatprep.mubr.msk.f32.mxu0 %vm254_vm3, %v13200_v46  ;;  %v13216_v61 = vld [vmem:[#allocation2 + $0x28] sm:$0xff] }
0x10c7   :  { %10859 = vmatprep.subr.bf16.mxu1 %v13472_v1 }
0x10c9   :  { %9875 = vmatmul.mubr.msk.f32.gmra.mrb[90].mxu0 %vm254_vm3, %v13206_v35 }
0x10ca   :  { %10861 = vmatpush3.bf16.msra.mxu1 %v12963_v63  ;;  %9877 = vmatprep.mubr.msk.f32.mxu0 %vm254_vm3, %v13210_v54 }
0x10cb   :  { %10862 = vmatprep.subr.bf16.mxu1 %v13472_v1 }
0x10cd   :  { %9878 = vmatmul.mubr.msk.f32.gmra.mrb[92].mxu0 %vm254_vm3, %v13216_v61 }
0x10ce   :  { %10864 = vmatpush3.bf16.msra.mxu1 %v12969_v49  ;;  %9880 = vmatprep.mubr.msk.f32.mxu0 %vm254_vm3, %v13220_v51  ;;  %v3787_v49 = vadd.f32 %v13155_v26, %v13492_v56  ;;  %v7545_v56 = vld [vmem:[%s13433_s16 + $0x1] ss:$0 sm:$0xff] }
0x10cf   :  { %10865 = vmatprep.subr.bf16.mxu1 %v13472_v1 }
0x10d2   :  { %10867 = vmatpush3.bf16.msra.mxu1 %v12975_v60 }
0x10d3   :  { %9883 = vmatprep.subr.mxu1 %v13471_v30 }
0x10d5   :  { %9861 = vmatmul.mubr.msk.f32.vlgmr.msra.gmra.mrb[86].mxu1 %vm1327_vm5, %v13177_v9 }
0x10d6   :  { %9885 = vmatprep.mubr.msk.f32.mxu1 %vm11145_vm2, %v13471_v30 }
0x1190   :  { %v6163_v63 = vpop.f32.mrb[84].mxu1  ;;  %v6252_v8 = vpop.f32.mrb[86].mxu0 }
0x1191   :  { %v6164_v1 = vadd.f32 %v13013_v16, %v6163_v63  ;;  %v6253_v60 = vadd.f32 %v13079_v17, %v6252_v8  ;;  %v9808_v31 = vpop.f32.mrb[85].mxu1  ;;  %v9835_v48 = vpop.f32.mrb[87].mxu0  ;;  %v6725_v63 = vld [vmem:[%s13434_s17 + $0x10] sm:$0xff]  ;;  %v6726_v8 = vld [vmem:[%s13434_s17 + $0x18] sm:$0xff] }
0x1192   :  { %v7542_v31 = vld [vmem:[%s13435_s18] ss:$0 sm:$0xff] }
0x1193   :  { %v6345_v4 = vadd.f32 %v6164_v1, %v3787_v49  ;;  %v6351_v45 = vadd.f32 %v6253_v60, %v3913_v3 }
0x1195   :  { %v6346_v58 = vsub.f32 0.0, %v6345_v4  ;;  %v6352_v44 = vsub.f32 0.0, %v6351_v45 }
0x1197   :  { %v6347_v42 = vmul.f32 1.442695, %v6346_v58  ;;  %v6353_v50 = vmul.f32 1.442695, %v6352_v44  ;;  %v6618_v44 = vlaneseq }
0x1198   :  { %v13238_v23 = vpop.f32.mrb[88].mxu0 }
0x1199   :  { %11054 = vpow2.f32 %v6347_v42  ;;  %v13240_v62 = vpop.f32.mrb[89].mxu0 }
0x119a   :  { %11056 = vpow2.f32 %v6353_v50 }
0x119c   :  { %v13242_v57 = vpop.f32.mrb[90].mxu0 }
0x119d   :  { %v13244_v0 = vpop.f32.mrb[91].mxu0 }
0x11a0   :  { %v13246_v16 = vpop.f32.mrb[92].mxu0 }
0x11a1   :  { %v13248_v17 = vpop.f32.mrb[93].mxu0 }
0x11a3   :  { %v11055_v26 = vpop.eup %11054 }
0x11a4   :  { %v6349_v13 = vadd.f32 1.0, %v11055_v26  ;;  %v11057_v19 = vpop.eup %11056  ;;  %v6619_v26 = vshrl.u32 %v6618_v44, 7 }
0x11a5   :  { %v6355_v33 = vadd.f32 1.0, %v11057_v19 }
0x11a6   :  { %11058 = vrcp.f32 %v6349_v13  ;;  %v6621_v13 = vand.u32 127, %v6618_v44 }
0x11a7   :  { %11060 = vrcp.f32 %v6355_v33  ;;  %v13332_v33 = vld [vmem:[%s13431_s14] ss:$0 sm:$0xff]  ;;  %s13495_s14 = sld [smem:[#allocation25_spill]] }
0x11a8   :  { %v6341_v14 = vpop.f32.mrb[86].mxu1  ;;  %vm6622_vm6 = vcmp.eq.s32.totalorder %v6619_v26, %v6621_v13 }
0x11a9   :  { %v9862_v47 = vpop.f32.mrb[87].mxu1  ;;  %v6342_v41 = vadd.f32 %v13090_v10, %v6341_v14  ;;  %v6837_v14 = vsub.s32 0, %v6619_v26 }
0x11b0   :  { %v11059_v55 = vpop.eup %11058 }
0x11b1   :  { %v6357_v5 = vmul.f32 %v11059_v55, %v6342_v41  ;;  %v11061_v11 = vpop.eup %11060  ;;  %v7538_v41 = vsel %vm6622_vm6, 1.0, %v13471_v30 }
0x11b2   :  { %v6360_v2 = vsub.f32 1.0, %v11061_v11  ;;  %v6362_v59 = vmul.f32 %v11061_v11, %v13177_v9  ;;  %v6723_v9 = vld [vmem:[%s13434_s17] sm:$0xff] }
0x11b3   :  { %v6358_v28 = vadd.f32 %v6357_v5, %v13494_v43  ;;  %v6485_v43 = vadd.f32 %v13332_v33, %v13244_v0 }
0x11b5   :  { %11062 = vtanh.f32 %v6358_v28 }
0x11bf   :  { %v11063_v25 = vpop.eup %11062 }
0x11c0   :  { %v6361_v22 = vmul.f32 %v11063_v25, %v6360_v2 }
0x11c2   :  { %v13253_v21 = vadd.f32 %v6362_v59, %v6361_v22 }
0x11c4   :  { %6364 = vst.msk [vmem:[#allocation2 + $0x38] sm:$0xff] %vm1327_vm5, %v13253_v21  ;;  %9894 = vmatpush3.msra.mxu0 %v13253_v21  ;;  %v6623_v10 = vmul.f32 %v13253_v21, %v13253_v21  ;;  %v6951_v49 = vmul.f32 %v7545_v56, %v13253_v21  ;;  %v6719_v1 = vmul.f32 %v7539_v24, %v13253_v21  ;;  %v7535_v56 = vld [vmem:[%s13432_s15] ss:$0 sm:$0xff] }
0x11c5   :  { %9903 = vmatprep.subr.mxu0 %v13471_v30 }
0x11c6   :  { %6625 = vrot.lane.b32.xlu0 %v6623_v10, %s11148_s4  ;;  %v6952_v3 = vsel %vm254_vm3, %v6951_v49, 0.0  ;;  %v6720_v60 = vsel %vm254_vm3, %v6719_v1, 0.0 }
0x11cb   :  { %v13262_v37 = vld [vmem:[#allocation2 + $0x38] sm:$0xff] }
0x11cc   :  { %9881 = vmatmul.mubr.msk.f32.gmra.mrb[94].mxu0 %vm254_vm3, %v13262_v37 }
0x11cd   :  { %9895 = vmatprep.mubr.msk.f32.mxu0 %vm11145_vm2, %v13471_v30 }
0x1238   :  { %v6626_v27 = vpop.permute.xlu0 %6625 }
0x1239   :  { %v6628_v34 = vsel %vm254_vm3, %v6626_v27, 0.0  ;;  %v7070_v27 = vld [vmem:[%s13495_s14] sm:$0xff] }
0x123a   :  { %6629 = vadd.xlane.f32.xlu1 %v6628_v34  ;;  %v6495_v34 = vadd.f32 %v13332_v33, %v13248_v17 }
0x126d   :  { %6960 = vxpose.xlu1.b32.start [1/4] (short) (narrow) %v7546_v53, 8 }
0x1271   :  { %6961 = vxpose.xlu1.b32.cont [2/4] (short) (narrow) %v7547_v40, 8 }
0x1275   :  { %6962 = vxpose.xlu1.b32.cont [3/4] (short) (narrow) %v7548_v7, 8 }
0x1279   :  { %6963 = vxpose.xlu1.b32.end [4/4] (short) (narrow) %v7549_v32, 8 }
0x1297   :  { %7080 = vperm.xlu1 %10887, %v7553_v18  }
0x129f   :  { %v13284_v12 = vpop.f32.mrb[94].mxu0 }
0x12a0   :  { %v13286_v20 = vpop.f32.mrb[95].mxu0 }
0x12c7   :  { %v6630_v15 = vpop.xlane.xlu1 %6629 }
0x12c8   :  { %v6631_v52 = vmax.f32 %v6630_v15, 1e-12  ;;  %v6505_v15 = vadd.f32 %v13332_v33, %v13286_v20 }
0x12ca   :  { %11064 = vrsqrt.f32 %v6631_v52 }
0x12cb   :  { %11066 = vtanh.f32 %v6485_v43  ;;  %v6490_v43 = vadd.f32 %v13242_v57, %v13332_v33 }
0x12cc   :  { %11068 = vtanh.f32 %v6495_v34 }
0x12cd   :  { %11070 = vtanh.f32 %v6505_v15 }
0x12d4   :  { %v11065_v38 = vpop.eup %11064 }
0x12d5   :  { %v6633_v39 = vmul.f32 %v11065_v38, %v13253_v21 }
0x12d7   :  { %6635 = vrot.lane.b32.xlu0 %v6633_v39, %s11148_s4 }
0x12ed   :  { %v6976_v45 = vpop.trf.xlu1 }
0x12f5   :  { %6727 = vxpose.xlu0.b32.start [1/4] (short) (narrow) %v6723_v9, 8  ;;  %v13350_v9 = vld [vmem:[%s13496_s3] sm:$0xff] }
0x12f9   :  { %6728 = vxpose.xlu0.b32.cont [2/4] (short) (narrow) %v6724_v36, 8 }
0x12fd   :  { %6729 = vxpose.xlu0.b32.cont [3/4] (short) (narrow) %v6725_v63, 8  ;;  %v11067_v63 = vpop.eup %11066 }
0x12fe   :  { %v6530_v24 = vmul.f32 %v11067_v63, %v7535_v56 }
0x1300   :  { %v6543_v1 = vsel %vm6536_vm13, %v6530_v24, 0.0 }
0x1301   :  { %6730 = vxpose.xlu0.b32.end [4/4] (short) (narrow) %v6726_v8, 8 }
0x1316   :  { %v7081_v32 = vpop.permute.xlu1 %7080 }
0x132e   :  { %6953 = vadd.xlane.f32.xlu0 %v6952_v3  ;;  %v11069_v3 = vpop.eup %11068 }
0x1332   :  { %6721 = vadd.xlane.f32.xlu0 %v6720_v60  ;;  %v6532_v60 = vmul.f32 %v11069_v3, %v7535_v56 }
0x1348   :  { %6847 = vperm.xlu0 %10886, %v7542_v31   ;;  %v11071_v31 = vpop.eup %11070 }
0x1349   :  { %v6636_v48 = vpop.permute.xlu0 %6635 }
0x134a   :  { %9884 = vmatpush3.xpose.msk.msra.mxu1 %vm254_vm3, %v6636_v48 }
0x134b   :  { %9888 = vmatprep.subr.mxu1 %v13471_v30 }
0x134d   :  { %9886 = vmatmul.mubr.msk.f32.vlgmr.msra.gmra.mrb[88].mxu1 %vm254_vm3, %v6636_v48  ;;  %v6549_v48 = vsel %vm6536_vm13, %v6532_v60, 0.0 }
0x134e   :  { %9889 = vmatpush3.xpose.msk.msra.mxu1 %vm254_vm3, %v13253_v21  ;;  %9890 = vmatprep.mubr.msk.f32.mxu1 %vm11145_vm2, %v13471_v30 }
0x134f   :  { %9898 = vmatprep.subr.mxu1 %v13471_v30 }
0x1375   :  { %v6743_v4 = vpop.trf.xlu0 }
0x1376   :  { %9891 = vmatmul.mubr.msk.f32.vlgmr.msra.gmra.mrb[90].mxu1 %vm254_vm3, %v6743_v4  ;;  %v6534_v4 = vmul.f32 %v11071_v31, %v7535_v56 }
0x1377   :  { %9899 = vmatpush3.xpose.msk.msra.mxu1 %vm254_vm3, %v13253_v21  ;;  %9900 = vmatprep.mubr.msk.f32.mxu1 %vm11145_vm2, %v13471_v30 }
0x137a   :  { %9901 = vmatmul.mubr.msk.f32.vlgmr.msra.gmra.mrb[92].mxu1 %vm254_vm3, %v6976_v45  ;;  %v6555_v45 = vsel %vm6536_vm13, %v6534_v4, 0.0 }
0x13bb   :  { %v6954_v50 = vpop.xlane.xlu0 %6953 }
0x13bf   :  { %v6722_v47 = vpop.xlane.xlu0 %6721 }
0x13c7   :  { %v6848_v11 = vpop.permute.xlu0 %6847 }
0x1420   :  { %v6705_v58 = vpop.f32.mrb[88].mxu1 }
0x1421   :  { %v9887_v42 = vpop.f32.mrb[89].mxu1  ;;  %v6711_v2 = vsub.f32 %v6705_v58, %v7538_v41  ;;  %v7564_v58 = vld [vmem:[%s13436_s19 + $0x4] ss:$0 sm:$0xff] }
0x1422   :  { %v7556_v42 = vld [vmem:[%s13436_s19] ss:$0 sm:$0xff] }
0x1423   :  { %vm6855_vm8 = vcmp.eq.f32.partialorder %v6711_v2, 0.0  ;;  %v7191_v44 = vmul.f32 %v7556_v42, %v13253_v21 }
0x1424   :  { %vm6856_vm10 = vmor %vm6855_vm8, %vm6622_vm6 }
0x1449   :  { %v6831_v19 = vpop.f32.mrb[90].mxu1 }
0x144a   :  { %v6838_v55 = vrot.slane %v6831_v19, %v6837_v14  ;;  %v9892_v5 = vpop.f32.mrb[91].mxu1 }
0x144c   :  { %v6839_v28 = vadd.f32 %v6838_v55, %v6722_v47  ;;  %v6475_v47 = vadd.f32 %v13332_v33, %v13240_v62  ;;  %v6480_v55 = vadd.f32 %v13238_v23, %v13332_v33  ;;  %v6500_v62 = vadd.f32 %v13246_v16, %v13332_v33 }
0x144d   :  { %v7061_v25 = vpop.f32.mrb[92].mxu1  ;;  %v6510_v23 = vadd.f32 %v13284_v12, %v13332_v33 }
0x144e   :  { %v6850_v59 = vadd.f32 %v6848_v11, %v6839_v28  ;;  %v7068_v22 = vrot.slane %v7061_v25, %v6837_v14  ;;  %v9902_v10 = vpop.f32.mrb[93].mxu1 }
0x1450   :  { %v7069_v53 = vadd.f32 %v7068_v22, %v6954_v50  ;;  %vm6851_vm7 = vcmp.ge.f32.partialorder %v6850_v59, 0.0  ;;  %v6852_v40 = vmul.f32 0.01, %v6850_v59  ;;  %v7192_v50 = vsel %vm254_vm3, %v7191_v44, 0.0 }
0x1452   :  { %v7071_v0 = vadd.f32 %v7070_v27, %v7069_v53  ;;  %v6853_v7 = vsel %vm6851_vm7, %v6850_v59, %v6852_v40 }
0x1453   :  { %v6854_v18 = vmul.f32 %v6853_v7, %v6711_v2 }
0x1454   :  { %v7083_v52 = vadd.f32 %v7081_v32, %v7071_v0 }
0x1455   :  { %v6857_v38 = vsel %vm6856_vm10, -1e+10, %v6854_v18 }
0x1456   :  { %v6859_v39 = vsel %vm6858_vm9, %v6857_v38, -inf  ;;  %vm7084_vm11 = vcmp.ge.f32.partialorder %v7083_v52, 0.0  ;;  %v7085_v17 = vmul.f32 0.01, %v7083_v52 }
0x1457   :  { %6860 = vmax.xlane.f32.xlu0 %v6859_v39 }
0x1458   :  { %v7086_v36 = vsel %vm7084_vm11, %v7083_v52, %v7085_v17 }
0x1459   :  { %v7088_v8 = vmul.f32 %v13350_v9, %v7086_v36 }
0x145b   :  { %vm7089_vm12 = vcmp.eq.f32.partialorder %v7088_v8, 0.0 }
0x145c   :  { %v7090_v20 = vsel %vm7089_vm12, -100000.0, %v7088_v8 }
0x145d   :  { %v7091_v49 = vsel %vm6858_vm9, %v7090_v20, -inf }
0x145e   :  { %7092 = vmax.xlane.f32.xlu1 %v7091_v49 }
0x1462   :  { %6544 = vadd.xlane.f32.xlu1 %v6543_v1 }
0x1466   :  { %6550 = vadd.xlane.f32.xlu1 %v6549_v48 }
0x146a   :  { %6556 = vadd.xlane.f32.xlu1 %v6555_v45 }
0x147b   :  { %7242 = vrot.lane.b32.xlu1 %v7564_v58, %s11147_s30  ;;  %s11149_s30 = smov 96  }
0x149f   :  { %7193 = vadd.xlane.f32.xlu1 %v7192_v50 }
0x14e4   :  { %v6861_v26 = vpop.xlane.xlu0 %6860 }
0x14e5   :  { %v6862_v13 = vsub.f32 %v6857_v38, %v6861_v26 }
0x14e7   :  { %v6863_v14 = vmul.f32 1.442695, %v6862_v13 }
0x14e9   :  { %11072 = vpow2.f32 %v6863_v14 }
0x14ea   :  { %11074 = vtanh.f32 %v6475_v47 }
0x14eb   :  { %v7093_v19 = vpop.xlane.xlu1 %7092 }
0x14ec   :  { %v7094_v41 = vsub.f32 %v7090_v20, %v7093_v19 }
0x14ee   :  { %v7095_v5 = vmul.f32 1.442695, %v7094_v41 }
0x14ef   :  { %v6545_v18 = vpop.xlane.xlu1 %6544 }
0x14f0   :  { %11076 = vpow2.f32 %v7095_v5 }
0x14f1   :  { %11078 = vtanh.f32 %v6480_v55 }
0x14f2   :  { %11080 = vtanh.f32 %v6490_v43 }
0x14f3   :  { %v11073_v28 = vpop.eup %11072  ;;  %11082 = vtanh.f32 %v6500_v62  ;;  %v6551_v52 = vpop.xlane.xlu1 %6550 }
0x14f4   :  { %v6865_v11 = vsel %vm6858_vm9, %v11073_v28, 0.0  ;;  %v11075_v2 = vpop.eup %11074  ;;  %11084 = vtanh.f32 %v6510_v23 }
0x14f5   :  { %6866 = vadd.xlane.f32.xlu0 %v6865_v11  ;;  %v6528_v22 = vmul.f32 %v11075_v2, %v7535_v56 }
0x14f7   :  { %v6537_v57 = vsel %vm6536_vm13, %v6528_v22, 0.0  ;;  %v6557_v38 = vpop.xlane.xlu1 %6556 }
0x14fa   :  { %v11077_v25 = vpop.eup %11076 }
0x14fb   :  { %v7097_v59 = vsel %vm6858_vm9, %v11077_v25, 0.0  ;;  %v11079_v10 = vpop.eup %11078  ;;  %v7243_v39 = vpop.permute.xlu1 %7242 }
0x14fc   :  { %7098 = vadd.xlane.f32.xlu0 %v7097_v59  ;;  %v6529_v27 = vmul.f32 %v11079_v10, %v7535_v56  ;;  %v11081_v34 = vpop.eup %11080  ;;  %v7245_v17 = vmul.f32 %v7243_v39, %v13253_v21 }
0x14fd   :  { %v6531_v16 = vmul.f32 %v11081_v34, %v7535_v56  ;;  %v11083_v40 = vpop.eup %11082 }
0x14fe   :  { %v6540_v53 = vsel %vm6536_vm13, %v6529_v27, 0.0  ;;  %v6533_v7 = vmul.f32 %v11083_v40, %v7535_v56  ;;  %v11085_v12 = vpop.eup %11084 }
0x14ff   :  { %v6546_v0 = vsel %vm6536_vm13, %v6531_v16, 0.0  ;;  %v6535_v32 = vmul.f32 %v11085_v12, %v7535_v56 }
0x1500   :  { %6538 = vadd.xlane.f32.xlu0 %v6537_v57  ;;  %v6552_v33 = vsel %vm6536_vm13, %v6533_v7, 0.0 }
0x1501   :  { %v6558_v15 = vsel %vm6536_vm13, %v6535_v32, 0.0 }
0x1504   :  { %6541 = vadd.xlane.f32.xlu0 %v6540_v53 }
0x1508   :  { %6547 = vadd.xlane.f32.xlu0 %v6546_v0 }
0x150c   :  { %6553 = vadd.xlane.f32.xlu0 %v6552_v33 }
0x1510   :  { %6559 = vadd.xlane.f32.xlu0 %v6558_v15 }
0x1526   :  { %7247 = vrot.lane.b32.xlu0 %v7245_v17, %s11149_s30 }
0x1582   :  { %v6867_v36 = vpop.xlane.xlu0 %6866 }
0x1583   :  { %11086 = vrcp.f32 %v6867_v36 }
0x1589   :  { %v7099_v63 = vpop.xlane.xlu0 %7098 }
0x158a   :  { %11088 = vrcp.f32 %v7099_v63 }
0x158d   :  { %v11087_v8 = vpop.eup %11086  ;;  %v6539_v20 = vpop.xlane.xlu0 %6538 }
0x158e   :  { %v6869_v49 = vmul.f32 %v11087_v8, %v11073_v28 }
0x1590   :  { %9896 = vmatmul.mubr.msk.f32.vlgmr.msra.gmra.mrb[96].mxu0 %vm6858_vm9, %v6869_v49 }
0x1591   :  { %9904 = vmatpush3.msra.mxu0 %v13253_v21  ;;  %v6542_v56 = vpop.xlane.xlu0 %6541  ;;  %9905 = vmatprep.mubr.msk.f32.mxu0 %vm11145_vm2, %v13471_v30 }
0x1592   :  { %v6561_v24 = vmax.f32 %v6539_v20, %v6542_v56 }
0x1594   :  { %v11089_v3 = vpop.eup %11088  ;;  %v6562_v1 = vmax.f32 %v6561_v24, %v6545_v18  ;;  %v7558_v24 = vld [vmem:[%s13436_s19 + $0x1] ss:$0 sm:$0xff] }
0x1595   :  { %v7101_v60 = vmul.f32 %v11089_v3, %v11077_v25  ;;  %v6548_v31 = vpop.xlane.xlu0 %6547 }
0x1596   :  { %v6563_v48 = vmax.f32 %v6562_v1, %v6548_v31 }
0x1597   :  { %v7102_v4 = vmul.f32 %v7101_v60, %v13350_v9 }
0x1598   :  { %v6564_v45 = vmax.f32 %v6563_v48, %v6551_v52 }
0x1599   :  { %v6554_v58 = vpop.xlane.xlu0 %6553  ;;  %9906 = vmatmul.mubr.msk.f32.vlgmr.msra.gmra.mrb[98].mxu0 %vm6858_vm9, %v7102_v4 }
0x159a   :  { %v6565_v42 = vmax.f32 %v6564_v45, %v6554_v58  ;;  %v7562_v45 = vld [vmem:[%s13436_s19 + $0x3] ss:$0 sm:$0xff] }
0x159c   :  { %v6566_v44 = vmax.f32 %v6565_v42, %v6557_v38 }
0x159d   :  { %v6560_v50 = vpop.xlane.xlu0 %6559 }
0x159e   :  { %v6567_v21 = vmax.f32 %v6566_v44, %v6560_v50 }
0x15a0   :  { %v6568_v26 = vsub.f32 %v6539_v20, %v6567_v21  ;;  %v6574_v13 = vsub.f32 %v6542_v56, %v6567_v21  ;;  %v6580_v14 = vsub.f32 %v6545_v18, %v6567_v21  ;;  %v6586_v30 = vsub.f32 %v6548_v31, %v6567_v21 }
0x15a1   :  { %v6592_v55 = vsub.f32 %v6551_v52, %v6567_v21  ;;  %v6598_v9 = vsub.f32 %v6554_v58, %v6567_v21  ;;  %v6604_v28 = vsub.f32 %v6557_v38, %v6567_v21  ;;  %v6610_v62 = vsub.f32 %v6560_v50, %v6567_v21  ;;  %v7248_v48 = vpop.permute.xlu0 %7247  ;;  %v7555_v21 = vld [vmem:[#allocation3] ss:$0 sm:$0xff] }
0x15a2   :  { %v6569_v47 = vmul.f32 1.442695, %v6568_v26  ;;  %v6575_v19 = vmul.f32 1.442695, %v6574_v13  ;;  %v6581_v41 = vmul.f32 1.442695, %v6580_v14  ;;  %v7194_v26 = vpop.xlane.xlu1 %7193 }
0x15a3   :  { %v6587_v5 = vmul.f32 1.442695, %v6586_v30  ;;  %v6593_v43 = vmul.f32 1.442695, %v6592_v55  ;;  %v6599_v11 = vmul.f32 1.442695, %v6598_v9  ;;  %v7195_v14 = vadd.f32 %v7555_v21, %v7194_v26 }
0x15a4   :  { %11090 = vpow2.f32 %v6569_v47  ;;  %v6605_v2 = vmul.f32 1.442695, %v6604_v28  ;;  %v6611_v25 = vmul.f32 1.442695, %v6610_v62  ;;  %v7250_v4 = vsel %vm254_vm3, %v7248_v48, 0.0 }
0x15a5   :  { %11092 = vpow2.f32 %v6575_v19 }
0x15a6   :  { %11094 = vpow2.f32 %v6581_v41 }
0x15a7   :  { %11096 = vpow2.f32 %v6587_v5 }
0x15a8   :  { %11098 = vpow2.f32 %v6593_v43 }
0x15a9   :  { %11100 = vpow2.f32 %v6599_v11 }
0x15aa   :  { %11102 = vpow2.f32 %v6605_v2 }
0x15ab   :  { %11104 = vpow2.f32 %v6611_v25 }
0x15ae   :  { %v11091_v23 = vpop.eup %11090 }
0x15af   :  { %v11093_v59 = vpop.eup %11092  ;;  %v6572_v22 = vmul.f32 %v11091_v23, %v13186_v29 }
0x15b0   :  { %v11095_v10 = vpop.eup %11094  ;;  %v6577_v57 = vadd.f32 %v11093_v59, %v11091_v23  ;;  %v6578_v27 = vmul.f32 %v11093_v59, %v13196_v6 }
0x15b1   :  { %v11097_v34 = vpop.eup %11096  ;;  %v6584_v40 = vmul.f32 %v11095_v10, %v13200_v46 }
0x15b2   :  { %v6583_v53 = vadd.f32 %v11095_v10, %v6577_v57  ;;  %v6579_v16 = vadd.f32 %v6578_v27, %v6572_v22  ;;  %v11099_v12 = vpop.eup %11098  ;;  %v6590_v33 = vmul.f32 %v11097_v34, %v13206_v35 }
0x15b3   :  { %v11101_v18 = vpop.eup %11100  ;;  %v6596_v38 = vmul.f32 %v11099_v12, %v13210_v54 }
0x15b4   :  { %v6589_v0 = vadd.f32 %v11097_v34, %v6583_v53  ;;  %v6585_v7 = vadd.f32 %v6584_v40, %v6579_v16  ;;  %v11103_v29 = vpop.eup %11102  ;;  %v6602_v63 = vmul.f32 %v11101_v18, %v13216_v61  ;;  %v7560_v61 = vld [vmem:[%s13436_s19 + $0x2] ss:$0 sm:$0xff] }
0x15b5   :  { %v11105_v6 = vpop.eup %11104  ;;  %v6608_v8 = vmul.f32 %v11103_v29, %v13220_v51 }
0x15b6   :  { %v6595_v32 = vadd.f32 %v11099_v12, %v6589_v0  ;;  %v6591_v15 = vadd.f32 %v6590_v33, %v6585_v7  ;;  %v6614_v35 = vmul.f32 %v11105_v6, %v13262_v37 }
0x15b8   :  { %v6601_v52 = vadd.f32 %v11101_v18, %v6595_v32  ;;  %v6597_v17 = vadd.f32 %v6596_v38, %v6591_v15 }
0x15ba   :  { %v6607_v39 = vadd.f32 %v11103_v29, %v6601_v52  ;;  %v6603_v46 = vadd.f32 %v6602_v63, %v6597_v17 }
0x15bc   :  { %v6613_v36 = vadd.f32 %v11105_v6, %v6607_v39  ;;  %v6609_v20 = vadd.f32 %v6608_v8, %v6603_v46 }
0x15be   :  { %11106 = vrcp.f32 %v6613_v36  ;;  %v6615_v49 = vadd.f32 %v6614_v35, %v6609_v20 }
0x15c8   :  { %v11107_v56 = vpop.eup %11106 }
0x15c9   :  { %v6617_v54 = vmul.f32 %v11107_v56, %v6615_v49 }
0x15cb   :  { %v7204_v3 = vmul.f32 %v7558_v24, %v6617_v54 }
0x15cd   :  { %v7205_v1 = vsel %vm254_vm3, %v7204_v3, 0.0 }
0x15ce   :  { %7206 = vadd.xlane.f32.xlu0 %v7205_v1 }
0x165b   :  { %v7207_v13 = vpop.xlane.xlu0 %7206 }
0x165c   :  { %v7208_v47 = vadd.f32 %v7207_v13, %v7195_v14 }
0x1663   :  { %v6939_v60 = vpop.f32.mrb[96].mxu0 }
0x1664   :  { %v7217_v51 = vmul.f32 %v7560_v61, %v6939_v60  ;;  %v9897_v31 = vpop.f32.mrb[97].mxu0 }
0x1666   :  { %v7218_v37 = vsel %vm254_vm3, %v7217_v51, 0.0 }
0x1667   :  { %7219 = vadd.xlane.f32.xlu1 %v7218_v37 }
0x166b   :  { %7251 = vadd.xlane.f32.xlu1 %v7250_v4 }
0x166c   :  { %v7172_v58 = vpop.f32.mrb[98].mxu0 }
0x166d   :  { %v7230_v42 = vmul.f32 %v7562_v45, %v7172_v58  ;;  %v9907_v44 = vpop.f32.mrb[99].mxu0 }
0x166f   :  { %v7231_v50 = vsel %vm254_vm3, %v7230_v42, 0.0 }
0x1670   :  { %7232 = vadd.xlane.f32.xlu0 %v7231_v50 }
0x16f4   :  { %v7220_v30 = vpop.xlane.xlu1 %7219 }
0x16f5   :  { %v7221_v19 = vadd.f32 %v7220_v30, %v7208_v47 }
0x16f8   :  { %v7252_v5 = vpop.xlane.xlu1 %7251 }
0x16fd   :  { %v7233_v41 = vpop.xlane.xlu0 %7232 }
0x16fe   :  { %v7234_v55 = vadd.f32 %v7233_v41, %v7221_v19 }
0x1700   :  { %v7253_v9 = vadd.f32 %v7252_v5, %v7234_v55 }
0x1702   :  { %7255 = vst.msk [vmem:[%s13438_s21] sm:$0xff] %vm7254_vm14, %v7253_v9 }
0x1703   :  { %7260 = vsyncpa [#allocation5], 1 }

</bundles_post_ra>
